<compile_context>
chip_gen: v7x
topology: tpu7x:2x2x1
jax: 0.10.0
libtpu: 0.0.40
codegen_flags: <defaults>
</compile_context>

<pallas_src>
import math

import jax
import jax.numpy as jnp
from jax import lax
from jax.experimental import pallas as pl
from jax.experimental.pallas import tpu as pltpu

LN_EPS = 1e-5  # matches torch.nn.LayerNorm default


# ----------------------------- kernel helpers ---------------------------------------------
def _layernorm(x, gamma, beta):
    mu = jnp.mean(x, axis=-1, keepdims=True)
    var = jnp.mean(jnp.square(x - mu), axis=-1, keepdims=True)
    return (x - mu) * lax.rsqrt(var + LN_EPS) * gamma + beta


def _softmax_last(s):
    s = s - jnp.max(s, axis=-1, keepdims=True)
    e = jnp.exp(s)
    return e * pl.reciprocal(jnp.sum(e, axis=-1, keepdims=True), approx=True)


# ----------------------------- Pallas kernel ----------------------------------------------
def attentional_dti_kernel(
    mol_ref, prot_ref,                        # (TB, Lm, Dm) f32, (TB, Lp, Dp) f32
    wq_m_ref, wkv_m_ref, wo_m_ref,            # (Dm, A), (Dm, 2A), (A, Dm)  bf16
    wq_p_ref, wkv_p_ref, wo_p_ref,            # (Dp, A), (Dp, 2A), (A, Dp)  bf16
    lnm_g_ref, lnm_b_ref, lnp_g_ref, lnp_b_ref,   # (1, Dm) / (1, Dp) f32
    w_head_m_ref, w_head_p_ref, b_head_ref,   # (1, Dm), (1, Dp), (1, 1) f32 (folded head)
    out_ref,                                  # (1, TB, 1) f32 per-step output block
):
    TB, Lm, Dm = mol_ref.shape
    _, Lp, Dp = prot_ref.shape
    A = wq_m_ref.shape[1]
    bf16, f32 = jnp.bfloat16, jnp.float32

    mol = mol_ref[...]                 # f32 (residual / LN math stays f32)
    prot = prot_ref[...]
    mol_bf = mol.astype(bf16)          # bf16 cast happens on-chip, per tile
    prot_bf = prot.astype(bf16)
    mol_cls = mol[:, 0, :]             # (TB, Dm) f32
    prot_cls = prot[:, 0, :]           # (TB, Dp) f32

    def mm(a, b):                      # bf16 MXU matmul, f32 accumulation
        return jnp.dot(a, b, preferred_element_type=f32)

    # ---- CLS-only query projections (M = TB); 1/sqrt(A) already folded into Wq ----
    q_m = mm(mol_bf[:, 0, :], wq_m_ref[...])                     # (TB, A) f32
    q_p = mm(prot_bf[:, 0, :], wq_p_ref[...])                    # (TB, A) f32

    # ---- full-sequence fused K/V projections (N = 2A) ----
    kv_m = mm(mol_bf.reshape(TB * Lm, Dm), wkv_m_ref[...])       # (TB*Lm, 2A) f32
    kv_p = mm(prot_bf.reshape(TB * Lp, Dp), wkv_p_ref[...])      # (TB*Lp, 2A) f32
    k_m = kv_m[:, :A].reshape(TB, Lm, A)
    v_m = kv_m[:, A:].reshape(TB, Lm, A)
    k_p = kv_p[:, :A].reshape(TB, Lp, A)
    v_p = kv_p[:, A:].reshape(TB, Lp, A)

    # ---- molecule CLS attends to all protein tokens (+ residual on the CLS row only) ----
    # One query per example -> broadcast-multiply + reduce (VPU+XLU) instead of M=1 matmuls.
    # TODO(synk): no attention/padding mask is applied (matches the synthetic test; real
    # variable-length encoder outputs would need a mask added to the logits here).
    s_m = jnp.sum(q_m[:, None, :] * k_p, axis=-1)                # (TB, Lp)
    p_m = _softmax_last(s_m)
    ctx_m = jnp.sum(p_m[:, :, None] * v_p, axis=1)               # (TB, A)
    mol_out_cls = mol_cls + mm(ctx_m.astype(bf16), wo_m_ref[...])    # (TB, Dm)

    # ---- protein CLS attends to all molecule tokens (+ residual) ----
    s_p = jnp.sum(q_p[:, None, :] * k_m, axis=-1)                # (TB, Lm)
    p_p = _softmax_last(s_p)
    ctx_p = jnp.sum(p_p[:, :, None] * v_m, axis=1)               # (TB, A)
    prot_out_cls = prot_cls + mm(ctx_p.astype(bf16), wo_p_ref[...])  # (TB, Dp)

    # ---- LayerNorm (f32) + folded LN->Linear->fc_out head (no concat: two per-stream dots) --
    ln_m = _layernorm(mol_out_cls, lnm_g_ref[...], lnm_b_ref[...])   # (TB, Dm)
    ln_p = _layernorm(prot_out_cls, lnp_g_ref[...], lnp_b_ref[...])  # (TB, Dp)
    head = (jnp.sum(ln_m * w_head_m_ref[...], axis=-1, keepdims=True)
            + jnp.sum(ln_p * w_head_p_ref[...], axis=-1, keepdims=True)
            + b_head_ref[...])                                   # (TB, 1) f32
    # Output is only TB scalars per step (<= 1 vreg row), so the store path is negligible;
    # the sublane-oriented (TB, 1) store avoids a sublane->lane relayout inside the kernel.
    out_ref[0] = head.astype(out_ref.dtype)


# ----------------------------- parameters --------------------------------------------------
def make_params(key, mol_dim, prot_dim, hidden_dim, attn_dim):
    ks = jax.random.split(key, 11)
    init = lambda k, shape, fan_in: (
        jax.random.normal(k, shape, jnp.float32) / math.sqrt(fan_in))
    return dict(
        wq_m=init(ks[0], (mol_dim, attn_dim), mol_dim),
        wk_p=init(ks[1], (prot_dim, attn_dim), prot_dim),
        wv_p=init(ks[2], (prot_dim, attn_dim), prot_dim),
        wo_m=init(ks[3], (attn_dim, mol_dim), attn_dim),
        wq_p=init(ks[4], (prot_dim, attn_dim), prot_dim),
        wk_m=init(ks[5], (mol_dim, attn_dim), mol_dim),
        wv_m=init(ks[6], (mol_dim, attn_dim), mol_dim),
        wo_p=init(ks[7], (attn_dim, prot_dim), attn_dim),
        ln_m_g=jnp.ones((1, mol_dim), jnp.float32),
        ln_m_b=jnp.zeros((1, mol_dim), jnp.float32),
        ln_p_g=jnp.ones((1, prot_dim), jnp.float32),
        ln_p_b=jnp.zeros((1, prot_dim), jnp.float32),
        w_mlp_m=init(ks[8], (mol_dim, hidden_dim), mol_dim),
        b_mlp_m=jnp.zeros((1, hidden_dim), jnp.float32),
        w_mlp_p=init(ks[9], (prot_dim, hidden_dim), prot_dim),
        b_mlp_p=jnp.zeros((1, hidden_dim), jnp.float32),
        w_fc=init(ks[10], (hidden_dim, 1), hidden_dim),
        b_fc=jnp.zeros((1, 1), jnp.float32),
    )


def prepare_fused_params(p):
    """Fuse KV weights, fold the attention scale into Wq, and fold the linear head.

    The head fold (w_mlp @ w_fc) is valid because the reference module has NO activation
    between the hidden Linear and fc_out (nn.Sequential(LayerNorm, Linear) then fc_out).
    """
    attn_dim = p["wq_m"].shape[-1]
    scale = 1.0 / math.sqrt(attn_dim)
    wkv_m = jnp.concatenate([p["wk_m"], p["wv_m"]], axis=1)   # (Dm, 2A)
    wkv_p = jnp.concatenate([p["wk_p"], p["wv_p"]], axis=1)   # (Dp, 2A)
    w_head_m = (p["w_mlp_m"] @ p["w_fc"]).T                   # (1, Dm)
    w_head_p = (p["w_mlp_p"] @ p["w_fc"]).T                   # (1, Dp)
    b_head = (p["b_mlp_m"] + p["b_mlp_p"]) @ p["w_fc"] + p["b_fc"]   # (1, 1)
    return dict(
        wq_m=(p["wq_m"] * scale).astype(jnp.bfloat16),
        wkv_m=wkv_m.astype(jnp.bfloat16),
        wo_m=p["wo_m"].astype(jnp.bfloat16),
        wq_p=(p["wq_p"] * scale).astype(jnp.bfloat16),
        wkv_p=wkv_p.astype(jnp.bfloat16),
        wo_p=p["wo_p"].astype(jnp.bfloat16),
        ln_m_g=p["ln_m_g"], ln_m_b=p["ln_m_b"],
        ln_p_g=p["ln_p_g"], ln_p_b=p["ln_p_b"],
        w_head_m=w_head_m.astype(jnp.float32),
        w_head_p=w_head_p.astype(jnp.float32),
        b_head=b_head.astype(jnp.float32),
    )


WEIGHT_ORDER = ["wq_m", "wkv_m", "wo_m", "wq_p", "wkv_p", "wo_p",
                "ln_m_g", "ln_m_b", "ln_p_g", "ln_p_b",
                "w_head_m", "w_head_p", "b_head"]


# ----------------------------- wrapper ------------------------------------------------------
def _pick_vmem_limit_bytes():
    # v5e/v6e have 128 MiB of physical VMEM, v7x only 64 MiB -> derive the scoped limit
    # from the chip instead of hard-coding 64 MiB; safe fallback if the query fails.
    try:
        cap = pltpu.get_tpu_info().vmem_capacity_bytes
        return int(min(96 * 1024 * 1024, (cap * 3) // 4))
    except Exception:
        return 48 * 1024 * 1024


def _pick_batch_tile(batch):
    # Fill the MXU M dimension (TB*L rows per projection matmul) while keeping
    # nb = B // TB >= 2 so the "parallel" batch axis can be split across v7x's two
    # TensorCores. Cap at 128 to bound VMEM; pick a divisor of B.
    tb = min(128, max(1, batch // 2))
    while batch % tb:
        tb -= 1
    return tb


def attentional_dti_forward(mol_hidden, prot_hidden, params, *, batch_tile=None):
    B, Lm, Dm = mol_hidden.shape
    _, Lp, Dp = prot_hidden.shape
    if batch_tile is None:
        batch_tile = _pick_batch_tile(B)
    assert B % batch_tile == 0, "batch must be divisible by batch_tile"
    nb = B // batch_tile

    fused = prepare_fused_params(params)
    weights = [fused[name] for name in WEIGHT_ORDER]

    def full_spec(arr):
        nd = arr.ndim
        # TODO(synk): constant-index weight blocks could use pipeline_mode=pl.Buffered(1)
        # (or a persistent VMEM scratch) to skip double-buffering on v7x's smaller VMEM;
        # negligible at these weight sizes (~0.5 MiB total).
        return pl.BlockSpec(arr.shape, lambda b, _nd=nd: (0,) * _nd)

    in_specs = [
        pl.BlockSpec((batch_tile, Lm, Dm), lambda b: (b, 0, 0)),
        pl.BlockSpec((batch_tile, Lp, Dp), lambda b: (b, 0, 0)),
    ] + [full_spec(w) for w in weights]

    # Per-grid-step output block (no shared resident block) so the batch axis can be
    # marked "parallel" and sharded across v7x's two TensorCores.
    out_specs = pl.BlockSpec((1, batch_tile, 1), lambda b: (b, 0, 0))

    out = pl.pallas_call(
        attentional_dti_kernel,
        out_shape=jax.ShapeDtypeStruct((nb, batch_tile, 1), jnp.float32),
        grid=(nb,),
        in_specs=in_specs,
        out_specs=out_specs,
        compiler_params=pltpu.CompilerParams(
            dimension_semantics=("parallel",),
            vmem_limit_bytes=_pick_vmem_limit_bytes()),
    )(mol_hidden.astype(jnp.float32), prot_hidden.astype(jnp.float32), *weights)
    return out.reshape(B, 1)


# ----------------------------- plain-JAX reference (module semantics, f32) -----------------
def reference_forward(mol_hidden, prot_hidden, p):
    def softmax(s):
        s = s - jnp.max(s, axis=-1, keepdims=True)
        e = jnp.exp(s)
        return e / jnp.sum(e, axis=-1, keepdims=True)

    def ln(x, g, b):
        mu = jnp.mean(x, -1, keepdims=True)
        var = jnp.mean((x - mu) ** 2, -1, keepdims=True)
        return (x - mu) / jnp.sqrt(var + LN_EPS) * g + b

    scale = 1.0 / math.sqrt(p["wq_m"].shape[-1])
    q_m = mol_hidden @ p["wq_m"]
    k_p = prot_hidden @ p["wk_p"]
    v_p = prot_hidden @ p["wv_p"]
    a_m = softmax(jnp.einsum("bqd,bkd->bqk", q_m, k_p) * scale)
    mol_out = mol_hidden + jnp.einsum("bqk,bkd->bqd", a_m, v_p) @ p["wo_m"]

    q_p = prot_hidden @ p["wq_p"]
    k_m = mol_hidden @ p["wk_m"]
    v_m = mol_hidden @ p["wv_m"]
    a_p = softmax(jnp.einsum("bqd,bkd->bqk", q_p, k_m) * scale)
    prot_out = prot_hidden + jnp.einsum("bqk,bkd->bqd", a_p, v_m) @ p["wo_p"]

    mol_cls = mol_out[:, 0]
    prot_cls = prot_out[:, 0]
    mol_proj = ln(mol_cls, p["ln_m_g"][0], p["ln_m_b"][0]) @ p["w_mlp_m"] + p["b_mlp_m"][0]
    prot_proj = ln(prot_cls, p["ln_p_g"][0], p["ln_p_b"][0]) @ p["w_mlp_p"] + p["b_mlp_p"][0]
    return (mol_proj + prot_proj) @ p["w_fc"] + p["b_fc"][0]


# ----------------------------- main ---------------------------------------------------------
if __name__ == "__main__":
    # TODO(synk): molecule_encoder / protein_encoder are external injected transformer
    # encoders (frozen all-but-last layer); their `last_hidden_state` outputs are modeled
    # here as random kernel inputs instead of re-implementing the full encoders.
    B = 32                                  # batch_tile defaults to 16 -> grid = (2,) (even)
    Lm, Lp = 16, 32
    MOL_DIM, PROT_DIM, HIDDEN_DIM, ATTN_DIM = 128, 256, 128, 128  # lane-aligned dims

    key = jax.random.PRNGKey(0)
    k_mol, k_prot, k_params = jax.random.split(key, 3)
    mol_hidden = jax.random.normal(k_mol, (B, Lm, MOL_DIM), jnp.float32)
    prot_hidden = jax.random.normal(k_prot, (B, Lp, PROT_DIM), jnp.float32)
    params = make_params(k_params, MOL_DIM, PROT_DIM, HIDDEN_DIM, ATTN_DIM)

    out = attentional_dti_forward(mol_hidden, prot_hidden, params)
    out = jax.block_until_ready(out)
    assert out.shape == (B, 1), out.shape

    ref = reference_forward(mol_hidden, prot_hidden, params)
    # Accuracy budget: bf16 MXU weights/activations (~4e-3 rel) + approx-reciprocal softmax
    # (~1e-3 rel) vs the all-f32 reference; residual/LN math is f32 in both.
    assert jnp.allclose(out, ref, rtol=5e-2, atol=5e-2), (out, ref)

    print("KERNEL_OK")
</pallas_src>

<mosaic_0001>
module attributes {stable_mosaic.version = 11 : i64} {
  func.func @attentional_dti_kernel(%arg0: i32, %arg1: memref<16x16x128xf32, #tpu.memory_space<vmem>>, %arg2: memref<16x32x256xf32, #tpu.memory_space<vmem>>, %arg3: memref<128x128xbf16, #tpu.memory_space<vmem>>, %arg4: memref<128x256xbf16, #tpu.memory_space<vmem>>, %arg5: memref<128x128xbf16, #tpu.memory_space<vmem>>, %arg6: memref<256x128xbf16, #tpu.memory_space<vmem>>, %arg7: memref<256x256xbf16, #tpu.memory_space<vmem>>, %arg8: memref<128x256xbf16, #tpu.memory_space<vmem>>, %arg9: memref<1x128xf32, #tpu.memory_space<vmem>>, %arg10: memref<1x128xf32, #tpu.memory_space<vmem>>, %arg11: memref<1x256xf32, #tpu.memory_space<vmem>>, %arg12: memref<1x256xf32, #tpu.memory_space<vmem>>, %arg13: memref<1x128xf32, #tpu.memory_space<vmem>>, %arg14: memref<1x256xf32, #tpu.memory_space<vmem>>, %arg15: memref<1x1xf32, #tpu.memory_space<vmem>>, %arg16: memref<1x16x1xf32, #tpu.memory_space<vmem>>) attributes {dimension_semantics = [#tpu.dimension_semantics<parallel>], iteration_bounds = array<i64: 2>, scalar_prefetch = 0 : i64, scratch_operands = 0 : i64, tpu.core_type = #tpu.core_type<tc>, window_params = [{transform_indices = @transform_0, window_bounds = array<i64: 16, 16, 128>}, {transform_indices = @transform_1, window_bounds = array<i64: 16, 32, 256>}, {pipeline_mode = #tpu.pipeline_mode<synchronous>, transform_indices = @transform_2, window_bounds = array<i64: 128, 128>}, {pipeline_mode = #tpu.pipeline_mode<synchronous>, transform_indices = @transform_3, window_bounds = array<i64: 128, 256>}, {pipeline_mode = #tpu.pipeline_mode<synchronous>, transform_indices = @transform_4, window_bounds = array<i64: 128, 128>}, {pipeline_mode = #tpu.pipeline_mode<synchronous>, transform_indices = @transform_5, window_bounds = array<i64: 256, 128>}, {pipeline_mode = #tpu.pipeline_mode<synchronous>, transform_indices = @transform_6, window_bounds = array<i64: 256, 256>}, {pipeline_mode = #tpu.pipeline_mode<synchronous>, transform_indices = @transform_7, window_bounds = array<i64: 128, 256>}, {pipeline_mode = #tpu.pipeline_mode<synchronous>, transform_indices = @transform_8, window_bounds = array<i64: 1, 128>}, {pipeline_mode = #tpu.pipeline_mode<synchronous>, transform_indices = @transform_9, window_bounds = array<i64: 1, 128>}, {pipeline_mode = #tpu.pipeline_mode<synchronous>, transform_indices = @transform_10, window_bounds = array<i64: 1, 256>}, {pipeline_mode = #tpu.pipeline_mode<synchronous>, transform_indices = @transform_11, window_bounds = array<i64: 1, 256>}, {pipeline_mode = #tpu.pipeline_mode<synchronous>, transform_indices = @transform_12, window_bounds = array<i64: 1, 128>}, {pipeline_mode = #tpu.pipeline_mode<synchronous>, transform_indices = @transform_13, window_bounds = array<i64: 1, 256>}, {pipeline_mode = #tpu.pipeline_mode<synchronous>, transform_indices = @transform_14, window_bounds = array<i64: 1, 1>}, {transform_indices = @transform_15, window_bounds = array<i64: 1, 16, 1>}]} {
    %c0 = arith.constant 0 : index
    %c0_0 = arith.constant 0 : index
    %c0_1 = arith.constant 0 : index
    %0 = vector.load %arg1[%c0, %c0_0, %c0_1] : memref<16x16x128xf32, #tpu.memory_space<vmem>>, vector<16x16x128xf32>
    %c0_2 = arith.constant 0 : index
    %c0_3 = arith.constant 0 : index
    %c0_4 = arith.constant 0 : index
    %1 = vector.load %arg2[%c0_2, %c0_3, %c0_4] : memref<16x32x256xf32, #tpu.memory_space<vmem>>, vector<16x32x256xf32>
    %2 = arith.truncf %0 : vector<16x16x128xf32> to vector<16x16x128xbf16>
    %3 = arith.truncf %1 : vector<16x32x256xf32> to vector<16x32x256xbf16>
    %4 = vector.extract_strided_slice %0 {offsets = [0, 0, 0], sizes = [16, 1, 128], strides = [1, 1, 1]} : vector<16x16x128xf32> to vector<16x1x128xf32>
    %5 = vector.shape_cast %4 : vector<16x1x128xf32> to vector<16x128xf32>
    %6 = vector.extract_strided_slice %1 {offsets = [0, 0, 0], sizes = [16, 1, 256], strides = [1, 1, 1]} : vector<16x32x256xf32> to vector<16x1x256xf32>
    %7 = vector.shape_cast %6 : vector<16x1x256xf32> to vector<16x256xf32>
    %8 = vector.extract_strided_slice %2 {offsets = [0, 0, 0], sizes = [16, 1, 128], strides = [1, 1, 1]} : vector<16x16x128xbf16> to vector<16x1x128xbf16>
    %9 = vector.shape_cast %8 : vector<16x1x128xbf16> to vector<16x128xbf16>
    %c0_5 = arith.constant 0 : index
    %c0_6 = arith.constant 0 : index
    %10 = vector.load %arg3[%c0_5, %c0_6] : memref<128x128xbf16, #tpu.memory_space<vmem>>, vector<128x128xbf16>
    %cst = arith.constant dense<0.000000e+00> : vector<16x128xf32>
    %11 = tpu.matmul %9, %10, %cst {dimension_numbers = #tpu.dot_dimension_numbers<[1], [0], [0], [1], [0, 0, 1, 1], [], []>} : vector<16x128xbf16>, vector<128x128xbf16>, vector<16x128xf32> -> vector<16x128xf32>
    %12 = vector.extract_strided_slice %3 {offsets = [0, 0, 0], sizes = [16, 1, 256], strides = [1, 1, 1]} : vector<16x32x256xbf16> to vector<16x1x256xbf16>
    %13 = vector.shape_cast %12 : vector<16x1x256xbf16> to vector<16x256xbf16>
    %c0_7 = arith.constant 0 : index
    %c0_8 = arith.constant 0 : index
    %14 = vector.load %arg6[%c0_7, %c0_8] : memref<256x128xbf16, #tpu.memory_space<vmem>>, vector<256x128xbf16>
    %cst_9 = arith.constant dense<0.000000e+00> : vector<16x128xf32>
    %15 = tpu.matmul %13, %14, %cst_9 {dimension_numbers = #tpu.dot_dimension_numbers<[1], [0], [0], [1], [0, 0, 1, 1], [], []>} : vector<16x256xbf16>, vector<256x128xbf16>, vector<16x128xf32> -> vector<16x128xf32>
    %16 = vector.shape_cast %2 : vector<16x16x128xbf16> to vector<256x128xbf16>
    %c0_10 = arith.constant 0 : index
    %c0_11 = arith.constant 0 : index
    %17 = vector.load %arg4[%c0_10, %c0_11] : memref<128x256xbf16, #tpu.memory_space<vmem>>, vector<128x256xbf16>
    %cst_12 = arith.constant dense<0.000000e+00> : vector<256x256xf32>
    %18 = tpu.matmul %16, %17, %cst_12 {dimension_numbers = #tpu.dot_dimension_numbers<[1], [0], [0], [1], [0, 0, 1, 1], [], []>} : vector<256x128xbf16>, vector<128x256xbf16>, vector<256x256xf32> -> vector<256x256xf32>
    %19 = vector.shape_cast %3 : vector<16x32x256xbf16> to vector<512x256xbf16>
    %c0_13 = arith.constant 0 : index
    %c0_14 = arith.constant 0 : index
    %20 = vector.load %arg7[%c0_13, %c0_14] : memref<256x256xbf16, #tpu.memory_space<vmem>>, vector<256x256xbf16>
    %cst_15 = arith.constant dense<0.000000e+00> : vector<512x256xf32>
    %21 = tpu.matmul %19, %20, %cst_15 {dimension_numbers = #tpu.dot_dimension_numbers<[1], [0], [0], [1], [0, 0, 1, 1], [], []>} : vector<512x256xbf16>, vector<256x256xbf16>, vector<512x256xf32> -> vector<512x256xf32>
    %22 = vector.extract_strided_slice %18 {offsets = [0, 0], sizes = [256, 128], strides = [1, 1]} : vector<256x256xf32> to vector<256x128xf32>
    %23 = vector.shape_cast %22 : vector<256x128xf32> to vector<16x16x128xf32>
    %24 = vector.extract_strided_slice %18 {offsets = [0, 128], sizes = [256, 128], strides = [1, 1]} : vector<256x256xf32> to vector<256x128xf32>
    %25 = vector.shape_cast %24 : vector<256x128xf32> to vector<16x16x128xf32>
    %26 = vector.extract_strided_slice %21 {offsets = [0, 0], sizes = [512, 128], strides = [1, 1]} : vector<512x256xf32> to vector<512x128xf32>
    %27 = vector.shape_cast %26 : vector<512x128xf32> to vector<16x32x128xf32>
    %28 = vector.extract_strided_slice %21 {offsets = [0, 128], sizes = [512, 128], strides = [1, 1]} : vector<512x256xf32> to vector<512x128xf32>
    %29 = vector.shape_cast %28 : vector<512x128xf32> to vector<16x32x128xf32>
    %30 = vector.shape_cast %11 : vector<16x128xf32> to vector<16x1x128xf32>
    %31 = vector.broadcast %30 : vector<16x1x128xf32> to vector<16x32x128xf32>
    %32 = arith.mulf %31, %27 : vector<16x32x128xf32>
    %cst_16 = arith.constant dense<0.000000e+00> : vector<16x32xf32>
    %33 = vector.multi_reduction <add>, %32, %cst_16 [2] : vector<16x32x128xf32> to vector<16x32xf32>
    %cst_17 = arith.constant dense<0xFF800000> : vector<16xf32>
    %34 = vector.multi_reduction <maximumf>, %33, %cst_17 [1] : vector<16x32xf32> to vector<16xf32>
    %35 = vector.shape_cast %34 : vector<16xf32> to vector<16x1xf32>
    %36 = vector.broadcast %35 : vector<16x1xf32> to vector<16x32xf32>
    %37 = arith.subf %33, %36 : vector<16x32xf32>
    %38 = math.exp %37 : vector<16x32xf32>
    %cst_18 = arith.constant dense<0.000000e+00> : vector<16xf32>
    %39 = vector.multi_reduction <add>, %38, %cst_18 [1] : vector<16x32xf32> to vector<16xf32>
    %40 = vector.shape_cast %39 : vector<16xf32> to vector<16x1xf32>
    %41 = tpu.reciprocal %40 {approx = true} : vector<16x1xf32> -> vector<16x1xf32>
    %42 = vector.broadcast %41 : vector<16x1xf32> to vector<16x32xf32>
    %43 = arith.mulf %38, %42 : vector<16x32xf32>
    %44 = vector.shape_cast %43 : vector<16x32xf32> to vector<16x32x1xf32>
    %45 = vector.broadcast %44 : vector<16x32x1xf32> to vector<16x32x128xf32>
    %46 = arith.mulf %45, %29 : vector<16x32x128xf32>
    %cst_19 = arith.constant dense<0.000000e+00> : vector<16x128xf32>
    %47 = vector.multi_reduction <add>, %46, %cst_19 [1] : vector<16x32x128xf32> to vector<16x128xf32>
    %48 = arith.truncf %47 : vector<16x128xf32> to vector<16x128xbf16>
    %c0_20 = arith.constant 0 : index
    %c0_21 = arith.constant 0 : index
    %49 = vector.load %arg5[%c0_20, %c0_21] : memref<128x128xbf16, #tpu.memory_space<vmem>>, vector<128x128xbf16>
    %cst_22 = arith.constant dense<0.000000e+00> : vector<16x128xf32>
    %50 = tpu.matmul %48, %49, %cst_22 {dimension_numbers = #tpu.dot_dimension_numbers<[1], [0], [0], [1], [0, 0, 1, 1], [], []>} : vector<16x128xbf16>, vector<128x128xbf16>, vector<16x128xf32> -> vector<16x128xf32>
    %51 = arith.addf %5, %50 : vector<16x128xf32>
    %52 = vector.shape_cast %15 : vector<16x128xf32> to vector<16x1x128xf32>
    %53 = vector.broadcast %52 : vector<16x1x128xf32> to vector<16x16x128xf32>
    %54 = arith.mulf %53, %23 : vector<16x16x128xf32>
    %cst_23 = arith.constant dense<0.000000e+00> : vector<16x16xf32>
    %55 = vector.multi_reduction <add>, %54, %cst_23 [2] : vector<16x16x128xf32> to vector<16x16xf32>
    %cst_24 = arith.constant dense<0xFF800000> : vector<16xf32>
    %56 = vector.multi_reduction <maximumf>, %55, %cst_24 [1] : vector<16x16xf32> to vector<16xf32>
    %57 = vector.shape_cast %56 : vector<16xf32> to vector<16x1xf32>
    %58 = vector.broadcast %57 : vector<16x1xf32> to vector<16x16xf32>
    %59 = arith.subf %55, %58 : vector<16x16xf32>
    %60 = math.exp %59 : vector<16x16xf32>
    %cst_25 = arith.constant dense<0.000000e+00> : vector<16xf32>
    %61 = vector.multi_reduction <add>, %60, %cst_25 [1] : vector<16x16xf32> to vector<16xf32>
    %62 = vector.shape_cast %61 : vector<16xf32> to vector<16x1xf32>
    %63 = tpu.reciprocal %62 {approx = true} : vector<16x1xf32> -> vector<16x1xf32>
    %64 = vector.broadcast %63 : vector<16x1xf32> to vector<16x16xf32>
    %65 = arith.mulf %60, %64 : vector<16x16xf32>
    %66 = vector.shape_cast %65 : vector<16x16xf32> to vector<16x16x1xf32>
    %67 = vector.broadcast %66 : vector<16x16x1xf32> to vector<16x16x128xf32>
    %68 = arith.mulf %67, %25 : vector<16x16x128xf32>
    %cst_26 = arith.constant dense<0.000000e+00> : vector<16x128xf32>
    %69 = vector.multi_reduction <add>, %68, %cst_26 [1] : vector<16x16x128xf32> to vector<16x128xf32>
    %70 = arith.truncf %69 : vector<16x128xf32> to vector<16x128xbf16>
    %c0_27 = arith.constant 0 : index
    %c0_28 = arith.constant 0 : index
    %71 = vector.load %arg8[%c0_27, %c0_28] : memref<128x256xbf16, #tpu.memory_space<vmem>>, vector<128x256xbf16>
    %cst_29 = arith.constant dense<0.000000e+00> : vector<16x256xf32>
    %72 = tpu.matmul %70, %71, %cst_29 {dimension_numbers = #tpu.dot_dimension_numbers<[1], [0], [0], [1], [0, 0, 1, 1], [], []>} : vector<16x128xbf16>, vector<128x256xbf16>, vector<16x256xf32> -> vector<16x256xf32>
    %73 = arith.addf %7, %72 : vector<16x256xf32>
    %c0_30 = arith.constant 0 : index
    %c0_31 = arith.constant 0 : index
    %74 = vector.load %arg9[%c0_30, %c0_31] : memref<1x128xf32, #tpu.memory_space<vmem>>, vector<1x128xf32>
    %c0_32 = arith.constant 0 : index
    %c0_33 = arith.constant 0 : index
    %75 = vector.load %arg10[%c0_32, %c0_33] : memref<1x128xf32, #tpu.memory_space<vmem>>, vector<1x128xf32>
    %cst_34 = arith.constant dense<0.000000e+00> : vector<16xf32>
    %76 = vector.multi_reduction <add>, %51, %cst_34 [1] : vector<16x128xf32> to vector<16xf32>
    %77 = vector.shape_cast %76 : vector<16xf32> to vector<16x1xf32>
    %cst_35 = arith.constant 1.280000e+02 : f32
    %78 = vector.broadcast %cst_35 : f32 to vector<16x1xf32>
    %79 = arith.divf %77, %78 : vector<16x1xf32>
    %80 = vector.broadcast %79 : vector<16x1xf32> to vector<16x128xf32>
    %81 = arith.subf %51, %80 : vector<16x128xf32>
    %82 = arith.mulf %81, %81 : vector<16x128xf32>
    %cst_36 = arith.constant dense<0.000000e+00> : vector<16xf32>
    %83 = vector.multi_reduction <add>, %82, %cst_36 [1] : vector<16x128xf32> to vector<16xf32>
    %84 = vector.shape_cast %83 : vector<16xf32> to vector<16x1xf32>
    %cst_37 = arith.constant 1.280000e+02 : f32
    %85 = vector.broadcast %cst_37 : f32 to vector<16x1xf32>
    %86 = arith.divf %84, %85 : vector<16x1xf32>
    %87 = vector.broadcast %79 : vector<16x1xf32> to vector<16x128xf32>
    %88 = arith.subf %51, %87 : vector<16x128xf32>
    %cst_38 = arith.constant 9.99999974E-6 : f32
    %89 = vector.broadcast %cst_38 : f32 to vector<16x1xf32>
    %90 = arith.addf %86, %89 : vector<16x1xf32>
    %91 = math.rsqrt %90 : vector<16x1xf32>
    %92 = vector.broadcast %91 : vector<16x1xf32> to vector<16x128xf32>
    %93 = arith.mulf %88, %92 : vector<16x128xf32>
    %94 = vector.broadcast %74 : vector<1x128xf32> to vector<16x128xf32>
    %95 = arith.mulf %93, %94 : vector<16x128xf32>
    %96 = vector.broadcast %75 : vector<1x128xf32> to vector<16x128xf32>
    %97 = arith.addf %95, %96 : vector<16x128xf32>
    %c0_39 = arith.constant 0 : index
    %c0_40 = arith.constant 0 : index
    %98 = vector.load %arg11[%c0_39, %c0_40] : memref<1x256xf32, #tpu.memory_space<vmem>>, vector<1x256xf32>
    %c0_41 = arith.constant 0 : index
    %c0_42 = arith.constant 0 : index
    %99 = vector.load %arg12[%c0_41, %c0_42] : memref<1x256xf32, #tpu.memory_space<vmem>>, vector<1x256xf32>
    %cst_43 = arith.constant dense<0.000000e+00> : vector<16xf32>
    %100 = vector.multi_reduction <add>, %73, %cst_43 [1] : vector<16x256xf32> to vector<16xf32>
    %101 = vector.shape_cast %100 : vector<16xf32> to vector<16x1xf32>
    %cst_44 = arith.constant 2.560000e+02 : f32
    %102 = vector.broadcast %cst_44 : f32 to vector<16x1xf32>
    %103 = arith.divf %101, %102 : vector<16x1xf32>
    %104 = vector.broadcast %103 : vector<16x1xf32> to vector<16x256xf32>
    %105 = arith.subf %73, %104 : vector<16x256xf32>
    %106 = arith.mulf %105, %105 : vector<16x256xf32>
    %cst_45 = arith.constant dense<0.000000e+00> : vector<16xf32>
    %107 = vector.multi_reduction <add>, %106, %cst_45 [1] : vector<16x256xf32> to vector<16xf32>
    %108 = vector.shape_cast %107 : vector<16xf32> to vector<16x1xf32>
    %cst_46 = arith.constant 2.560000e+02 : f32
    %109 = vector.broadcast %cst_46 : f32 to vector<16x1xf32>
    %110 = arith.divf %108, %109 : vector<16x1xf32>
    %111 = vector.broadcast %103 : vector<16x1xf32> to vector<16x256xf32>
    %112 = arith.subf %73, %111 : vector<16x256xf32>
    %cst_47 = arith.constant 9.99999974E-6 : f32
    %113 = vector.broadcast %cst_47 : f32 to vector<16x1xf32>
    %114 = arith.addf %110, %113 : vector<16x1xf32>
    %115 = math.rsqrt %114 : vector<16x1xf32>
    %116 = vector.broadcast %115 : vector<16x1xf32> to vector<16x256xf32>
    %117 = arith.mulf %112, %116 : vector<16x256xf32>
    %118 = vector.broadcast %98 : vector<1x256xf32> to vector<16x256xf32>
    %119 = arith.mulf %117, %118 : vector<16x256xf32>
    %120 = vector.broadcast %99 : vector<1x256xf32> to vector<16x256xf32>
    %121 = arith.addf %119, %120 : vector<16x256xf32>
    %c0_48 = arith.constant 0 : index
    %c0_49 = arith.constant 0 : index
    %122 = vector.load %arg13[%c0_48, %c0_49] : memref<1x128xf32, #tpu.memory_space<vmem>>, vector<1x128xf32>
    %123 = vector.broadcast %122 : vector<1x128xf32> to vector<16x128xf32>
    %124 = arith.mulf %97, %123 : vector<16x128xf32>
    %cst_50 = arith.constant dense<0.000000e+00> : vector<16xf32>
    %125 = vector.multi_reduction <add>, %124, %cst_50 [1] : vector<16x128xf32> to vector<16xf32>
    %126 = vector.shape_cast %125 : vector<16xf32> to vector<16x1xf32>
    %c0_51 = arith.constant 0 : index
    %c0_52 = arith.constant 0 : index
    %127 = vector.load %arg14[%c0_51, %c0_52] : memref<1x256xf32, #tpu.memory_space<vmem>>, vector<1x256xf32>
    %128 = vector.broadcast %127 : vector<1x256xf32> to vector<16x256xf32>
    %129 = arith.mulf %121, %128 : vector<16x256xf32>
    %cst_53 = arith.constant dense<0.000000e+00> : vector<16xf32>
    %130 = vector.multi_reduction <add>, %129, %cst_53 [1] : vector<16x256xf32> to vector<16xf32>
    %131 = vector.shape_cast %130 : vector<16xf32> to vector<16x1xf32>
    %132 = arith.addf %126, %131 : vector<16x1xf32>
    %c0_54 = arith.constant 0 : index
    %c0_55 = arith.constant 0 : index
    %133 = vector.load %arg15[%c0_54, %c0_55] : memref<1x1xf32, #tpu.memory_space<vmem>>, vector<1x1xf32>
    %134 = vector.broadcast %133 : vector<1x1xf32> to vector<16x1xf32>
    %135 = arith.addf %132, %134 : vector<16x1xf32>
    %c0_56 = arith.constant 0 : index
    %c0_57 = arith.constant 0 : index
    %c0_58 = arith.constant 0 : index
    %136 = vector.load %arg16[%c0_56, %c0_57, %c0_58] : memref<1x16x1xf32, #tpu.memory_space<vmem>>, vector<1x16x1xf32>
    %137 = vector.shape_cast %136 : vector<1x16x1xf32> to vector<16x1xf32>
    %138 = vector.shape_cast %135 : vector<16x1xf32> to vector<1x16x1xf32>
    tpu.vector_store %arg16[%c0_56, %c0_57, %c0_58], %138 {strides = array<i32>} : memref<1x16x1xf32, #tpu.memory_space<vmem>>, vector<1x16x1xf32>,
    return
  }
  func.func @transform_0(%arg0: i32) -> (i32, i32, i32) {
    %c0_i32 = arith.constant 0 : i32
    %c0_i32_0 = arith.constant 0 : i32
    %c0_i32_1 = arith.constant 0 : i32
    return %arg0, %c0_i32, %c0_i32_0 : i32, i32, i32
  }
  func.func @transform_1(%arg0: i32) -> (i32, i32, i32) {
    %c0_i32 = arith.constant 0 : i32
    %c0_i32_0 = arith.constant 0 : i32
    %c0_i32_1 = arith.constant 0 : i32
    return %arg0, %c0_i32, %c0_i32_0 : i32, i32, i32
  }
  func.func @transform_2(%arg0: i32) -> (i32, i32) {
    %c0_i32 = arith.constant 0 : i32
    %c0_i32_0 = arith.constant 0 : i32
    %c0_i32_1 = arith.constant 0 : i32
    return %c0_i32, %c0_i32_0 : i32, i32
  }
  func.func @transform_3(%arg0: i32) -> (i32, i32) {
    %c0_i32 = arith.constant 0 : i32
    %c0_i32_0 = arith.constant 0 : i32
    %c0_i32_1 = arith.constant 0 : i32
    return %c0_i32, %c0_i32_0 : i32, i32
  }
  func.func @transform_4(%arg0: i32) -> (i32, i32) {
    %c0_i32 = arith.constant 0 : i32
    %c0_i32_0 = arith.constant 0 : i32
    %c0_i32_1 = arith.constant 0 : i32
    return %c0_i32, %c0_i32_0 : i32, i32
  }
  func.func @transform_5(%arg0: i32) -> (i32, i32) {
    %c0_i32 = arith.constant 0 : i32
    %c0_i32_0 = arith.constant 0 : i32
    %c0_i32_1 = arith.constant 0 : i32
    return %c0_i32, %c0_i32_0 : i32, i32
  }
  func.func @transform_6(%arg0: i32) -> (i32, i32) {
    %c0_i32 = arith.constant 0 : i32
    %c0_i32_0 = arith.constant 0 : i32
    %c0_i32_1 = arith.constant 0 : i32
    return %c0_i32, %c0_i32_0 : i32, i32
  }
  func.func @transform_7(%arg0: i32) -> (i32, i32) {
    %c0_i32 = arith.constant 0 : i32
    %c0_i32_0 = arith.constant 0 : i32
    %c0_i32_1 = arith.constant 0 : i32
    return %c0_i32, %c0_i32_0 : i32, i32
  }
  func.func @transform_8(%arg0: i32) -> (i32, i32) {
    %c0_i32 = arith.constant 0 : i32
    %c0_i32_0 = arith.constant 0 : i32
    %c0_i32_1 = arith.constant 0 : i32
    return %c0_i32, %c0_i32_0 : i32, i32
  }
  func.func @transform_9(%arg0: i32) -> (i32, i32) {
    %c0_i32 = arith.constant 0 : i32
    %c0_i32_0 = arith.constant 0 : i32
    %c0_i32_1 = arith.constant 0 : i32
    return %c0_i32, %c0_i32_0 : i32, i32
  }
  func.func @transform_10(%arg0: i32) -> (i32, i32) {
    %c0_i32 = arith.constant 0 : i32
    %c0_i32_0 = arith.constant 0 : i32
    %c0_i32_1 = arith.constant 0 : i32
    return %c0_i32, %c0_i32_0 : i32, i32
  }
  func.func @transform_11(%arg0: i32) -> (i32, i32) {
    %c0_i32 = arith.constant 0 : i32
    %c0_i32_0 = arith.constant 0 : i32
    %c0_i32_1 = arith.constant 0 : i32
    return %c0_i32, %c0_i32_0 : i32, i32
  }
  func.func @transform_12(%arg0: i32) -> (i32, i32) {
    %c0_i32 = arith.constant 0 : i32
    %c0_i32_0 = arith.constant 0 : i32
    %c0_i32_1 = arith.constant 0 : i32
    return %c0_i32, %c0_i32_0 : i32, i32
  }
  func.func @transform_13(%arg0: i32) -> (i32, i32) {
    %c0_i32 = arith.constant 0 : i32
    %c0_i32_0 = arith.constant 0 : i32
    %c0_i32_1 = arith.constant 0 : i32
    return %c0_i32, %c0_i32_0 : i32, i32
  }
  func.func @transform_14(%arg0: i32) -> (i32, i32) {
    %c0_i32 = arith.constant 0 : i32
    %c0_i32_0 = arith.constant 0 : i32
    %c0_i32_1 = arith.constant 0 : i32
    return %c0_i32, %c0_i32_0 : i32, i32
  }
  func.func @transform_15(%arg0: i32) -> (i32, i32, i32) {
    %c0_i32 = arith.constant 0 : i32
    %c0_i32_0 = arith.constant 0 : i32
    %c0_i32_1 = arith.constant 0 : i32
    return %arg0, %c0_i32, %c0_i32_0 : i32, i32, i32
  }
}

</mosaic_0001>

<bundles_post_ra>
// kernel: tpu_custom_call.1
= control target key start
LH: loop header
LB: loop body
LE: loop exit
PB: predicated region body
PF: predicated region fallthrough
CT: control target
= control target key end

     0   :  { %s12459_s0 = inlined_call_operand.hbm [shape: f32[32,16,128], index: 0, kind: input, shape index: {}]   ;;  %s12460_s1 = inlined_call_operand.hbm [shape: f32[32,32,256], index: 1, kind: input, shape index: {}]   ;;  %s12461_s2 = inlined_call_operand.hbm [shape: bf16[128,128], index: 2, kind: input, shape index: {}]   ;;  %s12462_s3 = inlined_call_operand.hbm [shape: bf16[128,256], index: 3, kind: input, shape index: {}]   ;;  %s12463_s4 = inlined_call_operand.hbm [shape: bf16[128,128], index: 4, kind: input, shape index: {}]   ;;  %s12464_s5 = inlined_call_operand.hbm [shape: bf16[256,128], index: 5, kind: input, shape index: {}]   ;;  %s12465_s6 = inlined_call_operand.hbm [shape: bf16[256,256], index: 6, kind: input, shape index: {}]   ;;  %s12466_s7 = inlined_call_operand.hbm [shape: bf16[128,256], index: 7, kind: input, shape index: {}]   ;;  %s12467_s8 = inlined_call_operand.vmem [shape: f32[1,128], index: 8, kind: input, shape index: {}]   ;;  %s12468_s9 = inlined_call_operand.vmem [shape: f32[1,128], index: 9, kind: input, shape index: {}]   ;;  %s12469_s10 = inlined_call_operand.vmem [shape: f32[1,256], index: 10, kind: input, shape index: {}]   ;;  %s12470_s11 = inlined_call_operand.vmem [shape: f32[1,256], index: 11, kind: input, shape index: {}]   ;;  %s12471_s12 = inlined_call_operand.vmem [shape: f32[1,128], index: 12, kind: input, shape index: {}]   ;;  %s12472_s13 = inlined_call_operand.vmem [shape: f32[1,256], index: 13, kind: input, shape index: {}]   ;;  %s12473_s14 = inlined_call_operand.<no memory space> [shape: f32[1,1], index: 14, kind: input, shape index: {}]   ;;  %s12474_s15 = inlined_call_operand.vmem [shape: f32[2,16,1], index: 15, kind: output, shape index: {}]  }
   0x1   :  { %12703 = sst [smem:[#allocation216_spill]] %s12459_s0  ;;  %v20_v0 = vstv %s12473_s14 }
   0x2   :  { %12704 = sst [smem:[#allocation217_spill]] %s12461_s2  ;;  %21 = vst [vmem:[#allocation2] sm:$0x1] %v20_v0 }
   0x3   :  { %12705 = sst [smem:[#allocation218_spill]] %s12462_s3 }
   0x4   :  { %12706 = sst [smem:[#allocation219_spill]] %s12467_s8 }
   0x5   :  { %12707 = sst [smem:[#allocation220_spill]] %s12468_s9 }
   0x6   :  { %12708 = sst [smem:[#allocation221_spill]] %s12470_s11 }
   0x7   :  { %12709 = sst [smem:[#allocation222_spill]] %s12471_s12 }
   0x8   :  { %12710 = sst [smem:[#allocation223_spill]] %s12472_s13 }
   0x9   :  { %12711 = sst [smem:[#allocation224_spill]] %s12474_s15 }
   0xa   :  { %22 = vsyncpa [#allocation4], 0 }
   0xb   :  { %24 = vsyncpa [#allocation4 + $0x1], 0 }
   0xc   :  { %25 = vsyncpa [#allocation6], 0 }
   0xd   :  { %27 = vsyncpa [#allocation6 + $0x1], 0 }
   0xe   :  { %28 = vsyncpa [#allocation9], 0 }
   0xf   :  { %29 = vsyncpa [#allocation12], 0 }
  0x10   :  { %30 = vsyncpa [#allocation15], 0  ;;  %s8605_s20 = smov 0   ;;  %s8607_s21 = smov 0  }
  0x11   :  { %s8609_s22 = smov 0   ;;  %s8611_s23 = smov 0  }
  0x12 LB: > { %s8504_s14 = smov [#allocation7]   ;;  %s8626_s25 = sadd.s32 4294967295, %s8502_s23   ;;  %s8502_s23 = sphi %s8611_s23, %s13375_s23   ;;  %s8498_s22 = sphi %s8609_s22, %s13374_s22   ;;  %s8494_s21 = sphi %s8607_s21, %s13373_s21   ;;  %s8490_s20 = sphi %s8605_s20, %s13372_s20  }
  0x13   : > { %s404_s24 = sshll.u32 %s8504_s14, 4  ;;  %p7473_p0 = scmp.ge.s32.totalorder %s8502_s23, 1  ;;  %s8631_s24 = int_to_ptr.vmem [resolvable:$true] %s404_s24 }
  0x14   : > { %p12477_p1 = scmp.eq.s32.totalorder %s8626_s25, 0  ;;  %p392_p2 = scmp.lt.s32.totalorder %s8502_s23, 3 }
  0x15   : > { %s8505_s27 = smov [#allocation8]   ;;  %s8506_s30 = smov [#allocation11]  }
  0x16   : > { %p8633_p3 = pnand %p7473_p0, %p392_p2  ;;  %s417_s28 = sshll.u32 %s8505_s27, 4  ;;  %s8645_s28 = int_to_ptr.vmem [resolvable:$true] %s417_s28 }
  0x17   : > { %s8647_s16 = sshll.u32 %s8506_s30, 4  ;;  %s12714_s2 = sld [smem:[#allocation217_spill]]  ;;  %s444_s16 = int_to_ptr.vmem [resolvable:$true] %s8647_s16 }
  0x18   : > { %s12712_s26 = scalar_select %p8633_p3, 1, 0 }
  0x19   : > { %p7747_p4 = pneg %p8633_p3 }
  0x1b   : > { %p8641_p5 = pnand %p7747_p4, %p12477_p1 }
  0x1d   : > { %s8220_s19 = scalar_lea.hbm %s12714_s2, 1024  ;;  %p8657_p7 = pneg %p8641_p5 }
  0x1e   : > { %p8221_p6 = scmp.ne.s32.totalorder %s12714_s2, %s8220_s19  ;;  %p8227_p10 = scmp.lt.u32.totalorder %s8220_s19, %s12714_s2 }
  0x20   : > { %p8223_p8 = pnand %p8657_p7, %p8221_p6 }
  0x22   : > { %p8224_p9 = pneg %p8223_p8 }
  0x24   : > { %p8229_p11 = pnand %p8227_p10, %p8224_p9 }
  0x26   : > { %8232 = shalt.err (!%p8229_p11)
}
  0x27   : > { %s8233_s15 = scalar_lea.vmem %s8631_s24, 1024  ;;  %p8241_p2 = scmp.lt.s32.totalorder %s8631_s24, %s8631_s24 }
  0x28   : > { %p8234_p12 = scmp.ne.s32.totalorder %s8631_s24, %s8233_s15  ;;  %p8242_p4 = scmp.lt.s32.totalorder %s8233_s15, %s8233_s15 }
  0x2a   : > { %p8236_p13 = pnand %p8234_p12, %p8657_p7  ;;  %p8243_p6 = por %p8242_p4, %p8241_p2 }
  0x2c   : > { %p8237_p0 = pneg %p8236_p13 }
  0x2e   : > { %p8244_p8 = pnand %p8243_p6, %p8237_p0 }
  0x30   : > { %8247 = shalt.err (!%p8244_p8)
}
  0x31   : > { %s12475_s17 = smov 64   ;;  %s8508_s12 = smov 4  }
  0x32   : > { %7750 = dma.hbm_to_vmem [thread:$0]  (!%p8641_p5), %s12714_s2, 1024, %s8631_s24, [#allocation6], %s12475_s17, %s12475_s17, %s8508_s12  }
  0x33   : > { %s12716_s3 = sld [smem:[#allocation218_spill]] }
  0x39   : > { %s8248_s15 = scalar_lea.hbm %s12716_s3, 2048 }
  0x3a   : > { %p8249_p9 = scmp.ne.s32.totalorder %s12716_s3, %s8248_s15  ;;  %p8255_p12 = scmp.lt.u32.totalorder %s8248_s15, %s12716_s3 }
  0x3c   : > { %p8251_p10 = pnand %p8249_p9, %p8657_p7 }
  0x3e   : > { %p8252_p11 = pneg %p8251_p10 }
  0x40   : > { %p8257_p13 = pnand %p8255_p12, %p8252_p11 }
  0x42   : > { %8260 = shalt.err (!%p8257_p13)
}
  0x43   : > { %s8261_s24 = scalar_lea.vmem %s8645_s28, 2048  ;;  %p8269_p6 = scmp.lt.s32.totalorder %s8645_s28, %s8645_s28 }
  0x44   : > { %p8262_p0 = scmp.ne.s32.totalorder %s8645_s28, %s8261_s24  ;;  %p8270_p8 = scmp.lt.s32.totalorder %s8261_s24, %s8261_s24 }
  0x46   : > { %p8264_p2 = pnand %p8262_p0, %p8657_p7  ;;  %p8271_p9 = por %p8270_p8, %p8269_p6 }
  0x48   : > { %p8265_p4 = pneg %p8264_p2 }
  0x4a   : > { %p8272_p10 = pnand %p8271_p9, %p8265_p4 }
  0x4c   : > { %8275 = shalt.err (!%p8272_p10)
}
  0x4d   : > { %s12479_s8 = smov 128   ;;  %s12481_s9 = smov 8  }
  0x4e   : > { %7753 = dma.hbm_to_vmem [thread:$0]  (!%p8641_p5), %s12716_s3, 2048, %s8645_s28, [#allocation9], %s12479_s8, %s12479_s8, %s12481_s9  }
  0x4f   : > { %s8276_s14 = scalar_lea.hbm %s12464_s5, 2048 }
  0x50   : > { %p8277_p11 = scmp.ne.s32.totalorder %s12464_s5, %s8276_s14  ;;  %p8283_p0 = scmp.lt.u32.totalorder %s8276_s14, %s12464_s5 }
  0x52   : > { %p8279_p12 = pnand %p8277_p11, %p8657_p7 }
  0x54   : > { %p8280_p13 = pneg %p8279_p12 }
  0x56   : > { %p8285_p2 = pnand %p8283_p0, %p8280_p13 }
  0x58   : > { %8288 = shalt.err (!%p8285_p2)
}
  0x59   : > { %s8289_s11 = scalar_lea.vmem %s444_s16, 2048  ;;  %p8297_p9 = scmp.lt.s32.totalorder %s444_s16, %s444_s16 }
  0x5a   : > { %p8290_p4 = scmp.ne.s32.totalorder %s444_s16, %s8289_s11  ;;  %p8298_p10 = scmp.lt.s32.totalorder %s8289_s11, %s8289_s11 }
  0x5c   : > { %p8292_p6 = pnand %p8290_p4, %p8657_p7  ;;  %p8299_p1 = por %p8298_p10, %p8297_p9 }
  0x5e   : > { %p8293_p8 = pneg %p8292_p6 }
  0x60   : > { %p8300_p3 = pnand %p8299_p1, %p8293_p8 }
  0x62   : > { %8303 = shalt.err (!%p8300_p3)
}
  0x63   : > { %s12717_s28 = smov 64   ;;  %s8511_s18 = smov [#allocation10]  }
  0x64   : > { %7759 = dma.hbm_to_vmem [thread:$0]  (!%p8641_p5), %s12464_s5, 2048, %s444_s16, [#allocation12], %s12717_s28, %s12717_s28, %s8508_s12  }
  0x65   : > { %s430_s19 = sshll.u32 %s8511_s18, 4  ;;  %s8512_s14 = smov [#allocation13]   ;;  %s431_s19 = int_to_ptr.vmem [resolvable:$true] %s430_s19 }
  0x66   : > { %s456_s30 = sshll.u32 %s8512_s14, 4  ;;  %s8304_s11 = scalar_lea.hbm %s12463_s4, 1024  ;;  %s457_s30 = int_to_ptr.vmem [resolvable:$true] %s456_s30 }
  0x67   : > { %p8305_p1 = scmp.ne.s32.totalorder %s12463_s4, %s8304_s11  ;;  %p8311_p12 = scmp.lt.u32.totalorder %s8304_s11, %s12463_s4 }
  0x69   : > { %p8307_p3 = pnand %p8305_p1, %p8657_p7 }
  0x6b   : > { %p8308_p11 = pneg %p8307_p3 }
  0x6d   : > { %p8313_p13 = pnand %p8311_p12, %p8308_p11 }
  0x6f   : > { %8316 = shalt.err (!%p8313_p13)
}
  0x70   : > { %s8317_s16 = scalar_lea.vmem %s431_s19, 1024  ;;  %p8325_p6 = scmp.lt.s32.totalorder %s431_s19, %s431_s19 }
  0x71   : > { %p8318_p0 = scmp.ne.s32.totalorder %s431_s19, %s8317_s16  ;;  %p8326_p8 = scmp.lt.s32.totalorder %s8317_s16, %s8317_s16 }
  0x73   : > { %p8320_p2 = pnand %p8318_p0, %p8657_p7  ;;  %p8327_p9 = por %p8326_p8, %p8325_p6 }
  0x75   : > { %p8321_p4 = pneg %p8320_p2 }
  0x77   : > { %p8328_p10 = pnand %p8327_p9, %p8321_p4 }
  0x79   : > { %8331 = shalt.err (!%p8328_p10)
}
  0x7a   : > { %7756 = dma.hbm_to_vmem [thread:$0]  (!%p8641_p5), %s12463_s4, 1024, %s431_s19, [#allocation9], %s12717_s28, %s12717_s28, %s8508_s12  }
  0x7b   : > { %s8332_s18 = scalar_lea.hbm %s12465_s6, 4096 }
  0x7c   : > { %p8333_p1 = scmp.ne.s32.totalorder %s12465_s6, %s8332_s18  ;;  %p8339_p12 = scmp.lt.u32.totalorder %s8332_s18, %s12465_s6 }
  0x7e   : > { %p8335_p3 = pnand %p8333_p1, %p8657_p7 }
  0x80   : > { %p8336_p11 = pneg %p8335_p3 }
  0x82   : > { %p8341_p13 = pnand %p8339_p12, %p8336_p11 }
  0x84   : > { %8344 = shalt.err (!%p8341_p13)
}
  0x85   : > { %s8345_s17 = scalar_lea.vmem %s457_s30, 4096  ;;  %p8353_p6 = scmp.lt.s32.totalorder %s457_s30, %s457_s30 }
  0x86   : > { %p8346_p0 = scmp.ne.s32.totalorder %s457_s30, %s8345_s17  ;;  %p8354_p8 = scmp.lt.s32.totalorder %s8345_s17, %s8345_s17 }
  0x88   : > { %p8348_p2 = pnand %p8346_p0, %p8657_p7  ;;  %p8355_p9 = por %p8354_p8, %p8353_p6 }
  0x8a   : > { %p8349_p4 = pneg %p8348_p2 }
  0x8c   : > { %p8356_p10 = pnand %p8355_p9, %p8349_p4 }
  0x8e   : > { %8359 = shalt.err (!%p8356_p10)
}
  0x8f   : > { %s12718_s12 = smov 8   ;;  %s12719_s28 = smov 128  }
  0x90   : > { %7762 = dma.hbm_to_vmem [thread:$0]  (!%p8641_p5), %s12465_s6, 4096, %s457_s30, [#allocation12], %s12719_s28, %s12719_s28, %s12718_s12  }
  0x91   : > { %s8513_s2 = smov [#allocation14]   ;;  %s8360_s18 = scalar_lea.hbm %s12466_s7, 2048 }
  0x92   : > { %s469_s8 = sshll.u32 %s8513_s2, 4  ;;  %p8361_p1 = scmp.ne.s32.totalorder %s12466_s7, %s8360_s18  ;;  %s470_s8 = int_to_ptr.vmem [resolvable:$true] %s469_s8 }
  0x93   : > { %p8367_p12 = scmp.lt.u32.totalorder %s8360_s18, %s12466_s7 }
  0x94   : > { %p8363_p3 = pnand %p8361_p1, %p8657_p7 }
  0x96   : > { %p8364_p11 = pneg %p8363_p3 }
  0x98   : > { %p8369_p13 = pnand %p8367_p12, %p8364_p11 }
  0x9a   : > { %8372 = shalt.err (!%p8369_p13)
}
  0x9b   : > { %s8373_s30 = scalar_lea.vmem %s470_s8, 2048  ;;  %p8381_p6 = scmp.lt.s32.totalorder %s470_s8, %s470_s8 }
  0x9c   : > { %p8374_p0 = scmp.ne.s32.totalorder %s470_s8, %s8373_s30  ;;  %p8382_p8 = scmp.lt.s32.totalorder %s8373_s30, %s8373_s30 }
  0x9e   : > { %p8376_p2 = pnand %p8374_p0, %p8657_p7  ;;  %p8383_p9 = por %p8382_p8, %p8381_p6 }
  0xa0   : > { %p8377_p4 = pneg %p8376_p2 }
  0xa2   : > { %p8384_p10 = pnand %p8383_p9, %p8377_p4 }
  0xa4   : > { %8387 = shalt.err (!%p8384_p10)
}
  0xa5   : > { %7765 = dma.hbm_to_vmem [thread:$0]  (!%p8641_p5), %s12466_s7, 2048, %s470_s8, [#allocation15], %s12719_s28, %s12719_s28, %s12718_s12  }
  0xa6   : > { %s8793_s29 = sadd.s32 1, %s8502_s23   ;;  %s43_s27 = sadd.s32 1, %s8498_s22 }
  0xa7   : > { %s40_s16 = ssub.s32 %s8502_s23, %s8793_s29  ;;  %p50_p7 = scmp.ne.s32.totalorder %s8498_s22, %s8494_s21 }
  0xa8   : > { %p41_p1 = scmp.eq.s32.totalorder %s40_s16, 0  ;;  %p51_p3 = scmp.eq.s32.totalorder %s8502_s23, 0 }
  0xa9   : > { %p56_p11 = scmp.ne.s32.totalorder %s8494_s21, %s8490_s20  ;;  %p7779_p12 = scmp.lt.s32.totalorder %s8502_s23, 2 }
  0xaa   : > { %s8805_s2 = scalar_select %p41_p1, %s8498_s22, %s43_s27  }
  0xab   : > { %p52_p13 = por %p51_p3, %p50_p7  ;;  %p12720_p0 = scmp.eq.s32.totalorder %s8626_s25, 0 }
  0xac   : > { %s8814_s8 = sand.u32 1, %s8498_s22   ;;  %s7603_s13 = sshll.u32 %s8502_s23, 12 }
  0xad   : > { %p8809_p2 = por %p12720_p0, %p56_p11  ;;  %s7481_s18 = sshll.u32 %s8814_s8, 8 }
  0xae   : > { %s12722_s0 = sld [smem:[#allocation216_spill]]  ;;  %s508_s20 = scalar_lea.vmem [#allocation3], %s7481_s18 }
  0xaf   : > { %s516_s11 = sshll.u32 %s508_s20, 4  ;;  %p8823_p5 = pnand %p7779_p12, %p52_p13  ;;  %s8827_s11 = int_to_ptr.vmem [resolvable:$true] %s516_s11 }
  0xb0   : > { %s526_s17 = sand.u32 1, %s8502_s23   ;;  %s505_s19 = scalar_lea.sflag [#allocation4], %s8814_s8 }
  0xb1   : > { %p8390_p6 = pneg %p8823_p5 }
  0xb4   : > { %s8821_s24 = scalar_lea.hbm %s12722_s0, %s7603_s13  ;;  %s8393_s18 = scalar_lea.hbm %s12722_s0, 8192 }
  0xb5   : > { %s8388_s27 = scalar_lea.hbm %s8821_s24, 4096  ;;  %p8394_p10 = scmp.lt.u32.totalorder %s8821_s24, %s12722_s0 }
  0xb6   : > { %p8389_p4 = scmp.ne.s32.totalorder %s8821_s24, %s8388_s27  ;;  %p8395_p7 = scmp.lt.u32.totalorder %s8393_s18, %s8388_s27 }
  0xb7   : > { %p8397_p3 = scmp.lt.u32.totalorder %s8388_s27, %s8821_s24 }
  0xb8   : > { %p8391_p8 = pnand %p8390_p6, %p8389_p4  ;;  %p8396_p1 = por %p8395_p7, %p8394_p10 }
  0xba   : > { %p8392_p9 = pneg %p8391_p8  ;;  %p8398_p11 = por %p8397_p3, %p8396_p1 }
  0xbc   : > { %p8399_p12 = pnand %p8398_p11, %p8392_p9 }
  0xbe   : > { %8402 = shalt.err (!%p8399_p12)
}
  0xbf   : > { %s8403_s20 = scalar_lea.vmem %s8827_s11, 4096  ;;  %s8514_s16 = smov [#allocation3]  }
  0xc0   : > { %p8404_p13 = scmp.ne.s32.totalorder %s8827_s11, %s8403_s20  ;;  %s8408_s13 = sshll.u32 %s8514_s16, 4  ;;  %s8409_s13 = int_to_ptr.vmem [resolvable:$false] %s8408_s13 }
  0xc1   : > { %s8410_s14 = scalar_lea.vmem %s8409_s13, 8192  ;;  %p8411_p8 = scmp.lt.s32.totalorder %s8827_s11, %s8409_s13 }
  0xc2   : > { %p8406_p0 = pnand %p8404_p13, %p8390_p6  ;;  %p8412_p10 = scmp.lt.s32.totalorder %s8410_s14, %s8403_s20 }
  0xc4   : > { %p8407_p4 = pneg %p8406_p0  ;;  %p8413_p7 = por %p8412_p10, %p8411_p8 }
  0xc6   : > { %p8414_p1 = pnand %p8413_p7, %p8407_p4 }
  0xc8   : > { %8417 = shalt.err (!%p8414_p1)
}
  0xc9   : > { %7769 = dma.hbm_to_vmem [thread:$0]  (!%p8823_p5), %s8821_s24, 4096, %s8827_s11, %s505_s19, %s12719_s28, %s12719_s28, %s12718_s12  }
  0xca   : > { %s7485_s27 = sshll.u32 %s8814_s8, 10  ;;  %s7605_s18 = sshll.u32 %s8502_s23, 14 }
  0xcb   : > { %s8866_s16 = scalar_lea.hbm %s12460_s1, %s7605_s18  ;;  %s530_s13 = scalar_lea.vmem [#allocation5], %s7485_s27 }
  0xcc   : > { %s538_s14 = sshll.u32 %s530_s13, 4  ;;  %s8872_s0 = scalar_lea.sflag [#allocation6], %s526_s17  ;;  %s8868_s14 = int_to_ptr.vmem [resolvable:$true] %s538_s14 }
  0xcd   : > { %s8418_s3 = scalar_lea.hbm %s8866_s16, 16384  ;;  %s8423_s8 = scalar_lea.hbm %s12460_s1, 32768 }
  0xce   : > { %p8419_p9 = scmp.ne.s32.totalorder %s8866_s16, %s8418_s3  ;;  %p8424_p12 = scmp.lt.u32.totalorder %s8866_s16, %s12460_s1 }
  0xcf   : > { %p8425_p13 = scmp.lt.u32.totalorder %s8423_s8, %s8418_s3  ;;  %p8427_p4 = scmp.lt.u32.totalorder %s8418_s3, %s8866_s16 }
  0xd0   : > { %p8421_p3 = pnand %p8419_p9, %p8390_p6 }
  0xd1   : > { %p8426_p0 = por %p8425_p13, %p8424_p12 }
  0xd2   : > { %p8422_p11 = pneg %p8421_p3 }
  0xd3   : > { %p8428_p8 = por %p8427_p4, %p8426_p0 }
  0xd5   : > { %p8429_p10 = pnand %p8428_p8, %p8422_p11 }
  0xd7   : > { %8432 = shalt.err (!%p8429_p10)
}
  0xd8   : > { %s8433_s23 = scalar_lea.vmem %s8868_s14, 16384  ;;  %s8515_s17 = smov [#allocation5]  }
  0xd9   : > { %p8434_p7 = scmp.ne.s32.totalorder %s8868_s14, %s8433_s23  ;;  %s8438_s19 = sshll.u32 %s8515_s17, 4  ;;  %s8439_s19 = int_to_ptr.vmem [resolvable:$false] %s8438_s19 }
  0xda   : > { %s8440_s27 = scalar_lea.vmem %s8439_s19, 32768  ;;  %p8441_p3 = scmp.lt.s32.totalorder %s8868_s14, %s8439_s19 }
  0xdb   : > { %p8436_p1 = pnand %p8434_p7, %p8390_p6  ;;  %p8442_p12 = scmp.lt.s32.totalorder %s8440_s27, %s8433_s23 }
  0xdd   : > { %p8437_p9 = pneg %p8436_p1  ;;  %p8443_p13 = por %p8442_p12, %p8441_p3 }
  0xdf   : > { %p8444_p0 = pnand %p8443_p13, %p8437_p9 }
  0xe1   : > { %8447 = shalt.err (!%p8444_p0)
}
  0xe2   : > { %s8516_s3 = smov 256   ;;  %s8517_s18 = smov 16  }
  0xe3   : > { %7772 = dma.hbm_to_vmem [thread:$0]  (!%p8823_p5), %s8866_s16, 16384, %s8868_s14, %s8872_s0, %s8516_s3, %s8516_s3, %s8517_s18  }
  0xe4   : > { %p12724_p6 = scmp.ne.s32.totalorder %s12712_s26, 0 }
  0xe6   : > { %550 = sbr.rel (%p12724_p6) target bundleno = 2573 (0xa0d), region = 80 }
  0xed   : > { %s552_s15 = sand.u32 1, %s8494_s21  }
  0xee   : > { %s7490_s20 = sshll.u32 %s552_s15, 8  ;;  %s553_s13 = scalar_lea.sflag [#allocation4], %s552_s15 }
  0xef   : > { %s8901_s12 = scalar_lea.vmem [#allocation3], %s7490_s20 }
  0xf0   : > { %8465 = dma.done.wait (%p8809_p2), %s553_s13, 4096  }
  0xf1   : > { %8467 = vsyncadd (%p8809_p2), %s553_s13, 4294963200  ;;  %s561_s28 = sand.u32 1, %s8626_s25   ;;  %s7491_s30 = sshll.u32 %s552_s15, 10 }
  0xf2   : > { %s562_s0 = scalar_lea.sflag [#allocation6], %s561_s28  ;;  %s8908_s16 = scalar_lea.vmem [#allocation5], %s7491_s30 }
  0xf3   : > { %8469 = dma.done.wait (%p8809_p2), %s562_s0, 16384  }
  0xf4   : > { %8471 = vsyncadd (%p8809_p2), %s562_s0, 4294950912  ;;  %p12725_p5 = scmp.eq.s32.totalorder %s8626_s25, 0 }
  0xf6   : > { %8473 = dma.done.wait (%p12725_p5), [#allocation6], 1024   ;;  %p12726_p11 = pmov %p12725_p5 }
  0xf7   : > { %p12727_p4 = pmov %p12725_p5 }
  0xf8   : > { %8475 = vsyncadd (%p12726_p11), [#allocation6], 4294966272 }
  0xf9   : > { %8477 = dma.done.wait (%p12727_p4), [#allocation9], 3072   ;;  %p12728_p8 = pmov %p12727_p4 }
  0xfa   : > { %p12729_p10 = pmov %p12727_p4 }
  0xfb   : > { %8479 = vsyncadd (%p12728_p8), [#allocation9], 4294964224 }
  0xfc   : > { %8481 = dma.done.wait (%p12729_p10), [#allocation12], 6144   ;;  %p12730_p7 = pmov %p12727_p4 }
  0xfd   : > { %p12731_p2 = pmov %p12727_p4 }
  0xfe   : > { %8483 = vsyncadd (%p12730_p7), [#allocation12], 4294961152 }
  0xff   : > { %8485 = dma.done.wait (%p12731_p2), [#allocation15], 2048   ;;  %p12732_p1 = pmov %p12731_p2 }
 0x100   : > { %v12483_v1 = vmov 0.0   ;;  %vm8519_vm0 = vmmov 0   ;;  %v12485_v2 = vmov 0   ;;  %v7836_v3 = vld [vmem:[#allocation7] sm:$0xff]   ;;  %v7839_v6 = vld [vmem:[#allocation7 + $0x8] sm:$0xff]   ;;  %v7842_v9 = vld [vmem:[#allocation7 + $0x10] sm:$0xff]  }
 0x101   : > { %8487 = vsyncadd (%p12732_p1), [#allocation15], 4294965248  ;;  %7647 = vmatprep.subr.bf16.mxu0 %v12483_v1  ;;  %7663 = vmatprep.mubr.msk.bf16.mxu0 %vm8519_vm0, %v12483_v1  ;;  %v7837_v4 = vld [vmem:[#allocation11 + $0x40] sm:$0xff]   ;;  %v7840_v7 = vld [vmem:[#allocation11 + $0x48] sm:$0xff]   ;;  %vm938_vm1 = vcmask 1041409   ;;  %vm941_vm2 = vcmask 1042434  }
 0x102   : > { %7835 = vset.pattern.permute.xlu0 %v12485_v2  ;;  %7834 = vset.pattern.permute.xlu1 %v12485_v2  ;;  %v7838_v5 = vld [vmem:[#allocation11] sm:$0xff]   ;;  %v7841_v8 = vld [vmem:[#allocation11 + $0x8] sm:$0xff]   ;;  %v7843_v10 = vld [vmem:[#allocation11 + $0x50] sm:$0xff]   ;;  %vm944_vm3 = vcmask 1043459   ;;  %vm947_vm4 = vcmask 1044484   ;;  %vm950_vm5 = vcmask 1045509  }
 0x103   : > { %7648 = vmatpush3.bf16.msra.mxu0 %v7836_v3  ;;  %7616 = vmatprep.subr.bf16.mxu1 %v7837_v4  ;;  %v7844_v11 = vld [vmem:[#allocation11 + $0x10] sm:$0xff]   ;;  %v7845_v12 = vld [vmem:[#allocation7 + $0x18] sm:$0xff]   ;;  %v7849_v15 = vld [vmem:[#allocation11 + $0x60] sm:$0xff]   ;;  %vm953_vm6 = vcmask 1046534   ;;  %vm956_vm7 = vcmask 1047559   ;;  %vm2637_vm8 = vcmask 130112  }
 0x104   : > { %7649 = vmatprep.subr.bf16.mxu0 %v12483_v1  ;;  %7617 = vmatpush3.bf16.msra.mxu1 %v7838_v5  ;;  %v7846_v13 = vld [vmem:[#allocation11 + $0x58] sm:$0xff]   ;;  %v7848_v16 = vld [vmem:[#allocation7 + $0x20] sm:$0xff]   ;;  %v7852_v18 = vld [vmem:[#allocation11 + $0x68] sm:$0xff]   ;;  %vm5178_vm9 = vcmask 130048   ;;  %vm2644_vm10 = vcmask 195712   ;;  %vm2651_vm11 = vcmask 261312  }
 0x105   : > { %7618 = vmatprep.subr.bf16.mxu1 %v7840_v7  ;;  %v7847_v14 = vld [vmem:[#allocation11 + $0x18] sm:$0xff]   ;;  %v7850_v17 = vld [vmem:[#allocation11 + $0x20] sm:$0xff]   ;;  %v7851_v19 = vld [vmem:[#allocation7 + $0x28] sm:$0xff]   ;;  %vm2954_vm12 = vcmask 261120   ;;  %s13338_s24 = sld [smem:[#allocation221_spill]]  ;;  %s13339_s17 = sld [smem:[#allocation223_spill]] }
 0x106   : > { %v7853_v20 = vld [vmem:[#allocation11 + $0x28] sm:$0xff]   ;;  %v7854_v21 = vld [vmem:[#allocation7 + $0x30] sm:$0xff]   ;;  %v7858_v24 = vld [vmem:[#allocation11 + $0x78] sm:$0xff]   ;;  %s13358_s3 = sld [smem:[#allocation219_spill]]  ;;  %s13359_s20 = sld [smem:[#allocation220_spill]]  ;;  %vm7322_vm13 = vcmask 7168  }
 0x107   : > { %7650 = vmatpush3.bf16.msra.mxu0 %v7839_v6  ;;  %v7855_v22 = vld [vmem:[#allocation11 + $0x70] sm:$0xff]   ;;  %v7857_v25 = vld [vmem:[#allocation7 + $0x38] sm:$0xff]   ;;  %v682_v26 = vld [vmem:[%s8908_s16 + $0x8] sm:$0xff]  ;;  %s13360_s28 = sld [smem:[#allocation222_spill]]  ;;  %p643_p9 = scmp.lt.s32.totalorder %s8626_s25, 1 }
 0x108   : > { %7651 = vmatprep.subr.bf16.mxu0 %v12483_v1  ;;  %7619 = vmatpush3.bf16.msra.mxu1 %v7841_v8  ;;  %v7856_v23 = vld [vmem:[#allocation11 + $0x30] sm:$0xff]   ;;  %v684_v27 = vld [vmem:[%s8908_s16 + $0x18] sm:$0xff]  ;;  %v690_v28 = vld [vmem:[%s8908_s16 + $0x48] sm:$0xff]  ;;  %s13371_s26 = sld [smem:[#allocation224_spill]] }
 0x109   : > { %7620 = vmatprep.subr.bf16.mxu1 %v7843_v10  ;;  %v692_v29 = vld [vmem:[%s8908_s16 + $0x58] sm:$0xff]  ;;  %v698_v30 = vld [vmem:[%s8908_s16 + $0x88] sm:$0xff]  ;;  %v8947_v32 = vpack.c.bf16 %v684_v27, %v682_v26  ;;  %s13377_s25 = smov (!%p643_p9, %s8626_s25), 1 }
 0x10a   : > { %v700_v31 = vld [vmem:[%s8908_s16 + $0x98] sm:$0xff]  ;;  %v706_v34 = vld [vmem:[%s8908_s16 + $0xc8] sm:$0xff]  ;;  %v8952_v37 = vpack.c.bf16 %v692_v29, %v690_v28  ;;  %s7606_s30 = sshll.u32 %s13377_s25, 4 }
 0x10b   : > { %7652 = vmatpush3.bf16.msra.mxu0 %v7842_v9  ;;  %12733 = vst [vmem:[#allocation22_spill] sm:$0xff] %v8947_v32  ;;  %v7859_v33 = vld [vmem:[#allocation11 + $0x38] sm:$0xff]   ;;  %v714_v36 = vld [vmem:[%s8908_s16 + $0x108] sm:$0xff]  ;;  %v8954_v38 = vpack.c.bf16 %v700_v31, %v698_v30  ;;  %v1128_v54 = vunpack.c.l.b16 %v8947_v32 }
 0x10c   : > { %7653 = vmatprep.subr.bf16.mxu0 %v12483_v1  ;;  %7621 = vmatpush3.bf16.msra.mxu1 %v7844_v11  ;;  %v708_v35 = vld [vmem:[%s8908_s16 + $0xd8] sm:$0xff]  ;;  %12734 = vst [vmem:[#allocation23_spill] sm:$0xff] %v8952_v37  ;;  %v722_v40 = vld [vmem:[%s8908_s16 + $0x148] sm:$0xff]  ;;  %v1130_v48 = vunpack.c.l.b16 %v8952_v37  ;;  %v779_v37 = vld [vmem:[%s8908_s16 + $0x310] sm:$0xff] }
 0x10d   : > { %7622 = vmatprep.subr.bf16.mxu1 %v7846_v13  ;;  %12735 = vst [vmem:[#allocation24_spill] sm:$0xff] %v8954_v38  ;;  %v716_v39 = vld [vmem:[%s8908_s16 + $0x118] sm:$0xff]  ;;  %v8960_v42 = vpack.c.bf16 %v708_v35, %v706_v34  ;;  %v730_v43 = vld [vmem:[%s8908_s16 + $0x188] sm:$0xff]  ;;  %v1132_v49 = vunpack.c.l.b16 %v8954_v38 }
 0x10e   : > { %v724_v41 = vld [vmem:[%s8908_s16 + $0x158] sm:$0xff]  ;;  %v738_v45 = vld [vmem:[%s8908_s16 + $0x1c8] sm:$0xff]  ;;  %v8965_v46 = vpack.c.bf16 %v716_v39, %v714_v36  ;;  %v1173_v6 = vrot.slane %v1130_v48, 7  ;;  %s647_s9 = scalar_lea.vmem %s13371_s26, %s7606_s30 }
 0x10f   : > { %7654 = vmatpush3.bf16.msra.mxu0 %v7845_v12  ;;  %12736 = vst [vmem:[#allocation25_spill] sm:$0xff] %v8960_v42  ;;  %v732_v44 = vld [vmem:[%s8908_s16 + $0x198] sm:$0xff]  ;;  %v8967_v47 = vpack.c.bf16 %v724_v41, %v722_v40  ;;  %v746_v51 = vld [vmem:[%s8908_s16 + $0x208] sm:$0xff]  ;;  %v1134_v55 = vunpack.c.l.b16 %v8960_v42  ;;  %v1175_v7 = vrot.slane %v1132_v49, 6  ;;  %v649_v40 = vld [vmem:[%s8901_s12] sm:$0xff] }
 0x110   : > { %7655 = vmatprep.subr.bf16.mxu0 %v12483_v1  ;;  %7623 = vmatpush3.bf16.msra.mxu1 %v7847_v14  ;;  %v740_v50 = vld [vmem:[%s8908_s16 + $0x1d8] sm:$0xff]  ;;  %v8974_v53 = vpack.c.bf16 %v732_v44, %v730_v43  ;;  %v754_v56 = vld [vmem:[%s8908_s16 + $0x248] sm:$0xff]  ;;  %v1136_v61 = vunpack.c.l.b16 %v8965_v46  ;;  %v651_v43 = vld [vmem:[%s8901_s12 + $0x10] sm:$0xff] }
 0x111   : > { %7624 = vmatprep.subr.bf16.mxu1 %v7849_v15  ;;  %v748_v52 = vld [vmem:[%s8908_s16 + $0x218] sm:$0xff]  ;;  %v762_v58 = vld [vmem:[%s8908_s16 + $0x288] sm:$0xff]  ;;  %v8981_v59 = vpack.c.bf16 %v740_v50, %v738_v45  ;;  %v1138_v62 = vunpack.c.l.b16 %v8967_v47  ;;  %v753_v42 = vld [vmem:[%s8908_s16 + $0x240] sm:$0xff] }
 0x112   : > { %v756_v57 = vld [vmem:[%s8908_s16 + $0x258] sm:$0xff]  ;;  %v8983_v60 = vpack.c.bf16 %v748_v52, %v746_v51  ;;  %v770_v0 = vld [vmem:[%s8908_s16 + $0x2c8] sm:$0xff]  ;;  %v1140_v5 = vunpack.c.l.b16 %v8974_v53  ;;  %v1179_v31 = vrot.slane %v1136_v61, 4  ;;  %v653_v51 = vld [vmem:[%s8901_s12 + $0x20] sm:$0xff] }
 0x113   : > { %7656 = vmatpush3.bf16.msra.mxu0 %v7848_v16  ;;  %v764_v63 = vld [vmem:[%s8908_s16 + $0x298] sm:$0xff]  ;;  %v8990_v4 = vpack.c.bf16 %v756_v57, %v754_v56  ;;  %v778_v8 = vld [vmem:[%s8908_s16 + $0x308] sm:$0xff]  ;;  %v1142_v13 = vunpack.c.l.b16 %v8981_v59  ;;  %v1181_v39 = vrot.slane %v1138_v62, 3  ;;  %v657_v62 = vld [vmem:[%s8901_s12 + $0x40] sm:$0xff] }
 0x114   : > { %7657 = vmatprep.subr.bf16.mxu0 %v12483_v1  ;;  %7625 = vmatpush3.bf16.msra.mxu1 %v7850_v17  ;;  %12737 = vst [vmem:[#allocation26_spill] sm:$0xff] %v8983_v60  ;;  %v772_v3 = vld [vmem:[%s8908_s16 + $0x2d8] sm:$0xff]  ;;  %v786_v10 = vld [vmem:[%s8908_s16 + $0x348] sm:$0xff]  ;;  %v8996_v11 = vpack.c.bf16 %v764_v63, %v762_v58  ;;  %v1144_v14 = vunpack.c.l.b16 %v8983_v60  ;;  %v1183_v48 = vrot.slane %v1140_v5, 2  ;;  %v655_v58 = vld [vmem:[%s8901_s12 + $0x30] sm:$0xff] }
 0x115   : > { %7626 = vmatprep.subr.bf16.mxu1 %v7852_v18  ;;  %12738 = vst [vmem:[#allocation27_spill] sm:$0xff] %v8990_v4  ;;  %v780_v9 = vld [vmem:[%s8908_s16 + $0x318] sm:$0xff]  ;;  %v8998_v12 = vpack.c.bf16 %v772_v3, %v770_v0  ;;  %v794_v16 = vld [vmem:[%s8908_s16 + $0x388] sm:$0xff]  ;;  %v1185_v49 = vrot.slane %v1142_v13, 1 }
 0x116   : > { %12739 = vst [vmem:[#allocation28_spill] sm:$0xff] %v8996_v11  ;;  %v788_v15 = vld [vmem:[%s8908_s16 + $0x358] sm:$0xff]  ;;  %v9005_v18 = vpack.c.bf16 %v780_v9, %v778_v8  ;;  %v1148_v26 = vunpack.c.l.b16 %v8996_v11  ;;  %v650_v41 = vld [vmem:[%s8901_s12 + $0x8] sm:$0xff]  ;;  %v761_v11 = vld [vmem:[%s8908_s16 + $0x280] sm:$0xff] }
 0x117   : > { %7658 = vmatpush3.bf16.msra.mxu0 %v7851_v19  ;;  %12740 = vst [vmem:[#allocation29_spill] sm:$0xff] %v8998_v12  ;;  %v796_v17 = vld [vmem:[%s8908_s16 + $0x398] sm:$0xff]  ;;  %v1146_v19 = vunpack.c.l.b16 %v8990_v4  ;;  %v1150_v27 = vunpack.c.l.b16 %v8998_v12  ;;  %v654_v52 = vld [vmem:[%s8901_s12 + $0x28] sm:$0xff]  ;;  %v755_v12 = vld [vmem:[%s8908_s16 + $0x250] sm:$0xff] }
 0x118   : > { %7659 = vmatprep.subr.bf16.mxu0 %v12483_v1  ;;  %7627 = vmatpush3.bf16.msra.mxu1 %v7853_v20  ;;  %12741 = vst [vmem:[#allocation30_spill] sm:$0xff] %v9005_v18  ;;  %v1174_v20 = vsel %vm938_vm1, %v1173_v6, %v1128_v54  ;;  %v1152_v29 = vunpack.c.l.b16 %v9005_v18  ;;  %v652_v50 = vld [vmem:[%s8901_s12 + $0x18] sm:$0xff]  ;;  %v1203_v56 = vrot.slane %v1148_v26, 6  ;;  %v658_v5 = vld [vmem:[%s8901_s12 + $0x48] sm:$0xff]  ;;  %v659_v6 = vld [vmem:[%s8901_s12 + $0x50] sm:$0xff] }
 0x119   : > { %7628 = vmatprep.subr.bf16.mxu1 %v7855_v22  ;;  %v802_v22 = vld [vmem:[%s8908_s16 + $0x3c8] sm:$0xff]  ;;  %v1176_v30 = vsel %vm941_vm2, %v1175_v7, %v1174_v20  ;;  %v1205_v57 = vrot.slane %v1150_v27, 5  ;;  %v656_v61 = vld [vmem:[%s8901_s12 + $0x38] sm:$0xff]  ;;  %v9051_v26 = vpack.c.bf16 %v652_v50, %v651_v43  ;;  %v9053_v27 = vpack.c.bf16 %v654_v52, %v653_v51  ;;  %v675_v51 = vld [vmem:[%s8901_s12 + $0xd0] sm:$0xff] }
 0x11a   : > { %v1207_v0 = vrot.slane %v1152_v29, 4  ;;  %v660_v7 = vld [vmem:[%s8901_s12 + $0x58] sm:$0xff]  ;;  %v667_v29 = vld [vmem:[%s8901_s12 + $0x90] sm:$0xff]  ;;  %v674_v50 = vld [vmem:[%s8901_s12 + $0xc8] sm:$0xff] }
 0x11b   : > { %7660 = vmatpush3.bf16.msra.mxu0 %v7854_v21  ;;  %v1177_v21 = vrot.slane %v1134_v55, 5  ;;  %v1201_v55 = vrot.slane %v1146_v19, 7  ;;  %v664_v20 = vld [vmem:[%s8901_s12 + $0x78] sm:$0xff] }
 0x11c   : > { %7661 = vmatprep.subr.bf16.mxu0 %v12483_v1  ;;  %7629 = vmatpush3.bf16.msra.mxu1 %v7856_v23  ;;  %v804_v23 = vld [vmem:[%s8908_s16 + $0x3d8] sm:$0xff]  ;;  %v707_v1 = vld [vmem:[%s8908_s16 + $0xd0] sm:$0xff] }
 0x11d   : > { %7630 = vmatprep.subr.bf16.mxu1 %v7858_v24  ;;  %v9011_v24 = vpack.c.bf16 %v788_v15, %v786_v10  ;;  %v9017_v28 = vpack.c.bf16 %v804_v23, %v802_v22  ;;  %v1178_v36 = vsel %vm944_vm3, %v1177_v21, %v1176_v30  ;;  %v1202_v9 = vsel %vm938_vm1, %v1201_v55, %v1144_v14  ;;  %v661_v15 = vld [vmem:[%s8901_s12 + $0x60] sm:$0xff]  ;;  %v666_v22 = vld [vmem:[%s8901_s12 + $0x88] sm:$0xff]  ;;  %v668_v30 = vld [vmem:[%s8901_s12 + $0x98] sm:$0xff] }
 0x11e   : > { %v1180_v45 = vsel %vm947_vm4, %v1179_v31, %v1178_v36  ;;  %v1204_v19 = vsel %vm941_vm2, %v1203_v56, %v1202_v9  ;;  %v665_v21 = vld [vmem:[%s8901_s12 + $0x80] sm:$0xff]  ;;  %v9049_v23 = vpack.c.bf16 %v650_v41, %v649_v40  ;;  %v671_v40 = vld [vmem:[%s8901_s12 + $0xb0] sm:$0xff]  ;;  %v672_v41 = vld [vmem:[%s8901_s12 + $0xb8] sm:$0xff]  ;;  %v9079_v52 = vpack.c.bf16 %v668_v30, %v667_v29 }
 0x11f   : > { %7662 = vmatpush3.bf16.msra.mxu0 %v7857_v25  ;;  %12742 = vst [vmem:[#allocation31_spill] sm:$0xff] %v9011_v24  ;;  %v9013_v25 = vpack.c.bf16 %v796_v17, %v794_v16  ;;  %12744 = vst [vmem:[#allocation33_spill] sm:$0xff] %v9017_v28  ;;  %v1154_v34 = vunpack.c.l.b16 %v9011_v24  ;;  %v1158_v44 = vunpack.c.l.b16 %v9017_v28  ;;  %v1182_v54 = vsel %vm950_vm5, %v1181_v39, %v1180_v45  ;;  %v662_v16 = vld [vmem:[%s8901_s12 + $0x68] sm:$0xff]  ;;  %v663_v17 = vld [vmem:[%s8901_s12 + $0x70] sm:$0xff] }
 0x120   : > { %7631 = vmatpush3.bf16.msra.mxu1 %v7859_v33  ;;  %v7862_v33 = vld [vmem:[#allocation8 + $0x4] ss:$8 sps:$4 sm:$0xff]   ;;  %v1184_v63 = vsel %vm953_vm6, %v1183_v48, %v1182_v54  ;;  %v1206_v14 = vsel %vm944_vm3, %v1205_v57, %v1204_v19  ;;  %v9069_v43 = vpack.c.bf16 %v662_v16, %v661_v15  ;;  %v9073_v45 = vpack.c.bf16 %v666_v22, %v665_v21  ;;  %v676_v57 = vld [vmem:[%s8901_s12 + $0xd8] sm:$0xff] }
 0x121   : > { %12743 = vst [vmem:[#allocation32_spill] sm:$0xff] %v9013_v25  ;;  %v1156_v35 = vunpack.c.l.b16 %v9013_v25  ;;  %1452 = vmatprep.subr.bf16.mxu0 %v7862_v33  ;;  %v1209_v3 = vrot.slane %v1154_v34, 3  ;;  %v1186_v8 = vsel %vm956_vm7, %v1185_v49, %v1184_v63  ;;  %v1213_v13 = vrot.slane %v1158_v44, 1  ;;  %v669_v31 = vld [vmem:[%s8901_s12 + $0xa0] sm:$0xff]  ;;  %v670_v39 = vld [vmem:[%s8901_s12 + $0xa8] sm:$0xff] }
 0x122   : > { %v9059_v33 = vpack.c.bf16 %v656_v61, %v655_v58  ;;  %v9061_v34 = vpack.c.bf16 %v658_v5, %v657_v62  ;;  %v1208_v36 = vsel %vm947_vm4, %v1207_v0, %v1206_v14  ;;  %v9071_v44 = vpack.c.bf16 %v664_v20, %v663_v17  ;;  %v673_v49 = vld [vmem:[%s8901_s12 + $0xc0] sm:$0xff]  ;;  %v678_v61 = vld [vmem:[%s8901_s12 + $0xe8] sm:$0xff]  ;;  %v679_v5 = vld [vmem:[%s8901_s12 + $0xf0] sm:$0xff] }
 0x123   : > { %v1211_v10 = vrot.slane %v1156_v35, 2  ;;  %v9063_v35 = vpack.c.bf16 %v660_v7, %v659_v6  ;;  %v1210_v48 = vsel %vm950_vm5, %v1209_v3, %v1208_v36  ;;  %v9081_v54 = vpack.c.bf16 %v670_v39, %v669_v31  ;;  %v677_v58 = vld [vmem:[%s8901_s12 + $0xe0] sm:$0xff]  ;;  %v680_v6 = vld [vmem:[%s8901_s12 + $0xf8] sm:$0xff] }
 0x124   : > { %v9083_v55 = vpack.c.bf16 %v672_v41, %v671_v40  ;;  %v9089_v62 = vpack.c.bf16 %v674_v50, %v673_v49  ;;  %v922_v63 = vunpack.c.l.b16 %v9051_v26  ;;  %v923_v0 = vunpack.c.l.b16 %v9053_v27  ;;  %v681_v41 = vld [vmem:[%s8908_s16] sm:$0xff] }
 0x125   : > { %v1212_v56 = vsel %vm953_vm6, %v1211_v10, %v1210_v48  ;;  %v9096_v7 = vpack.c.bf16 %v676_v57, %v675_v51  ;;  %v9098_v9 = vpack.c.bf16 %v678_v61, %v677_v58  ;;  %v924_v15 = vunpack.c.l.b16 %v9059_v33  ;;  %v683_v48 = vld [vmem:[%s8908_s16 + $0x10] sm:$0xff]  ;;  %v689_v57 = vld [vmem:[%s8908_s16 + $0x40] sm:$0xff] }
 0x126   : > { %12745 = vst [vmem:[#allocation34_spill] sm:$0xff] %v9089_v62  ;;  %v1214_v3 = vsel %vm956_vm7, %v1213_v13, %v1212_v56  ;;  %v9101_v16 = vpack.c.bf16 %v680_v6, %v679_v5  ;;  %v925_v17 = vunpack.c.l.b16 %v9061_v34  ;;  %v926_v19 = vunpack.c.l.b16 %v9063_v35  ;;  %v691_v58 = vld [vmem:[%s8908_s16 + $0x50] sm:$0xff]  ;;  %v697_v61 = vld [vmem:[%s8908_s16 + $0x80] sm:$0xff] }
 0x127   : > { %12746 = vst [vmem:[#allocation35_spill] sm:$0xff] %v9096_v7  ;;  %12747 = vst [vmem:[#allocation36_spill] sm:$0xff] %v9098_v9  ;;  %v1216_v10 = vpack.c.b16 %v1214_v3, %v1186_v8  ;;  %v921_v20 = vunpack.c.l.b16 %v9049_v23  ;;  %v927_v13 = vunpack.c.l.b16 %v9069_v43  ;;  %v928_v21 = vunpack.c.l.b16 %v9071_v44  ;;  %v699_v3 = vld [vmem:[%s8908_s16 + $0x90] sm:$0xff]  ;;  %v721_v24 = vld [vmem:[%s8908_s16 + $0x140] sm:$0xff] }
 0x128   : > { %12748 = vst [vmem:[#allocation37_spill] sm:$0xff] %v9101_v16  ;;  %v930_v22 = vunpack.c.l.b16 %v9079_v52  ;;  %v929_v8 = vunpack.c.l.b16 %v9073_v45  ;;  %v931_v14 = vunpack.c.l.b16 %v9081_v54  ;;  %v932_v29 = vunpack.c.l.b16 %v9083_v55 }
 0x129   : > { %1347 = vmatprep.mubr.bf16.mxu1 %v1216_v10  ;;  %v933_v30 = vunpack.c.l.b16 %v9089_v62  ;;  %v934_v31 = vunpack.c.l.b16 %v9096_v7  ;;  %v935_v36 = vunpack.c.l.b16 %v9098_v9  ;;  %v937_v39 = vrot.slane %v922_v63, 7  ;;  %v705_v10 = vld [vmem:[%s8908_s16 + $0xc0] sm:$0xff]  ;;  %v795_v7 = vld [vmem:[%s8908_s16 + $0x390] sm:$0xff] }
 0x12a   : > { %v940_v40 = vrot.slane %v923_v0, 6  ;;  %v936_v49 = vunpack.c.l.b16 %v9101_v16  ;;  %v943_v50 = vrot.slane %v924_v15, 5  ;;  %v946_v51 = vrot.slane %v925_v17, 4  ;;  %v713_v15 = vld [vmem:[%s8908_s16 + $0x100] sm:$0xff]  ;;  %v715_v17 = vld [vmem:[%s8908_s16 + $0x110] sm:$0xff] }
 0x12b   : > { %v949_v56 = vrot.slane %v926_v19, 3  ;;  %v939_v63 = vsel %vm938_vm1, %v937_v39, %v921_v20  ;;  %v952_v0 = vrot.slane %v927_v13, 2  ;;  %v958_v5 = vrot.slane %v930_v22, 7  ;;  %v723_v20 = vld [vmem:[%s8908_s16 + $0x150] sm:$0xff]  ;;  %v729_v13 = vld [vmem:[%s8908_s16 + $0x180] sm:$0xff] }
 0x12c   : > { %v960_v6 = vrot.slane %v931_v14, 6  ;;  %v942_v19 = vsel %vm941_vm2, %v940_v40, %v939_v63  ;;  %v955_v2 = vrot.slane %v928_v21, 1  ;;  %v962_v28 = vrot.slane %v932_v29, 5  ;;  %v731_v22 = vld [vmem:[%s8908_s16 + $0x190] sm:$0xff]  ;;  %v737_v21 = vld [vmem:[%s8908_s16 + $0x1c0] sm:$0xff] }
 0x12d   : > { %v964_v25 = vrot.slane %v933_v30, 4  ;;  %v945_v14 = vsel %vm944_vm3, %v943_v50, %v942_v19  ;;  %v959_v39 = vsel %vm938_vm1, %v958_v5, %v929_v8  ;;  %v966_v18 = vrot.slane %v934_v31, 3  ;;  %v739_v63 = vld [vmem:[%s8908_s16 + $0x1d0] sm:$0xff]  ;;  %v745_v29 = vld [vmem:[%s8908_s16 + $0x200] sm:$0xff] }
 0x12e   : > { %v968_v40 = vrot.slane %v935_v36, 2  ;;  %v747_v30 = vld [vmem:[%s8908_s16 + $0x210] sm:$0xff]  ;;  %v948_v38 = vsel %vm947_vm4, %v946_v51, %v945_v14  ;;  %v961_v50 = vsel %vm941_vm2, %v960_v6, %v959_v39  ;;  %v970_v19 = vrot.slane %v936_v49, 1  ;;  %v769_v31 = vld [vmem:[%s8908_s16 + $0x2c0] sm:$0xff] }
 0x12f   : > { %v763_v8 = vld [vmem:[%s8908_s16 + $0x290] sm:$0xff]  ;;  %v777_v5 = vld [vmem:[%s8908_s16 + $0x300] sm:$0xff]  ;;  %v9148_v4 = vpack.c.bf16 %v683_v48, %v681_v41  ;;  %v951_v32 = vsel %vm950_vm5, %v949_v56, %v948_v38  ;;  %v963_v16 = vsel %vm944_vm3, %v962_v28, %v961_v50  ;;  %v9155_v6 = vpack.c.bf16 %v691_v58, %v689_v57 }
 0x130   : > { %v771_v36 = vld [vmem:[%s8908_s16 + $0x2d0] sm:$0xff]  ;;  %v785_v9 = vld [vmem:[%s8908_s16 + $0x340] sm:$0xff]  ;;  %v9157_v49 = vpack.c.bf16 %v699_v3, %v697_v61  ;;  %v954_v39 = vsel %vm953_vm6, %v952_v0, %v951_v32  ;;  %v965_v60 = vsel %vm947_vm4, %v964_v25, %v963_v16  ;;  %v9163_v41 = vpack.c.bf16 %v707_v1, %v705_v10 }
 0x131   : > { %v787_v51 = vld [vmem:[%s8908_s16 + $0x350] sm:$0xff]  ;;  %v793_v14 = vld [vmem:[%s8908_s16 + $0x380] sm:$0xff]  ;;  %v9165_v48 = vpack.c.bf16 %v715_v17, %v713_v15  ;;  %v957_v38 = vsel %vm956_vm7, %v955_v2, %v954_v39  ;;  %v967_v28 = vsel %vm950_vm5, %v966_v18, %v965_v60  ;;  %v9170_v50 = vpack.c.bf16 %v723_v20, %v721_v24 }
 0x132   : > { %v801_v62 = vld [vmem:[%s8908_s16 + $0x3c0] sm:$0xff]  ;;  %v803_v56 = vld [vmem:[%s8908_s16 + $0x3d0] sm:$0xff]  ;;  %v9172_v57 = vpack.c.bf16 %v731_v22, %v729_v13  ;;  %v969_v32 = vsel %vm953_vm6, %v968_v40, %v967_v28  ;;  %v9177_v25 = vpack.c.bf16 %v739_v63, %v737_v21  ;;  %v9179_v16 = vpack.c.bf16 %v747_v30, %v745_v29 }
 0x133   : > { %v9174_v58 = vld [vmem:[#allocation13 + $0x4] ss:$8 sps:$4 sm:$0xff]   ;;  %v9181_v1 = vpack.c.bf16 %v755_v12, %v753_v42  ;;  %v7860_v61 = vld [vmem:[#allocation8] ss:$8 sps:$4 sm:$0xff]   ;;  %v971_v2 = vsel %vm956_vm7, %v970_v19, %v969_v32  ;;  %v9184_v3 = vpack.c.bf16 %v763_v8, %v761_v11  ;;  %v9186_v60 = vpack.c.bf16 %v771_v36, %v769_v31  ;;  %v7868_v42 = vld [vmem:[#allocation8 + $0x14] ss:$8 sps:$4 sm:$0xff]  }
 0x134   : > { %v9188_v18 = vpack.c.bf16 %v779_v37, %v777_v5  ;;  %7687 = vmatprep.subr.bf16.mxu1 %v9174_v58  ;;  %v972_v24 = vpack.c.b16 %v971_v2, %v957_v38  ;;  %v9191_v0 = vpack.c.bf16 %v787_v51, %v785_v9  ;;  %v9193_v10 = vpack.c.bf16 %v795_v7, %v793_v14  ;;  %v7866_v63 = vld [vmem:[#allocation8 + $0x10] ss:$8 sps:$4 sm:$0xff]   ;;  %v7874_v36 = vld [vmem:[#allocation8 + $0x24] ss:$8 sps:$4 sm:$0xff]  }
 0x135   : > { %v9195_v15 = vpack.c.bf16 %v803_v56, %v801_v62  ;;  %v1129_v12 = vunpack.c.l.b16 %v9155_v6  ;;  %v1131_v17 = vunpack.c.l.b16 %v9157_v49  ;;  %v1133_v11 = vunpack.c.l.b16 %v9163_v41 }
 0x136   : > { %12749 = vst [vmem:[#allocation38_spill] sm:$0xff] %v9191_v0  ;;  %12750 = vst [vmem:[#allocation39_spill] sm:$0xff] %v9193_v10  ;;  %v1135_v20 = vunpack.c.l.b16 %v9165_v48  ;;  %7664 = vmatmul.mubr.bf16.vlgmr.msra.gmra.mrb[0].mxu0 %v972_v24  ;;  %v1127_v37 = vunpack.c.l.b16 %v9148_v4  ;;  %v1137_v13 = vunpack.c.l.b16 %v9170_v50  ;;  %v1139_v9 = vunpack.c.l.b16 %v9172_v57 }
 0x137   : > { %12751 = vst [vmem:[#allocation40_spill] sm:$0xff] %v9195_v15  ;;  %v1141_v7 = vunpack.c.l.b16 %v9177_v25  ;;  %v1145_v62 = vunpack.c.l.b16 %v9181_v1  ;;  %v1147_v22 = vunpack.c.l.b16 %v9184_v3  ;;  %v1149_v40 = vunpack.c.l.b16 %v9186_v60  ;;  %1453 = vmatpush1.bf16.msra.mxu0 %v7860_v61 }
 0x138   : > { %v1151_v21 = vunpack.c.l.b16 %v9188_v18  ;;  %v12752_v29 = vmov 0   ;;  %v1143_v30 = vunpack.c.l.b16 %v9179_v16  ;;  %v1153_v19 = vunpack.c.l.b16 %v9191_v0  ;;  %1454 = vmatprep.subr.bf16.mxu0 %v7868_v42 }
 0x139   : > { %1484 = vmatprep.mubr.bf16.mxu0 %v12752_v29  ;;  %v1155_v8 = vunpack.c.l.b16 %v9193_v10  ;;  %v1159_v31 = vrot.slane %v1129_v12, 7  ;;  %v1157_v5 = vunpack.c.l.b16 %v9195_v15  ;;  %v1161_v51 = vrot.slane %v1131_v17, 6  ;;  %v7872_v10 = vld [vmem:[#allocation8 + $0x20] ss:$8 sps:$4 sm:$0xff]  }
 0x13a   : > { %v1163_v14 = vrot.slane %v1133_v11, 5  ;;  %v1165_v39 = vrot.slane %v1135_v20, 4  ;;  %v1167_v28 = vrot.slane %v1137_v13, 3  ;;  %v1169_v56 = vrot.slane %v1139_v9, 2  ;;  %v7880_v11 = vld [vmem:[#allocation8 + $0x34] ss:$8 sps:$4 sm:$0xff]  }
 0x13b   : > { %v1160_v38 = vsel %vm938_vm1, %v1159_v31, %v1127_v37  ;;  %v1187_v32 = vrot.slane %v1145_v62, 7  ;;  %v1189_v2 = vrot.slane %v1147_v22, 6  ;;  %v1191_v24 = vrot.slane %v1149_v40, 5  ;;  %1455 = vmatpush1.bf16.msra.mxu0 %v7866_v63 }
 0x13c   : > { %v1162_v61 = vsel %vm941_vm2, %v1161_v51, %v1160_v38  ;;  %v1193_v0 = vrot.slane %v1151_v21, 4  ;;  %v1171_v12 = vrot.slane %v1141_v7, 1  ;;  %v1195_v17 = vrot.slane %v1153_v19, 3  ;;  %1456 = vmatprep.subr.bf16.mxu0 %v7874_v36  ;;  %v7878_v7 = vld [vmem:[#allocation8 + $0x30] ss:$8 sps:$4 sm:$0xff]  }
 0x13d   : > { %v1164_v42 = vsel %vm944_vm3, %v1163_v14, %v1162_v61  ;;  %v1188_v15 = vsel %vm938_vm1, %v1187_v32, %v1143_v30  ;;  %v1197_v13 = vrot.slane %v1155_v8, 2  ;;  %v1199_v22 = vrot.slane %v1157_v5, 1  ;;  %v7886_v19 = vld [vmem:[#allocation8 + $0x44] ss:$8 sps:$4 sm:$0xff]   ;;  %v7863_v8 = vld [vmem:[#allocation13] ss:$8 sps:$4 sm:$0xff]  }
 0x13e   : > { %v1166_v20 = vsel %vm947_vm4, %v1165_v39, %v1164_v42  ;;  %v1190_v37 = vsel %vm941_vm2, %v1189_v2, %v1188_v15  ;;  %v7871_v36 = vld [vmem:[#allocation13 + $0x14] ss:$8 sps:$4 sm:$0xff]   ;;  %v7884_v5 = vld [vmem:[#allocation8 + $0x40] ss:$8 sps:$4 sm:$0xff]   ;;  %v7890_v39 = vld [vmem:[#allocation8 + $0x50] ss:$8 sps:$4 sm:$0xff]  }
 0x13f   : > { %v1168_v9 = vsel %vm950_vm5, %v1167_v28, %v1166_v20  ;;  %v1192_v62 = vsel %vm944_vm3, %v1191_v24, %v1190_v37  ;;  %1457 = vmatpush1.bf16.msra.mxu0 %v7872_v10  ;;  %v7892_v14 = vld [vmem:[#allocation8 + $0x54] ss:$8 sps:$4 sm:$0xff]   ;;  %v7877_v10 = vld [vmem:[#allocation13 + $0x24] ss:$8 sps:$4 sm:$0xff]   ;;  %v7875_v28 = vld [vmem:[#allocation13 + $0x20] ss:$8 sps:$4 sm:$0xff]  }
 0x140   : > { %v1170_v40 = vsel %vm953_vm6, %v1169_v56, %v1168_v9  ;;  %v1194_v21 = vsel %vm947_vm4, %v1193_v0, %v1192_v62  ;;  %1458 = vmatprep.subr.bf16.mxu0 %v7880_v11  ;;  %v7869_v0 = vld [vmem:[#allocation13 + $0x10] ss:$8 sps:$4 sm:$0xff]   ;;  %v7898_v38 = vld [vmem:[#allocation8 + $0x64] ss:$8 sps:$4 sm:$0xff]   ;;  %v7883_v56 = vld [vmem:[#allocation13 + $0x34] ss:$8 sps:$4 sm:$0xff]  }
 0x141   : > { %v1172_v63 = vsel %vm956_vm7, %v1171_v12, %v1170_v40  ;;  %v1196_v30 = vsel %vm950_vm5, %v1195_v17, %v1194_v21  ;;  %v7896_v32 = vld [vmem:[#allocation8 + $0x60] ss:$8 sps:$4 sm:$0xff]   ;;  %v7904_v61 = vld [vmem:[#allocation8 + $0x74] ss:$8 sps:$4 sm:$0xff]   ;;  %v7881_v2 = vld [vmem:[#allocation13 + $0x30] ss:$8 sps:$4 sm:$0xff]  }
 0x142   : > { %v1198_v15 = vsel %vm953_vm6, %v1197_v13, %v1196_v30  ;;  %v7889_v24 = vld [vmem:[#allocation13 + $0x44] ss:$8 sps:$4 sm:$0xff]   ;;  %v7902_v42 = vld [vmem:[#allocation8 + $0x70] ss:$8 sps:$4 sm:$0xff]   ;;  %v7887_v11 = vld [vmem:[#allocation13 + $0x40] ss:$8 sps:$4 sm:$0xff]  }
 0x143   : > { %v1200_v31 = vsel %vm956_vm7, %v1199_v22, %v1198_v15  ;;  %1459 = vmatpush1.bf16.msra.mxu0 %v7878_v7  ;;  %v710_v12 = vld [vmem:[%s8908_s16 + $0xe8] sm:$0xff]  ;;  %v712_v17 = vld [vmem:[%s8908_s16 + $0xf8] sm:$0xff] }
 0x144   : > { %v1215_v51 = vpack.c.b16 %v1200_v31, %v1172_v63  ;;  %1460 = vmatprep.subr.bf16.mxu0 %v7886_v19  ;;  %v840_v20 = vpack.c.bf16 %v712_v17, %v710_v12  ;;  %v7895_v37 = vld [vmem:[#allocation13 + $0x54] ss:$8 sps:$4 sm:$0xff]   ;;  %v7893_v13 = vld [vmem:[#allocation13 + $0x50] ss:$8 sps:$4 sm:$0xff]   ;;  %v7901_v9 = vld [vmem:[#allocation13 + $0x64] ss:$8 sps:$4 sm:$0xff]  }
 0x145   : > { %v7899_v62 = vld [vmem:[#allocation13 + $0x60] ss:$8 sps:$4 sm:$0xff]   ;;  %v7907_v22 = vld [vmem:[#allocation13 + $0x74] ss:$8 sps:$4 sm:$0xff]   ;;  %v7905_v40 = vld [vmem:[#allocation13 + $0x70] ss:$8 sps:$4 sm:$0xff]  }
 0x146   : > { %1348 = vmatmul.mubr.bf16.vlgmr.msra.gmra.mrb[0].mxu1 %v1215_v51  ;;  %v7913_v21 = vld [vmem:[#allocation13 + $0x94] ss:$8 sps:$4 sm:$0xff]   ;;  %v7911_v7 = vld [vmem:[#allocation13 + $0x90] ss:$8 sps:$4 sm:$0xff]   ;;  %v7916_v63 = vld [vmem:[#allocation13 + $0xa4] ss:$8 sps:$4 sm:$0xff]  }
 0x147   : > { %7703 = vmatpush1.bf16.msra.mxu1 %v7863_v8  ;;  %1461 = vmatpush1.bf16.msra.mxu0 %v7884_v5  ;;  %v7919_v30 = vld [vmem:[#allocation13 + $0xb4] ss:$8 sps:$4 sm:$0xff]   ;;  %v7917_v19 = vld [vmem:[#allocation13 + $0xb0] ss:$8 sps:$4 sm:$0xff]   ;;  %v7922_v15 = vld [vmem:[#allocation13 + $0xc4] ss:$8 sps:$4 sm:$0xff]  }
 0x148   : > { %7688 = vmatprep.subr.bf16.mxu1 %v7871_v36  ;;  %1462 = vmatprep.subr.bf16.mxu0 %v7892_v14  ;;  %v7923_v31 = vld [vmem:[#allocation13 + $0xd0] ss:$8 sps:$4 sm:$0xff]   ;;  %v7931_v51 = vld [vmem:[#allocation13 + $0xf4] ss:$8 sps:$4 sm:$0xff]   ;;  %v709_v14 = vld [vmem:[%s8908_s16 + $0xe0] sm:$0xff] }
 0x149   : > { %1939 = vmatprep.mubr.bf16.mxu1 %v840_v20  ;;  %v7929_v5 = vld [vmem:[#allocation13 + $0xf0] ss:$8 sps:$4 sm:$0xff]   ;;  %v12756_v20 = vld [vmem:[#allocation26_spill] sm:$0xff] }
 0x14a   : > { %v744_v12 = vld [vmem:[%s8908_s16 + $0x1f8] sm:$0xff]  ;;  %v743_v17 = vld [vmem:[%s8908_s16 + $0x1f0] sm:$0xff] }
 0x14b   : > { %7704 = vmatpush1.bf16.msra.mxu1 %v7869_v0  ;;  %1463 = vmatpush1.bf16.msra.mxu0 %v7890_v39  ;;  %v720_v39 = vld [vmem:[%s8908_s16 + $0x138] sm:$0xff] }
 0x14c   : > { %7689 = vmatprep.subr.bf16.mxu1 %v7877_v10  ;;  %1464 = vmatprep.subr.bf16.mxu0 %v7898_v38  ;;  %v717_v38 = vld [vmem:[%s8908_s16 + $0x120] sm:$0xff] }
 0x14f   : > { %7705 = vmatpush1.bf16.msra.mxu1 %v7875_v28  ;;  %1465 = vmatpush1.bf16.msra.mxu0 %v7896_v32  ;;  %v725_v32 = vld [vmem:[%s8908_s16 + $0x160] sm:$0xff] }
 0x150   : > { %7690 = vmatprep.subr.bf16.mxu1 %v7883_v56  ;;  %1466 = vmatprep.subr.bf16.mxu0 %v7904_v61  ;;  %v727_v61 = vld [vmem:[%s8908_s16 + $0x170] sm:$0xff] }
 0x153   : > { %7706 = vmatpush1.bf16.msra.mxu1 %v7881_v2  ;;  %1467 = vmatpush1.bf16.msra.mxu0 %v7902_v42  ;;  %v742_v42 = vld [vmem:[%s8908_s16 + $0x1e8] sm:$0xff] }
 0x154   : > { %7691 = vmatprep.subr.bf16.mxu1 %v7889_v24  ;;  %1837 = vmatprep.subr.bf16.mxu0 %v9174_v58  ;;  %v7910_v58 = vld [vmem:[#allocation13 + $0x84] ss:$8 sps:$4 sm:$0xff]  }
 0x156   : > { %1485 = vmatmul.mubr.bf16.vlgmr.msra.gmra.mrb[4].mxu0 %v9049_v23  ;;  %v7908_v23 = vld [vmem:[#allocation13 + $0x80] ss:$8 sps:$4 sm:$0xff]  }
 0x157   : > { %7707 = vmatpush1.bf16.msra.mxu1 %v7887_v11  ;;  %1494 = vmatprep.mubr.bf16.mxu0 %v12752_v29 }
 0x158   : > { %7692 = vmatprep.subr.bf16.mxu1 %v7895_v37  ;;  %1838 = vmatpush1.bf16.msra.mxu0 %v7863_v8  ;;  %v7925_v8 = vld [vmem:[#allocation13 + $0xd4] ss:$8 sps:$4 sm:$0xff]  }
 0x159   : > { %1839 = vmatprep.subr.bf16.mxu0 %v7871_v36  ;;  %v7926_v36 = vld [vmem:[#allocation13 + $0xe0] ss:$8 sps:$4 sm:$0xff]  }
 0x15b   : > { %7708 = vmatpush1.bf16.msra.mxu1 %v7893_v13 }
 0x15c   : > { %7693 = vmatprep.subr.bf16.mxu1 %v7901_v9  ;;  %1840 = vmatpush1.bf16.msra.mxu0 %v7869_v0  ;;  %v711_v0 = vld [vmem:[%s8908_s16 + $0xf0] sm:$0xff] }
 0x15d   : > { %1841 = vmatprep.subr.bf16.mxu0 %v7877_v10  ;;  %v718_v10 = vld [vmem:[%s8908_s16 + $0x128] sm:$0xff] }
 0x15e   : > { %1495 = vmatmul.mubr.bf16.gmra.mrb[8].mxu0 %v9051_v26  ;;  %v7914_v26 = vld [vmem:[#allocation13 + $0xa0] ss:$8 sps:$4 sm:$0xff]  }
 0x15f   : > { %7709 = vmatpush1.bf16.msra.mxu1 %v7899_v62  ;;  %1504 = vmatprep.mubr.bf16.mxu0 %v12752_v29 }
 0x160   : > { %7694 = vmatprep.subr.bf16.mxu1 %v7907_v22  ;;  %1842 = vmatpush1.bf16.msra.mxu0 %v7875_v28  ;;  %v719_v28 = vld [vmem:[%s8908_s16 + $0x130] sm:$0xff] }
 0x161   : > { %1843 = vmatprep.subr.bf16.mxu0 %v7883_v56  ;;  %v728_v56 = vld [vmem:[%s8908_s16 + $0x178] sm:$0xff] }
 0x163   : > { %7710 = vmatpush1.bf16.msra.mxu1 %v7905_v40 }
 0x164   : > { %7695 = vmatprep.subr.bf16.mxu1 %v7910_v58  ;;  %1844 = vmatpush1.bf16.msra.mxu0 %v7881_v2  ;;  %v736_v2 = vld [vmem:[%s8908_s16 + $0x1b8] sm:$0xff] }
 0x165   : > { %1845 = vmatprep.subr.bf16.mxu0 %v7889_v24  ;;  %v735_v24 = vld [vmem:[%s8908_s16 + $0x1b0] sm:$0xff] }
 0x166   : > { %1505 = vmatmul.mubr.bf16.gmra.mrb[12].mxu0 %v9053_v27  ;;  %v7920_v27 = vld [vmem:[#allocation13 + $0xc0] ss:$8 sps:$4 sm:$0xff]  }
 0x167   : > { %7711 = vmatpush1.bf16.msra.mxu1 %v7908_v23  ;;  %1514 = vmatprep.mubr.bf16.mxu0 %v12752_v29 }
 0x168   : > { %7696 = vmatprep.subr.bf16.mxu1 %v7913_v21  ;;  %1846 = vmatpush1.bf16.msra.mxu0 %v7887_v11  ;;  %v12755_v11 = vld [vmem:[#allocation35_spill] sm:$0xff] }
 0x169   : > { %1847 = vmatprep.subr.bf16.mxu0 %v7895_v37  ;;  %v12757_v37 = vld [vmem:[#allocation36_spill] sm:$0xff] }
 0x16b   : > { %7712 = vmatpush1.bf16.msra.mxu1 %v7911_v7 }
 0x16c   : > { %7697 = vmatprep.subr.bf16.mxu1 %v7916_v63  ;;  %1848 = vmatpush1.bf16.msra.mxu0 %v7893_v13  ;;  %v750_v13 = vld [vmem:[%s8908_s16 + $0x228] sm:$0xff] }
 0x16d   : > { %1849 = vmatprep.subr.bf16.mxu0 %v7901_v9  ;;  %v752_v9 = vld [vmem:[%s8908_s16 + $0x238] sm:$0xff] }
 0x16e   : > { %1515 = vmatmul.mubr.bf16.gmra.mrb[16].mxu0 %v9059_v33  ;;  %v7928_v33 = vld [vmem:[#allocation13 + $0xe4] ss:$8 sps:$4 sm:$0xff]  }
 0x16f   : > { %7713 = vmatpush1.bf16.msra.mxu1 %v7914_v26  ;;  %1524 = vmatprep.mubr.bf16.mxu0 %v12752_v29 }
 0x170   : > { %7698 = vmatprep.subr.bf16.mxu1 %v7919_v30  ;;  %1850 = vmatpush1.bf16.msra.mxu0 %v7899_v62  ;;  %v749_v62 = vld [vmem:[%s8908_s16 + $0x220] sm:$0xff] }
 0x171   : > { %1851 = vmatprep.subr.bf16.mxu0 %v7907_v22  ;;  %v751_v22 = vld [vmem:[%s8908_s16 + $0x230] sm:$0xff] }
 0x173   : > { %7714 = vmatpush1.bf16.msra.mxu1 %v7917_v19 }
 0x174   : > { %7699 = vmatprep.subr.bf16.mxu1 %v7922_v15  ;;  %1852 = vmatpush1.bf16.msra.mxu0 %v7905_v40  ;;  %v12758_v40 = vld [vmem:[#allocation37_spill] sm:$0xff] }
 0x175   : > { %1853 = vmatprep.subr.bf16.mxu0 %v7910_v58  ;;  %v12759_v58 = vld [vmem:[#allocation22_spill] sm:$0xff] }
 0x176   : > { %1525 = vmatmul.mubr.bf16.gmra.mrb[20].mxu0 %v9061_v34  ;;  %v839_v34 = vpack.c.bf16 %v711_v0, %v709_v14  ;;  %v12762_v0 = vld [vmem:[#allocation28_spill] sm:$0xff] }
 0x177   : > { %7715 = vmatpush1.bf16.msra.mxu1 %v7920_v27  ;;  %1534 = vmatprep.mubr.bf16.mxu0 %v12752_v29 }
 0x178   : > { %7700 = vmatprep.subr.bf16.mxu1 %v7925_v8  ;;  %1854 = vmatpush1.bf16.msra.mxu0 %v7908_v23  ;;  %v686_v23 = vld [vmem:[%s8908_s16 + $0x28] sm:$0xff] }
 0x179   : > { %1855 = vmatprep.subr.bf16.mxu0 %v7913_v21  ;;  %v688_v21 = vld [vmem:[%s8908_s16 + $0x38] sm:$0xff] }
 0x17b   : > { %7716 = vmatpush1.bf16.msra.mxu1 %v7923_v31 }
 0x17c   : > { %7701 = vmatprep.subr.bf16.mxu1 %v7928_v33  ;;  %1856 = vmatpush1.bf16.msra.mxu0 %v7911_v7  ;;  %v859_v7 = vpack.c.bf16 %v751_v22, %v749_v62 }
 0x17d   : > { %1857 = vmatprep.subr.bf16.mxu0 %v7916_v63  ;;  %v828_v63 = vpack.c.bf16 %v688_v21, %v686_v23 }
 0x17e   : > { %1535 = vmatmul.mubr.bf16.gmra.mrb[24].mxu0 %v9063_v35  ;;  %v844_v35 = vpack.c.bf16 %v720_v39, %v718_v10  ;;  %v693_v10 = vld [vmem:[%s8908_s16 + $0x60] sm:$0xff]  ;;  %v695_v39 = vld [vmem:[%s8908_s16 + $0x70] sm:$0xff] }
 0x17f   : > { %7717 = vmatpush1.bf16.msra.mxu1 %v7926_v36  ;;  %1544 = vmatprep.mubr.bf16.mxu0 %v12752_v29 }
 0x180   : > { %7702 = vmatprep.subr.bf16.mxu1 %v7931_v51  ;;  %1858 = vmatpush1.bf16.msra.mxu0 %v7914_v26  ;;  %v12760_v26 = vld [vmem:[#allocation27_spill] sm:$0xff] }
 0x181   : > { %1859 = vmatprep.subr.bf16.mxu0 %v7919_v30  ;;  %v760_v30 = vld [vmem:[%s8908_s16 + $0x278] sm:$0xff] }
 0x183   : > { %7718 = vmatpush1.bf16.msra.mxu1 %v7929_v5 }
 0x184   : > { %1860 = vmatpush1.bf16.msra.mxu0 %v7917_v19  ;;  %v685_v19 = vld [vmem:[%s8908_s16 + $0x20] sm:$0xff] }
 0x185   : > { %1861 = vmatprep.subr.bf16.mxu0 %v7922_v15  ;;  %v687_v15 = vld [vmem:[%s8908_s16 + $0x30] sm:$0xff] }
 0x186   : > { %1940 = vmatmul.mubr.bf16.vlgmr.msra.gmra.mrb[4].mxu1 %v839_v34  ;;  %1545 = vmatmul.mubr.bf16.gmra.mrb[28].mxu0 %v9069_v43  ;;  %v12753_v43 = vmov 0.0   ;;  %v768_v34 = vld [vmem:[%s8908_s16 + $0x2b8] sm:$0xff] }
 0x187   : > { %1949 = vmatprep.mubr.bf16.mxu1 %v8965_v46  ;;  %1554 = vmatprep.mubr.bf16.mxu0 %v12752_v29  ;;  %v843_v46 = vpack.c.bf16 %v719_v28, %v717_v38  ;;  %v831_v38 = vpack.c.bf16 %v695_v39, %v693_v10  ;;  %v765_v28 = vld [vmem:[%s8908_s16 + $0x2a0] sm:$0xff] }
 0x188   : > { %1862 = vmatpush1.bf16.msra.mxu0 %v7920_v27 }
 0x189   : > { %1863 = vmatprep.subr.bf16.mxu0 %v7925_v8  ;;  %v827_v8 = vpack.c.bf16 %v687_v15, %v685_v19 }
 0x18c   : > { %1864 = vmatpush1.bf16.msra.mxu0 %v7923_v31  ;;  %v757_v31 = vld [vmem:[%s8908_s16 + $0x260] sm:$0xff] }
 0x18d   : > { %1865 = vmatprep.subr.bf16.mxu0 %v7928_v33  ;;  %v759_v33 = vld [vmem:[%s8908_s16 + $0x270] sm:$0xff] }
 0x18e   : > { %1950 = vmatmul.mubr.bf16.gmra.mrb[8].mxu1 %v9165_v48  ;;  %1555 = vmatmul.mubr.bf16.gmra.mrb[32].mxu0 %v9071_v44  ;;  %v726_v48 = vld [vmem:[%s8908_s16 + $0x168] sm:$0xff] }
 0x18f   : > { %1959 = vmatprep.mubr.bf16.mxu1 %v844_v35  ;;  %1564 = vmatprep.mubr.bf16.mxu0 %v12752_v29  ;;  %v848_v44 = vpack.c.bf16 %v728_v56, %v726_v48  ;;  %v12763_v48 = vld [vmem:[#allocation24_spill] sm:$0xff]  ;;  %v704_v56 = vld [vmem:[%s8908_s16 + $0xb8] sm:$0xff] }
 0x190   : > { %1866 = vmatpush1.bf16.msra.mxu0 %v7926_v36  ;;  %v12761_v36 = vld [vmem:[#allocation23_spill] sm:$0xff] }
 0x191   : > { %1867 = vmatprep.subr.bf16.mxu0 %v7931_v51  ;;  %v696_v51 = vld [vmem:[%s8908_s16 + $0x78] sm:$0xff] }
 0x194   : > { %1868 = vmatpush1.bf16.msra.mxu0 %v7929_v5  ;;  %v863_v5 = vpack.c.bf16 %v759_v33, %v757_v31 }
 0x195   : > { %7667 = vmatprep.subr.bf16.mxu0 %v12753_v43 }
 0x196   : > { %1960 = vmatmul.mubr.bf16.gmra.mrb[12].mxu1 %v843_v46  ;;  %1565 = vmatmul.mubr.bf16.gmra.mrb[36].mxu0 %v9073_v45  ;;  %v734_v45 = vld [vmem:[%s8908_s16 + $0x1a8] sm:$0xff]  ;;  %v767_v46 = vld [vmem:[%s8908_s16 + $0x2b0] sm:$0xff] }
 0x197   : > { %1969 = vmatprep.mubr.bf16.mxu1 %v8967_v47  ;;  %1574 = vmatprep.mubr.bf16.mxu0 %v12752_v29  ;;  %v847_v47 = vpack.c.bf16 %v727_v61, %v725_v32  ;;  %v12764_v61 = vld [vmem:[#allocation29_spill] sm:$0xff] }
 0x19e   : > { %1970 = vmatmul.mubr.bf16.gmra.mrb[16].mxu1 %v9170_v50  ;;  %1575 = vmatmul.mubr.bf16.gmra.mrb[40].mxu0 %v9079_v52  ;;  %v852_v50 = vpack.c.bf16 %v736_v2, %v734_v45  ;;  %v733_v52 = vld [vmem:[%s8908_s16 + $0x1a0] sm:$0xff]  ;;  %v703_v2 = vld [vmem:[%s8908_s16 + $0xb0] sm:$0xff] }
 0x19f   : > { %1979 = vmatprep.mubr.bf16.mxu1 %v848_v44  ;;  %1584 = vmatprep.mubr.bf16.mxu0 %v12752_v29  ;;  %v867_v44 = vpack.c.bf16 %v767_v46, %v765_v28  ;;  %v701_v45 = vld [vmem:[%s8908_s16 + $0xa0] sm:$0xff] }
 0x1a0   : > { %v789_v46 = vld [vmem:[%s8908_s16 + $0x360] sm:$0xff] }
 0x1a6   : > { %1980 = vmatmul.mubr.bf16.gmra.mrb[20].mxu1 %v847_v47  ;;  %1585 = vmatmul.mubr.bf16.gmra.mrb[44].mxu0 %v9081_v54  ;;  %v12754_v54 = vld [vmem:[#allocation34_spill] sm:$0xff]  ;;  %v776_v47 = vld [vmem:[%s8908_s16 + $0x2f8] sm:$0xff] }
 0x1a7   : > { %1989 = vmatprep.mubr.bf16.mxu1 %v8974_v53  ;;  %1594 = vmatprep.mubr.bf16.mxu0 %v12752_v29  ;;  %v851_v53 = vpack.c.bf16 %v735_v24, %v733_v52  ;;  %v835_v52 = vpack.c.bf16 %v703_v2, %v701_v45  ;;  %v773_v24 = vld [vmem:[%s8908_s16 + $0x2e0] sm:$0xff] }
 0x1ae   : > { %1990 = vmatmul.mubr.bf16.gmra.mrb[24].mxu1 %v9172_v57  ;;  %1595 = vmatmul.mubr.bf16.gmra.mrb[48].mxu0 %v9083_v55  ;;  %v856_v57 = vpack.c.bf16 %v744_v12, %v742_v42  ;;  %v741_v55 = vld [vmem:[%s8908_s16 + $0x1e0] sm:$0xff]  ;;  %v12506_v12 = vlaneseq }
 0x1af   : > { %1999 = vmatprep.mubr.bf16.mxu1 %v852_v50  ;;  %1604 = vmatprep.mubr.bf16.mxu0 %v12752_v29 }
 0x1b6   : > { %2000 = vmatmul.mubr.bf16.gmra.mrb[28].mxu1 %v851_v53  ;;  %1605 = vmatmul.mubr.bf16.gmra.mrb[52].mxu0 %v12754_v54  ;;  %v775_v53 = vld [vmem:[%s8908_s16 + $0x2f0] sm:$0xff]  ;;  %v8521_v54 = vmov 1966171168  }
 0x1b7   : > { %2009 = vmatprep.mubr.bf16.mxu1 %v8981_v59  ;;  %1614 = vmatprep.mubr.bf16.mxu0 %v12752_v29  ;;  %v855_v59 = vpack.c.bf16 %v743_v17, %v741_v55  ;;  %v2194_v42 = vunpack.c.l.s4 %v8521_v54  ;;  %v9333_v17 = vshrl.u32 %v12506_v12, 7 }
 0x1b9   : > { %v2195_v55 = vunpack.c.0.s8 %v2194_v42 }
 0x1be   : > { %2010 = vmatmul.mubr.bf16.gmra.mrb[32].mxu1 %v9177_v25  ;;  %1615 = vmatmul.mubr.bf16.gmra.mrb[56].mxu0 %v12755_v11  ;;  %v860_v25 = vpack.c.bf16 %v752_v9, %v750_v13  ;;  %v12766_v11 = vld [vmem:[#allocation30_spill] sm:$0xff] }
 0x1bf   : > { %2019 = vmatprep.mubr.bf16.mxu1 %v856_v57  ;;  %1624 = vmatprep.mubr.bf16.mxu0 %v12752_v29  ;;  %v12765_v57 = vld [vmem:[#allocation25_spill] sm:$0xff] }
 0x1c6   : > { %2020 = vmatmul.mubr.bf16.gmra.mrb[36].mxu1 %v855_v59  ;;  %1625 = vmatmul.mubr.bf16.gmra.mrb[60].mxu0 %v12757_v37  ;;  %v782_v59 = vld [vmem:[%s8908_s16 + $0x328] sm:$0xff] }
 0x1c7   : > { %2029 = vmatprep.mubr.bf16.mxu1 %v12756_v20  ;;  %1634 = vmatprep.mubr.bf16.mxu0 %v12752_v29  ;;  %v784_v20 = vld [vmem:[%s8908_s16 + $0x338] sm:$0xff] }
 0x1c8   : > { %v876_v13 = vpack.c.bf16 %v784_v20, %v782_v59 }
 0x1ce   : > { %2030 = vmatmul.mubr.bf16.gmra.mrb[40].mxu1 %v9179_v16  ;;  %1635 = vmatmul.mubr.bf16.gmra.mrb[64].mxu0 %v12758_v40  ;;  %v758_v16 = vld [vmem:[%s8908_s16 + $0x268] sm:$0xff] }
 0x1cf   : > { %2039 = vmatprep.mubr.bf16.mxu1 %v860_v25  ;;  %1869 = vmatprep.mubr.bf16.mxu0 %v12759_v58  ;;  %v864_v27 = vpack.c.bf16 %v760_v30, %v758_v16 }
 0x1d6   : > { %2040 = vmatmul.mubr.bf16.gmra.mrb[44].mxu1 %v859_v7  ;;  %1870 = vmatmul.mubr.bf16.vlgmr.msra.gmra.mrb[68].mxu0 %v9148_v4  ;;  %v694_v4 = vld [vmem:[%s8908_s16 + $0x68] sm:$0xff]  ;;  %v781_v7 = vld [vmem:[%s8908_s16 + $0x320] sm:$0xff] }
 0x1d7   : > { %2049 = vmatprep.mubr.bf16.mxu1 %v12760_v26  ;;  %1879 = vmatprep.mubr.bf16.mxu0 %v828_v63  ;;  %v832_v14 = vpack.c.bf16 %v696_v51, %v694_v4  ;;  %v783_v63 = vld [vmem:[%s8908_s16 + $0x330] sm:$0xff]  ;;  %v790_v4 = vld [vmem:[%s8908_s16 + $0x368] sm:$0xff]  ;;  %v792_v51 = vld [vmem:[%s8908_s16 + $0x378] sm:$0xff] }
 0x1de   : > { %2050 = vmatmul.mubr.bf16.gmra.mrb[48].mxu1 %v9181_v1  ;;  %1880 = vmatmul.mubr.bf16.gmra.mrb[72].mxu0 %v827_v8  ;;  %v766_v1 = vld [vmem:[%s8908_s16 + $0x2a8] sm:$0xff] }
 0x1df   : > { %2059 = vmatprep.mubr.bf16.mxu1 %v864_v27  ;;  %1889 = vmatprep.mubr.bf16.mxu0 %v12761_v36  ;;  %v868_v35 = vpack.c.bf16 %v768_v34, %v766_v1  ;;  %v12767_v36 = vld [vmem:[#allocation31_spill] sm:$0xff]  ;;  %v880_v34 = vpack.c.bf16 %v792_v51, %v790_v4  ;;  %v808_v51 = vld [vmem:[%s8908_s16 + $0x3f8] sm:$0xff] }
 0x1e0   : > { %v806_v4 = vld [vmem:[%s8908_s16 + $0x3e8] sm:$0xff] }
 0x1e6   : > { %2060 = vmatmul.mubr.bf16.gmra.mrb[52].mxu1 %v863_v5  ;;  %1890 = vmatmul.mubr.bf16.gmra.mrb[76].mxu0 %v9155_v6  ;;  %v702_v6 = vld [vmem:[%s8908_s16 + $0xa8] sm:$0xff] }
 0x1e7   : > { %2069 = vmatprep.mubr.bf16.mxu1 %v12762_v0  ;;  %1899 = vmatprep.mubr.bf16.mxu0 %v832_v14  ;;  %v836_v32 = vpack.c.bf16 %v704_v56, %v702_v6 }
 0x1ee   : > { %2070 = vmatmul.mubr.bf16.gmra.mrb[56].mxu1 %v9184_v3  ;;  %1900 = vmatmul.mubr.bf16.gmra.mrb[80].mxu0 %v831_v38  ;;  %v774_v3 = vld [vmem:[%s8908_s16 + $0x2e8] sm:$0xff] }
 0x1ef   : > { %2079 = vmatprep.mubr.bf16.mxu1 %v868_v35  ;;  %1909 = vmatprep.mubr.bf16.mxu0 %v12763_v48  ;;  %v872_v50 = vpack.c.bf16 %v776_v47, %v774_v3  ;;  %v12768_v35 = vld [vmem:[#allocation38_spill] sm:$0xff]  ;;  %v791_v48 = vld [vmem:[%s8908_s16 + $0x370] sm:$0xff]  ;;  %v9395_v47 = vsub.s32 0, %v9333_v17 }
 0x1f1   : > { %12769 = vst [vmem:[#allocation34_spill] sm:$0xff] %v9395_v47 }
 0x1f6   : > { %2080 = vmatmul.mubr.bf16.gmra.mrb[60].mxu1 %v867_v44  ;;  %1910 = vmatmul.mubr.bf16.gmra.mrb[84].mxu0 %v9157_v49  ;;  %v871_v49 = vpack.c.bf16 %v775_v53, %v773_v24  ;;  %v798_v24 = vld [vmem:[%s8908_s16 + $0x3a8] sm:$0xff]  ;;  %v800_v53 = vld [vmem:[%s8908_s16 + $0x3b8] sm:$0xff] }
 0x1f7   : > { %2089 = vmatprep.mubr.bf16.mxu1 %v12764_v61  ;;  %1919 = vmatprep.mubr.bf16.mxu0 %v836_v32  ;;  %v879_v32 = vpack.c.bf16 %v791_v48, %v789_v46  ;;  %v12779_v48 = vld [vmem:[#allocation40_spill] sm:$0xff] }
 0x1fe   : > { %2090 = vmatmul.mubr.bf16.gmra.mrb[64].mxu1 %v9186_v60  ;;  %1920 = vmatmul.mubr.bf16.gmra.mrb[88].mxu0 %v835_v52  ;;  %v9338_v60 = vsub.s32 %v2195_v55, %v9333_v17  ;;  %v884_v55 = vpack.c.bf16 %v800_v53, %v798_v24 }
 0x1ff   : > { %2099 = vmatprep.mubr.bf16.mxu1 %v872_v50  ;;  %1929 = vmatprep.mubr.bf16.mxu0 %v12765_v57  ;;  %v12770_v50 = vld [vmem:[#allocation32_spill] sm:$0xff] }
 0x206   : > { %2100 = vmatmul.mubr.bf16.gmra.mrb[68].mxu1 %v871_v49  ;;  %1930 = vmatmul.mubr.bf16.gmra.mrb[92].mxu0 %v9163_v41 }
 0x207   : > { %2109 = vmatprep.mubr.bf16.mxu1 %v12766_v11  ;;  %7683 = vmatprep.mubr.msk.bf16.mxu0 %vm8519_vm0, %v12753_v43 }
 0x209   : > { %v1056_v37 = vpop.f32.mrb[0].mxu0 }
 0x20a   : > { %v2192_v9 = vcombine.high %v1056_v37, %v1056_v37  ;;  %v9345_v25 = vrot.slane %v1056_v37, %v9338_v60  ;;  %v7665_v62 = vpop.f32.mrb[1].mxu0 }
 0x20b   : > { %v1059_v22 = vpop.f32.mrb[2].mxu0  ;;  %v12773_v62 = vld [vmem:[#allocation39_spill] sm:$0xff] }
 0x20c   : > { %v9348_v41 = vrot.slane %v2192_v9, %v9338_v60  ;;  %v9352_v40 = vrot.slane %v9345_v25, %v9338_v60  ;;  %v2241_v58 = vcombine.high %v1059_v22, %v1059_v22  ;;  %v7666_v23 = vpop.f32.mrb[3].mxu0  ;;  %v2248_v21 = vrot.slane %v1059_v22, %v9338_v60  ;;  %v797_v22 = vld [vmem:[%s8908_s16 + $0x3a0] sm:$0xff] }
 0x20e   : > { %2110 = vmatmul.mubr.bf16.gmra.mrb[72].mxu1 %v9188_v18  ;;  %v2208_v26 = vcombine.high %v9348_v41, %v9348_v41  ;;  %v2255_v16 = vrot.slane %v2241_v58, %v9338_v60  ;;  %v2256_v30 = vcombine.high %v2248_v21, %v2248_v21  ;;  %v9362_v19 = vrot.slane %v2248_v21, %v9338_v60  ;;  %v799_v58 = vld [vmem:[%s8908_s16 + $0x3b0] sm:$0xff] }
 0x20f   : > { %2119 = vmatprep.mubr.bf16.mxu1 %v876_v13  ;;  %v875_v18 = vpack.c.bf16 %v783_v63, %v781_v7  ;;  %v883_v21 = vpack.c.bf16 %v799_v58, %v797_v22 }
 0x210   : > { %v9365_v15 = vrot.slane %v2208_v26, %v9338_v60  ;;  %v2257_v27 = vcombine.high %v2255_v16, %v2255_v16  ;;  %v9368_v8 = vrot.slane %v2255_v16, %v9338_v60  ;;  %v9371_v31 = vrot.slane %v2256_v30, %v9338_v60 }
 0x212   : > { %v9374_v33 = vrot.slane %v2257_v27, %v9338_v60 }
 0x216   : > { %2120 = vmatmul.mubr.bf16.gmra.mrb[76].mxu1 %v875_v18 }
 0x217   : > { %2129 = vmatprep.mubr.bf16.mxu1 %v12767_v36  ;;  %v12776_v36 = vld [vmem:[#allocation33_spill] sm:$0xff] }
 0x219   : > { %v7632_v5 = vpop.f32.mrb[0].mxu1 }
 0x21a   : > { %v7633_v14 = vpop.f32.mrb[1].mxu1 }
 0x21b   : > { %v9379_v0 = vadd.f32 %v7633_v14, %v7632_v5  ;;  %v7635_v1 = vpop.f32.mrb[2].mxu1 }
 0x21c   : > { %v7636_v10 = vpop.f32.mrb[3].mxu1 }
 0x21d   : > { %v7637_v39 = vadd.f32 %v7636_v10, %v7635_v1  ;;  %v4719_v6 = vrot.slane %v9379_v0, %v9338_v60  ;;  %v888_v1 = vpack.c.bf16 %v808_v51, %v806_v4 }
 0x21e   : > { %2130 = vmatmul.mubr.bf16.gmra.mrb[80].mxu1 %v12768_v35  ;;  %v4712_v35 = vcombine.high %v9379_v0, %v9379_v0 }
 0x21f   : > { %v4761_v38 = vcombine.high %v7637_v39, %v7637_v39  ;;  %v4768_v28 = vrot.slane %v7637_v39, %v9338_v60  ;;  %2139 = vmatprep.mubr.bf16.mxu1 %v880_v34  ;;  %v4735_v45 = vrot.slane %v4719_v6, %v9338_v60  ;;  %v4727_v54 = vcombine.high %v4719_v6, %v4719_v6  ;;  %v805_v6 = vld [vmem:[%s8908_s16 + $0x3e0] sm:$0xff] }
 0x221   : > { %v4775_v56 = vrot.slane %v4761_v38, %v9338_v60  ;;  %v4776_v44 = vcombine.high %v4768_v28, %v4768_v28  ;;  %v9389_v61 = vrot.slane %v4768_v28, %v9338_v60  ;;  %v4813_v42 = vrot.slane %v4735_v45, %v9395_v47 }
 0x222   : > { %v4749_v9 = vrot.slane %v4727_v54, %v9338_v60  ;;  %v4757_v27 = vcombine.high %v4735_v45, %v4735_v45 }
 0x223   : > { %v9392_v3 = vrot.slane %v4776_v44, %v9338_v60  ;;  %v9399_v2 = vrot.slane %v4775_v56, %v9338_v60  ;;  %v4777_v52 = vcombine.high %v4775_v56, %v4775_v56  ;;  %v807_v56 = vld [vmem:[%s8908_s16 + $0x3f0] sm:$0xff]  ;;  %v4726_v44 = vrot.slane %v4712_v35, %v9338_v60 }
 0x224   : > { %v4817_v23 = vrot.slane %v4749_v9, %v9395_v47  ;;  %v4821_v5 = vrot.slane %v4757_v27, %v9395_v47  ;;  %v4759_v46 = vcombine.high %v4749_v9, %v4749_v9  ;;  %v887_v45 = vpack.c.bf16 %v807_v56, %v805_v6 }
 0x225   : > { %v9406_v57 = vrot.slane %v4777_v52, %v9338_v60  ;;  %v2207_v9 = vcombine.high %v9345_v25, %v9345_v25  ;;  %v9470_v6 = vrot.slane %v9348_v41, %v9338_v60 }
 0x226   : > { %2140 = vmatmul.mubr.bf16.gmra.mrb[84].mxu1 %v879_v32  ;;  %v4825_v32 = vrot.slane %v4759_v46, %v9395_v47 }
 0x227   : > { %2149 = vmatprep.mubr.bf16.mxu1 %v12770_v50 }
 0x229   : > { %v1486_v49 = vpop.f32.mrb[4].mxu0 }
 0x22a   : > { %v9408_v11 = vpop.f32.mrb[5].mxu0  ;;  %v4890_v59 = vmul.f32 %v4813_v42, %v1486_v49 }
 0x22b   : > { %12771 = vst [vmem:[#allocation35_spill] sm:$0xff] %v9408_v11  ;;  %v1490_v20 = vpop.f32.mrb[6].mxu0 }
 0x22c   : > { %4922 = vadd.xlane.f32.xlu0 %v4890_v59  ;;  %v9410_v37 = vpop.f32.mrb[7].mxu0  ;;  %v4891_v13 = vmul.f32 %v4813_v42, %v1490_v20  ;;  %v4742_v42 = vrot.slane %v4726_v44, %v9338_v60 }
 0x22d   : > { %12772 = vst [vmem:[#allocation26_spill] sm:$0xff] %v9410_v37 }
 0x22e   : > { %2150 = vmatmul.mubr.bf16.gmra.mrb[88].mxu1 %v12773_v62  ;;  %4924 = vadd.xlane.f32.xlu1 %v4891_v13  ;;  %v4829_v49 = vrot.slane %v4742_v42, %v9395_v47  ;;  %v4758_v51 = vcombine.high %v4742_v42, %v4742_v42 }
 0x22f   : > { %2159 = vmatprep.mubr.bf16.mxu1 %v884_v55  ;;  %v4728_v55 = vcombine.high %v4726_v44, %v4726_v44 }
 0x231   : > { %v1496_v7 = vpop.f32.mrb[8].mxu0 }
 0x232   : > { %v4892_v63 = vmul.f32 %v4817_v23, %v1496_v7  ;;  %v9417_v26 = vpop.f32.mrb[9].mxu0 }
 0x233   : > { %12774 = vst [vmem:[#allocation36_spill] sm:$0xff] %v9417_v26  ;;  %v1500_v16 = vpop.f32.mrb[10].mxu0 }
 0x234   : > { %v4893_v30 = vmul.f32 %v4817_v23, %v1500_v16  ;;  %4926 = vadd.xlane.f32.xlu0 %v4892_v63  ;;  %v9419_v18 = vpop.f32.mrb[11].mxu0  ;;  %v4756_v23 = vrot.slane %v4728_v55, %v9338_v60 }
 0x235   : > { %12775 = vst [vmem:[#allocation37_spill] sm:$0xff] %v9419_v18 }
 0x236   : > { %2160 = vmatmul.mubr.bf16.gmra.mrb[92].mxu1 %v883_v21  ;;  %v9450_v21 = vrot.slane %v2207_v9, %v9338_v60  ;;  %v4833_v7 = vrot.slane %v4756_v23, %v9395_v47 }
 0x237   : > { %2169 = vmatprep.mubr.bf16.mxu1 %v12776_v36 }
 0x238   : > { %4928 = vadd.xlane.f32.xlu0 %v4893_v30  ;;  %v2239_v27 = vcombine.high %v9450_v21, %v9450_v21 }
 0x239   : > { %v1506_v14 = vpop.f32.mrb[12].mxu0 }
 0x23a   : > { %v4894_v34 = vmul.f32 %v4821_v5, %v1506_v14  ;;  %v9425_v10 = vpop.f32.mrb[13].mxu0 }
 0x23b   : > { %12777 = vst [vmem:[#allocation22_spill] sm:$0xff] %v9425_v10  ;;  %v1510_v39 = vpop.f32.mrb[14].mxu0 }
 0x23c   : > { %v4895_v38 = vmul.f32 %v4821_v5, %v1510_v39  ;;  %4930 = vadd.xlane.f32.xlu1 %v4894_v34  ;;  %v9429_v28 = vpop.f32.mrb[15].mxu0  ;;  %v9460_v5 = vrot.slane %v2239_v27, %v9395_v47  ;;  %v4845_v27 = vrot.slane %v9389_v61, %v9395_v47 }
 0x23d   : > { %12778 = vst [vmem:[#allocation27_spill] sm:$0xff] %v9429_v28 }
 0x23e   : > { %2170 = vmatmul.mubr.bf16.gmra.mrb[96].mxu1 %v12779_v48  ;;  %4932 = vadd.xlane.f32.xlu0 %v4895_v38 }
 0x23f   : > { %2179 = vmatprep.mubr.bf16.mxu1 %v888_v1  ;;  %v4837_v1 = vrot.slane %v4758_v51, %v9395_v47 }
 0x241   : > { %v1516_v50 = vpop.f32.mrb[16].mxu0 }
 0x242   : > { %v4896_v52 = vmul.f32 %v4825_v32, %v1516_v50  ;;  %v9436_v24 = vpop.f32.mrb[17].mxu0 }
 0x243   : > { %12780 = vst [vmem:[#allocation23_spill] sm:$0xff] %v9436_v24  ;;  %v1520_v0 = vpop.f32.mrb[18].mxu0 }
 0x244   : > { %v4897_v53 = vmul.f32 %v4825_v32, %v1520_v0  ;;  %4934 = vadd.xlane.f32.xlu1 %v4896_v52  ;;  %v9438_v54 = vpop.f32.mrb[19].mxu0  ;;  %v4760_v52 = vcombine.high %v4756_v23, %v4756_v23  ;;  %v2309_v0 = vrot.slane %v9470_v6, %v9395_v47 }
 0x245   : > { %12781 = vst [vmem:[#allocation28_spill] sm:$0xff] %v9438_v54 }
 0x246   : > { %2180 = vmatmul.mubr.bf16.gmra.mrb[100].mxu1 %v887_v45  ;;  %4936 = vadd.xlane.f32.xlu0 %v4897_v53  ;;  %v4841_v42 = vrot.slane %v4760_v52, %v9395_v47  ;;  %v2313_v52 = vrot.slane %v9365_v15, %v9395_v47 }
 0x249   : > { %v1526_v59 = vpop.f32.mrb[20].mxu0 }
 0x24a   : > { %v4898_v20 = vmul.f32 %v4829_v49, %v1526_v59  ;;  %v9442_v13 = vpop.f32.mrb[21].mxu0 }
 0x24b   : > { %12782 = vst [vmem:[#allocation24_spill] sm:$0xff] %v9442_v13  ;;  %v1530_v62 = vpop.f32.mrb[22].mxu0 }
 0x24c   : > { %v4899_v22 = vmul.f32 %v4829_v49, %v1530_v62  ;;  %4938 = vadd.xlane.f32.xlu1 %v4898_v20  ;;  %v9446_v58 = vpop.f32.mrb[23].mxu0 }
 0x24d   : > { %12783 = vst [vmem:[#allocation29_spill] sm:$0xff] %v9446_v58 }
 0x251   : > { %v1536_v63 = vpop.f32.mrb[24].mxu0 }
 0x252   : > { %v4900_v16 = vmul.f32 %v4833_v7, %v1536_v63  ;;  %v9453_v30 = vpop.f32.mrb[25].mxu0 }
 0x253   : > { %12784 = vst [vmem:[#allocation25_spill] sm:$0xff] %v9453_v30  ;;  %v1540_v25 = vpop.f32.mrb[26].mxu0 }
 0x254   : > { %v4901_v36 = vmul.f32 %v4833_v7, %v1540_v25  ;;  %v9457_v4 = vpop.f32.mrb[27].mxu0 }
 0x255   : > { %12785 = vst [vmem:[#allocation30_spill] sm:$0xff] %v9457_v4 }
 0x259   : > { %v1941_v14 = vpop.f32.mrb[4].mxu1  ;;  %v1546_v35 = vpop.f32.mrb[28].mxu0 }
 0x25a   : > { %v2384_v34 = vmul.f32 %v9460_v5, %v1941_v14  ;;  %v9464_v39 = vpop.f32.mrb[5].mxu1  ;;  %v4902_v46 = vmul.f32 %v4837_v1, %v1546_v35  ;;  %v9466_v48 = vpop.f32.mrb[29].mxu0 }
 0x25b   : > { %12786 = vst [vmem:[#allocation31_spill] sm:$0xff] %v9464_v39  ;;  %v1945_v38 = vpop.f32.mrb[6].mxu1  ;;  %12787 = vst [vmem:[#allocation38_spill] sm:$0xff] %v9466_v48  ;;  %v1550_v32 = vpop.f32.mrb[30].mxu0 }
 0x25c   : > { %v2385_v56 = vmul.f32 %v9460_v5, %v1945_v38  ;;  %v9473_v44 = vpop.f32.mrb[7].mxu1  ;;  %2462 = vadd.xlane.f32.xlu0 %v2384_v34  ;;  %v4903_v45 = vmul.f32 %v4837_v1, %v1550_v32  ;;  %v9475_v50 = vpop.f32.mrb[31].mxu0 }
 0x25d   : > { %12788 = vst [vmem:[#allocation32_spill] sm:$0xff] %v9473_v44  ;;  %12789 = vst [vmem:[#allocation39_spill] sm:$0xff] %v9475_v50 }
 0x25e   : > { %2464 = vadd.xlane.f32.xlu1 %v2385_v56 }
 0x260   : > { %4940 = vadd.xlane.f32.xlu0 %v4899_v22 }
 0x261   : > { %v1951_v53 = vpop.f32.mrb[8].mxu1  ;;  %v1556_v49 = vpop.f32.mrb[32].mxu0 }
 0x262   : > { %v2386_v60 = vmul.f32 %v2309_v0, %v1951_v53  ;;  %v9480_v41 = vpop.f32.mrb[9].mxu1  ;;  %4942 = vadd.xlane.f32.xlu1 %v4900_v16  ;;  %v4904_v59 = vmul.f32 %v4841_v42, %v1556_v49  ;;  %v9482_v20 = vpop.f32.mrb[33].mxu0 }
 0x263   : > { %12790 = vst [vmem:[#allocation33_spill] sm:$0xff] %v9480_v41  ;;  %v1955_v55 = vpop.f32.mrb[10].mxu1  ;;  %12791 = vst [vmem:[#allocation40_spill] sm:$0xff] %v9482_v20  ;;  %v1560_v23 = vpop.f32.mrb[34].mxu0 }
 0x264   : > { %v2387_v9 = vmul.f32 %v2309_v0, %v1955_v55  ;;  %v9484_v62 = vpop.f32.mrb[11].mxu1  ;;  %2466 = vadd.xlane.f32.xlu0 %v2386_v60  ;;  %v4905_v7 = vmul.f32 %v4841_v42, %v1560_v23  ;;  %v9486_v63 = vpop.f32.mrb[35].mxu0 }
 0x265   : > { %12792 = vst [vmem:[#allocation41_spill] sm:$0xff] %v9484_v62  ;;  %12793 = vst [vmem:[#allocation42_spill] sm:$0xff] %v9486_v63 }
 0x266   : > { %2468 = vadd.xlane.f32.xlu1 %v2387_v9 }
 0x268   : > { %4944 = vadd.xlane.f32.xlu0 %v4901_v36 }
 0x269   : > { %v1961_v22 = vpop.f32.mrb[12].mxu1  ;;  %v1566_v51 = vpop.f32.mrb[36].mxu0 }
 0x26a   : > { %v2388_v16 = vmul.f32 %v2309_v0, %v1961_v22  ;;  %v9490_v25 = vpop.f32.mrb[13].mxu1  ;;  %4946 = vadd.xlane.f32.xlu1 %v4902_v46  ;;  %v4906_v1 = vmul.f32 %v4845_v27, %v1566_v51  ;;  %v9492_v34 = vpop.f32.mrb[37].mxu0  ;;  %v4849_v46 = vrot.slane %v9392_v3, %v9395_v47  ;;  %v4806_v51 = vcombine.high %v9389_v61, %v9389_v61 }
 0x26b   : > { %12794 = vst [vmem:[#allocation43_spill] sm:$0xff] %v9490_v25  ;;  %v1965_v14 = vpop.f32.mrb[14].mxu1  ;;  %12795 = vst [vmem:[#allocation44_spill] sm:$0xff] %v9492_v34  ;;  %v1570_v56 = vpop.f32.mrb[38].mxu0 }
 0x26c   : > { %v2389_v35 = vmul.f32 %v2309_v0, %v1965_v14  ;;  %v9494_v38 = vpop.f32.mrb[15].mxu1  ;;  %2470 = vadd.xlane.f32.xlu0 %v2388_v16  ;;  %v4907_v32 = vmul.f32 %v4845_v27, %v1570_v56  ;;  %v9496_v36 = vpop.f32.mrb[39].mxu0 }
 0x26d   : > { %12796 = vst [vmem:[#allocation45_spill] sm:$0xff] %v9494_v38  ;;  %12797 = vst [vmem:[#allocation46_spill] sm:$0xff] %v9496_v36 }
 0x26e   : > { %2472 = vadd.xlane.f32.xlu1 %v2389_v35 }
 0x270   : > { %4948 = vadd.xlane.f32.xlu0 %v4903_v45 }
 0x271   : > { %v1971_v53 = vpop.f32.mrb[16].mxu1  ;;  %v1576_v0 = vpop.f32.mrb[40].mxu0 }
 0x272   : > { %v2390_v42 = vmul.f32 %v2313_v52, %v1971_v53  ;;  %v9502_v60 = vpop.f32.mrb[17].mxu1  ;;  %4950 = vadd.xlane.f32.xlu1 %v4904_v59  ;;  %v4908_v55 = vmul.f32 %v4849_v46, %v1576_v0  ;;  %v9504_v9 = vpop.f32.mrb[41].mxu0  ;;  %v4853_v59 = vrot.slane %v4806_v51, %v9395_v47  ;;  %v4808_v51 = vcombine.high %v9392_v3, %v9392_v3 }
 0x273   : > { %12798 = vst [vmem:[#allocation47_spill] sm:$0xff] %v9502_v60  ;;  %v1975_v49 = vpop.f32.mrb[18].mxu1  ;;  %12799 = vst [vmem:[#allocation48_spill] sm:$0xff] %v9504_v9  ;;  %v1580_v45 = vpop.f32.mrb[42].mxu0 }
 0x274   : > { %v2391_v23 = vmul.f32 %v2313_v52, %v1975_v49  ;;  %v9506_v22 = vpop.f32.mrb[19].mxu1  ;;  %2474 = vadd.xlane.f32.xlu0 %v2390_v42  ;;  %v4909_v27 = vmul.f32 %v4849_v46, %v1580_v45  ;;  %v9508_v16 = vpop.f32.mrb[43].mxu0  ;;  %v2238_v46 = vcombine.high %v9470_v6, %v9470_v6 }
 0x275   : > { %12800 = vst [vmem:[#allocation49_spill] sm:$0xff] %v9506_v22  ;;  %12801 = vst [vmem:[#allocation50_spill] sm:$0xff] %v9508_v16 }
 0x276   : > { %2476 = vadd.xlane.f32.xlu1 %v2391_v23 }
 0x278   : > { %4952 = vadd.xlane.f32.xlu0 %v4905_v7 }
 0x279   : > { %v1981_v14 = vpop.f32.mrb[20].mxu1  ;;  %v1586_v53 = vpop.f32.mrb[44].mxu0 }
 0x27a   : > { %v2392_v35 = vmul.f32 %v2313_v52, %v1981_v14  ;;  %v9513_v56 = vpop.f32.mrb[21].mxu1  ;;  %4954 = vadd.xlane.f32.xlu1 %v4906_v1  ;;  %v4910_v49 = vmul.f32 %v4853_v59, %v1586_v53  ;;  %v9515_v42 = vpop.f32.mrb[45].mxu0  ;;  %v2317_v1 = vrot.slane %v2238_v46, %v9395_v47  ;;  %v4857_v53 = vrot.slane %v4808_v51, %v9395_v47 }
 0x27b   : > { %12802 = vst [vmem:[#allocation51_spill] sm:$0xff] %v9513_v56  ;;  %v1985_v0 = vpop.f32.mrb[22].mxu1  ;;  %12803 = vst [vmem:[#allocation52_spill] sm:$0xff] %v9515_v42  ;;  %v1590_v61 = vpop.f32.mrb[46].mxu0  ;;  %v4861_v51 = vrot.slane %v9399_v2, %v9395_v47 }
 0x27c   : > { %v2393_v45 = vmul.f32 %v2313_v52, %v1985_v0  ;;  %v9519_v12 = vpop.f32.mrb[23].mxu1  ;;  %2478 = vadd.xlane.f32.xlu0 %v2392_v35  ;;  %v4911_v7 = vmul.f32 %v4853_v59, %v1590_v61  ;;  %v9521_v23 = vpop.f32.mrb[47].mxu0 }
 0x27d   : > { %12804 = vst [vmem:[#allocation53_spill] sm:$0xff] %v9519_v12  ;;  %12805 = vst [vmem:[#allocation54_spill] sm:$0xff] %v9521_v23 }
 0x27e   : > { %2480 = vadd.xlane.f32.xlu1 %v2393_v45 }
 0x280   : > { %4956 = vadd.xlane.f32.xlu0 %v4907_v32 }
 0x281   : > { %v1991_v14 = vpop.f32.mrb[24].mxu1  ;;  %v1596_v52 = vpop.f32.mrb[48].mxu0 }
 0x282   : > { %v2394_v63 = vmul.f32 %v2317_v1, %v1991_v14  ;;  %v9527_v6 = vpop.f32.mrb[25].mxu1  ;;  %4958 = vadd.xlane.f32.xlu1 %v4908_v55  ;;  %v4912_v0 = vmul.f32 %v4857_v53, %v1596_v52  ;;  %v9529_v59 = vpop.f32.mrb[49].mxu0 }
 0x283   : > { %12806 = vst [vmem:[#allocation55_spill] sm:$0xff] %v9527_v6  ;;  %v1995_v35 = vpop.f32.mrb[26].mxu1  ;;  %12807 = vst [vmem:[#allocation56_spill] sm:$0xff] %v9529_v59  ;;  %v1600_v3 = vpop.f32.mrb[50].mxu0 }
 0x284   : > { %v2395_v61 = vmul.f32 %v2317_v1, %v1995_v35  ;;  %v9531_v20 = vpop.f32.mrb[27].mxu1  ;;  %2482 = vadd.xlane.f32.xlu0 %v2394_v63  ;;  %v4913_v32 = vmul.f32 %v4857_v53, %v1600_v3  ;;  %v9533_v45 = vpop.f32.mrb[51].mxu0  ;;  %v2240_v63 = vcombine.high %v9365_v15, %v9365_v15 }
 0x285   : > { %12808 = vst [vmem:[#allocation57_spill] sm:$0xff] %v9531_v20  ;;  %12809 = vst [vmem:[#allocation58_spill] sm:$0xff] %v9533_v45 }
 0x286   : > { %2484 = vadd.xlane.f32.xlu1 %v2395_v61 }
 0x288   : > { %4960 = vadd.xlane.f32.xlu0 %v4909_v27 }
 0x289   : > { %v2001_v46 = vpop.f32.mrb[28].mxu1  ;;  %v1606_v52 = vpop.f32.mrb[52].mxu0 }
 0x28a   : > { %v2396_v55 = vmul.f32 %v2317_v1, %v2001_v46  ;;  %v9537_v14 = vpop.f32.mrb[29].mxu1  ;;  %4962 = vadd.xlane.f32.xlu1 %v4910_v49  ;;  %v4914_v35 = vmul.f32 %v4861_v51, %v1606_v52  ;;  %v9539_v50 = vpop.f32.mrb[53].mxu0  ;;  %v2321_v49 = vrot.slane %v2240_v63, %v9395_v47  ;;  %v4865_v52 = vrot.slane %v9406_v57, %v9395_v47 }
 0x28b   : > { %12810 = vst [vmem:[#allocation59_spill] sm:$0xff] %v9537_v14  ;;  %v2005_v29 = vpop.f32.mrb[30].mxu1  ;;  %12811 = vst [vmem:[#allocation60_spill] sm:$0xff] %v9539_v50  ;;  %v1610_v27 = vpop.f32.mrb[54].mxu0 }
 0x28c   : > { %v2397_v53 = vmul.f32 %v2317_v1, %v2005_v29  ;;  %v9543_v3 = vpop.f32.mrb[31].mxu1  ;;  %2486 = vadd.xlane.f32.xlu0 %v2396_v55  ;;  %v4915_v61 = vmul.f32 %v4861_v51, %v1610_v27  ;;  %v9545_v48 = vpop.f32.mrb[55].mxu0 }
 0x28d   : > { %12812 = vst [vmem:[#allocation61_spill] sm:$0xff] %v9543_v3  ;;  %12813 = vst [vmem:[#allocation62_spill] sm:$0xff] %v9545_v48  ;;  %v4807_v48 = vcombine.high %v9399_v2, %v9399_v2 }
 0x28e   : > { %2488 = vadd.xlane.f32.xlu1 %v2397_v53 }
 0x290   : > { %4964 = vadd.xlane.f32.xlu0 %v4911_v7 }
 0x291   : > { %v2011_v46 = vpop.f32.mrb[32].mxu1  ;;  %v1616_v29 = vpop.f32.mrb[56].mxu0 }
 0x292   : > { %v2398_v4 = vmul.f32 %v2321_v49, %v2011_v46  ;;  %v9550_v30 = vpop.f32.mrb[33].mxu1  ;;  %4966 = vadd.xlane.f32.xlu1 %v4912_v0  ;;  %v4916_v1 = vmul.f32 %v4865_v52, %v1616_v29  ;;  %v9552_v55 = vpop.f32.mrb[57].mxu0  ;;  %v4869_v0 = vrot.slane %v4807_v48, %v9395_v47  ;;  %v4809_v48 = vcombine.high %v9406_v57, %v9406_v57 }
 0x293   : > { %12814 = vst [vmem:[#allocation63_spill] sm:$0xff] %v9550_v30  ;;  %v2015_v15 = vpop.f32.mrb[34].mxu1  ;;  %12815 = vst [vmem:[#allocation64_spill] sm:$0xff] %v9552_v55  ;;  %v1620_v7 = vpop.f32.mrb[58].mxu0 }
 0x294   : > { %v2399_v51 = vmul.f32 %v2321_v49, %v2015_v15  ;;  %v9554_v27 = vpop.f32.mrb[35].mxu1  ;;  %2490 = vadd.xlane.f32.xlu0 %v2398_v4  ;;  %v4917_v53 = vmul.f32 %v4865_v52, %v1620_v7  ;;  %v9556_v63 = vpop.f32.mrb[59].mxu0 }
 0x295   : > { %12816 = vst [vmem:[#allocation65_spill] sm:$0xff] %v9554_v27  ;;  %12817 = vst [vmem:[#allocation66_spill] sm:$0xff] %v9556_v63 }
 0x296   : > { %2492 = vadd.xlane.f32.xlu1 %v2399_v51 }
 0x298   : > { %4968 = vadd.xlane.f32.xlu0 %v4913_v32  ;;  %v2325_v32 = vrot.slane %v9362_v19, %v9395_v47 }
 0x299   : > { %v2021_v46 = vpop.f32.mrb[36].mxu1  ;;  %v1626_v15 = vpop.f32.mrb[60].mxu0 }
 0x29a   : > { %v2400_v50 = vmul.f32 %v2321_v49, %v2021_v46  ;;  %v9561_v29 = vpop.f32.mrb[37].mxu1  ;;  %4970 = vadd.xlane.f32.xlu1 %v4914_v35  ;;  %v4918_v58 = vmul.f32 %v4869_v0, %v1626_v15  ;;  %v9563_v4 = vpop.f32.mrb[61].mxu0  ;;  %v4873_v46 = vrot.slane %v4809_v48, %v9395_v47 }
 0x29b   : > { %12818 = vst [vmem:[#allocation67_spill] sm:$0xff] %v9561_v29  ;;  %v2025_v55 = vpop.f32.mrb[38].mxu1  ;;  %12819 = vst [vmem:[#allocation68_spill] sm:$0xff] %v9563_v4  ;;  %v1630_v63 = vpop.f32.mrb[62].mxu0 }
 0x29c   : > { %v2401_v52 = vmul.f32 %v2321_v49, %v2025_v55  ;;  %v9565_v7 = vpop.f32.mrb[39].mxu1  ;;  %2494 = vadd.xlane.f32.xlu0 %v2400_v50  ;;  %v4919_v2 = vmul.f32 %v4869_v0, %v1630_v63  ;;  %v9567_v51 = vpop.f32.mrb[63].mxu0 }
 0x29d   : > { %12820 = vst [vmem:[#allocation69_spill] sm:$0xff] %v9565_v7  ;;  %12821 = vst [vmem:[#allocation70_spill] sm:$0xff] %v9567_v51 }
 0x29e   : > { %2496 = vadd.xlane.f32.xlu1 %v2401_v52 }
 0x2a0   : > { %4972 = vadd.xlane.f32.xlu0 %v4915_v61  ;;  %v2293_v61 = vrot.slane %v9352_v40, %v9395_v47 }
 0x2a1   : > { %v2031_v35 = vpop.f32.mrb[40].mxu1  ;;  %v1636_v50 = vpop.f32.mrb[64].mxu0 }
 0x2a2   : > { %v2402_v15 = vmul.f32 %v2325_v32, %v2031_v35  ;;  %v9574_v49 = vpop.f32.mrb[41].mxu1  ;;  %4974 = vadd.xlane.f32.xlu1 %v4916_v1  ;;  %v4920_v63 = vmul.f32 %v4873_v46, %v1636_v50  ;;  %v9576_v0 = vpop.f32.mrb[65].mxu0 }
 0x2a3   : > { %12822 = vst [vmem:[#allocation71_spill] sm:$0xff] %v9574_v49  ;;  %v2035_v55 = vpop.f32.mrb[42].mxu1  ;;  %12823 = vst [vmem:[#allocation72_spill] sm:$0xff] %v9576_v0  ;;  %v1640_v57 = vpop.f32.mrb[66].mxu0 }
 0x2a4   : > { %v2403_v51 = vmul.f32 %v2325_v32, %v2035_v55  ;;  %v9578_v4 = vpop.f32.mrb[43].mxu1  ;;  %2498 = vadd.xlane.f32.xlu0 %v2402_v15  ;;  %v4921_v52 = vmul.f32 %v4873_v46, %v1640_v57  ;;  %v9580_v13 = vpop.f32.mrb[67].mxu0  ;;  %v2329_v57 = vrot.slane %v9371_v31, %v9395_v47 }
 0x2a5   : > { %12824 = vst [vmem:[#allocation73_spill] sm:$0xff] %v9578_v4  ;;  %12825 = vst [vmem:[#allocation74_spill] sm:$0xff] %v9580_v13 }
 0x2a6   : > { %2500 = vadd.xlane.f32.xlu1 %v2403_v51 }
 0x2a8   : > { %4976 = vadd.xlane.f32.xlu0 %v4917_v53 }
 0x2a9   : > { %v2041_v48 = vpop.f32.mrb[44].mxu1  ;;  %v1871_v50 = vpop.f32.mrb[68].mxu0 }
 0x2aa   : > { %v2404_v1 = vmul.f32 %v2325_v32, %v2041_v48  ;;  %v9584_v35 = vpop.f32.mrb[45].mxu1  ;;  %4978 = vadd.xlane.f32.xlu1 %v4918_v58  ;;  %v2370_v55 = vmul.f32 %v2293_v61, %v1871_v50  ;;  %v9586_v45 = vpop.f32.mrb[69].mxu0 }
 0x2ab   : > { %12826 = vst [vmem:[#allocation75_spill] sm:$0xff] %v9584_v35  ;;  %v2045_v0 = vpop.f32.mrb[46].mxu1  ;;  %12827 = vst [vmem:[#allocation76_spill] sm:$0xff] %v9586_v45  ;;  %v1875_v46 = vpop.f32.mrb[70].mxu0 }
 0x2ac   : > { %v2405_v15 = vmul.f32 %v2325_v32, %v2045_v0  ;;  %v9588_v59 = vpop.f32.mrb[47].mxu1  ;;  %2502 = vadd.xlane.f32.xlu0 %v2404_v1  ;;  %v2371_v51 = vmul.f32 %v2293_v61, %v1875_v46  ;;  %v9590_v53 = vpop.f32.mrb[71].mxu0 }
 0x2ad   : > { %12828 = vst [vmem:[#allocation77_spill] sm:$0xff] %v9588_v59  ;;  %12829 = vst [vmem:[#allocation78_spill] sm:$0xff] %v9590_v53 }
 0x2ae   : > { %2504 = vadd.xlane.f32.xlu1 %v2405_v15 }
 0x2b0   : > { %4980 = vadd.xlane.f32.xlu0 %v4919_v2 }
 0x2b1   : > { %v2051_v48 = vpop.f32.mrb[48].mxu1  ;;  %v1881_v50 = vpop.f32.mrb[72].mxu0 }
 0x2b2   : > { %v2406_v58 = vmul.f32 %v2329_v57, %v2051_v48  ;;  %v9594_v13 = vpop.f32.mrb[49].mxu1  ;;  %4982 = vadd.xlane.f32.xlu1 %v4920_v63  ;;  %v2372_v32 = vmul.f32 %v2293_v61, %v1881_v50  ;;  %v9596_v0 = vpop.f32.mrb[73].mxu0  ;;  %v2297_v48 = vrot.slane %v9450_v21, %v9395_v47 }
 0x2b3   : > { %12830 = vst [vmem:[#allocation79_spill] sm:$0xff] %v9594_v13  ;;  %v2055_v35 = vpop.f32.mrb[50].mxu1  ;;  %12831 = vst [vmem:[#allocation80_spill] sm:$0xff] %v9596_v0  ;;  %v1885_v46 = vpop.f32.mrb[74].mxu0 }
 0x2b4   : > { %v2407_v1 = vmul.f32 %v2329_v57, %v2055_v35  ;;  %v9598_v59 = vpop.f32.mrb[51].mxu1  ;;  %2506 = vadd.xlane.f32.xlu0 %v2406_v58  ;;  %v2373_v15 = vmul.f32 %v2293_v61, %v1885_v46  ;;  %v9600_v49 = vpop.f32.mrb[75].mxu0  ;;  %v2286_v35 = vcombine.high %v9362_v19, %v9362_v19 }
 0x2b5   : > { %12832 = vst [vmem:[#allocation81_spill] sm:$0xff] %v9598_v59  ;;  %12833 = vst [vmem:[#allocation82_spill] sm:$0xff] %v9600_v49 }
 0x2b6   : > { %2508 = vadd.xlane.f32.xlu1 %v2407_v1  ;;  %v2333_v21 = vrot.slane %v2286_v35, %v9395_v47 }
 0x2b8   : > { %4984 = vadd.xlane.f32.xlu0 %v4921_v52 }
 0x2b9   : > { %v2061_v2 = vpop.f32.mrb[52].mxu1  ;;  %v1891_v4 = vpop.f32.mrb[76].mxu0 }
 0x2ba   : > { %v2408_v63 = vmul.f32 %v2329_v57, %v2061_v2  ;;  %v9604_v13 = vpop.f32.mrb[53].mxu1  ;;  %v2374_v61 = vmul.f32 %v2297_v48, %v1891_v4  ;;  %v9610_v46 = vpop.f32.mrb[77].mxu0 }
 0x2bb   : > { %12834 = vst [vmem:[#allocation83_spill] sm:$0xff] %v9604_v13  ;;  %v2065_v50 = vpop.f32.mrb[54].mxu1  ;;  %12836 = vst [vmem:[#allocation85_spill] sm:$0xff] %v9610_v46  ;;  %v1895_v52 = vpop.f32.mrb[78].mxu0 }
 0x2bc   : > { %v2409_v59 = vmul.f32 %v2329_v57, %v2065_v50  ;;  %v9608_v58 = vpop.f32.mrb[55].mxu1  ;;  %2434 = vadd.xlane.f32.xlu0 %v2370_v55  ;;  %v2375_v1 = vmul.f32 %v2297_v48, %v1895_v52  ;;  %v9612_v7 = vpop.f32.mrb[79].mxu0  ;;  %v2237_v52 = vcombine.high %v9352_v40, %v9352_v40 }
 0x2bd   : > { %12835 = vst [vmem:[#allocation84_spill] sm:$0xff] %v9608_v58  ;;  %12837 = vst [vmem:[#allocation86_spill] sm:$0xff] %v9612_v7  ;;  %v9649_v29 = vpop.xlane.xlu1 %4924 }
 0x2be   : > { %2512 = vadd.xlane.f32.xlu1 %v2409_v59 }
 0x2c0   : > { %2510 = vadd.xlane.f32.xlu0 %v2408_v63 }
 0x2c1   : > { %v2071_v2 = vpop.f32.mrb[56].mxu1  ;;  %v1901_v57 = vpop.f32.mrb[80].mxu0 }
 0x2c2   : > { %v2410_v13 = vmul.f32 %v2333_v21, %v2071_v2  ;;  %v9615_v3 = vpop.f32.mrb[57].mxu1  ;;  %2438 = vadd.xlane.f32.xlu1 %v2372_v32  ;;  %v2376_v4 = vmul.f32 %v2297_v48, %v1901_v57  ;;  %v9619_v58 = vpop.f32.mrb[81].mxu0  ;;  %v2301_v32 = vrot.slane %v2237_v52, %v9395_v47 }
 0x2c3   : > { %12838 = vst [vmem:[#allocation87_spill] sm:$0xff] %v9615_v3  ;;  %v2075_v19 = vpop.f32.mrb[58].mxu1  ;;  %12840 = vst [vmem:[#allocation89_spill] sm:$0xff] %v9619_v58  ;;  %v1905_v59 = vpop.f32.mrb[82].mxu0 }
 0x2c4   : > { %v2411_v50 = vmul.f32 %v2333_v21, %v2075_v19  ;;  %v9617_v55 = vpop.f32.mrb[59].mxu1  ;;  %2436 = vadd.xlane.f32.xlu0 %v2371_v51  ;;  %v2377_v63 = vmul.f32 %v2297_v48, %v1905_v59  ;;  %v9623_v35 = vpop.f32.mrb[83].mxu0 }
 0x2c5   : > { %12839 = vst [vmem:[#allocation88_spill] sm:$0xff] %v9617_v55  ;;  %12841 = vst [vmem:[#allocation90_spill] sm:$0xff] %v9623_v35  ;;  %v2288_v55 = vcombine.high %v9371_v31, %v9371_v31  ;;  %v9634_v48 = vpop.xlane.xlu0 %4922 }
 0x2c6   : > { %2440 = vadd.xlane.f32.xlu1 %v2373_v15 }
 0x2c8   : > { %2514 = vadd.xlane.f32.xlu0 %v2410_v13 }
 0x2c9   : > { %v2081_v2 = vpop.f32.mrb[60].mxu1  ;;  %v1911_v57 = vpop.f32.mrb[84].mxu0 }
 0x2ca   : > { %v2412_v3 = vmul.f32 %v2333_v21, %v2081_v2  ;;  %v9626_v19 = vpop.f32.mrb[61].mxu1  ;;  %2516 = vadd.xlane.f32.xlu1 %v2411_v50  ;;  %v2378_v40 = vmul.f32 %v2301_v32, %v1911_v57  ;;  %v9632_v15 = vpop.f32.mrb[85].mxu0  ;;  %v2337_v50 = vrot.slane %v2288_v55, %v9395_v47 }
 0x2cb   : > { %12842 = vst [vmem:[#allocation91_spill] sm:$0xff] %v9626_v19  ;;  %v2085_v51 = vpop.f32.mrb[62].mxu1  ;;  %12844 = vst [vmem:[#allocation93_spill] sm:$0xff] %v9632_v15  ;;  %v1915_v13 = vpop.f32.mrb[86].mxu0 }
 0x2cc   : > { %v2413_v12 = vmul.f32 %v2333_v21, %v2085_v51  ;;  %v9630_v38 = vpop.f32.mrb[63].mxu1  ;;  %2442 = vadd.xlane.f32.xlu0 %v2374_v61  ;;  %v2379_v59 = vmul.f32 %v2301_v32, %v1915_v13  ;;  %v9636_v52 = vpop.f32.mrb[87].mxu0 }
 0x2cd   : > { %12843 = vst [vmem:[#allocation92_spill] sm:$0xff] %v9630_v38  ;;  %12845 = vst [vmem:[#allocation94_spill] sm:$0xff] %v9636_v52  ;;  %v9639_v19 = vpop.xlane.xlu0 %4926 }
 0x2ce   : > { %2444 = vadd.xlane.f32.xlu1 %v2375_v1 }
 0x2d0   : > { %2518 = vadd.xlane.f32.xlu0 %v2412_v3 }
 0x2d1   : > { %v2091_v2 = vpop.f32.mrb[64].mxu1  ;;  %v1921_v51 = vpop.f32.mrb[88].mxu0 }
 0x2d2   : > { %v2414_v31 = vmul.f32 %v2337_v50, %v2091_v2  ;;  %v9641_v21 = vpop.f32.mrb[65].mxu1  ;;  %2520 = vadd.xlane.f32.xlu1 %v2413_v12  ;;  %v2380_v1 = vmul.f32 %v2301_v32, %v1921_v51  ;;  %v9645_v13 = vpop.f32.mrb[89].mxu0 }
 0x2d3   : > { %12846 = vst [vmem:[#allocation95_spill] sm:$0xff] %v9641_v21  ;;  %v2095_v61 = vpop.f32.mrb[66].mxu1  ;;  %12848 = vst [vmem:[#allocation97_spill] sm:$0xff] %v9645_v13  ;;  %v1925_v30 = vpop.f32.mrb[90].mxu0 }
 0x2d4   : > { %v2415_v57 = vmul.f32 %v2337_v50, %v2095_v61  ;;  %v9643_v38 = vpop.f32.mrb[67].mxu1  ;;  %2446 = vadd.xlane.f32.xlu0 %v2376_v4  ;;  %v2381_v3 = vmul.f32 %v2301_v32, %v1925_v30  ;;  %v9647_v55 = vpop.f32.mrb[91].mxu0 }
 0x2d5   : > { %12847 = vst [vmem:[#allocation96_spill] sm:$0xff] %v9643_v38  ;;  %12849 = vst [vmem:[#allocation98_spill] sm:$0xff] %v9647_v55  ;;  %v9651_v21 = vpop.xlane.xlu0 %4928  ;;  %v9659_v30 = vpop.xlane.xlu1 %4930 }
 0x2d6   : > { %2448 = vadd.xlane.f32.xlu1 %v2377_v63 }
 0x2d8   : > { %2522 = vadd.xlane.f32.xlu0 %v2414_v31 }
 0x2d9   : > { %v2101_v2 = vpop.f32.mrb[68].mxu1  ;;  %v1931_v4 = vpop.f32.mrb[92].mxu0 }
 0x2da   : > { %v2416_v12 = vmul.f32 %v2337_v50, %v2101_v2  ;;  %v9653_v44 = vpop.f32.mrb[69].mxu1  ;;  %2524 = vadd.xlane.f32.xlu1 %v2415_v57  ;;  %v9657_v63 = vpop.f32.mrb[93].mxu0  ;;  %v2341_v2 = vrot.slane %v9368_v8, %v9395_v47 }
 0x2db   : > { %12850 = vst [vmem:[#allocation99_spill] sm:$0xff] %v9653_v44  ;;  %v2105_v61 = vpop.f32.mrb[70].mxu1  ;;  %12852 = vst [vmem:[#allocation101_spill] sm:$0xff] %v9657_v63  ;;  %v1935_v32 = vpop.f32.mrb[94].mxu0 }
 0x2dc   : > { %v2417_v51 = vmul.f32 %v2337_v50, %v2105_v61  ;;  %v9655_v38 = vpop.f32.mrb[71].mxu1  ;;  %2450 = vadd.xlane.f32.xlu0 %v2378_v40  ;;  %v9661_v31 = vpop.f32.mrb[95].mxu0 }
 0x2dd   : > { %12851 = vst [vmem:[#allocation100_spill] sm:$0xff] %v9655_v38  ;;  %12853 = vst [vmem:[#allocation102_spill] sm:$0xff] %v9661_v31  ;;  %v9665_v14 = vpop.xlane.xlu0 %4932  ;;  %v9667_v57 = vpop.xlane.xlu1 %4934 }
 0x2de   : > { %2452 = vadd.xlane.f32.xlu1 %v2379_v59 }
 0x2e0   : > { %2526 = vadd.xlane.f32.xlu0 %v2416_v12  ;;  %v2382_v12 = vmul.f32 %v9460_v5, %v1931_v4 }
 0x2e1   : > { %v2111_v50 = vpop.f32.mrb[72].mxu1  ;;  %v9673_v59 = vpop.xlane.xlu0 %4936 }
 0x2e2   : > { %v2418_v61 = vmul.f32 %v2341_v2, %v2111_v50  ;;  %v9669_v38 = vpop.f32.mrb[73].mxu1  ;;  %2528 = vadd.xlane.f32.xlu1 %v2417_v51  ;;  %v9675_v27 = vpop.xlane.xlu1 %4938 }
 0x2e3   : > { %12854 = vst [vmem:[#allocation103_spill] sm:$0xff] %v9669_v38  ;;  %v2115_v40 = vpop.f32.mrb[74].mxu1 }
 0x2e4   : > { %v2419_v44 = vmul.f32 %v2341_v2, %v2115_v40  ;;  %v9671_v6 = vpop.f32.mrb[75].mxu1  ;;  %2454 = vadd.xlane.f32.xlu0 %v2380_v1  ;;  %v2383_v1 = vmul.f32 %v9460_v5, %v1935_v32 }
 0x2e5   : > { %12855 = vst [vmem:[#allocation104_spill] sm:$0xff] %v9671_v6 }
 0x2e6   : > { %2456 = vadd.xlane.f32.xlu1 %v2381_v3 }
 0x2e8   : > { %2530 = vadd.xlane.f32.xlu0 %v2418_v61 }
 0x2e9   : > { %v2121_v55 = vpop.f32.mrb[76].mxu1  ;;  %v9678_v56 = vpop.xlane.xlu0 %2462 }
 0x2ea   : > { %12856 = vst [vmem:[#allocation105_spill] sm:$0xff] %v9678_v56  ;;  %v2420_v50 = vmul.f32 %v2341_v2, %v2121_v55  ;;  %v9680_v22 = vpop.f32.mrb[77].mxu1  ;;  %2532 = vadd.xlane.f32.xlu1 %v2419_v44  ;;  %v2345_v55 = vrot.slane %v9374_v33, %v9395_v47 }
 0x2eb   : > { %12857 = vst [vmem:[#allocation106_spill] sm:$0xff] %v9680_v22  ;;  %v2125_v51 = vpop.f32.mrb[78].mxu1  ;;  %v9682_v40 = vpop.xlane.xlu1 %2464  ;;  %v12861_v22 = vlaneseq }
 0x2ec   : > { %12858 = vst [vmem:[#allocation107_spill] sm:$0xff] %v9682_v40  ;;  %v2421_v6 = vmul.f32 %v2341_v2, %v2125_v51  ;;  %v9685_v38 = vpop.f32.mrb[79].mxu1  ;;  %2458 = vadd.xlane.f32.xlu0 %v2382_v12 }
 0x2ed   : > { %12859 = vst [vmem:[#allocation108_spill] sm:$0xff] %v9685_v38  ;;  %v9687_v3 = vpop.xlane.xlu0 %4940  ;;  %v9696_v20 = vand.u32 127, %v12861_v22 }
 0x2ee   : > { %2460 = vadd.xlane.f32.xlu1 %v2383_v1 }
 0x2ef   : > { %v9689_v4 = vpop.xlane.xlu1 %4942  ;;  %v2632_v38 = vadd.s32 4294967288, %v9696_v20 }
 0x2f0   : > { %2534 = vadd.xlane.f32.xlu0 %v2420_v50 }
 0x2f1   : > { %v2131_v61 = vpop.f32.mrb[80].mxu1  ;;  %v9693_v44 = vpop.xlane.xlu0 %2466 }
 0x2f2   : > { %12860 = vst [vmem:[#allocation109_spill] sm:$0xff] %v9693_v44  ;;  %v2422_v5 = vmul.f32 %v2345_v55, %v2131_v61  ;;  %v9698_v32 = vpop.f32.mrb[81].mxu1  ;;  %2536 = vadd.xlane.f32.xlu1 %v2421_v6  ;;  %v9712_v61 = vsub.s32 %v2632_v38, %v9333_v17 }
 0x2f3   : > { %12862 = vst [vmem:[#allocation110_spill] sm:$0xff] %v9698_v32  ;;  %v2135_v2 = vpop.f32.mrb[82].mxu1  ;;  %v9700_v12 = vpop.xlane.xlu1 %2468 }
 0x2f4   : > { %12863 = vst [vmem:[#allocation111_spill] sm:$0xff] %v9700_v12  ;;  %v2423_v51 = vmul.f32 %v2345_v55, %v2135_v2  ;;  %v9702_v1 = vpop.f32.mrb[83].mxu1  ;;  %2538 = vadd.xlane.f32.xlu0 %v2422_v5  ;;  %v2287_v2 = vcombine.high %v9368_v8, %v9368_v8  ;;  %v5034_v49 = vrot.slane %v9651_v21, %v9712_v61 }
 0x2f5   : > { %12864 = vst [vmem:[#allocation112_spill] sm:$0xff] %v9702_v1  ;;  %v9704_v50 = vpop.xlane.xlu0 %4944  ;;  %v5043_v38 = vrot.slane %v9665_v14, %v9712_v61  ;;  %v5025_v8 = vrot.slane %v9649_v29, %v9712_v61  ;;  %v5052_v35 = vrot.slane %v9673_v59, %v9712_v61 }
 0x2f6   : > { %2540 = vadd.xlane.f32.xlu1 %v2423_v51  ;;  %v9722_v51 = vsub.s32 %v9696_v20, %v9333_v17 }
 0x2f7   : > { %v9707_v39 = vpop.xlane.xlu1 %4946 }
 0x2f8   : > { %v5021_v43 = vrot.slane %v9634_v48, %v9722_v51  ;;  %v5048_v41 = vrot.slane %v9667_v57, %v9722_v51  ;;  %v5057_v31 = vrot.slane %v9675_v27, %v9722_v51  ;;  %v5075_v7 = vrot.slane %v9707_v39, %v9722_v51 }
 0x2f9   : > { %v2141_v22 = vpop.f32.mrb[84].mxu1  ;;  %v9709_v25 = vpop.xlane.xlu0 %2470 }
 0x2fa   : > { %12865 = vst [vmem:[#allocation113_spill] sm:$0xff] %v9709_v25  ;;  %v2424_v6 = vmul.f32 %v2345_v55, %v2141_v22  ;;  %v9714_v32 = vpop.f32.mrb[85].mxu1  ;;  %v5026_v15 = vsel %vm2637_vm8, %v5025_v8, %v5021_v43 }
 0x2fb   : > { %12866 = vst [vmem:[#allocation114_spill] sm:$0xff] %v9714_v32  ;;  %v2145_v5 = vpop.f32.mrb[86].mxu1  ;;  %v9718_v1 = vpop.xlane.xlu1 %2472  ;;  %v5030_v32 = vrot.slane %v9639_v19, %v9722_v51 }
 0x2fc   : > { %12867 = vst [vmem:[#allocation115_spill] sm:$0xff] %v9718_v1  ;;  %v2425_v60 = vmul.f32 %v2345_v55, %v2145_v5  ;;  %v9726_v62 = vpop.f32.mrb[87].mxu1  ;;  %2542 = vadd.xlane.f32.xlu0 %v2424_v6  ;;  %v5039_v55 = vrot.slane %v9659_v30, %v9722_v51  ;;  %v5061_v6 = vrot.slane %v9687_v3, %v9712_v61 }
 0x2fd   : > { %12868 = vst [vmem:[#allocation116_spill] sm:$0xff] %v9726_v62  ;;  %v9730_v22 = vpop.xlane.xlu0 %4948  ;;  %v2349_v62 = vrot.slane %v2287_v2, %v9395_v47  ;;  %v5035_v13 = vsel %vm2637_vm8, %v5034_v49, %v5030_v32  ;;  %v5053_v49 = vsel %vm2637_vm8, %v5052_v35, %v5048_v41  ;;  %v5066_v32 = vrot.slane %v9689_v4, %v9722_v51 }
 0x2fe   : > { %2544 = vadd.xlane.f32.xlu1 %v2425_v60  ;;  %v5070_v60 = vrot.slane %v9704_v50, %v9712_v61  ;;  %v5044_v63 = vsel %vm2637_vm8, %v5043_v38, %v5039_v55  ;;  %v5079_v0 = vrot.slane %v9730_v22, %v9712_v61  ;;  %v5162_v38 = vsel %vm938_vm1, %v5035_v13, %v5026_v15 }
 0x2ff   : > { %v9742_v5 = vpop.xlane.xlu1 %4950  ;;  %v5062_v55 = vsel %vm2637_vm8, %v5061_v6, %v5057_v31  ;;  %v5163_v43 = vsel %vm941_vm2, %v5044_v63, %v5162_v38 }
 0x300   : > { %v5071_v41 = vsel %vm2637_vm8, %v5070_v60, %v5066_v32  ;;  %v5080_v15 = vsel %vm2637_vm8, %v5079_v0, %v5075_v7  ;;  %v5084_v13 = vrot.slane %v9742_v5, %v9722_v51 }
 0x301   : > { %v2151_v2 = vpop.f32.mrb[88].mxu1  ;;  %v9757_v58 = vpop.xlane.xlu0 %2474 }
 0x302   : > { %12869 = vst [vmem:[#allocation117_spill] sm:$0xff] %v9757_v58  ;;  %v2426_v52 = vmul.f32 %v2349_v62, %v2151_v2  ;;  %v9763_v46 = vpop.f32.mrb[89].mxu1  ;;  %v5164_v2 = vsel %vm944_vm3, %v5053_v49, %v5163_v43 }
 0x303   : > { %12870 = vst [vmem:[#allocation118_spill] sm:$0xff] %v9763_v46  ;;  %v2155_v53 = vpop.f32.mrb[90].mxu1  ;;  %v9769_v45 = vpop.xlane.xlu1 %2476  ;;  %v5165_v63 = vsel %vm947_vm4, %v5062_v55, %v5164_v2 }
 0x304   : > { %12871 = vst [vmem:[#allocation119_spill] sm:$0xff] %v9769_v45  ;;  %v2427_v35 = vmul.f32 %v2349_v62, %v2155_v53  ;;  %v9773_v8 = vpop.f32.mrb[91].mxu1  ;;  %2546 = vadd.xlane.f32.xlu0 %v2426_v52  ;;  %v5166_v53 = vsel %vm950_vm5, %v5071_v41, %v5165_v63  ;;  %v2289_v41 = vcombine.high %v9374_v33, %v9374_v33 }
 0x305   : > { %12872 = vst [vmem:[#allocation120_spill] sm:$0xff] %v9773_v8  ;;  %v9776_v46 = vpop.xlane.xlu0 %4952  ;;  %v5167_v60 = vsel %vm953_vm6, %v5080_v15, %v5166_v53 }
 0x306   : > { %v5088_v31 = vrot.slane %v9776_v46, %v9712_v61  ;;  %2548 = vadd.xlane.f32.xlu1 %v2427_v35  ;;  %v2353_v63 = vrot.slane %v2289_v41, %v9395_v47 }
 0x307   : > { %v9784_v6 = vpop.xlane.xlu1 %4954 }
 0x308   : > { %12873 = vst [vmem:[#allocation121_spill] sm:$0xff] %v9784_v6  ;;  %v5089_v52 = vsel %vm2637_vm8, %v5088_v31, %v5084_v13 }
 0x309   : > { %v2161_v49 = vpop.f32.mrb[92].mxu1  ;;  %v9789_v7 = vpop.xlane.xlu0 %2478  ;;  %v5168_v0 = vsel %vm956_vm7, %v5089_v52, %v5167_v60 }
 0x30a   : > { %v2428_v32 = vmul.f32 %v2349_v62, %v2161_v49  ;;  %v9792_v38 = vpop.f32.mrb[93].mxu1  ;;  %v5179_v43 = vsel %vm5178_vm9, %v5168_v0, -inf }
 0x30b   : > { %12874 = vst [vmem:[#allocation122_spill] sm:$0xff] %v9792_v38  ;;  %v2165_v55 = vpop.f32.mrb[94].mxu1  ;;  %5180 = vmax.xlane.f32.xlu0 %v5179_v43  ;;  %v9795_v35 = vpop.xlane.xlu1 %2480 }
 0x30c   : > { %12875 = vst [vmem:[#allocation123_spill] sm:$0xff] %v9795_v35  ;;  %v2429_v2 = vmul.f32 %v2349_v62, %v2165_v55  ;;  %v9799_v13 = vpop.f32.mrb[95].mxu1 }
 0x30d   : > { %12876 = vst [vmem:[#allocation124_spill] sm:$0xff] %v9799_v13  ;;  %v9801_v15 = vpop.xlane.xlu0 %4956 }
 0x30e   : > { %2552 = vadd.xlane.f32.xlu1 %v2429_v2  ;;  %v5097_v28 = vrot.slane %v9801_v15, %v9712_v61 }
 0x30f   : > { %2550 = vadd.xlane.f32.xlu0 %v2428_v32  ;;  %v9803_v31 = vpop.xlane.xlu1 %4958 }
 0x310   : > { %12877 = vst [vmem:[#allocation125_spill] sm:$0xff] %v9803_v31  ;;  %v5102_v26 = vrot.slane %v9803_v31, %v9722_v51 }
 0x311   : > { %v2171_v53 = vpop.f32.mrb[96].mxu1  ;;  %v9806_v52 = vpop.xlane.xlu0 %2482 }
 0x312   : > { %v2430_v60 = vmul.f32 %v2353_v63, %v2171_v53  ;;  %v9808_v49 = vpop.f32.mrb[97].mxu1 }
 0x313   : > { %12878 = vst [vmem:[#allocation126_spill] sm:$0xff] %v9808_v49  ;;  %v2175_v0 = vpop.f32.mrb[98].mxu1  ;;  %v9810_v43 = vpop.xlane.xlu1 %2484 }
 0x314   : > { %v2431_v33 = vmul.f32 %v2353_v63, %v2175_v0  ;;  %2554 = vadd.xlane.f32.xlu0 %v2430_v60  ;;  %v9812_v62 = vpop.f32.mrb[99].mxu1 }
 0x315   : > { %12879 = vst [vmem:[#allocation127_spill] sm:$0xff] %v9812_v62  ;;  %v9814_v55 = vpop.xlane.xlu0 %4960 }
 0x316   : > { %12880 = vst [vmem:[#allocation128_spill] sm:$0xff] %v9814_v55  ;;  %2556 = vadd.xlane.f32.xlu1 %v2431_v33  ;;  %v5106_v24 = vrot.slane %v9814_v55, %v9712_v61 }
 0x317   : > { %v9816_v32 = vpop.xlane.xlu1 %4962 }
 0x318   : > { %12881 = vst [vmem:[#allocation129_spill] sm:$0xff] %v9816_v32  ;;  %v5111_v11 = vrot.slane %v9816_v32, %v9722_v51 }
 0x319   : > { %v2181_v2 = vpop.f32.mrb[100].mxu1  ;;  %v9818_v41 = vpop.xlane.xlu0 %2486 }
 0x31a   : > { %v2432_v13 = vmul.f32 %v2353_v63, %v2181_v2  ;;  %v9820_v38 = vpop.f32.mrb[101].mxu1 }
 0x31b   : > { %12882 = vst [vmem:[#allocation130_spill] sm:$0xff] %v9820_v38  ;;  %v2185_v53 = vpop.f32.mrb[102].mxu1  ;;  %v9822_v49 = vpop.xlane.xlu1 %2488 }
 0x31c   : > { %12883 = vst [vmem:[#allocation131_spill] sm:$0xff] %v9822_v49  ;;  %v2433_v8 = vmul.f32 %v2353_v63, %v2185_v53  ;;  %2558 = vadd.xlane.f32.xlu0 %v2432_v13  ;;  %v9824_v0 = vpop.f32.mrb[103].mxu1 }
 0x31d   : > { %12884 = vst [vmem:[#allocation132_spill] sm:$0xff] %v9824_v0  ;;  %v9826_v60 = vpop.xlane.xlu0 %4964 }
 0x31e   : > { %12885 = vst [vmem:[#allocation133_spill] sm:$0xff] %v9826_v60  ;;  %2560 = vadd.xlane.f32.xlu1 %v2433_v8  ;;  %v5115_v54 = vrot.slane %v9826_v60, %v9712_v61  ;;  %v5093_v60 = vrot.slane %v9784_v6, %v9722_v51 }
 0x31f   : > { %v9828_v62 = vpop.xlane.xlu1 %4966 }
 0x320   : > { %12886 = vst [vmem:[#allocation134_spill] sm:$0xff] %v9828_v62  ;;  %v5120_v55 = vrot.slane %v9828_v62, %v9722_v51 }
 0x321   : > { %v9830_v33 = vpop.xlane.xlu0 %2490 }
 0x323   : > { %v9832_v42 = vpop.xlane.xlu1 %2492 }
 0x325   : > { %v9834_v23 = vpop.xlane.xlu0 %4968 }
 0x326   : > { %12887 = vst [vmem:[#allocation135_spill] sm:$0xff] %v9834_v23  ;;  %v5124_v18 = vrot.slane %v9834_v23, %v9712_v61 }
 0x327   : > { %v9836_v2 = vpop.xlane.xlu1 %4970 }
 0x328   : > { %12888 = vst [vmem:[#allocation136_spill] sm:$0xff] %v9836_v2  ;;  %v5129_v23 = vrot.slane %v9836_v2, %v9722_v51 }
 0x329   : > { %v9838_v38 = vpop.xlane.xlu0 %2494 }
 0x32b   : > { %v9840_v9 = vpop.xlane.xlu1 %2496 }
 0x32c   : > { %12889 = vst [vmem:[#allocation137_spill] sm:$0xff] %v9840_v9 }
 0x32d   : > { %v9842_v13 = vpop.xlane.xlu0 %4972 }
 0x32e   : > { %12890 = vst [vmem:[#allocation138_spill] sm:$0xff] %v9842_v13  ;;  %v5133_v37 = vrot.slane %v9842_v13, %v9712_v61 }
 0x32f   : > { %v9844_v63 = vpop.xlane.xlu1 %4974 }
 0x330   : > { %12891 = vst [vmem:[#allocation139_spill] sm:$0xff] %v9844_v63  ;;  %v5138_v62 = vrot.slane %v9844_v63, %v9722_v51  ;;  %v2646_v63 = vadd.s32 4294967272, %v9696_v20 }
 0x331   : > { %v9846_v53 = vpop.xlane.xlu0 %2498 }
 0x332   : > { %12892 = vst [vmem:[#allocation140_spill] sm:$0xff] %v9846_v53 }
 0x333   : > { %v9848_v8 = vpop.xlane.xlu1 %2500 }
 0x334   : > { %12893 = vst [vmem:[#allocation141_spill] sm:$0xff] %v9848_v8 }
 0x335   : > { %v9850_v0 = vpop.xlane.xlu0 %4976 }
 0x336   : > { %12894 = vst [vmem:[#allocation142_spill] sm:$0xff] %v9850_v0  ;;  %v5142_v31 = vrot.slane %v9850_v0, %v9712_v61 }
 0x337   : > { %v9852_v16 = vpop.xlane.xlu1 %4978 }
 0x338   : > { %12895 = vst [vmem:[#allocation143_spill] sm:$0xff] %v9852_v16 }
 0x339   : > { %v9854_v34 = vpop.xlane.xlu0 %2502 }
 0x33a   : > { %12896 = vst [vmem:[#allocation144_spill] sm:$0xff] %v9854_v34  ;;  %v5116_v34 = vsel %vm2637_vm8, %v5115_v54, %v5111_v11  ;;  %v5134_v11 = vsel %vm2637_vm8, %v5133_v37, %v5129_v23  ;;  %v5147_v54 = vrot.slane %v9852_v16, %v9722_v51 }
 0x33b   : > { %v9856_v36 = vpop.xlane.xlu1 %2504 }
 0x33c   : > { %12897 = vst [vmem:[#allocation145_spill] sm:$0xff] %v9856_v36  ;;  %v5107_v36 = vsel %vm2637_vm8, %v5106_v24, %v5102_v26  ;;  %v5098_v26 = vsel %vm2637_vm8, %v5097_v28, %v5093_v60  ;;  %v5125_v24 = vsel %vm2637_vm8, %v5124_v18, %v5120_v55 }
 0x33d   : > { %v9862_v10 = vpop.xlane.xlu0 %4980  ;;  %v5169_v6 = vsel %vm938_vm1, %v5107_v36, %v5098_v26 }
 0x33e   : > { %12898 = vst [vmem:[#allocation146_spill] sm:$0xff] %v9862_v10  ;;  %v5151_v32 = vrot.slane %v9862_v10, %v9712_v61  ;;  %v5170_v2 = vsel %vm941_vm2, %v5116_v34, %v5169_v6  ;;  %v5143_v10 = vsel %vm2637_vm8, %v5142_v31, %v5138_v62 }
 0x33f   : > { %v9886_v13 = vpop.xlane.xlu1 %4982  ;;  %v5171_v0 = vsel %vm944_vm3, %v5125_v24, %v5170_v2 }
 0x340   : > { %12899 = vst [vmem:[#allocation147_spill] sm:$0xff] %v9886_v13  ;;  %v5152_v18 = vsel %vm2637_vm8, %v5151_v32, %v5147_v54  ;;  %v5156_v28 = vrot.slane %v9886_v13, %v9722_v51  ;;  %v5172_v37 = vsel %vm947_vm4, %v5134_v11, %v5171_v0  ;;  %v2639_v13 = vadd.s32 4294967280, %v9696_v20 }
 0x341   : > { %v9888_v53 = vpop.xlane.xlu0 %2506  ;;  %v5173_v34 = vsel %vm950_vm5, %v5143_v10, %v5172_v37 }
 0x342   : > { %12900 = vst [vmem:[#allocation148_spill] sm:$0xff] %v9888_v53  ;;  %v5174_v31 = vsel %vm953_vm6, %v5152_v18, %v5173_v34 }
 0x343   : > { %v9909_v23 = vpop.xlane.xlu1 %2508 }
 0x344   : > { %12902 = vst [vmem:[#allocation150_spill] sm:$0xff] %v9909_v23 }
 0x345   : > { %v9901_v53 = vpop.xlane.xlu0 %4984 }
 0x346   : > { %12901 = vst [vmem:[#allocation149_spill] sm:$0xff] %v9901_v53  ;;  %v5160_v36 = vrot.slane %v9901_v53, %v9712_v61 }
 0x348   : > { %v5161_v6 = vsel %vm2637_vm8, %v5160_v36, %v5156_v28 }
 0x349   : > { %v9914_v62 = vpop.xlane.xlu0 %2434  ;;  %v5175_v55 = vsel %vm956_vm7, %v5161_v6, %v5174_v31 }
 0x34a   : > { %12903 = vst [vmem:[#allocation151_spill] sm:$0xff] %v9914_v62  ;;  %v5182_v32 = vsel %vm5178_vm9, %v5175_v55, -inf }
 0x34b   : > { %v9918_v60 = vpop.xlane.xlu1 %2512  ;;  %5183 = vmax.xlane.f32.xlu0 %v5182_v32 }
 0x34c   : > { %12904 = vst [vmem:[#allocation152_spill] sm:$0xff] %v9918_v60 }
 0x34d   : > { %v9920_v2 = vpop.xlane.xlu0 %2510 }
 0x34e   : > { %12905 = vst [vmem:[#allocation153_spill] sm:$0xff] %v9920_v2 }
 0x34f   : > { %v9922_v0 = vpop.xlane.xlu1 %2438 }
 0x350   : > { %12906 = vst [vmem:[#allocation154_spill] sm:$0xff] %v9922_v0 }
 0x351   : > { %v9924_v26 = vpop.xlane.xlu0 %2436 }
 0x352   : > { %12907 = vst [vmem:[#allocation155_spill] sm:$0xff] %v9924_v26 }
 0x353   : > { %v9926_v10 = vpop.xlane.xlu1 %2440 }
 0x355   : > { %v9928_v24 = vpop.xlane.xlu0 %2514 }
 0x356   : > { %12908 = vst [vmem:[#allocation156_spill] sm:$0xff] %v9928_v24  ;;  %v2736_v24 = vrot.slane %v9769_v45, %v9712_v61 }
 0x357   : > { %v9930_v11 = vpop.xlane.xlu1 %2516 }
 0x358   : > { %12909 = vst [vmem:[#allocation157_spill] sm:$0xff] %v9930_v11 }
 0x359   : > { %v9932_v54 = vpop.xlane.xlu0 %2442 }
 0x35a   : > { %12910 = vst [vmem:[#allocation158_spill] sm:$0xff] %v9932_v54 }
 0x35b   : > { %v9934_v18 = vpop.xlane.xlu1 %2444 }
 0x35c   : > { %12911 = vst [vmem:[#allocation159_spill] sm:$0xff] %v9934_v18 }
 0x35d   : > { %v9936_v28 = vpop.xlane.xlu0 %2518 }
 0x35e   : > { %12912 = vst [vmem:[#allocation160_spill] sm:$0xff] %v9936_v28 }
 0x35f   : > { %v9938_v36 = vpop.xlane.xlu1 %2520 }
 0x360   : > { %12913 = vst [vmem:[#allocation161_spill] sm:$0xff] %v9938_v36  ;;  %v9959_v36 = vsub.s32 %v2639_v13, %v9333_v17  ;;  %v2713_v13 = vrot.slane %v9693_v44, %v9722_v51 }
 0x361   : > { %v9940_v37 = vpop.xlane.xlu0 %2446 }
 0x362   : > { %12914 = vst [vmem:[#allocation162_spill] sm:$0xff] %v9940_v37  ;;  %12922 = vst [vmem:[#allocation170_spill] sm:$0xff] %v9959_v36  ;;  %v2703_v20 = vrot.slane %v9678_v56, %v9959_v36  ;;  %v2660_v56 = vrot.slane %v9934_v18, %v9712_v61 }
 0x363   : > { %v9942_v34 = vpop.xlane.xlu1 %2448 }
 0x364   : > { %12915 = vst [vmem:[#allocation163_spill] sm:$0xff] %v9942_v34 }
 0x365   : > { %v9944_v6 = vpop.xlane.xlu0 %2522 }
 0x366   : > { %12916 = vst [vmem:[#allocation164_spill] sm:$0xff] %v9944_v6  ;;  %v9964_v6 = vsub.s32 %v2646_v63, %v9333_v17 }
 0x367   : > { %v9946_v31 = vpop.xlane.xlu1 %2524 }
 0x368   : > { %12917 = vst [vmem:[#allocation165_spill] sm:$0xff] %v9946_v31  ;;  %v2717_v31 = vrot.slane %v9700_v12, %v9712_v61  ;;  %v2708_v12 = vrot.slane %v9682_v40, %v9964_v6  ;;  %v2670_v18 = vrot.slane %v9942_v34, %v9964_v6 }
 0x369   : > { %v9948_v55 = vpop.xlane.xlu0 %2450 }
 0x36a   : > { %12918 = vst [vmem:[#allocation166_spill] sm:$0xff] %v9948_v55  ;;  %v2718_v44 = vsel %vm2637_vm8, %v2717_v31, %v2713_v13 }
 0x36b   : > { %v9950_v32 = vpop.xlane.xlu1 %2452 }
 0x36c   : > { %12919 = vst [vmem:[#allocation167_spill] sm:$0xff] %v9950_v32  ;;  %v2679_v40 = vrot.slane %v9950_v32, %v9712_v61 }
 0x36d   : > { %v9953_v16 = vpop.xlane.xlu0 %2526 }
 0x36e   : > { %12920 = vst [vmem:[#allocation168_spill] sm:$0xff] %v9953_v16  ;;  %v2636_v16 = vrot.slane %v9924_v26, %v9712_v61  ;;  %v2631_v26 = vrot.slane %v9914_v62, %v9722_v51  ;;  %v2656_v62 = vrot.slane %v9932_v54, %v9722_v51  ;;  %v2727_v54 = vrot.slane %v9718_v1, %v9964_v6 }
 0x36f   : > { %v9956_v53 = vpop.xlane.xlu1 %2528 }
 0x370   : > { %12921 = vst [vmem:[#allocation169_spill] sm:$0xff] %v9956_v53  ;;  %v2722_v53 = vrot.slane %v9709_v25, %v9959_v36  ;;  %v2732_v25 = vrot.slane %v9757_v58, %v9722_v51  ;;  %v2638_v45 = vsel %vm2637_vm8, %v2636_v16, %v2631_v26  ;;  %v2643_v58 = vrot.slane %v9922_v0, %v9959_v36 }
 0x371   : > { %v9961_v28 = vpop.xlane.xlu0 %2454 }
 0x372   : > { %12923 = vst [vmem:[#allocation171_spill] sm:$0xff] %v9961_v28  ;;  %v2684_v31 = vrot.slane %v9961_v28, %v9959_v36  ;;  %v2723_v13 = vsel %vm2644_vm10, %v2722_v53, %v2718_v44  ;;  %v2737_v34 = vsel %vm2637_vm8, %v2736_v24, %v2732_v25  ;;  %v2650_v28 = vrot.slane %v9926_v10, %v9964_v6 }
 0x373   : > { %v9968_v11 = vpop.xlane.xlu1 %2456  ;;  %v2661_v44 = vsel %vm2637_vm8, %v2660_v56, %v2656_v62  ;;  %v2741_v53 = vrot.slane %v9789_v7, %v9959_v36  ;;  %v2746_v62 = vrot.slane %v9795_v35, %v9964_v6  ;;  %v2784_v35 = vrot.slane %v9840_v9, %v9964_v6 }
 0x374   : > { %12924 = vst [vmem:[#allocation172_spill] sm:$0xff] %v9968_v11  ;;  %v2689_v16 = vrot.slane %v9968_v11, %v9964_v6 }
 0x375   : > { %v9978_v63 = vpop.xlane.xlu0 %2530 }
 0x376   : > { %12925 = vst [vmem:[#allocation173_spill] sm:$0xff] %v9978_v63  ;;  %v2665_v63 = vrot.slane %v9940_v37, %v9959_v36  ;;  %v2675_v37 = vrot.slane %v9948_v55, %v9722_v51  ;;  %v2645_v55 = vsel %vm2644_vm10, %v2643_v58, %v2638_v45  ;;  %v2751_v45 = vrot.slane %v9806_v52, %v9722_v51 }
 0x377   : > { %v9995_v60 = vpop.xlane.xlu1 %2532  ;;  %v2755_v58 = vrot.slane %v9810_v43, %v9712_v61 }
 0x378   : > { %12926 = vst [vmem:[#allocation174_spill] sm:$0xff] %v9995_v60  ;;  %v2666_v32 = vsel %vm2644_vm10, %v2665_v63, %v2661_v44  ;;  %v2680_v11 = vsel %vm2637_vm8, %v2679_v40, %v2675_v37  ;;  %v2652_v37 = vsel %vm2651_vm11, %v2650_v28, %v2645_v55  ;;  %v2765_v63 = vrot.slane %v9822_v49, %v9964_v6 }
 0x379   : > { %v10011_v26 = vpop.xlane.xlu0 %2458  ;;  %v2671_v1 = vsel %vm2651_vm11, %v2670_v18, %v2666_v32  ;;  %v2685_v25 = vsel %vm2644_vm10, %v2684_v31, %v2680_v11  ;;  %v2760_v11 = vrot.slane %v9818_v41, %v9959_v36  ;;  %v2774_v18 = vrot.slane %v9832_v42, %v9712_v61 }
 0x37a   : > { %v2694_v24 = vrot.slane %v10011_v26, %v9722_v51  ;;  %v2690_v40 = vsel %vm2651_vm11, %v2689_v16, %v2685_v25  ;;  %v2779_v31 = vrot.slane %v9838_v38, %v9959_v36  ;;  %v2938_v44 = vsel %vm938_vm1, %v2671_v1, %v2652_v37 }
 0x37b   : > { %v10024_v0 = vpop.xlane.xlu1 %2460  ;;  %v2770_v25 = vrot.slane %v9830_v33, %v9722_v51  ;;  %v2939_v28 = vsel %vm941_vm2, %v2690_v40, %v2938_v44  ;;  %v2756_v49 = vsel %vm2637_vm8, %v2755_v58, %v2751_v45 }
 0x37c   : > { %v2698_v56 = vrot.slane %v10024_v0, %v9712_v61  ;;  %v2761_v37 = vsel %vm2644_vm10, %v2760_v11, %v2756_v49 }
 0x37d   : > { %v2766_v40 = vsel %vm2651_vm11, %v2765_v63, %v2761_v37  ;;  %v10100_v37 = vsub.s32 5, %v9333_v17 }
 0x37e   : > { %v2699_v32 = vsel %vm2637_vm8, %v2698_v56, %v2694_v24  ;;  %v2728_v24 = vsel %vm2651_vm11, %v2727_v54, %v2723_v13  ;;  %v2742_v56 = vsel %vm2644_vm10, %v2741_v53, %v2737_v34 }
 0x37f   : > { %v2704_v16 = vsel %vm2644_vm10, %v2703_v20, %v2699_v32  ;;  %v2747_v20 = vsel %vm2651_vm11, %v2746_v62, %v2742_v56  ;;  %v2775_v32 = vsel %vm2637_vm8, %v2774_v18, %v2770_v25  ;;  %v10071_v62 = vpop.xlane.xlu0 %2534  ;;  %12932 = vst [vmem:[#allocation180_spill] sm:$0xff] %v10100_v37 }
 0x380   : > { %v2709_v55 = vsel %vm2651_vm11, %v2708_v12, %v2704_v16  ;;  %v2780_v12 = vsel %vm2644_vm10, %v2779_v31, %v2775_v32  ;;  %v10090_v16 = vsub.s32 3, %v9333_v17 }
 0x381   : > { %v2940_v1 = vsel %vm944_vm3, %v2709_v55, %v2939_v28  ;;  %v2785_v34 = vsel %vm2651_vm11, %v2784_v35, %v2780_v12  ;;  %v10084_v35 = vsub.s32 2, %v9333_v17  ;;  %v10106_v12 = vsub.s32 6, %v9333_v17 }
 0x382   : > { %v2941_v9 = vsel %vm947_vm4, %v2728_v24, %v2940_v1  ;;  %v10095_v24 = vsub.s32 4, %v9333_v17 }
 0x383   : > { %v2942_v54 = vsel %vm950_vm5, %v2747_v20, %v2941_v9  ;;  %v10074_v45 = vpop.xlane.xlu0 %2538  ;;  %v10081_v9 = vsub.s32 1, %v9333_v17  ;;  %12933 = vst [vmem:[#allocation181_spill] sm:$0xff] %v10106_v12 }
 0x384   : > { %v2943_v13 = vsel %vm953_vm6, %v2766_v40, %v2942_v54  ;;  %12927 = vst [vmem:[#allocation175_spill] sm:$0xff] %v10074_v45  ;;  %12931 = vst [vmem:[#allocation179_spill] sm:$0xff] %v10095_v24 }
 0x385   : > { %v2944_v53 = vsel %vm956_vm7, %v2785_v34, %v2943_v13  ;;  %12930 = vst [vmem:[#allocation178_spill] sm:$0xff] %v10081_v9 }
 0x386   : > { %v2955_v49 = vsel %vm2954_vm12, %v2944_v53, -inf }
 0x387   : > { %2956 = vmax.xlane.f32.xlu0 %v2955_v49 }
 0x389   : > { %v10076_v58 = vpop.xlane.xlu0 %2542 }
 0x38a   : > { %12928 = vst [vmem:[#allocation176_spill] sm:$0xff] %v10076_v58 }
 0x391   : > { %v10078_v11 = vpop.xlane.xlu0 %2546 }
 0x392   : > { %12929 = vst [vmem:[#allocation177_spill] sm:$0xff] %v10078_v11 }
 0x398   : > { %v5181_v18 = vpop.xlane.xlu0 %5180 }
 0x399   : > { %v5190_v63 = vrot.slane %v5181_v18, %v9395_v47  ;;  %v5194_v31 = vrot.slane %v5181_v18, %v10081_v9  ;;  %v5198_v25 = vrot.slane %v5181_v18, %v10084_v35  ;;  %v5202_v56 = vrot.slane %v5181_v18, %v10090_v16 }
 0x39a   : > { %v5210_v54 = vrot.slane %v5181_v18, %v10100_v37 }
 0x39b   : > { %v5268_v44 = vsub.f32 %v9649_v29, %v5190_v63  ;;  %v5270_v28 = vsub.f32 %v9651_v21, %v5194_v31  ;;  %v5272_v1 = vsub.f32 %v9665_v14, %v5198_v25  ;;  %v5206_v29 = vrot.slane %v5181_v18, %v10095_v24 }
 0x39c   : > { %v5274_v32 = vsub.f32 %v9673_v59, %v5202_v56  ;;  %v5267_v21 = vsub.f32 %v9634_v48, %v5190_v63  ;;  %v5269_v49 = vsub.f32 %v9639_v19, %v5194_v31  ;;  %v10114_v59 = vsub.s32 7, %v9333_v17 }
 0x39d   : > { %v5301_v55 = vmul.f32 1.442695, %v5268_v44  ;;  %v5305_v20 = vmul.f32 1.442695, %v5270_v28  ;;  %v5309_v40 = vmul.f32 1.442695, %v5272_v1  ;;  %v5276_v14 = vsub.f32 %v9687_v3, %v5206_v29 }
 0x39e   : > { %v5313_v34 = vmul.f32 1.442695, %v5274_v32  ;;  %v5299_v53 = vmul.f32 1.442695, %v5267_v21  ;;  %12935 = vst [vmem:[#allocation183_spill] sm:$0xff] %v10114_v59  ;;  %v5214_v48 = vrot.slane %v5181_v18, %v10106_v12  ;;  %v5278_v63 = vsub.f32 %v9704_v50, %v5210_v54 }
 0x39f   : > { %7964 = vpow2.f32 %v5301_v55  ;;  %v5317_v44 = vmul.f32 1.442695, %v5276_v14  ;;  %v5271_v3 = vsub.f32 %v9659_v30, %v5198_v25  ;;  %v5303_v55 = vmul.f32 1.442695, %v5269_v49 }
 0x3a0   : > { %7966 = vpow2.f32 %v5305_v20  ;;  %v5218_v19 = vrot.slane %v5181_v18, %v10114_v59  ;;  %v5280_v17 = vsub.f32 %v9730_v22, %v5214_v48  ;;  %v5321_v31 = vmul.f32 1.442695, %v5278_v63 }
 0x3a1   : > { %7968 = vpow2.f32 %v5309_v40  ;;  %v5273_v50 = vsub.f32 %v9667_v57, %v5202_v56  ;;  %v5307_v20 = vmul.f32 1.442695, %v5271_v3  ;;  %v5275_v18 = vsub.f32 %v9675_v27, %v5206_v29 }
 0x3a2   : > { %7970 = vpow2.f32 %v5313_v34  ;;  %v5282_v30 = vsub.f32 %v9776_v46, %v5218_v19  ;;  %v5325_v25 = vmul.f32 1.442695, %v5280_v17  ;;  %v5277_v46 = vsub.f32 %v9689_v4, %v5210_v54 }
 0x3a3   : > { %7972 = vpow2.f32 %v5299_v53  ;;  %v5311_v22 = vmul.f32 1.442695, %v5273_v50  ;;  %v5315_v21 = vmul.f32 1.442695, %v5275_v18  ;;  %v5279_v29 = vsub.f32 %v9707_v39, %v5214_v48 }
 0x3a4   : > { %7974 = vpow2.f32 %v5317_v44  ;;  %v5329_v57 = vmul.f32 1.442695, %v5282_v30  ;;  %v5319_v34 = vmul.f32 1.442695, %v5277_v46  ;;  %v5281_v54 = vsub.f32 %v9742_v5, %v5218_v19  ;;  %v10164_v5 = vpop.xlane.xlu0 %2550 }
 0x3a5   : > { %7976 = vpow2.f32 %v5303_v55  ;;  %v5323_v49 = vmul.f32 1.442695, %v5279_v29  ;;  %12948 = vst [vmem:[#allocation196_spill] sm:$0xff] %v10164_v5  ;;  %v10169_v55 = vpop.xlane.xlu1 %2536  ;;  %v2812_v46 = vrot.slane %v9909_v23, %v9712_v61  ;;  %v12955_v29 = vld [vmem:[#allocation140_spill] sm:$0xff] }
 0x3a6   : > { %7978 = vpow2.f32 %v5321_v31  ;;  %v5327_v48 = vmul.f32 1.442695, %v5281_v54  ;;  %12950 = vst [vmem:[#allocation198_spill] sm:$0xff] %v10169_v55  ;;  %v2817_v54 = vrot.slane %v9920_v2, %v9959_v36  ;;  %v12965_v2 = vld [vmem:[#allocation160_spill] sm:$0xff] }
 0x3a7   : > { %7980 = vpow2.f32 %v5307_v20 }
 0x3a8   : > { %7982 = vpow2.f32 %v5325_v25  ;;  %v10173_v17 = vpop.xlane.xlu0 %2554 }
 0x3a9   : > { %v10110_v13 = vpop.eup %7964  ;;  %7984 = vpow2.f32 %v5311_v22  ;;  %12952 = vst [vmem:[#allocation200_spill] sm:$0xff] %v10173_v17  ;;  %v10180_v20 = vpop.xlane.xlu1 %2540  ;;  %v2793_v22 = vrot.slane %v9848_v8, %v9712_v61 }
 0x3aa   : > { %12934 = vst [vmem:[#allocation182_spill] sm:$0xff] %v10110_v13  ;;  %5399 = vperm.xlu0 %7835, %v10110_v13   ;;  %v10119_v28 = vpop.eup %7966  ;;  %7986 = vpow2.f32 %v5329_v57  ;;  %v12964_v13 = vld [vmem:[#allocation165_spill] sm:$0xff] }
 0x3ab   : > { %12936 = vst [vmem:[#allocation184_spill] sm:$0xff] %v10119_v28  ;;  %v10125_v1 = vpop.eup %7968  ;;  %7988 = vpow2.f32 %v5315_v21 }
 0x3ac   : > { %12937 = vst [vmem:[#allocation185_spill] sm:$0xff] %v10125_v1  ;;  %v10130_v32 = vpop.eup %7970  ;;  %7990 = vpow2.f32 %v5319_v34  ;;  %v10178_v50 = vpop.xlane.xlu0 %2558  ;;  %v2789_v34 = vrot.slane %v12955_v29, %v9722_v51 }
 0x3ad   : > { %12938 = vst [vmem:[#allocation186_spill] sm:$0xff] %v10130_v32  ;;  %v10134_v40 = vpop.eup %7972  ;;  %7992 = vpow2.f32 %v5323_v49  ;;  %12954 = vst [vmem:[#allocation202_spill] sm:$0xff] %v10178_v50  ;;  %v10185_v25 = vpop.xlane.xlu1 %2544  ;;  %v12956_v49 = vld [vmem:[#allocation148_spill] sm:$0xff] }
 0x3ae   : > { %5405 = vperm.xlu0 %7835, %v10119_v28   ;;  %12939 = vst [vmem:[#allocation187_spill] sm:$0xff] %v10134_v40  ;;  %5396 = vperm.xlu1 %7834, %v10134_v40   ;;  %v10137_v56 = vpop.eup %7974  ;;  %7994 = vpow2.f32 %v5327_v48  ;;  %v2808_v48 = vrot.slane %v12956_v49, %v9722_v51  ;;  %v12963_v28 = vld [vmem:[#allocation157_spill] sm:$0xff] }
 0x3af   : > { %12940 = vst [vmem:[#allocation188_spill] sm:$0xff] %v10137_v56  ;;  %v10141_v14 = vpop.eup %7976  ;;  %v2831_v40 = vrot.slane %v12963_v28, %v9712_v61 }
 0x3b0   : > { %12941 = vst [vmem:[#allocation189_spill] sm:$0xff] %v10141_v14  ;;  %v10144_v27 = vpop.eup %7978 }
 0x3b1   : > { %12942 = vst [vmem:[#allocation190_spill] sm:$0xff] %v10144_v27  ;;  %v10148_v53 = vpop.eup %7980 }
 0x3b2   : > { %5411 = vperm.xlu0 %7835, %v10125_v1   ;;  %5402 = vperm.xlu1 %7834, %v10141_v14   ;;  %12943 = vst [vmem:[#allocation191_spill] sm:$0xff] %v10148_v53  ;;  %v10151_v4 = vpop.eup %7982 }
 0x3b3   : > { %12944 = vst [vmem:[#allocation192_spill] sm:$0xff] %v10151_v4  ;;  %v10155_v63 = vpop.eup %7984 }
 0x3b4   : > { %12945 = vst [vmem:[#allocation193_spill] sm:$0xff] %v10155_v63  ;;  %v10158_v39 = vpop.eup %7986 }
 0x3b5   : > { %12946 = vst [vmem:[#allocation194_spill] sm:$0xff] %v10158_v39  ;;  %v10161_v44 = vpop.eup %7988 }
 0x3b6   : > { %5417 = vperm.xlu0 %7835, %v10130_v32   ;;  %5408 = vperm.xlu1 %7834, %v10148_v53   ;;  %12947 = vst [vmem:[#allocation195_spill] sm:$0xff] %v10161_v44  ;;  %v10166_v3 = vpop.eup %7990  ;;  %v12961_v32 = vld [vmem:[#allocation152_spill] sm:$0xff] }
 0x3b7   : > { %12949 = vst [vmem:[#allocation197_spill] sm:$0xff] %v10166_v3  ;;  %v10171_v19 = vpop.eup %7992  ;;  %v2822_v53 = vrot.slane %v12961_v32, %v9964_v6  ;;  %v12967_v32 = vld [vmem:[#allocation168_spill] sm:$0xff] }
 0x3b8   : > { %12951 = vst [vmem:[#allocation199_spill] sm:$0xff] %v10171_v19  ;;  %v10176_v31 = vpop.eup %7994 }
 0x3b9   : > { %12953 = vst [vmem:[#allocation201_spill] sm:$0xff] %v10176_v31 }
 0x3ba   : > { %5423 = vperm.xlu0 %7835, %v10137_v56   ;;  %5414 = vperm.xlu1 %7834, %v10155_v63   ;;  %v2813_v63 = vsel %vm2637_vm8, %v2812_v46, %v2808_v48  ;;  %v12966_v46 = vld [vmem:[#allocation164_spill] sm:$0xff] }
 0x3bb   : > { %v2846_v48 = vrot.slane %v12966_v46, %v9722_v51  ;;  %v12969_v46 = vld [vmem:[#allocation173_spill] sm:$0xff] }
 0x3bc   : > { %v2865_v49 = vrot.slane %v12969_v46, %v9722_v51 }
 0x3be   : > { %5429 = vperm.xlu0 %7835, %v10144_v27   ;;  %5420 = vperm.xlu1 %7834, %v10161_v44   ;;  %v12958_v27 = vld [vmem:[#allocation144_spill] sm:$0xff] }
 0x3c2   : > { %5435 = vperm.xlu0 %7835, %v10151_v4   ;;  %5426 = vperm.xlu1 %7834, %v10166_v3   ;;  %v2794_v4 = vsel %vm2637_vm8, %v2793_v22, %v2789_v34  ;;  %v12960_v3 = vld [vmem:[#allocation145_spill] sm:$0xff]  ;;  %v2818_v22 = vsel %vm2644_vm10, %v2817_v54, %v2813_v63  ;;  %v12962_v34 = vld [vmem:[#allocation156_spill] sm:$0xff]  ;;  %v2869_v63 = vrot.slane %v9995_v60, %v9712_v61 }
 0x3c3   : > { %v2803_v44 = vrot.slane %v12960_v3, %v9964_v6  ;;  %v2827_v14 = vrot.slane %v12962_v34, %v9722_v51  ;;  %v2836_v3 = vrot.slane %v12965_v2, %v9959_v36  ;;  %v2823_v8 = vsel %vm2651_vm11, %v2822_v53, %v2818_v22  ;;  %v12972_v53 = vld [vmem:[#allocation135_spill] sm:$0xff] }
 0x3c6   : > { %5441 = vperm.xlu0 %7835, %v10158_v39   ;;  %5432 = vperm.xlu1 %7834, %v10171_v19   ;;  %v10207_v39 = vpop.xlane.xlu1 %2548 }
 0x3c7   : > { %12957 = vst [vmem:[#allocation203_spill] sm:$0xff] %v10207_v39 }
 0x3ca   : > { %5438 = vperm.xlu1 %7834, %v10176_v31   ;;  %v2798_v31 = vrot.slane %v12958_v27, %v9959_v36  ;;  %v10238_v54 = vpop.xlane.xlu1 %2552  ;;  %v2832_v27 = vsel %vm2637_vm8, %v2831_v40, %v2827_v14 }
 0x3cc   : > { %v2799_v34 = vsel %vm2644_vm10, %v2798_v31, %v2794_v4  ;;  %v2870_v31 = vsel %vm2637_vm8, %v2869_v63, %v2865_v49  ;;  %v2884_v49 = vrot.slane %v10074_v45, %v9722_v51  ;;  %v2931_v63 = vrot.slane %v10178_v50, %v9959_v36 }
 0x3cd   : > { %v2804_v60 = vsel %vm2651_vm11, %v2803_v44, %v2799_v34  ;;  %v2888_v34 = vrot.slane %v10180_v20, %v9712_v61 }
 0x3ce   : > { %v10260_v46 = vpop.xlane.xlu1 %2556  ;;  %v2945_v45 = vsel %vm938_vm1, %v2823_v8, %v2804_v60 }
 0x3cf   : > { %v2889_v50 = vsel %vm2637_vm8, %v2888_v34, %v2884_v49 }
 0x3d8   : > { %v10183_v30 = vpop.xlane.xlu0 %5183 }
 0x3d9   : > { %v10189_v18 = vrot.slane %v10183_v30, %v9395_v47  ;;  %v10195_v57 = vrot.slane %v10183_v30, %v10081_v9  ;;  %v10214_v56 = vrot.slane %v10183_v30, %v10084_v35  ;;  %v10242_v28 = vrot.slane %v10183_v30, %v10090_v16 }
 0x3da   : > { %v10264_v44 = vrot.slane %v10183_v30, %v10095_v24 }
 0x3db   : > { %v5284_v21 = vsub.f32 %v9801_v15, %v10189_v18  ;;  %v12959_v15 = vld [vmem:[#allocation128_spill] sm:$0xff]  ;;  %v5290_v40 = vsub.f32 %v12972_v53, %v10242_v28  ;;  %v10295_v53 = vrot.slane %v10183_v30, %v10100_v37 }
 0x3dc   : > { %v5286_v19 = vsub.f32 %v12959_v15, %v10195_v57  ;;  %v2850_v15 = vrot.slane %v12964_v13, %v9712_v61  ;;  %v12968_v13 = vld [vmem:[#allocation133_spill] sm:$0xff]  ;;  %12971 = vst [vmem:[#allocation128_spill] sm:$0xff] %v10260_v46 }
 0x3dd   : > { %v5333_v1 = vmul.f32 1.442695, %v5284_v21  ;;  %v2855_v21 = vrot.slane %v12967_v32, %v9959_v36  ;;  %v5288_v23 = vsub.f32 %v12968_v13, %v10214_v56  ;;  %v2874_v32 = vrot.slane %v10071_v62, %v9959_v36 }
 0x3de   : > { %v5337_v2 = vmul.f32 1.442695, %v5286_v19  ;;  %v2851_v29 = vsel %vm2637_vm8, %v2850_v15, %v2846_v48  ;;  %v2837_v13 = vsel %vm2644_vm10, %v2836_v3, %v2832_v27  ;;  %v12973_v27 = vld [vmem:[#allocation169_spill] sm:$0xff]  ;;  %v2893_v15 = vrot.slane %v10076_v58, %v9959_v36 }
 0x3df   : > { %7996 = vpow2.f32 %v5333_v1  ;;  %v12970_v1 = vld [vmem:[#allocation161_spill] sm:$0xff]  ;;  %v2856_v4 = vsel %vm2644_vm10, %v2855_v21, %v2851_v29  ;;  %v5341_v14 = vmul.f32 1.442695, %v5288_v23  ;;  %v2860_v3 = vrot.slane %v12973_v27, %v9964_v6 }
 0x3e0   : > { %v2841_v19 = vrot.slane %v12970_v1, %v9964_v6  ;;  %7998 = vpow2.f32 %v5337_v2  ;;  %v2875_v22 = vsel %vm2644_vm10, %v2874_v32, %v2870_v31  ;;  %v2879_v29 = vrot.slane %v10169_v55, %v9964_v6  ;;  %v10291_v31 = vpop.xlane.xlu1 %2560  ;;  %v12974_v55 = vld [vmem:[#allocation138_spill] sm:$0xff] }
 0x3e1   : > { %v2907_v23 = vrot.slane %v10207_v39, %v9712_v61  ;;  %v2926_v2 = vrot.slane %v10260_v46, %v9712_v61  ;;  %v2903_v32 = vrot.slane %v10078_v11, %v9722_v51  ;;  %v2912_v48 = vrot.slane %v10164_v5, %v9959_v36 }
 0x3e2   : > { %v2922_v21 = vrot.slane %v10173_v17, %v9722_v51  ;;  %v5292_v46 = vsub.f32 %v12974_v55, %v10264_v44  ;;  %8000 = vpow2.f32 %v5341_v14  ;;  %v5345_v11 = vmul.f32 1.442695, %v5290_v40 }
 0x3e3   : > { %v2842_v5 = vsel %vm2651_vm11, %v2841_v19, %v2837_v13  ;;  %v2861_v17 = vsel %vm2651_vm11, %v2860_v3, %v2856_v4  ;;  %v2880_v27 = vsel %vm2651_vm11, %v2879_v29, %v2875_v22  ;;  %v2898_v39 = vrot.slane %v10185_v25, %v9964_v6  ;;  %v12975_v4 = vld [vmem:[#allocation142_spill] sm:$0xff] }
 0x3e4   : > { %v2908_v58 = vsel %vm2637_vm8, %v2907_v23, %v2903_v32  ;;  %v2927_v55 = vsel %vm2637_vm8, %v2926_v2, %v2922_v21  ;;  %v2894_v40 = vsel %vm2644_vm10, %v2893_v15, %v2889_v50  ;;  %v2936_v60 = vrot.slane %v10291_v31, %v9964_v6 }
 0x3e5   : > { %v2913_v8 = vsel %vm2644_vm10, %v2912_v48, %v2908_v58  ;;  %v2932_v13 = vsel %vm2644_vm10, %v2931_v63, %v2927_v55  ;;  %v10318_v19 = vrot.slane %v10183_v30, %v10106_v12  ;;  %v5294_v14 = vsub.f32 %v12975_v4, %v10295_v53 }
 0x3e6   : > { %8002 = vpow2.f32 %v5345_v11  ;;  %v5349_v3 = vmul.f32 1.442695, %v5292_v46  ;;  %v2946_v50 = vsel %vm941_vm2, %v2842_v5, %v2945_v45  ;;  %v2917_v58 = vrot.slane %v10238_v54, %v9964_v6  ;;  %v12976_v11 = vld [vmem:[#allocation146_spill] sm:$0xff] }
 0x3e7   : > { %v2947_v29 = vsel %vm944_vm3, %v2861_v17, %v2946_v50  ;;  %v2899_v49 = vsel %vm2651_vm11, %v2898_v39, %v2894_v40  ;;  %v2937_v15 = vsel %vm2651_vm11, %v2936_v60, %v2932_v13  ;;  %v5250_v45 = vrot.slane %v10183_v30, %v10114_v59  ;;  %v12978_v30 = vld [vmem:[#allocation121_spill] sm:$0xff] }
 0x3e8   : > { %v2918_v34 = vsel %vm2651_vm11, %v2917_v58, %v2913_v8  ;;  %v2948_v23 = vsel %vm947_vm4, %v2880_v27, %v2947_v29  ;;  %v5296_v5 = vsub.f32 %v12976_v11, %v10318_v19  ;;  %8004 = vpow2.f32 %v5349_v3  ;;  %v12977_v27 = vld [vmem:[#allocation149_spill] sm:$0xff]  ;;  %v12984_v29 = vld [vmem:[#allocation134_spill] sm:$0xff] }
 0x3e9   : > { %v10303_v36 = vpop.eup %7996  ;;  %v5353_v46 = vmul.f32 1.442695, %v5294_v14  ;;  %v2949_v17 = vsel %vm950_vm5, %v2899_v49, %v2948_v23  ;;  %v5298_v48 = vsub.f32 %v12977_v27, %v5250_v45  ;;  %v5283_v63 = vsub.f32 %v12978_v30, %v10189_v18  ;;  %v12980_v60 = vld [vmem:[#allocation125_spill] sm:$0xff] }
 0x3ea   : > { %5447 = vperm.xlu0 %7835, %v10303_v36   ;;  %v10325_v22 = vpop.eup %7998  ;;  %v2950_v39 = vsel %vm953_vm6, %v2918_v34, %v2949_v17  ;;  %v5357_v21 = vmul.f32 1.442695, %v5296_v5  ;;  %v5285_v13 = vsub.f32 %v12980_v60, %v10195_v57  ;;  %v12982_v18 = vld [vmem:[#allocation129_spill] sm:$0xff]  ;;  %v5289_v49 = vsub.f32 %v12984_v29, %v10242_v28  ;;  %v12988_v28 = vld [vmem:[#allocation139_spill] sm:$0xff]  ;;  %v12997_v29 = vld [vmem:[#allocation154_spill] sm:$0xff] }
 0x3eb   : > { %v2951_v32 = vsel %vm956_vm7, %v2937_v15, %v2950_v39  ;;  %8006 = vpow2.f32 %v5353_v46  ;;  %v5361_v8 = vmul.f32 1.442695, %v5298_v48  ;;  %v5331_v4 = vmul.f32 1.442695, %v5283_v63  ;;  %v12986_v15 = vld [vmem:[#allocation136_spill] sm:$0xff] }
 0x3ec   : > { %v10338_v2 = vpop.eup %8000  ;;  %v2958_v40 = vsel %vm2954_vm12, %v2951_v32, -inf  ;;  %8008 = vpow2.f32 %v5357_v21  ;;  %v5287_v3 = vsub.f32 %v12982_v18, %v10214_v56  ;;  %v5335_v50 = vmul.f32 1.442695, %v5285_v13  ;;  %v12991_v21 = vld [vmem:[#allocation147_spill] sm:$0xff] }
 0x3ed   : > { %8010 = vpow2.f32 %v5361_v8  ;;  %v5291_v23 = vsub.f32 %v12986_v15, %v10264_v44  ;;  %v5343_v56 = vmul.f32 1.442695, %v5289_v49  ;;  %v5293_v46 = vsub.f32 %v12988_v28, %v10295_v53  ;;  %v12989_v44 = vld [vmem:[#allocation143_spill] sm:$0xff] }
 0x3ee   : > { %5453 = vperm.xlu0 %7835, %v10325_v22   ;;  %2959 = vmax.xlane.f32.xlu1 %v2958_v40  ;;  %8012 = vpow2.f32 %v5331_v4  ;;  %v5339_v57 = vmul.f32 1.442695, %v5287_v3  ;;  %v5295_v32 = vsub.f32 %v12989_v44, %v10318_v19  ;;  %v5297_v30 = vsub.f32 %v12991_v21, %v5250_v45  ;;  %v12994_v13 = vld [vmem:[#allocation151_spill] sm:$0xff]  ;;  %v13001_v21 = vld [vmem:[#allocation158_spill] sm:$0xff] }
 0x3ef   : > { %8014 = vpow2.f32 %v5335_v50  ;;  %v5347_v17 = vmul.f32 1.442695, %v5291_v23  ;;  %v5351_v27 = vmul.f32 1.442695, %v5293_v46  ;;  %v12995_v4 = vld [vmem:[#allocation155_spill] sm:$0xff] }
 0x3f0   : > { %v10346_v55 = vpop.eup %8002  ;;  %8016 = vpow2.f32 %v5339_v57  ;;  %v5355_v63 = vmul.f32 1.442695, %v5295_v32  ;;  %v5359_v8 = vmul.f32 1.442695, %v5297_v30 }
 0x3f1   : > { %12979 = vst [vmem:[#allocation133_spill] sm:$0xff] %v10346_v55  ;;  %8018 = vpow2.f32 %v5343_v56 }
 0x3f2   : > { %5459 = vperm.xlu0 %7835, %v10338_v2   ;;  %v10352_v14 = vpop.eup %8004  ;;  %8020 = vpow2.f32 %v5347_v17  ;;  %v12999_v17 = vld [vmem:[#allocation167_spill] sm:$0xff] }
 0x3f3   : > { %12981 = vst [vmem:[#allocation161_spill] sm:$0xff] %v10352_v14  ;;  %8022 = vpow2.f32 %v5351_v27 }
 0x3f4   : > { %8024 = vpow2.f32 %v5355_v63 }
 0x3f5   : > { %v10357_v58 = vpop.eup %8006  ;;  %8026 = vpow2.f32 %v5359_v8 }
 0x3f6   : > { %5465 = vperm.xlu0 %7835, %v10346_v55   ;;  %12983 = vst [vmem:[#allocation135_spill] sm:$0xff] %v10357_v58  ;;  %v10362_v34 = vpop.eup %8008 }
 0x3f7   : > { %12985 = vst [vmem:[#allocation138_spill] sm:$0xff] %v10362_v34  ;;  %v10367_v11 = vpop.eup %8010 }
 0x3f8   : > { %12987 = vst [vmem:[#allocation142_spill] sm:$0xff] %v10367_v11  ;;  %v10369_v5 = vpop.eup %8012 }
 0x3f9   : > { %v10375_v39 = vpop.eup %8014 }
 0x3fa   : > { %5471 = vperm.xlu0 %7835, %v10352_v14   ;;  %v10380_v48 = vpop.eup %8016 }
 0x3fb   : > { %12990 = vst [vmem:[#allocation146_spill] sm:$0xff] %v10380_v48  ;;  %v10386_v40 = vpop.eup %8018 }
 0x3fc   : > { %12992 = vst [vmem:[#allocation149_spill] sm:$0xff] %v10386_v40  ;;  %v10391_v60 = vpop.eup %8020 }
 0x3fd   : > { %12993 = vst [vmem:[#allocation121_spill] sm:$0xff] %v10391_v60  ;;  %v10396_v3 = vpop.eup %8022 }
 0x3fe   : > { %5477 = vperm.xlu0 %7835, %v10357_v58   ;;  %12996 = vst [vmem:[#allocation125_spill] sm:$0xff] %v10396_v3  ;;  %v10404_v23 = vpop.eup %8024  ;;  %v13026_v58 = vld [vmem:[#allocation107_spill] sm:$0xff] }
 0x3ff   : > { %5444 = vperm.xlu1 %7834, %v10369_v5   ;;  %12998 = vst [vmem:[#allocation129_spill] sm:$0xff] %v10404_v23  ;;  %v10416_v27 = vpop.eup %8026 }
 0x400   : > { %13000 = vst [vmem:[#allocation134_spill] sm:$0xff] %v10416_v27 }
 0x402   : > { %5483 = vperm.xlu0 %7835, %v10362_v34  }
 0x403   : > { %5450 = vperm.xlu1 %7834, %v10375_v39  }
 0x406   : > { %5489 = vperm.xlu0 %7835, %v10367_v11   ;;  %v13020_v11 = vld [vmem:[#allocation172_spill] sm:$0xff] }
 0x407   : > { %5456 = vperm.xlu1 %7834, %v10380_v48  }
 0x40b   : > { %5462 = vperm.xlu1 %7834, %v10386_v40  }
 0x40f   : > { %5468 = vperm.xlu1 %7834, %v10391_v60  }
 0x413   : > { %5474 = vperm.xlu1 %7834, %v10396_v3  }
 0x414   : > { %v10384_v53 = vpop.xlane.xlu0 %2956 }
 0x415   : > { %v2966_v19 = vrot.slane %v10384_v53, %v9395_v47  ;;  %v10401_v50 = vrot.slane %v10384_v53, %v10084_v35  ;;  %v2970_v56 = vrot.slane %v10384_v53, %v10081_v9  ;;  %v10412_v46 = vrot.slane %v10384_v53, %v10090_v16 }
 0x417   : > { %v3043_v45 = vsub.f32 %v12994_v13, %v2966_v19  ;;  %v3044_v18 = vsub.f32 %v12995_v4, %v2966_v19  ;;  %v3045_v49 = vsub.f32 %v12997_v29, %v2966_v19  ;;  %v3046_v28 = vsub.f32 %v9926_v10, %v2966_v19  ;;  %5480 = vperm.xlu1 %7834, %v10404_v23   ;;  %v13002_v19 = vld [vmem:[#allocation159_spill] sm:$0xff] }
 0x418   : > { %v3052_v44 = vsub.f32 %v12999_v17, %v10401_v50  ;;  %v3047_v30 = vsub.f32 %v13001_v21, %v2970_v56  ;;  %v3055_v10 = vsub.f32 %v10011_v26, %v10412_v46  ;;  %v3048_v13 = vsub.f32 %v13002_v19, %v2970_v56  ;;  %v13005_v26 = vld [vmem:[#allocation162_spill] sm:$0xff]  ;;  %v13008_v21 = vld [vmem:[#allocation163_spill] sm:$0xff] }
 0x419   : > { %v3107_v57 = vmul.f32 1.442695, %v3043_v45  ;;  %v3109_v15 = vmul.f32 1.442695, %v3044_v18  ;;  %v3111_v32 = vmul.f32 1.442695, %v3045_v49  ;;  %v3056_v4 = vsub.f32 %v10024_v0, %v10412_v46 }
 0x41a   : > { %v3113_v63 = vmul.f32 1.442695, %v3046_v28  ;;  %v3125_v8 = vmul.f32 1.442695, %v3052_v44  ;;  %v3115_v45 = vmul.f32 1.442695, %v3047_v30  ;;  %v10434_v28 = vrot.slane %v10384_v53, %v10095_v24 }
 0x41b   : > { %8028 = vpow2.f32 %v3107_v57  ;;  %5486 = vperm.xlu1 %7834, %v10416_v27   ;;  %v3131_v18 = vmul.f32 1.442695, %v3055_v10  ;;  %v3049_v57 = vsub.f32 %v13005_v26, %v2970_v56  ;;  %v13006_v0 = vld [vmem:[#allocation105_spill] sm:$0xff]  ;;  %v3133_v44 = vmul.f32 1.442695, %v3056_v4  ;;  %v13009_v10 = vld [vmem:[#allocation111_spill] sm:$0xff] }
 0x41c   : > { %8030 = vpow2.f32 %v3109_v15  ;;  %v3117_v15 = vmul.f32 1.442695, %v3048_v13  ;;  %v3057_v17 = vsub.f32 %v13006_v0, %v10412_v46  ;;  %v3050_v30 = vsub.f32 %v13008_v21, %v2970_v56  ;;  %v13016_v21 = vld [vmem:[#allocation171_spill] sm:$0xff] }
 0x41d   : > { %8032 = vpow2.f32 %v3111_v32  ;;  %v10454_v56 = vrot.slane %v10384_v53, %v10100_v37  ;;  %v3054_v34 = vsub.f32 %v13020_v11, %v10401_v50  ;;  %v13023_v11 = vld [vmem:[#allocation109_spill] sm:$0xff]  ;;  %v3058_v27 = vsub.f32 %v13026_v58, %v10412_v46  ;;  %v13032_v23 = vld [vmem:[#allocation115_spill] sm:$0xff] }
 0x41e   : > { %8034 = vpow2.f32 %v3113_v63  ;;  %v3119_v63 = vmul.f32 1.442695, %v3049_v57  ;;  %v3135_v19 = vmul.f32 1.442695, %v3057_v17  ;;  %v3121_v26 = vmul.f32 1.442695, %v3050_v30 }
 0x41f   : > { %8036 = vpow2.f32 %v3125_v8  ;;  %v3060_v8 = vsub.f32 %v13009_v10, %v10434_v28  ;;  %v13013_v57 = vld [vmem:[#allocation113_spill] sm:$0xff]  ;;  %v3053_v30 = vsub.f32 %v13016_v21, %v10401_v50  ;;  %v13017_v10 = vld [vmem:[#allocation119_spill] sm:$0xff]  ;;  %v3137_v14 = vmul.f32 1.442695, %v3058_v27 }
 0x420   : > { %8038 = vpow2.f32 %v3115_v45  ;;  %v3062_v3 = vsub.f32 %v13032_v23, %v10434_v28 }
 0x421   : > { %8040 = vpow2.f32 %v3131_v18  ;;  %v13012_v18 = vld [vmem:[#allocation166_spill] sm:$0xff]  ;;  %v3141_v0 = vmul.f32 1.442695, %v3060_v8  ;;  %v3127_v21 = vmul.f32 1.442695, %v3053_v30 }
 0x422   : > { %8042 = vpow2.f32 %v3117_v15  ;;  %v3051_v4 = vsub.f32 %v13012_v18, %v10401_v50  ;;  %v3061_v15 = vsub.f32 %v13013_v57, %v10434_v28  ;;  %v3064_v18 = vsub.f32 %v13017_v10, %v10454_v56 }
 0x423   : > { %8044 = vpow2.f32 %v3133_v44  ;;  %v3059_v50 = vsub.f32 %v13023_v11, %v10434_v28  ;;  %v3129_v30 = vmul.f32 1.442695, %v3054_v34  ;;  %v10502_v34 = vrot.slane %v10384_v53, %v10114_v59 }
 0x424   : > { %8046 = vpow2.f32 %v3119_v63  ;;  %v3123_v63 = vmul.f32 1.442695, %v3051_v4  ;;  %v3143_v57 = vmul.f32 1.442695, %v3061_v15  ;;  %v10478_v4 = vrot.slane %v10384_v53, %v10106_v12 }
 0x425   : > { %v10425_v29 = vpop.eup %8028  ;;  %8048 = vpow2.f32 %v3135_v19  ;;  %v3149_v15 = vmul.f32 1.442695, %v3064_v18  ;;  %v3139_v11 = vmul.f32 1.442695, %v3059_v50  ;;  %v13029_v50 = vld [vmem:[#allocation117_spill] sm:$0xff]  ;;  %v3073_v27 = vsub.f32 %v9838_v38, %v10502_v34 }
 0x426   : > { %13003 = vst [vmem:[#allocation136_spill] sm:$0xff] %v10425_v29  ;;  %v10427_v49 = vpop.eup %8030  ;;  %3300 = vperm.xlu0 %7835, %v10425_v29   ;;  %8050 = vpow2.f32 %v3121_v26  ;;  %v3065_v26 = vsub.f32 %v9789_v7, %v10454_v56  ;;  %v3145_v23 = vmul.f32 1.442695, %v3062_v3  ;;  %v13037_v3 = vld [vmem:[#allocation123_spill] sm:$0xff] }
 0x427   : > { %13004 = vst [vmem:[#allocation139_spill] sm:$0xff] %v10427_v49  ;;  %3303 = vperm.xlu1 %7834, %v10427_v49   ;;  %v10438_v32 = vpop.eup %8032  ;;  %8052 = vpow2.f32 %v3141_v0  ;;  %v3167_v38 = vmul.f32 1.442695, %v3073_v27 }
 0x428   : > { %13007 = vst [vmem:[#allocation143_spill] sm:$0xff] %v10438_v32  ;;  %v10444_v13 = vpop.eup %8034  ;;  %8054 = vpow2.f32 %v3123_v63  ;;  %v3068_v63 = vsub.f32 %v9810_v43, %v10478_v4  ;;  %v3151_v7 = vmul.f32 1.442695, %v3065_v26  ;;  %v3069_v43 = vsub.f32 %v9818_v41, %v10478_v4 }
 0x429   : > { %13010 = vst [vmem:[#allocation147_spill] sm:$0xff] %v10444_v13  ;;  %v10446_v45 = vpop.eup %8036  ;;  %8056 = vpow2.f32 %v3143_v57  ;;  %v10510_v58 = vpop.permute.xlu0 %5399  ;;  %v3072_v41 = vsub.f32 %v9832_v42, %v10502_v34 }
 0x42a   : > { %13011 = vst [vmem:[#allocation151_spill] sm:$0xff] %v10446_v45  ;;  %3327 = vperm.xlu0 %7835, %v10446_v45   ;;  %v10458_v17 = vpop.eup %8038  ;;  %8058 = vpow2.f32 %v3127_v21  ;;  %v3157_v21 = vmul.f32 1.442695, %v3068_v63  ;;  %v3159_v53 = vmul.f32 1.442695, %v3069_v43 }
 0x42b   : > { %3306 = vperm.xlu1 %7834, %v10438_v32   ;;  %13014 = vst [vmem:[#allocation155_spill] sm:$0xff] %v10458_v17  ;;  %v10460_v44 = vpop.eup %8040  ;;  %8060 = vpow2.f32 %v3149_v15  ;;  %v3165_v42 = vmul.f32 1.442695, %v3072_v41  ;;  %v13090_v32 = vld [vmem:[#allocation198_spill] sm:$0xff] }
 0x42c   : > { %13015 = vst [vmem:[#allocation154_spill] sm:$0xff] %v10460_v44  ;;  %v10468_v19 = vpop.eup %8042  ;;  %8062 = vpow2.f32 %v3129_v30  ;;  %v3063_v30 = vsub.f32 %v13029_v50, %v10454_v56 }
 0x42d   : > { %13018 = vst [vmem:[#allocation167_spill] sm:$0xff] %v10468_v19  ;;  %v10470_v8 = vpop.eup %8044  ;;  %8064 = vpow2.f32 %v3151_v7  ;;  %v10512_v46 = vpop.permute.xlu1 %5396 }
 0x42e   : > { %3336 = vperm.xlu0 %7835, %v10460_v44   ;;  %13019 = vst [vmem:[#allocation158_spill] sm:$0xff] %v10470_v8  ;;  %v10482_v0 = vpop.eup %8046  ;;  %8066 = vpow2.f32 %v3139_v11  ;;  %v3147_v50 = vmul.f32 1.442695, %v3063_v30  ;;  %v10530_v11 = vpop.permute.xlu0 %5405 }
 0x42f   : > { %3309 = vperm.xlu1 %7834, %v10444_v13   ;;  %13021 = vst [vmem:[#allocation159_spill] sm:$0xff] %v10482_v0  ;;  %v10484_v10 = vpop.eup %8048  ;;  %8068 = vpow2.f32 %v3157_v21  ;;  %v13058_v13 = vld [vmem:[#allocation153_spill] sm:$0xff] }
 0x430   : > { %13022 = vst [vmem:[#allocation162_spill] sm:$0xff] %v10484_v10  ;;  %v10492_v57 = vpop.eup %8050  ;;  %8070 = vpow2.f32 %v3137_v14  ;;  %v3067_v14 = vsub.f32 %v9806_v52, %v10478_v4 }
 0x431   : > { %13024 = vst [vmem:[#allocation105_spill] sm:$0xff] %v10492_v57  ;;  %v10494_v18 = vpop.eup %8052  ;;  %8072 = vpow2.f32 %v3159_v53  ;;  %v10532_v43 = vpop.permute.xlu1 %5402 }
 0x432   : > { %3339 = vperm.xlu0 %7835, %v10470_v8   ;;  %13025 = vst [vmem:[#allocation163_spill] sm:$0xff] %v10494_v18  ;;  %v10506_v26 = vpop.eup %8054  ;;  %8074 = vpow2.f32 %v3147_v50  ;;  %v10546_v41 = vpop.permute.xlu0 %5411  ;;  %v3066_v50 = vsub.f32 %v13037_v3, %v10454_v56  ;;  %v3155_v55 = vmul.f32 1.442695, %v3067_v14  ;;  %v13042_v14 = vld [vmem:[#allocation131_spill] sm:$0xff] }
 0x433   : > { %3312 = vperm.xlu1 %7834, %v10458_v17   ;;  %13027 = vst [vmem:[#allocation111_spill] sm:$0xff] %v10506_v26  ;;  %v10508_v15 = vpop.eup %8056  ;;  %8076 = vpow2.f32 %v3165_v42  ;;  %v3071_v42 = vsub.f32 %v9830_v33, %v10502_v34 }
 0x434   : > { %13028 = vst [vmem:[#allocation166_spill] sm:$0xff] %v10508_v15  ;;  %v10520_v63 = vpop.eup %8058  ;;  %8078 = vpow2.f32 %v3145_v23  ;;  %v3153_v23 = vmul.f32 1.442695, %v3066_v50 }
 0x435   : > { %13030 = vst [vmem:[#allocation113_spill] sm:$0xff] %v10520_v63  ;;  %v10522_v7 = vpop.eup %8060  ;;  %v10548_v53 = vpop.permute.xlu1 %5408  ;;  %8080 = vpow2.f32 %v3167_v38  ;;  %v3070_v38 = vsub.f32 %v13042_v14, %v10478_v4  ;;  %v3163_v3 = vmul.f32 1.442695, %v3071_v42 }
 0x436   : > { %3342 = vperm.xlu0 %7835, %v10484_v10   ;;  %13031 = vst [vmem:[#allocation171_spill] sm:$0xff] %v10522_v7  ;;  %v10534_v21 = vpop.eup %8062  ;;  %8082 = vpow2.f32 %v3155_v55  ;;  %v5418_v40 = vpop.permute.xlu0 %5417 }
 0x437   : > { %3315 = vperm.xlu1 %7834, %v10468_v19   ;;  %13033 = vst [vmem:[#allocation119_spill] sm:$0xff] %v10534_v21  ;;  %v10536_v60 = vpop.eup %8064  ;;  %8084 = vpow2.f32 %v3153_v23 }
 0x438   : > { %13034 = vst [vmem:[#allocation172_spill] sm:$0xff] %v10536_v60  ;;  %v10542_v28 = vpop.eup %8066  ;;  %8086 = vpow2.f32 %v3163_v3  ;;  %v5498_v3 = vrot.slane %v10510_v58, %v9712_v61 }
 0x439   : > { %13035 = vst [vmem:[#allocation109_spill] sm:$0xff] %v10542_v28  ;;  %v10544_v30 = vpop.eup %8068 }
 0x43a   : > { %3351 = vperm.xlu0 %7835, %v10494_v18   ;;  %13036 = vst [vmem:[#allocation107_spill] sm:$0xff] %v10544_v30  ;;  %v10554_v52 = vpop.eup %8070  ;;  %v5424_v55 = vpop.permute.xlu0 %5423 }
 0x43b   : > { %3318 = vperm.xlu1 %7834, %v10482_v0   ;;  %13038 = vst [vmem:[#allocation117_spill] sm:$0xff] %v10554_v52  ;;  %v10556_v27 = vpop.eup %8072 }
 0x43c   : > { %13039 = vst [vmem:[#allocation115_spill] sm:$0xff] %v10556_v27 }
 0x43e   : > { %3354 = vperm.xlu0 %7835, %v10508_v15   ;;  %v5430_v42 = vpop.permute.xlu0 %5429 }
 0x43f   : > { %3321 = vperm.xlu1 %7834, %v10492_v57   ;;  %v5543_v10 = vrot.slane %v5430_v42, %v9712_v61 }
 0x442   : > { %3363 = vperm.xlu0 %7835, %v10522_v7  }
 0x443   : > { %3324 = vperm.xlu1 %7834, %v10506_v26  }
 0x446   : > { %3366 = vperm.xlu0 %7835, %v10536_v60   ;;  %v5415_v60 = vpop.permute.xlu1 %5414 }
 0x447   : > { %3330 = vperm.xlu1 %7834, %v10520_v63  }
 0x44a   : > { %3375 = vperm.xlu0 %7835, %v10544_v30   ;;  %v5421_v50 = vpop.permute.xlu1 %5420  ;;  %v3161_v30 = vmul.f32 1.442695, %v3070_v38  ;;  %v5512_v38 = vrot.slane %v10548_v53, %v9722_v51 }
 0x44b   : > { %3333 = vperm.xlu1 %7834, %v10534_v21   ;;  %v10562_v21 = vpop.eup %8074 }
 0x44c   : > { %13040 = vst [vmem:[#allocation123_spill] sm:$0xff] %v10562_v21  ;;  %v10564_v56 = vpop.eup %8076  ;;  %8088 = vpow2.f32 %v3161_v30  ;;  %v5503_v30 = vrot.slane %v10532_v43, %v9722_v51  ;;  %v5534_v43 = vrot.slane %v5424_v55, %v9712_v61 }
 0x44d   : > { %13041 = vst [vmem:[#allocation204_spill] sm:$0xff] %v10564_v56 }
 0x44e   : > { %3378 = vperm.xlu0 %7835, %v10556_v27   ;;  %v10570_v27 = vpop.eup %8078  ;;  %v5427_v23 = vpop.permute.xlu1 %5426 }
 0x44f   : > { %3348 = vperm.xlu1 %7834, %v10542_v28   ;;  %13043 = vst [vmem:[#allocation131_spill] sm:$0xff] %v10570_v27  ;;  %v10572_v33 = vpop.eup %8080  ;;  %v5539_v58 = vrot.slane %v5427_v23, %v9722_v51  ;;  %v13061_v28 = vld [vmem:[#allocation157_spill] sm:$0xff] }
 0x450   : > { %13044 = vst [vmem:[#allocation205_spill] sm:$0xff] %v10572_v33  ;;  %v10578_v7 = vpop.eup %8082 }
 0x451   : > { %v10581_v14 = vpop.eup %8084 }
 0x452   : > { %3387 = vperm.xlu0 %7835, %v10564_v56   ;;  %13047 = vst [vmem:[#allocation206_spill] sm:$0xff] %v10581_v14  ;;  %v5433_v15 = vpop.permute.xlu1 %5432 }
 0x453   : > { %3345 = vperm.xlu1 %7834, %v10554_v52   ;;  %v13045_v52 = vld [vmem:[#allocation137_spill] sm:$0xff] }
 0x454   : > { %v3074_v56 = vsub.f32 %v13045_v52, %v10502_v34  ;;  %13046 = vst [vmem:[#allocation137_spill] sm:$0xff] %v10578_v7  ;;  %v5507_v34 = vrot.slane %v10530_v11, %v9712_v61  ;;  %v5521_v11 = vrot.slane %v5415_v60, %v9722_v51 }
 0x456   : > { %3390 = vperm.xlu0 %7835, %v10572_v33   ;;  %v3169_v4 = vmul.f32 1.442695, %v3074_v56  ;;  %v10584_v33 = vpop.eup %8086  ;;  %v5516_v56 = vrot.slane %v10546_v41, %v9712_v61  ;;  %v5508_v53 = vsel %vm2637_vm8, %v5507_v34, %v5503_v30 }
 0x457   : > { %3360 = vperm.xlu1 %7834, %v10562_v21   ;;  %13048 = vst [vmem:[#allocation207_spill] sm:$0xff] %v10584_v33  ;;  %v10591_v52 = vpop.eup %8088 }
 0x458   : > { %8090 = vpow2.f32 %v3169_v4  ;;  %13049 = vst [vmem:[#allocation208_spill] sm:$0xff] %v10591_v52  ;;  %v5494_v4 = vrot.slane %v10512_v46, %v9722_v51  ;;  %v5548_v46 = vrot.slane %v5433_v15, %v9722_v51 }
 0x45a   : > { %v5499_v55 = vsel %vm2637_vm8, %v5498_v3, %v5494_v4 }
 0x45b   : > { %3357 = vperm.xlu1 %7834, %v10570_v27   ;;  %v5436_v27 = vpop.permute.xlu0 %5435  ;;  %v5635_v42 = vsel %vm938_vm1, %v5508_v53, %v5499_v55 }
 0x45c   : > { %v5552_v60 = vrot.slane %v5436_v27, %v9712_v61  ;;  %v5544_v27 = vsel %vm2637_vm8, %v5543_v10, %v5539_v58 }
 0x45f   : > { %3372 = vperm.xlu1 %7834, %v10578_v7   ;;  %v5442_v41 = vpop.permute.xlu0 %5441  ;;  %v5439_v7 = vpop.permute.xlu1 %5438 }
 0x460   : > { %v5557_v34 = vrot.slane %v5439_v7, %v9722_v51 }
 0x462   : > { %v10609_v21 = vpop.eup %8090 }
 0x463   : > { %3369 = vperm.xlu1 %7834, %v10581_v14   ;;  %v5525_v14 = vrot.slane %v5418_v40, %v9712_v61  ;;  %13050 = vst [vmem:[#allocation209_spill] sm:$0xff] %v10609_v21  ;;  %v5517_v40 = vsel %vm2637_vm8, %v5516_v56, %v5512_v38  ;;  %v5553_v56 = vsel %vm2637_vm8, %v5552_v60, %v5548_v46 }
 0x464   : > { %v5636_v30 = vsel %vm941_vm2, %v5517_v40, %v5635_v42  ;;  %v13052_v40 = vld [vmem:[#allocation144_spill] sm:$0xff] }
 0x467   : > { %3384 = vperm.xlu1 %7834, %v10584_v33   ;;  %v5530_v33 = vrot.slane %v5421_v50, %v9722_v51  ;;  %v5526_v50 = vsel %vm2637_vm8, %v5525_v14, %v5521_v11 }
 0x468   : > { %v5637_v15 = vsel %vm944_vm3, %v5526_v50, %v5636_v30 }
 0x469   : > { %v5535_v23 = vsel %vm2637_vm8, %v5534_v43, %v5530_v33  ;;  %v10631_v11 = vpop.permute.xlu0 %5447 }
 0x46a   : > { %v5638_v14 = vsel %vm947_vm4, %v5535_v23, %v5637_v15  ;;  %v13054_v15 = vld [vmem:[#allocation148_spill] sm:$0xff] }
 0x46b   : > { %3381 = vperm.xlu1 %7834, %v10591_v52   ;;  %v5561_v52 = vrot.slane %v5442_v41, %v9712_v61  ;;  %v5639_v7 = vsel %vm950_vm5, %v5544_v27, %v5638_v14 }
 0x46c   : > { %v5640_v3 = vsel %vm953_vm6, %v5553_v56, %v5639_v7 }
 0x46d   : > { %v5562_v38 = vsel %vm2637_vm8, %v5561_v52, %v5557_v34  ;;  %v10639_v53 = vpop.permute.xlu0 %5453  ;;  %v13051_v52 = vld [vmem:[#allocation140_spill] sm:$0xff]  ;;  %v13053_v34 = vld [vmem:[#allocation141_spill] sm:$0xff] }
 0x46e   : > { %v5641_v4 = vsel %vm956_vm7, %v5562_v38, %v5640_v3  ;;  %v13055_v38 = vld [vmem:[#allocation156_spill] sm:$0xff] }
 0x46f   : > { %3393 = vperm.xlu1 %7834, %v10609_v21   ;;  %v5651_v33 = vsel %vm5178_vm9, %v5641_v4, 0.0  ;;  %v13056_v4 = vld [vmem:[#allocation150_spill] sm:$0xff] }
 0x471   : > { %v10652_v23 = vpop.permute.xlu0 %5459 }
 0x472   : > { %v5588_v19 = vrot.slane %v10652_v23, %v9712_v61 }
 0x475   : > { %5652 = vadd.xlane.f32.xlu0 %v5651_v33 }
 0x47b   : > { %v10633_v10 = vpop.xlane.xlu1 %2959 }
 0x47c   : > { %v2998_v43 = vrot.slane %v10633_v10, %v9395_v47  ;;  %v3002_v46 = vrot.slane %v10633_v10, %v10081_v9  ;;  %v10649_v50 = vrot.slane %v10633_v10, %v10084_v35 }
 0x47e   : > { %v3075_v58 = vsub.f32 %v13051_v52, %v2998_v43  ;;  %v3077_v60 = vsub.f32 %v13052_v40, %v2998_v43  ;;  %v3076_v42 = vsub.f32 %v13053_v34, %v2998_v43  ;;  %v3079_v56 = vsub.f32 %v13054_v15, %v3002_v46  ;;  %v10662_v34 = vpop.permute.xlu0 %5465 }
 0x47f   : > { %v10637_v41 = vpop.permute.xlu1 %5444  ;;  %v3083_v7 = vsub.f32 %v13055_v38, %v10649_v50  ;;  %v3080_v33 = vsub.f32 %v13056_v4, %v3002_v46  ;;  %v3081_v38 = vsub.f32 %v13058_v13, %v3002_v46 }
 0x480   : > { %v3171_v30 = vmul.f32 1.442695, %v3075_v58  ;;  %v3175_v27 = vmul.f32 1.442695, %v3077_v60  ;;  %v3173_v3 = vmul.f32 1.442695, %v3076_v42  ;;  %v10666_v58 = vrot.slane %v10633_v10, %v10090_v16 }
 0x481   : > { %v3179_v52 = vmul.f32 1.442695, %v3079_v56  ;;  %v13057_v60 = vld [vmem:[#allocation152_spill] sm:$0xff]  ;;  %v3187_v21 = vmul.f32 1.442695, %v3083_v7 }
 0x482   : > { %8092 = vpow2.f32 %v3171_v30  ;;  %v3082_v15 = vsub.f32 %v13057_v60, %v3002_v46  ;;  %v3181_v42 = vmul.f32 1.442695, %v3080_v33  ;;  %v10676_v18 = vpop.permute.xlu0 %5471  ;;  %v3084_v60 = vsub.f32 %v13061_v28, %v10649_v50 }
 0x483   : > { %v10645_v55 = vpop.permute.xlu1 %5450  ;;  %8094 = vpow2.f32 %v3175_v27  ;;  %v13059_v27 = vld [vmem:[#allocation164_spill] sm:$0xff]  ;;  %v3183_v7 = vmul.f32 1.442695, %v3081_v38 }
 0x484   : > { %8096 = vpow2.f32 %v3173_v3  ;;  %v3087_v56 = vsub.f32 %v13059_v27, %v10666_v58  ;;  %v3185_v4 = vmul.f32 1.442695, %v3082_v15  ;;  %v10687_v3 = vrot.slane %v10633_v10, %v10095_v24  ;;  %v13065_v15 = vld [vmem:[#allocation145_spill] sm:$0xff] }
 0x485   : > { %8098 = vpow2.f32 %v3179_v52  ;;  %v3078_v38 = vsub.f32 %v13065_v15, %v2998_v43 }
 0x486   : > { %8100 = vpow2.f32 %v3187_v21  ;;  %v13063_v21 = vld [vmem:[#allocation168_spill] sm:$0xff]  ;;  %v3195_v52 = vmul.f32 1.442695, %v3087_v56 }
 0x487   : > { %v10655_v14 = vpop.permute.xlu1 %5456  ;;  %8102 = vpow2.f32 %v3181_v42  ;;  %v3089_v33 = vsub.f32 %v13063_v21, %v10666_v58  ;;  %v3189_v42 = vmul.f32 1.442695, %v3084_v60  ;;  %v10700_v21 = vpop.permute.xlu0 %5477  ;;  %v3093_v60 = vsub.f32 %v10071_v62, %v10687_v3 }
 0x488   : > { %8104 = vpow2.f32 %v3185_v4 }
 0x489   : > { %8106 = vpow2.f32 %v3183_v7  ;;  %v3199_v24 = vmul.f32 1.442695, %v3089_v33  ;;  %v3177_v7 = vmul.f32 1.442695, %v3078_v38 }
 0x48a   : > { %8108 = vpow2.f32 %v3195_v52 }
 0x48b   : > { %v10660_v40 = vpop.permute.xlu1 %5462  ;;  %8110 = vpow2.f32 %v3189_v42  ;;  %v10722_v38 = vpop.permute.xlu0 %5483  ;;  %v13072_v42 = vld [vmem:[#allocation165_spill] sm:$0xff] }
 0x48c   : > { %v10674_v57 = vpop.eup %8092  ;;  %8112 = vpow2.f32 %v3199_v24  ;;  %v3207_v24 = vmul.f32 1.442695, %v3093_v60 }
 0x48d   : > { %13060 = vst [vmem:[#allocation140_spill] sm:$0xff] %v10674_v57  ;;  %3396 = vperm.xlu1 %7834, %v10674_v57   ;;  %v10683_v46 = vpop.eup %8094  ;;  %v13066_v57 = vld [vmem:[#allocation174_spill] sm:$0xff]  ;;  %8114 = vpow2.f32 %v3177_v7  ;;  %v13075_v7 = vld [vmem:[#allocation176_spill] sm:$0xff] }
 0x48e   : > { %13062 = vst [vmem:[#allocation144_spill] sm:$0xff] %v10683_v46  ;;  %3402 = vperm.xlu0 %7835, %v10683_v46   ;;  %v10692_v28 = vpop.eup %8096  ;;  %v3092_v63 = vsub.f32 %v13066_v57, %v10687_v3  ;;  %v13069_v46 = vld [vmem:[#allocation160_spill] sm:$0xff]  ;;  %v10712_v57 = vrot.slane %v10633_v10, %v10100_v37 }
 0x48f   : > { %v10670_v30 = vpop.permute.xlu1 %5468  ;;  %13064 = vst [vmem:[#allocation141_spill] sm:$0xff] %v10692_v28  ;;  %v10702_v56 = vpop.eup %8098  ;;  %v3085_v43 = vsub.f32 %v13069_v46, %v10649_v50 }
 0x490   : > { %13067 = vst [vmem:[#allocation148_spill] sm:$0xff] %v10702_v56  ;;  %v10704_v4 = vpop.eup %8100  ;;  %v3205_v33 = vmul.f32 1.442695, %v3092_v63  ;;  %v3096_v62 = vsub.f32 %v10180_v20, %v10712_v57  ;;  %v10742_v20 = vrot.slane %v10633_v10, %v10106_v12  ;;  %v3097_v60 = vsub.f32 %v13075_v7, %v10712_v57 }
 0x491   : > { %3399 = vperm.xlu1 %7834, %v10692_v28   ;;  %13068 = vst [vmem:[#allocation156_spill] sm:$0xff] %v10704_v4  ;;  %v10716_v52 = vpop.eup %8102 }
 0x492   : > { %3420 = vperm.xlu0 %7835, %v10704_v4   ;;  %13070 = vst [vmem:[#allocation150_spill] sm:$0xff] %v10716_v52  ;;  %v10720_v46 = vpop.eup %8104  ;;  %v3088_v4 = vsub.f32 %v13072_v42, %v10666_v58  ;;  %8116 = vpow2.f32 %v3205_v33  ;;  %v3086_v42 = vsub.f32 %v12970_v1, %v10649_v50  ;;  %v3213_v33 = vmul.f32 1.442695, %v3096_v62 }
 0x493   : > { %v10681_v13 = vpop.permute.xlu1 %5474  ;;  %13071 = vst [vmem:[#allocation152_spill] sm:$0xff] %v10720_v46  ;;  %v10730_v63 = vpop.eup %8106  ;;  %v3215_v7 = vmul.f32 1.442695, %v3097_v60  ;;  %v10774_v60 = vrot.slane %v10633_v10, %v10114_v59  ;;  %v13087_v10 = vld [vmem:[#allocation128_spill] sm:$0xff] }
 0x494   : > { %13073 = vst [vmem:[#allocation153_spill] sm:$0xff] %v10730_v63  ;;  %v10734_v37 = vpop.eup %8108 }
 0x495   : > { %3408 = vperm.xlu1 %7834, %v10702_v56   ;;  %v3191_v56 = vmul.f32 1.442695, %v3085_v43  ;;  %13074 = vst [vmem:[#allocation164_spill] sm:$0xff] %v10734_v37  ;;  %v3197_v43 = vmul.f32 1.442695, %v3088_v4 }
 0x496   : > { %3417 = vperm.xlu0 %7835, %v10720_v46   ;;  %v10746_v46 = vpop.permute.xlu0 %5489 }
 0x497   : > { %v10696_v27 = vpop.permute.xlu1 %5480  ;;  %8118 = vpow2.f32 %v3191_v56  ;;  %v13078_v56 = vld [vmem:[#allocation173_spill] sm:$0xff] }
 0x498   : > { %8120 = vpow2.f32 %v3207_v24  ;;  %v3091_v4 = vsub.f32 %v13078_v56, %v10687_v3  ;;  %v13079_v24 = vld [vmem:[#allocation203_spill] sm:$0xff] }
 0x499   : > { %3411 = vperm.xlu1 %7834, %v10716_v52   ;;  %v10748_v52 = vpop.eup %8110  ;;  %8122 = vpow2.f32 %v3197_v43  ;;  %v3100_v62 = vsub.f32 %v13079_v24, %v10742_v20 }
 0x49a   : > { %3432 = vperm.xlu0 %7835, %v10734_v37   ;;  %13076 = vst [vmem:[#allocation157_spill] sm:$0xff] %v10748_v52  ;;  %v10752_v50 = vpop.eup %8112  ;;  %v3193_v37 = vmul.f32 1.442695, %v3086_v42  ;;  %8124 = vpow2.f32 %v3213_v33  ;;  %v13082_v42 = vld [vmem:[#allocation169_spill] sm:$0xff]  ;;  %v3203_v56 = vmul.f32 1.442695, %v3091_v4 }
 0x49b   : > { %v10718_v15 = vpop.permute.xlu1 %5486  ;;  %13077 = vst [vmem:[#allocation168_spill] sm:$0xff] %v10752_v50  ;;  %v10762_v12 = vpop.eup %8114  ;;  %v3090_v43 = vsub.f32 %v13082_v42, %v10666_v58  ;;  %v13083_v33 = vld [vmem:[#allocation196_spill] sm:$0xff]  ;;  %v13086_v4 = vld [vmem:[#allocation175_spill] sm:$0xff] }
 0x49c   : > { %13080 = vst [vmem:[#allocation145_spill] sm:$0xff] %v10762_v12  ;;  %v10766_v44 = vpop.eup %8116  ;;  %8126 = vpow2.f32 %v3193_v37  ;;  %v3101_v24 = vsub.f32 %v13083_v33, %v10742_v20  ;;  %v3095_v42 = vsub.f32 %v13086_v4, %v10712_v57  ;;  %v3094_v4 = vsub.f32 %v13090_v32, %v10687_v3 }
 0x49d   : > { %3414 = vperm.xlu1 %7834, %v10730_v63   ;;  %13081 = vst [vmem:[#allocation174_spill] sm:$0xff] %v10766_v44  ;;  %8128 = vpow2.f32 %v3215_v7 }
 0x49e   : > { %3438 = vperm.xlu0 %7835, %v10752_v50   ;;  %v3221_v50 = vmul.f32 1.442695, %v3100_v62  ;;  %8130 = vpow2.f32 %v3203_v56  ;;  %v3104_v62 = vsub.f32 %v13087_v10, %v10774_v60  ;;  %v3223_v7 = vmul.f32 1.442695, %v3101_v24  ;;  %v13091_v56 = vld [vmem:[#allocation202_spill] sm:$0xff] }
 0x49f   : > { %v3105_v10 = vsub.f32 %v13091_v56, %v10774_v60  ;;  %v3209_v3 = vmul.f32 1.442695, %v3094_v4 }
 0x4a0   : > { %8132 = vpow2.f32 %v3221_v50  ;;  %v3229_v50 = vmul.f32 1.442695, %v3104_v62 }
 0x4a1   : > { %3423 = vperm.xlu1 %7834, %v10748_v52   ;;  %v10778_v52 = vpop.eup %8118  ;;  %v3231_v62 = vmul.f32 1.442695, %v3105_v10 }
 0x4a2   : > { %3447 = vperm.xlu0 %7835, %v10766_v44   ;;  %13084 = vst [vmem:[#allocation160_spill] sm:$0xff] %v10778_v52  ;;  %v10782_v58 = vpop.eup %8120 }
 0x4a3   : > { %13085 = vst [vmem:[#allocation165_spill] sm:$0xff] %v10782_v58  ;;  %v10792_v33 = vpop.eup %8122 }
 0x4a4   : > { %13088 = vst [vmem:[#allocation176_spill] sm:$0xff] %v10792_v33  ;;  %v10796_v59 = vpop.eup %8124 }
 0x4a5   : > { %v10760_v63 = vpop.permute.xlu0 %3300  ;;  %3405 = vperm.xlu1 %7834, %v10762_v12   ;;  %v3201_v12 = vmul.f32 1.442695, %v3090_v43  ;;  %13089 = vst [vmem:[#allocation173_spill] sm:$0xff] %v10796_v59  ;;  %v3211_v43 = vmul.f32 1.442695, %v3095_v42  ;;  %v3106_v42 = vsub.f32 %v10291_v31, %v10774_v60 }
 0x4a6   : > { %v10732_v28 = vpop.permute.xlu1 %3303  ;;  %3450 = vperm.xlu0 %7835, %v10782_v58   ;;  %v10806_v58 = vpop.eup %8126 }
 0x4a7   : > { %8134 = vpow2.f32 %v3201_v12  ;;  %13092 = vst [vmem:[#allocation203_spill] sm:$0xff] %v10806_v58  ;;  %v10810_v45 = vpop.eup %8128  ;;  %v13094_v12 = vld [vmem:[#allocation177_spill] sm:$0xff]  ;;  %v3233_v31 = vmul.f32 1.442695, %v3106_v42 }
 0x4a8   : > { %8136 = vpow2.f32 %v3223_v7  ;;  %13093 = vst [vmem:[#allocation169_spill] sm:$0xff] %v10810_v45  ;;  %v3099_v32 = vsub.f32 %v13094_v12, %v10742_v20  ;;  %v10818_v7 = vpop.eup %8130 }
 0x4a9   : > { %v10784_v37 = vpop.permute.xlu0 %3327  ;;  %3426 = vperm.xlu1 %7834, %v10778_v52   ;;  %8138 = vpow2.f32 %v3211_v43  ;;  %13095 = vst [vmem:[#allocation196_spill] sm:$0xff] %v10818_v7  ;;  %v3098_v43 = vsub.f32 %v10185_v25, %v10712_v57 }
 0x4aa   : > { %v10750_v1 = vpop.permute.xlu1 %3306  ;;  %3459 = vperm.xlu0 %7835, %v10796_v59   ;;  %8140 = vpow2.f32 %v3229_v50  ;;  %v10822_v59 = vpop.eup %8132  ;;  %v3219_v4 = vmul.f32 1.442695, %v3099_v32  ;;  %v13099_v32 = vld [vmem:[#allocation200_spill] sm:$0xff] }
 0x4ab   : > { %13096 = vst [vmem:[#allocation175_spill] sm:$0xff] %v10822_v59  ;;  %8142 = vpow2.f32 %v3209_v3  ;;  %v3103_v3 = vsub.f32 %v13099_v32, %v10774_v60 }
 0x4ac   : > { %8144 = vpow2.f32 %v3231_v62  ;;  %v3102_v62 = vsub.f32 %v10238_v54, %v10742_v20 }
 0x4ad   : > { %3435 = vperm.xlu1 %7834, %v10792_v33   ;;  %v10804_v24 = vpop.permute.xlu0 %3336  ;;  %8146 = vpow2.f32 %v3219_v4  ;;  %v3227_v4 = vmul.f32 1.442695, %v3103_v3 }
 0x4ae   : > { %v10764_v8 = vpop.permute.xlu1 %3309  ;;  %3462 = vperm.xlu0 %7835, %v10810_v45   ;;  %v3217_v45 = vmul.f32 1.442695, %v3098_v43  ;;  %8148 = vpow2.f32 %v3233_v31 }
 0x4b0   : > { %8150 = vpow2.f32 %v3217_v45 }
 0x4b1   : > { %3429 = vperm.xlu1 %7834, %v10806_v58   ;;  %v10824_v33 = vpop.permute.xlu0 %3339  ;;  %v10830_v10 = vpop.eup %8134  ;;  %8152 = vpow2.f32 %v3227_v4  ;;  %v5584_v58 = vrot.slane %v10655_v14, %v9722_v51  ;;  %v5570_v14 = vrot.slane %v10631_v11, %v9712_v61  ;;  %v5611_v11 = vrot.slane %v10681_v13, %v9722_v51 }
 0x4b2   : > { %v10780_v0 = vpop.permute.xlu1 %3312  ;;  %3471 = vperm.xlu0 %7835, %v10822_v59   ;;  %13097 = vst [vmem:[#allocation128_spill] sm:$0xff] %v10830_v10  ;;  %v10834_v12 = vpop.eup %8136  ;;  %v5624_v13 = vrot.slane %v10722_v38, %v9712_v61 }
 0x4b3   : > { %13098 = vst [vmem:[#allocation198_spill] sm:$0xff] %v10834_v12  ;;  %v10842_v25 = vpop.eup %8138 }
 0x4b4   : > { %13100 = vst [vmem:[#allocation202_spill] sm:$0xff] %v10842_v25  ;;  %v10846_v42 = vpop.eup %8140 }
 0x4b5   : > { %3444 = vperm.xlu1 %7834, %v10818_v7   ;;  %v10840_v59 = vpop.permute.xlu0 %3342  ;;  %13101 = vst [vmem:[#allocation177_spill] sm:$0xff] %v10846_v42  ;;  %v10852_v60 = vpop.eup %8142  ;;  %v5566_v7 = vrot.slane %v10637_v41, %v9722_v51  ;;  %v5606_v41 = vrot.slane %v10676_v18, %v9712_v61  ;;  %v5620_v18 = vrot.slane %v10696_v27, %v9722_v51 }
 0x4b6   : > { %v10794_v44 = vpop.permute.xlu1 %3315  ;;  %3474 = vperm.xlu0 %7835, %v10834_v12   ;;  %13102 = vst [vmem:[#allocation200_spill] sm:$0xff] %v10852_v60  ;;  %v10856_v31 = vpop.eup %8144  ;;  %v3225_v12 = vmul.f32 1.442695, %v3102_v62 }
 0x4b7   : > { %13103 = vst [vmem:[#allocation210_spill] sm:$0xff] %v10856_v31  ;;  %v5571_v29 = vsel %vm2637_vm8, %v5570_v14, %v5566_v7  ;;  %v3517_v38 = vrot.slane %v10794_v44, %v9712_v61 }
 0x4b8   : > { %8154 = vpow2.f32 %v3225_v12 }
 0x4b9   : > { %3441 = vperm.xlu1 %7834, %v10830_v10   ;;  %v10858_v32 = vpop.permute.xlu0 %3351 }
 0x4ba   : > { %v10808_v52 = vpop.permute.xlu1 %3318  ;;  %3483 = vperm.xlu0 %7835, %v10846_v42   ;;  %v10862_v42 = vpop.eup %8146 }
 0x4bb   : > { %13104 = vst [vmem:[#allocation211_spill] sm:$0xff] %v10862_v42  ;;  %v10866_v54 = vpop.eup %8148 }
 0x4bc   : > { %13105 = vst [vmem:[#allocation212_spill] sm:$0xff] %v10866_v54  ;;  %v10874_v3 = vpop.eup %8150 }
 0x4bd   : > { %3456 = vperm.xlu1 %7834, %v10842_v25   ;;  %v10870_v45 = vpop.permute.xlu0 %3354  ;;  %13106 = vst [vmem:[#allocation213_spill] sm:$0xff] %v10874_v3  ;;  %v10879_v4 = vpop.eup %8152 }
 0x4be   : > { %v10820_v56 = vpop.permute.xlu1 %3321  ;;  %3486 = vperm.xlu0 %7835, %v10856_v31   ;;  %13107 = vst [vmem:[#allocation214_spill] sm:$0xff] %v10879_v4 }
 0x4c1   : > { %3453 = vperm.xlu1 %7834, %v10852_v60   ;;  %v10881_v31 = vpop.permute.xlu0 %3363 }
 0x4c2   : > { %v10832_v50 = vpop.permute.xlu1 %3324  ;;  %3489 = vperm.xlu0 %7835, %v10866_v54   ;;  %v10886_v60 = vpop.eup %8154 }
 0x4c3   : > { %13108 = vst [vmem:[#allocation215_spill] sm:$0xff] %v10886_v60  ;;  %v3532_v44 = vrot.slane %v10832_v50, %v9722_v51 }
 0x4c5   : > { %3468 = vperm.xlu1 %7834, %v10862_v42   ;;  %v10889_v12 = vpop.permute.xlu0 %3366 }
 0x4c6   : > { %v10844_v57 = vpop.permute.xlu1 %3330 }
 0x4c9   : > { %3465 = vperm.xlu1 %7834, %v10874_v3   ;;  %v5575_v3 = vrot.slane %v10645_v55, %v9722_v51  ;;  %v10905_v26 = vpop.permute.xlu0 %3375  ;;  %v5602_v55 = vrot.slane %v10670_v30, %v9722_v51 }
 0x4ca   : > { %v10854_v43 = vpop.permute.xlu1 %3333 }
 0x4cb   : > { %v5607_v30 = vsel %vm2637_vm8, %v5606_v41, %v5602_v55 }
 0x4cd   : > { %3480 = vperm.xlu1 %7834, %v10879_v4   ;;  %v5579_v4 = vrot.slane %v10639_v53, %v9712_v61  ;;  %v5597_v53 = vrot.slane %v10662_v34, %v9712_v61  ;;  %v10934_v7 = vpop.permute.xlu0 %3378 }
 0x4ce   : > { %v10864_v10 = vpop.permute.xlu1 %3348 }
 0x4cf   : > { %v5580_v17 = vsel %vm2637_vm8, %v5579_v4, %v5575_v3  ;;  %v3555_v3 = vrot.slane %v10824_v33, %v9712_v61  ;;  %v5625_v4 = vsel %vm2637_vm8, %v5624_v13, %v5620_v18  ;;  %v3527_v33 = vrot.slane %v10820_v56, %v9964_v6 }
 0x4d0   : > { %v5642_v49 = vsel %vm938_vm1, %v5580_v17, %v5571_v29  ;;  %v5615_v29 = vrot.slane %v10700_v21, %v9712_v61  ;;  %v3508_v21 = vrot.slane %v10764_v8, %v9964_v6  ;;  %v3513_v8 = vrot.slane %v10780_v0, %v9722_v51 }
 0x4d1   : > { %3477 = vperm.xlu1 %7834, %v10886_v60   ;;  %v5593_v60 = vrot.slane %v10660_v40, %v9722_v51  ;;  %v5589_v40 = vsel %vm2637_vm8, %v5588_v19, %v5584_v58  ;;  %v3494_v19 = vrot.slane %v10760_v63, %v9722_v51  ;;  %v3498_v58 = vrot.slane %v10732_v28, %v9712_v61  ;;  %v13109_v63 = vld [vmem:[#allocation170_spill] sm:$0xff] }
 0x4d2   : > { %v10872_v20 = vpop.permute.xlu1 %3345  ;;  %v5643_v34 = vsel %vm941_vm2, %v5589_v40, %v5642_v49  ;;  %v5633_v49 = vrot.slane %v10746_v46, %v9712_v61  ;;  %v10949_v28 = vsel %vm2637_vm8, %v5615_v29, %v5611_v11  ;;  %v3560_v14 = vrot.slane %v10840_v59, %v13109_v63 }
 0x4d3   : > { %v5598_v23 = vsel %vm2637_vm8, %v5597_v53, %v5593_v60  ;;  %v3503_v60 = vrot.slane %v10750_v1, %v13109_v63  ;;  %v3499_v55 = vsel %vm2637_vm8, %v3498_v58, %v3494_v19  ;;  %v3522_v1 = vrot.slane %v10808_v52, %v13109_v63 }
 0x4d4   : > { %v5644_v17 = vsel %vm944_vm3, %v5598_v23, %v5643_v34  ;;  %v3551_v53 = vrot.slane %v10804_v24, %v9722_v51  ;;  %v5629_v40 = vrot.slane %v10718_v15, %v9722_v51  ;;  %v3536_v59 = vrot.slane %v10784_v37, %v9712_v61  ;;  %v3388_v23 = vpop.permute.xlu0 %3387 }
 0x4d5   : > { %v10944_v27 = vsel %vm947_vm4, %v5607_v30, %v5644_v17  ;;  %v3504_v52 = vsel %vm2644_vm10, %v3503_v60, %v3499_v55  ;;  %v3570_v24 = vrot.slane %v10864_v10, %v9722_v51  ;;  %v3518_v30 = vsel %vm2637_vm8, %v3517_v38, %v3513_v8 }
 0x4d6   : > { %v10877_v62 = vpop.permute.xlu1 %3360  ;;  %v3509_v0 = vsel %vm2651_vm11, %v3508_v21, %v3504_v52  ;;  %v3556_v56 = vsel %vm2637_vm8, %v3555_v3, %v3551_v53  ;;  %v3541_v50 = vrot.slane %v10844_v57, %v13109_v63  ;;  %v3574_v37 = vrot.slane %v10858_v32, %v9712_v61 }
 0x4d7   : > { %v3561_v15 = vsel %vm2644_vm10, %v3560_v14, %v3556_v56  ;;  %v3523_v11 = vsel %vm2644_vm10, %v3522_v1, %v3518_v30  ;;  %v3589_v10 = vrot.slane %v10877_v62, %v9722_v51  ;;  %v3537_v18 = vsel %vm2637_vm8, %v3536_v59, %v3532_v44 }
 0x4d8   : > { %v3528_v34 = vsel %vm2651_vm11, %v3527_v33, %v3523_v11  ;;  %v3546_v19 = vrot.slane %v10854_v43, %v9964_v6  ;;  %v3593_v58 = vrot.slane %v10881_v31, %v9712_v61  ;;  %v3575_v32 = vsel %vm2637_vm8, %v3574_v37, %v3570_v24  ;;  %v3391_v21 = vpop.permute.xlu0 %3390 }
 0x4d9   : > { %v3565_v29 = vrot.slane %v10872_v20, %v9964_v6  ;;  %v3579_v17 = vrot.slane %v10870_v45, %v13109_v63  ;;  %v3542_v13 = vsel %vm2644_vm10, %v3541_v50, %v3537_v18  ;;  %v3612_v43 = vrot.slane %v10905_v26, %v9712_v61  ;;  %v13111_v18 = vld [vmem:[#allocation187_spill] sm:$0xff] }
 0x4da   : > { %v10884_v54 = vpop.permute.xlu1 %3357  ;;  %v3598_v60 = vrot.slane %v10889_v12, %v13109_v63  ;;  %v3631_v20 = vrot.slane %v3388_v23, %v9712_v61  ;;  %v3547_v3 = vsel %vm2651_vm11, %v3546_v19, %v3542_v13  ;;  %v3617_v55 = vrot.slane %v10934_v7, %v13109_v63 }
 0x4db   : > { %v3580_v38 = vsel %vm2644_vm10, %v3579_v17, %v3575_v32  ;;  %v3566_v12 = vsel %vm2651_vm11, %v3565_v29, %v3561_v15  ;;  %v3795_v53 = vsel %vm938_vm1, %v3528_v34, %v3509_v0  ;;  %v5634_v59 = vsel %vm2637_vm8, %v5633_v49, %v5629_v40  ;;  %v13112_v29 = vld [vmem:[#allocation184_spill] sm:$0xff]  ;;  %v13113_v17 = vld [vmem:[#allocation189_spill] sm:$0xff] }
 0x4dc   : > { %v3796_v44 = vsel %vm941_vm2, %v3547_v3, %v3795_v53  ;;  %v5646_v23 = vsel %vm950_vm5, %v10949_v28, %v10944_v27 }
 0x4dd   : > { %v3797_v52 = vsel %vm944_vm3, %v3566_v12, %v3796_v44  ;;  %v5647_v30 = vsel %vm953_vm6, %v5625_v4, %v5646_v23 }
 0x4de   : > { %v10891_v42 = vpop.permute.xlu1 %3372  ;;  %v5648_v46 = vsel %vm956_vm7, %v5634_v59, %v5647_v30 }
 0x4df   : > { %v3608_v57 = vrot.slane %v10891_v42, %v9722_v51  ;;  %v3584_v42 = vrot.slane %v10884_v54, %v9964_v6  ;;  %v5654_v37 = vsel %vm5178_vm9, %v5648_v46, 0.0 }
 0x4e1   : > { %v3613_v26 = vsel %vm2637_vm8, %v3612_v43, %v3608_v57  ;;  %v3585_v8 = vsel %vm2651_vm11, %v3584_v42, %v3580_v38  ;;  %v13116_v38 = vld [vmem:[#allocation186_spill] sm:$0xff] }
 0x4e2   : > { %v10897_v25 = vpop.permute.xlu1 %3369  ;;  %v3618_v7 = vsel %vm2644_vm10, %v3617_v55, %v3613_v26  ;;  %v3798_v56 = vsel %vm947_vm4, %v3585_v8, %v3797_v52 }
 0x4e3   : > { %v3603_v45 = vrot.slane %v10897_v25, %v9964_v6  ;;  %v3636_v25 = vrot.slane %v3391_v21, %v13109_v63 }
 0x4e6   : > { %v10925_v48 = vpop.permute.xlu1 %3384 }
 0x4e7   : > { %v3627_v62 = vrot.slane %v10925_v48, %v9722_v51  ;;  %v3594_v48 = vsel %vm2637_vm8, %v3593_v58, %v3589_v10  ;;  %v13110_v10 = vld [vmem:[#allocation182_spill] sm:$0xff] }
 0x4e8   : > { %v3599_v33 = vsel %vm2644_vm10, %v3598_v60, %v3594_v48 }
 0x4e9   : > { %v3632_v14 = vsel %vm2637_vm8, %v3631_v20, %v3627_v62  ;;  %v13115_v20 = vld [vmem:[#allocation191_spill] sm:$0xff] }
 0x4ea   : > { %v3382_v41 = vpop.permute.xlu1 %3381  ;;  %v3637_v0 = vsel %vm2644_vm10, %v3636_v25, %v3632_v14 }
 0x4eb   : > { %v3622_v54 = vrot.slane %v3382_v41, %v9964_v6  ;;  %v3604_v41 = vsel %vm2651_vm11, %v3603_v45, %v3599_v33 }
 0x4ec   : > { %v3799_v49 = vsel %vm950_vm5, %v3604_v41, %v3798_v56 }
 0x4ed   : > { %v3623_v24 = vsel %vm2651_vm11, %v3622_v54, %v3618_v7  ;;  %v13117_v54 = vld [vmem:[#allocation193_spill] sm:$0xff] }
 0x4ee   : > { %v3394_v31 = vpop.permute.xlu1 %3393  ;;  %v3800_v40 = vsel %vm953_vm6, %v3623_v24, %v3799_v49 }
 0x4ef   : > { %v3641_v1 = vrot.slane %v3394_v31, %v9964_v6  ;;  %v13114_v31 = vld [vmem:[#allocation185_spill] sm:$0xff] }
 0x4f1   : > { %v3642_v50 = vsel %vm2651_vm11, %v3641_v1, %v3637_v0 }
 0x4f2   : > { %v3801_v15 = vsel %vm956_vm7, %v3642_v50, %v3800_v40 }
 0x4f3   : > { %v3811_v27 = vsel %vm2954_vm12, %v3801_v15, 0.0 }
 0x4f5   : > { %5655 = vadd.xlane.f32.xlu1 %v5654_v37 }
 0x4f9   : > { %3812 = vadd.xlane.f32.xlu1 %v3811_v27 }
 0x502   : > { %v5653_v28 = vpop.xlane.xlu0 %5652 }
 0x503   : > { %8156 = vrcp.f32 %v5653_v28 }
 0x50c   : > { %v3397_v58 = vpop.permute.xlu1 %3396 }
 0x50d   : > { %v11050_v11 = vpop.eup %8156  ;;  %v3403_v32 = vpop.permute.xlu0 %3402  ;;  %v3646_v27 = vrot.slane %v3397_v58, %v9722_v51 }
 0x50e   : > { %v5664_v4 = vrot.slane %v11050_v11, %v9395_v47  ;;  %v5668_v57 = vrot.slane %v11050_v11, %v10081_v9  ;;  %v5672_v43 = vrot.slane %v11050_v11, %v10084_v35  ;;  %v5676_v48 = vrot.slane %v11050_v11, %v10090_v16 }
 0x510   : > { %v5742_v34 = vmul.f32 %v13110_v10, %v5664_v4  ;;  %v5741_v19 = vmul.f32 %v13111_v18, %v5664_v4  ;;  %v5744_v62 = vmul.f32 %v13112_v29, %v5668_v57  ;;  %v5743_v13 = vmul.f32 %v13113_v17, %v5668_v57  ;;  %v3400_v42 = vpop.permute.xlu1 %3399 }
 0x511   : > { %v5746_v60 = vmul.f32 %v13114_v31, %v5672_v43  ;;  %v5745_v21 = vmul.f32 %v13115_v20, %v5672_v43  ;;  %v3421_v45 = vpop.permute.xlu0 %3420  ;;  %v5748_v26 = vmul.f32 %v13116_v38, %v5676_v48  ;;  %v5747_v55 = vmul.f32 %v13117_v54, %v5676_v48 }
 0x512   : > { %5780 = vperm.xlu0 %7835, %v5742_v34   ;;  %5775 = vperm.xlu1 %7834, %v5741_v19   ;;  %v3650_v49 = vrot.slane %v3400_v42, %v9712_v61  ;;  %v3655_v19 = vrot.slane %v3403_v32, %v13109_v63  ;;  %v3684_v32 = vrot.slane %v3421_v45, %v9722_v51 }
 0x514   : > { %v3409_v3 = vpop.permute.xlu1 %3408  ;;  %v3651_v10 = vsel %vm2637_vm8, %v3650_v49, %v3646_v27 }
 0x515   : > { %v3418_v12 = vpop.permute.xlu0 %3417  ;;  %v3665_v28 = vrot.slane %v3409_v3, %v9722_v51  ;;  %v3656_v43 = vsel %vm2644_vm10, %v3655_v19, %v3651_v10 }
 0x516   : > { %5790 = vperm.xlu0 %7835, %v5744_v62   ;;  %5785 = vperm.xlu1 %7834, %v5743_v13   ;;  %v3679_v62 = vrot.slane %v3418_v12, %v9964_v6 }
 0x518   : > { %v3412_v14 = vpop.permute.xlu1 %3411 }
 0x519   : > { %v3433_v1 = vpop.permute.xlu0 %3432  ;;  %v3669_v40 = vrot.slane %v3412_v14, %v9712_v61 }
 0x51a   : > { %5800 = vperm.xlu0 %7835, %v5746_v60   ;;  %5795 = vperm.xlu1 %7834, %v5745_v21   ;;  %v3703_v13 = vrot.slane %v3433_v1, %v9722_v51 }
 0x51b   : > { %v3670_v34 = vsel %vm2637_vm8, %v3669_v40, %v3665_v28 }
 0x51c   : > { %v3415_v53 = vpop.permute.xlu1 %3414 }
 0x51d   : > { %v3439_v25 = vpop.permute.xlu0 %3438  ;;  %v3674_v37 = vrot.slane %v3415_v53, %v13109_v63 }
 0x51e   : > { %5810 = vperm.xlu0 %7835, %v5748_v26   ;;  %5805 = vperm.xlu1 %7834, %v5747_v55   ;;  %v3712_v20 = vrot.slane %v3439_v25, %v13109_v63 }
 0x51f   : > { %v3675_v57 = vsel %vm2644_vm10, %v3674_v37, %v3670_v34 }
 0x520   : > { %v3424_v8 = vpop.permute.xlu1 %3423  ;;  %v3680_v60 = vsel %vm2651_vm11, %v3679_v62, %v3675_v57 }
 0x521   : > { %v3448_v33 = vpop.permute.xlu0 %3447  ;;  %v3688_v17 = vrot.slane %v3424_v8, %v9712_v61 }
 0x522   : > { %v3726_v3 = vrot.slane %v3448_v33, %v9712_v61 }
 0x523   : > { %v3689_v12 = vsel %vm2637_vm8, %v3688_v17, %v3684_v32 }
 0x524   : > { %v3406_v44 = vpop.permute.xlu1 %3405 }
 0x525   : > { %v3451_v41 = vpop.permute.xlu0 %3450  ;;  %v3660_v58 = vrot.slane %v3406_v44, %v9964_v6 }
 0x526   : > { %v3731_v14 = vrot.slane %v3451_v41, %v13109_v63 }
 0x527   : > { %v3661_v45 = vsel %vm2651_vm11, %v3660_v58, %v3656_v43 }
 0x528   : > { %v3427_v7 = vpop.permute.xlu1 %3426  ;;  %v3802_v49 = vsel %vm938_vm1, %v3680_v60, %v3661_v45 }
 0x529   : > { %v3460_v59 = vpop.permute.xlu0 %3459  ;;  %v3693_v21 = vrot.slane %v3427_v7, %v13109_v63 }
 0x52a   : > { %v3745_v38 = vrot.slane %v3460_v59, %v9712_v61 }
 0x52b   : > { %v3694_v44 = vsel %vm2644_vm10, %v3693_v21, %v3689_v12 }
 0x52c   : > { %v3436_v52 = vpop.permute.xlu1 %3435 }
 0x52d   : > { %v3463_v23 = vpop.permute.xlu0 %3462  ;;  %v3707_v29 = vrot.slane %v3436_v52, %v9712_v61 }
 0x52e   : > { %v3750_v7 = vrot.slane %v3463_v23, %v13109_v63 }
 0x52f   : > { %v3708_v26 = vsel %vm2637_vm8, %v3707_v29, %v3703_v13 }
 0x530   : > { %v3430_v24 = vpop.permute.xlu1 %3429  ;;  %v3713_v59 = vsel %vm2644_vm10, %v3712_v20, %v3708_v26  ;;  %v13118_v20 = vld [vmem:[#allocation26_spill] sm:$0xff] }
 0x531   : > { %v3472_v56 = vpop.permute.xlu0 %3471  ;;  %v3698_v54 = vrot.slane %v3430_v24, %v9964_v6 }
 0x533   : > { %v3699_v41 = vsel %vm2651_vm11, %v3698_v54, %v3694_v44 }
 0x534   : > { %v3445_v0 = vpop.permute.xlu1 %3444 }
 0x535   : > { %v11068_v46 = vpop.permute.xlu0 %3474  ;;  %v3722_v42 = vrot.slane %v3445_v0, %v9722_v51  ;;  %v3764_v0 = vrot.slane %v3472_v56, %v9712_v61 }
 0x537   : > { %v3727_v53 = vsel %vm2637_vm8, %v3726_v3, %v3722_v42 }
 0x538   : > { %v3442_v30 = vpop.permute.xlu1 %3441 }
 0x539   : > { %v3484_v4 = vpop.permute.xlu0 %3483  ;;  %v3717_v1 = vrot.slane %v3442_v30, %v9964_v6 }
 0x53a   : > { %v3783_v30 = vrot.slane %v3484_v4, %v9712_v61  ;;  %v3803_v61 = vsel %vm941_vm2, %v3699_v41, %v3802_v49 }
 0x53b   : > { %v3718_v40 = vsel %vm2651_vm11, %v3717_v1, %v3713_v59 }
 0x53c   : > { %v3457_v50 = vpop.permute.xlu1 %3456 }
 0x53d   : > { %v3741_v31 = vrot.slane %v3457_v50, %v9722_v51  ;;  %v3487_v55 = vpop.permute.xlu0 %3486 }
 0x53e   : > { %v3788_v37 = vrot.slane %v3487_v55, %v13109_v63 }
 0x53f   : > { %v3746_v25 = vsel %vm2637_vm8, %v3745_v38, %v3741_v31 }
 0x540   : > { %v3454_v15 = vpop.permute.xlu1 %3453  ;;  %v3751_v23 = vsel %vm2644_vm10, %v3750_v7, %v3746_v25  ;;  %v13120_v25 = vld [vmem:[#allocation37_spill] sm:$0xff] }
 0x541   : > { %v3736_v8 = vrot.slane %v3454_v15, %v9964_v6  ;;  %v3732_v15 = vsel %vm2644_vm10, %v3731_v14, %v3727_v53  ;;  %v3490_v28 = vpop.permute.xlu0 %3489 }
 0x542   : > { %v3793_v62 = vrot.slane %v3490_v28, %v9964_v6 }
 0x543   : > { %v3737_v27 = vsel %vm2651_vm11, %v3736_v8, %v3732_v15 }
 0x544   : > { %v3469_v18 = vpop.permute.xlu1 %3468 }
 0x545   : > { %v3760_v33 = vrot.slane %v3469_v18, %v9722_v51  ;;  %v3804_v18 = vsel %vm944_vm3, %v3718_v40, %v3803_v61  ;;  %v13123_v40 = vld [vmem:[#allocation22_spill] sm:$0xff] }
 0x546   : > { %v3805_v29 = vsel %vm947_vm4, %v3737_v27, %v3804_v18  ;;  %v13126_v18 = vld [vmem:[#allocation23_spill] sm:$0xff] }
 0x547   : > { %v3765_v10 = vsel %vm2637_vm8, %v3764_v0, %v3760_v33  ;;  %v13121_v33 = vld [vmem:[#allocation36_spill] sm:$0xff] }
 0x548   : > { %v3466_v48 = vpop.permute.xlu1 %3465 }
 0x549   : > { %v3755_v52 = vrot.slane %v3466_v48, %v9964_v6  ;;  %v13119_v48 = vld [vmem:[#allocation35_spill] sm:$0xff] }
 0x54b   : > { %v3756_v4 = vsel %vm2651_vm11, %v3755_v52, %v3751_v23 }
 0x54c   : > { %v3481_v24 = vpop.permute.xlu1 %3480  ;;  %v3806_v13 = vsel %vm950_vm5, %v3756_v4, %v3805_v29  ;;  %v13125_v4 = vld [vmem:[#allocation28_spill] sm:$0xff] }
 0x54d   : > { %v3779_v50 = vrot.slane %v3481_v24, %v9722_v51  ;;  %v3769_v51 = vrot.slane %v11068_v46, %v13109_v63 }
 0x54f   : > { %v3784_v56 = vsel %vm2637_vm8, %v3783_v30, %v3779_v50  ;;  %v3770_v17 = vsel %vm2644_vm10, %v3769_v51, %v3765_v10  ;;  %v13122_v30 = vld [vmem:[#allocation27_spill] sm:$0xff] }
 0x550   : > { %v3478_v34 = vpop.permute.xlu1 %3477  ;;  %v3789_v57 = vsel %vm2644_vm10, %v3788_v37, %v3784_v56 }
 0x551   : > { %v3774_v19 = vrot.slane %v3478_v34, %v9964_v6  ;;  %v3794_v63 = vsel %vm2651_vm11, %v3793_v62, %v3789_v57 }
 0x553   : > { %v3775_v58 = vsel %vm2651_vm11, %v3774_v19, %v3770_v17  ;;  %v13127_v17 = vld [vmem:[#allocation139_spill] sm:$0xff] }
 0x554   : > { %v3807_v46 = vsel %vm953_vm6, %v3775_v58, %v3806_v13 }
 0x555   : > { %v3808_v43 = vsel %vm956_vm7, %v3794_v63, %v3807_v46 }
 0x556   : > { %v3814_v42 = vsel %vm2954_vm12, %v3808_v43, 0.0 }
 0x557   : > { %3815 = vadd.xlane.f32.xlu0 %v3814_v42  ;;  %v13128_v42 = vld [vmem:[#allocation136_spill] sm:$0xff] }
 0x582   : > { %v5656_v31 = vpop.xlane.xlu1 %5655 }
 0x583   : > { %8158 = vrcp.f32 %v5656_v31 }
 0x586   : > { %v3813_v32 = vpop.xlane.xlu1 %3812 }
 0x587   : > { %8160 = vrcp.f32 %v3813_v32 }
 0x58d   : > { %v11137_v38 = vpop.eup %8158 }
 0x58e   : > { %v5696_v26 = vrot.slane %v11137_v38, %v9395_v47  ;;  %v5700_v1 = vrot.slane %v11137_v38, %v10081_v9  ;;  %v5704_v59 = vrot.slane %v11137_v38, %v10084_v35 }
 0x590   : > { %v5758_v45 = vmul.f32 %v10303_v36, %v5696_v26  ;;  %v5757_v14 = vmul.f32 %v10369_v5, %v5696_v26  ;;  %v5760_v36 = vmul.f32 %v10325_v22, %v5700_v1  ;;  %v5759_v5 = vmul.f32 %v10375_v39, %v5700_v1  ;;  %v13124_v39 = vld [vmem:[#allocation146_spill] sm:$0xff] }
 0x591   : > { %v5781_v6 = vpop.permute.xlu0 %5780  ;;  %v5776_v60 = vpop.permute.xlu1 %5775  ;;  %v5762_v27 = vmul.f32 %v10338_v2, %v5704_v59  ;;  %v5761_v61 = vmul.f32 %v13124_v39, %v5704_v59  ;;  %v13135_v39 = vld [vmem:[#allocation154_spill] sm:$0xff] }
 0x592   : > { %v5934_v21 = vmul.f32 %v5781_v6, %v13118_v20  ;;  %v5933_v3 = vmul.f32 %v5776_v60, %v13119_v48  ;;  %5860 = vperm.xlu0 %7835, %v5758_v45   ;;  %5855 = vperm.xlu1 %7834, %v5757_v14   ;;  %v11149_v41 = vpop.eup %8160  ;;  %v13129_v48 = vld [vmem:[#allocation155_spill] sm:$0xff] }
 0x593   : > { %v11158_v28 = vrot.slane %v11149_v41, %v9395_v47  ;;  %v3828_v63 = vrot.slane %v11149_v41, %v10081_v9  ;;  %v3832_v26 = vrot.slane %v11149_v41, %v10084_v35 }
 0x594   : > { %v5965_v54 = vadd.f32 %v5934_v21, %v5933_v3 }
 0x595   : > { %v5791_v55 = vpop.permute.xlu0 %5790  ;;  %v5786_v12 = vpop.permute.xlu1 %5785  ;;  %v3902_v58 = vmul.f32 %v13127_v17, %v11158_v28  ;;  %v3901_v31 = vmul.f32 %v13128_v42, %v11158_v28  ;;  %v3905_v3 = vmul.f32 %v13129_v48, %v3828_v63  ;;  %v13143_v42 = vld [vmem:[#allocation147_spill] sm:$0xff] }
 0x596   : > { %v5966_v53 = vrot.slane %v5965_v54, 4  ;;  %v5936_v8 = vmul.f32 %v5791_v55, %v13120_v25  ;;  %v5935_v44 = vmul.f32 %v5786_v12, %v13121_v33  ;;  %5870 = vperm.xlu0 %7835, %v5760_v36   ;;  %5865 = vperm.xlu1 %7834, %v5759_v5   ;;  %v13130_v12 = vld [vmem:[#allocation167_spill] sm:$0xff] }
 0x597   : > { %v3906_v45 = vmul.f32 %v13130_v12, %v3828_v63  ;;  %v13131_v33 = vld [vmem:[#allocation111_spill] sm:$0xff] }
 0x598   : > { %v5967_v7 = vadd.f32 %v5966_v53, %v5965_v54  ;;  %v5972_v0 = vadd.f32 %v5936_v8, %v5935_v44  ;;  %v3909_v44 = vmul.f32 %v13131_v33, %v3832_v26  ;;  %v13149_v12 = vld [vmem:[#allocation107_spill] sm:$0xff]  ;;  %v13153_v33 = vld [vmem:[#allocation137_spill] sm:$0xff] }
 0x599   : > { %v5801_v52 = vpop.permute.xlu0 %5800  ;;  %v5796_v24 = vpop.permute.xlu1 %5795 }
 0x59a   : > { %v5938_v50 = vmul.f32 %v5801_v52, %v13122_v30  ;;  %v5968_v49 = vrot.slane %v5967_v7, 2  ;;  %v5937_v15 = vmul.f32 %v5796_v24, %v13123_v40  ;;  %v5973_v23 = vrot.slane %v5972_v0, 4  ;;  %5880 = vperm.xlu0 %7835, %v5762_v27   ;;  %5875 = vperm.xlu1 %7834, %v5761_v61   ;;  %v13132_v24 = vld [vmem:[#allocation151_spill] sm:$0xff] }
 0x59b   : > { %v3910_v36 = vmul.f32 %v13132_v24, %v3832_v26  ;;  %v13133_v40 = vld [vmem:[#allocation143_spill] sm:$0xff]  ;;  %v3836_v27 = vrot.slane %v11149_v41, %v10090_v16 }
 0x59c   : > { %v5969_v37 = vadd.f32 %v5968_v49, %v5967_v7  ;;  %v5979_v10 = vadd.f32 %v5938_v50, %v5937_v15  ;;  %v5974_v51 = vadd.f32 %v5973_v23, %v5972_v0  ;;  %v3903_v15 = vmul.f32 %v13133_v40, %v11158_v28  ;;  %v13134_v23 = vld [vmem:[#allocation159_spill] sm:$0xff]  ;;  %v13160_v40 = vld [vmem:[#allocation206_spill] sm:$0xff] }
 0x59d   : > { %v5811_v22 = vpop.permute.xlu0 %5810  ;;  %v5806_v56 = vpop.permute.xlu1 %5805  ;;  %v3913_v61 = vmul.f32 %v13135_v39, %v3836_v27 }
 0x59e   : > { %v5940_v34 = vmul.f32 %v5811_v22, %v13125_v4  ;;  %v5939_v19 = vmul.f32 %v5806_v56, %v13126_v18  ;;  %v5970_v57 = vrot.slane %v5969_v37, 1  ;;  %v5980_v29 = vrot.slane %v5979_v10, 4  ;;  %3972 = vperm.xlu1 %7834, %v3902_v58   ;;  %3967 = vperm.xlu0 %7835, %v3901_v31   ;;  %v13141_v58 = vld [vmem:[#allocation105_spill] sm:$0xff] }
 0x59f   : > { %v5975_v62 = vrot.slane %v5974_v51, 2  ;;  %v3904_v31 = vmul.f32 %v13143_v42, %v11158_v28  ;;  %v13150_v28 = vld [vmem:[#allocation119_spill] sm:$0xff]  ;;  %v13168_v42 = vld [vmem:[#allocation157_spill] sm:$0xff] }
 0x5a0   : > { %v5986_v2 = vadd.f32 %v5940_v34, %v5939_v19  ;;  %v5981_v13 = vadd.f32 %v5980_v29, %v5979_v10  ;;  %v5971_v46 = vadd.f32 %v5970_v57, %v5969_v37  ;;  %v3907_v37 = vmul.f32 %v13134_v23, %v3828_v63  ;;  %v13137_v34 = vld [vmem:[#allocation179_spill] sm:$0xff]  ;;  %v13138_v19 = vld [vmem:[#allocation113_spill] sm:$0xff]  ;;  %v13161_v23 = vld [vmem:[#allocation208_spill] sm:$0xff] }
 0x5a1   : > { %v5976_v43 = vadd.f32 %v5975_v62, %v5974_v51  ;;  %v13136_v51 = vld [vmem:[#allocation158_spill] sm:$0xff]  ;;  %v3840_v18 = vrot.slane %v11149_v41, %v13137_v34  ;;  %v3911_v57 = vmul.f32 %v13138_v19, %v3832_v26  ;;  %v13139_v29 = vld [vmem:[#allocation109_spill] sm:$0xff] }
 0x5a2   : > { %v5987_v32 = vrot.slane %v5986_v2, 4  ;;  %v5982_v6 = vrot.slane %v5981_v13, 2  ;;  %v6077_v54 = vpack.c.bf16 %v5971_v46, %v5971_v46  ;;  %3987 = vperm.xlu1 %7834, %v3905_v3   ;;  %3992 = vperm.xlu0 %7835, %v3906_v45   ;;  %v3914_v4 = vmul.f32 %v13136_v51, %v3836_v27  ;;  %v13142_v46 = vld [vmem:[#allocation180_spill] sm:$0xff]  ;;  %v13147_v3 = vld [vmem:[#allocation181_spill] sm:$0xff] }
 0x5a3   : > { %v5977_v60 = vrot.slane %v5976_v43, 1  ;;  %v3917_v62 = vmul.f32 %v13139_v29, %v3840_v18  ;;  %v13163_v51 = vld [vmem:[#allocation140_spill] sm:$0xff] }
 0x5a4   : > { %v5988_v20 = vadd.f32 %v5987_v32, %v5986_v2  ;;  %v5983_v21 = vadd.f32 %v5982_v6, %v5981_v13  ;;  %v6125_v7 = vunpack.c.l.b16 %v6077_v54  ;;  %v13140_v2 = vld [vmem:[#allocation163_spill] sm:$0xff]  ;;  %v3908_v13 = vmul.f32 %v13141_v58, %v3828_v63  ;;  %v13165_v29 = vld [vmem:[#allocation148_spill] sm:$0xff] }
 0x5a5   : > { %v5978_v55 = vadd.f32 %v5977_v60, %v5976_v43  ;;  %v3918_v17 = vmul.f32 %v13140_v2, %v3840_v18  ;;  %v3844_v43 = vrot.slane %v11149_v41, %v13142_v46  ;;  %v13144_v32 = vld [vmem:[#allocation123_spill] sm:$0xff]  ;;  %v13145_v60 = vld [vmem:[#allocation162_spill] sm:$0xff]  ;;  %v3848_v54 = vrot.slane %v11149_v41, %v13147_v3 }
 0x5a6   : > { %v5989_v14 = vrot.slane %v5988_v20, 2  ;;  %v5984_v1 = vrot.slane %v5983_v21, 1  ;;  %4007 = vperm.xlu1 %7834, %v3909_v44   ;;  %4012 = vperm.xlu0 %7835, %v3910_v36   ;;  %v13148_v63 = vld [vmem:[#allocation171_spill] sm:$0xff]  ;;  %v13166_v2 = vld [vmem:[#allocation150_spill] sm:$0xff] }
 0x5a7   : > { %v6078_v53 = vpack.c.bf16 %v5978_v55, %v5978_v55  ;;  %v3921_v6 = vmul.f32 %v13144_v32, %v3844_v43  ;;  %v3922_v55 = vmul.f32 %v13148_v63, %v3844_v43  ;;  %v3926_v45 = vmul.f32 %v13149_v12, %v3848_v54  ;;  %v13156_v36 = vld [vmem:[#allocation115_spill] sm:$0xff]  ;;  %v13169_v32 = vld [vmem:[#allocation144_spill] sm:$0xff] }
 0x5a8   : > { %v5990_v25 = vadd.f32 %v5989_v14, %v5988_v20  ;;  %v5985_v8 = vadd.f32 %v5984_v1, %v5983_v21  ;;  %v3915_v20 = vmul.f32 %v13145_v60, %v3836_v27  ;;  %v13146_v21 = vld [vmem:[#allocation166_spill] sm:$0xff]  ;;  %v3912_v14 = vmul.f32 %v13150_v28, %v3832_v26  ;;  %v13151_v1 = vld [vmem:[#allocation172_spill] sm:$0xff]  ;;  %v13157_v26 = vld [vmem:[#allocation207_spill] sm:$0xff] }
 0x5a9   : > { %v6126_v59 = vunpack.c.l.b16 %v6078_v53  ;;  %v3919_v48 = vmul.f32 %v13146_v21, %v3840_v18  ;;  %v3923_v53 = vmul.f32 %v13151_v1, %v3844_v43  ;;  %v3925_v44 = vmul.f32 %v13153_v33, %v3848_v54  ;;  %v13170_v60 = vld [vmem:[#allocation153_spill] sm:$0xff]  ;;  %v13173_v12 = vld [vmem:[#allocation196_spill] sm:$0xff] }
 0x5aa   : > { %v5991_v52 = vrot.slane %v5990_v25, 1  ;;  %v6079_v5 = vpack.c.bf16 %v5985_v8, %v5985_v8  ;;  %3977 = vperm.xlu1 %7834, %v3903_v15   ;;  %3997 = vperm.xlu0 %7835, %v3907_v37   ;;  %v3924_v15 = vmul.f32 %v13160_v40, %v3844_v43  ;;  %v3928_v37 = vmul.f32 %v13161_v23, %v3848_v54  ;;  %v13174_v28 = vld [vmem:[#allocation160_spill] sm:$0xff] }
 0x5ab   : > { %v6141_v0 = vsel %vm938_vm1, %v6126_v59, %v6125_v7  ;;  %v13154_v7 = vld [vmem:[#allocation204_spill] sm:$0xff] }
 0x5ac   : > { %v5992_v30 = vadd.f32 %v5991_v52, %v5990_v25  ;;  %v6127_v50 = vunpack.c.l.b16 %v6079_v5  ;;  %v13152_v25 = vld [vmem:[#allocation183_spill] sm:$0xff]  ;;  %v13155_v52 = vld [vmem:[#allocation117_spill] sm:$0xff]  ;;  %v3927_v5 = vmul.f32 %v13156_v36, %v3848_v54  ;;  %v13175_v1 = vld [vmem:[#allocation152_spill] sm:$0xff] }
 0x5ad   : > { %v3852_v8 = vrot.slane %v11149_v41, %v13152_v25  ;;  %v3916_v24 = vmul.f32 %v13155_v52, %v3836_v27  ;;  %v13159_v41 = vld [vmem:[#allocation131_spill] sm:$0xff]  ;;  %v13162_v27 = vld [vmem:[#allocation209_spill] sm:$0xff] }
 0x5ae   : > { %v6080_v49 = vpack.c.bf16 %v5992_v30, %v5992_v30  ;;  %v6142_v10 = vsel %vm941_vm2, %v6127_v50, %v6141_v0  ;;  %4027 = vperm.xlu1 %7834, %v3913_v61   ;;  %4032 = vperm.xlu0 %7835, %v3914_v4   ;;  %v13158_v30 = vld [vmem:[#allocation205_spill] sm:$0xff] }
 0x5af   : > { %v3930_v59 = vmul.f32 %v13154_v7, %v3852_v8  ;;  %v3929_v0 = vmul.f32 %v13157_v26, %v3852_v8  ;;  %v3931_v50 = vmul.f32 %v13158_v30, %v3852_v8  ;;  %v13177_v7 = vld [vmem:[#allocation202_spill] sm:$0xff]  ;;  %v13178_v52 = vld [vmem:[#allocation145_spill] sm:$0xff] }
 0x5b0   : > { %v6128_v22 = vunpack.c.l.b16 %v6080_v49  ;;  %v3920_v49 = vmul.f32 %v13159_v41, %v3840_v18  ;;  %v13164_v18 = vld [vmem:[#allocation141_spill] sm:$0xff] }
 0x5b2   : > { %v11183_v56 = vsel %vm944_vm3, %v6128_v22, %v6142_v10  ;;  %4017 = vperm.xlu1 %7834, %v3911_v57   ;;  %4047 = vperm.xlu0 %7835, %v3917_v62   ;;  %v3932_v10 = vmul.f32 %v13162_v27, %v3852_v8  ;;  %v13176_v8 = vld [vmem:[#allocation174_spill] sm:$0xff] }
 0x5b6   : > { %4052 = vperm.xlu1 %7834, %v3918_v17   ;;  %4002 = vperm.xlu0 %7835, %v3908_v13   ;;  %v13167_v13 = vld [vmem:[#allocation156_spill] sm:$0xff] }
 0x5ba   : > { %3982 = vperm.xlu1 %7834, %v3904_v31   ;;  %4067 = vperm.xlu0 %7835, %v3921_v6  }
 0x5be   : > { %4037 = vperm.xlu1 %7834, %v3915_v20   ;;  %4057 = vperm.xlu0 %7835, %v3919_v48   ;;  %v13171_v48 = vld [vmem:[#allocation164_spill] sm:$0xff] }
 0x5c2   : > { %4072 = vperm.xlu1 %7834, %v3922_v55   ;;  %4092 = vperm.xlu0 %7835, %v3926_v45  }
 0x5c6   : > { %4022 = vperm.xlu1 %7834, %v3912_v14   ;;  %4077 = vperm.xlu0 %7835, %v3923_v53  }
 0x5ca   : > { %4087 = vperm.xlu1 %7834, %v3925_v44   ;;  %4112 = vperm.xlu0 %7835, %v3930_v59  }
 0x5ce   : > { %4042 = vperm.xlu1 %7834, %v3916_v24   ;;  %4097 = vperm.xlu0 %7835, %v3927_v5  }
 0x5d2   : > { %4107 = vperm.xlu1 %7834, %v3929_v0   ;;  %4117 = vperm.xlu0 %7835, %v3931_v50   ;;  %v13179_v0 = vld [vmem:[#allocation46_spill] sm:$0xff]  ;;  %v13180_v50 = vld [vmem:[#allocation44_spill] sm:$0xff] }
 0x5d6   : > { %4062 = vperm.xlu1 %7834, %v3920_v49   ;;  %v13181_v49 = vld [vmem:[#allocation203_spill] sm:$0xff] }
 0x5da   : > { %4082 = vperm.xlu1 %7834, %v3924_v15   ;;  %v13182_v15 = vld [vmem:[#allocation168_spill] sm:$0xff] }
 0x5de   : > { %4102 = vperm.xlu1 %7834, %v3928_v37  }
 0x5e2   : > { %4122 = vperm.xlu1 %7834, %v3932_v10  }
 0x5e4   : > { %v3816_v22 = vpop.xlane.xlu0 %3815 }
 0x5e5   : > { %8162 = vrcp.f32 %v3816_v22  ;;  %v13183_v22 = vld [vmem:[#allocation211_spill] sm:$0xff] }
 0x5ef   : > { %v11218_v39 = vpop.eup %8162 }
 0x5f0   : > { %v3856_v61 = vrot.slane %v11218_v39, %v9395_v47  ;;  %v3860_v57 = vrot.slane %v11218_v39, %v10081_v9  ;;  %v3864_v58 = vrot.slane %v11218_v39, %v10084_v35  ;;  %v3868_v21 = vrot.slane %v11218_v39, %v10090_v16  ;;  %v13172_v35 = vld [vmem:[#allocation176_spill] sm:$0xff]  ;;  %v8214_v47 = vld [vmem:[%s8908_s16 + $0x348] sm:$0xff] }
 0x5f1   : > { %v11240_v55 = vrot.slane %v11218_v39, %v13137_v34  ;;  %v11250_v44 = vrot.slane %v11218_v39, %v13142_v46  ;;  %v11257_v26 = vrot.slane %v11218_v39, %v13147_v3 }
 0x5f2   : > { %v3933_v4 = vmul.f32 %v13163_v51, %v3856_v61  ;;  %v3934_v19 = vmul.f32 %v13164_v18, %v3856_v61  ;;  %v3937_v62 = vmul.f32 %v13165_v29, %v3860_v57  ;;  %v3938_v17 = vmul.f32 %v13166_v2, %v3860_v57  ;;  %v13186_v29 = vld [vmem:[#allocation173_spill] sm:$0xff] }
 0x5f3   : > { %v3941_v43 = vmul.f32 %v13167_v13, %v3864_v58  ;;  %v3942_v31 = vmul.f32 %v13168_v42, %v3864_v58  ;;  %v3935_v6 = vmul.f32 %v13169_v32, %v3856_v61  ;;  %v3939_v20 = vmul.f32 %v13170_v60, %v3860_v57 }
 0x5f4   : > { %4127 = vperm.xlu1 %7834, %v3933_v4   ;;  %4132 = vperm.xlu0 %7835, %v3934_v19   ;;  %v3945_v54 = vmul.f32 %v13171_v48, %v3868_v21  ;;  %v3946_v63 = vmul.f32 %v13172_v35, %v3868_v21  ;;  %v3949_v45 = vmul.f32 %v13173_v12, %v11240_v55  ;;  %v13184_v4 = vld [vmem:[#allocation50_spill] sm:$0xff]  ;;  %v13185_v19 = vld [vmem:[#allocation48_spill] sm:$0xff] }
 0x5f5   : > { %v3943_v14 = vmul.f32 %v13174_v28, %v3864_v58  ;;  %v3940_v53 = vmul.f32 %v13175_v1, %v3860_v57  ;;  %v3950_v33 = vmul.f32 %v13176_v8, %v11240_v55  ;;  %v3953_v59 = vmul.f32 %v13177_v7, %v11250_v44  ;;  %v13189_v48 = vld [vmem:[#allocation54_spill] sm:$0xff]  ;;  %v13190_v35 = vld [vmem:[#allocation52_spill] sm:$0xff]  ;;  %v13192_v8 = vld [vmem:[#allocation175_spill] sm:$0xff] }
 0x5f6   : > { %v3936_v24 = vmul.f32 %v13178_v52, %v3856_v61  ;;  %v3944_v40 = vmul.f32 %v13181_v49, %v3864_v58  ;;  %v3947_v23 = vmul.f32 %v13182_v15, %v3868_v21  ;;  %v3957_v61 = vmul.f32 %v13183_v22, %v11257_v26  ;;  %v13191_v1 = vld [vmem:[#allocation214_spill] sm:$0xff]  ;;  %v13193_v52 = vld [vmem:[#allocation76_spill] sm:$0xff] }
 0x5f7   : > { %v13195_v15 = vld [vmem:[#allocation200_spill] sm:$0xff] }
 0x5f8   : > { %4147 = vperm.xlu1 %7834, %v3937_v62   ;;  %4152 = vperm.xlu0 %7835, %v3938_v17   ;;  %v3954_v62 = vmul.f32 %v13186_v29, %v11250_v44 }
 0x5fc   : > { %4167 = vperm.xlu1 %7834, %v3941_v43   ;;  %4172 = vperm.xlu0 %7835, %v3942_v31   ;;  %v13187_v43 = vld [vmem:[#allocation128_spill] sm:$0xff]  ;;  %v13188_v31 = vld [vmem:[#allocation165_spill] sm:$0xff] }
 0x5fd   : > { %v3948_v42 = vmul.f32 %v13187_v43, %v3868_v21  ;;  %v3951_v32 = vmul.f32 %v13188_v31, %v11240_v55 }
 0x600   : > { %4137 = vperm.xlu1 %7834, %v3935_v6   ;;  %4157 = vperm.xlu0 %7835, %v3939_v20   ;;  %v11274_v6 = vrot.slane %v11218_v39, %v13152_v25  ;;  %v3958_v39 = vmul.f32 %v13192_v8, %v11257_v26 }
 0x604   : > { %4187 = vperm.xlu1 %7834, %v3945_v54   ;;  %4192 = vperm.xlu0 %7835, %v3946_v63  }
 0x608   : > { %4207 = vperm.xlu1 %7834, %v3949_v45   ;;  %4177 = vperm.xlu0 %7835, %v3943_v14  }
 0x60c   : > { %4162 = vperm.xlu1 %7834, %v3940_v53   ;;  %4212 = vperm.xlu0 %7835, %v3950_v33   ;;  %v3961_v53 = vmul.f32 %v13191_v1, %v11274_v6  ;;  %v13204_v1 = vld [vmem:[#allocation198_spill] sm:$0xff] }
 0x610   : > { %4227 = vperm.xlu1 %7834, %v3953_v59   ;;  %4142 = vperm.xlu0 %7835, %v3936_v24  }
 0x611   : > { %v5861_v36 = vpop.permute.xlu0 %5860  ;;  %v5856_v5 = vpop.permute.xlu1 %5855 }
 0x612   : > { %v5950_v30 = vmul.f32 %v5861_v36, %v13179_v0  ;;  %v5949_v41 = vmul.f32 %v5856_v5, %v13180_v50  ;;  %v13194_v36 = vld [vmem:[#allocation78_spill] sm:$0xff] }
 0x614   : > { %v6021_v37 = vadd.f32 %v5950_v30, %v5949_v41  ;;  %4182 = vperm.xlu1 %7834, %v3944_v40   ;;  %4197 = vperm.xlu0 %7835, %v3947_v23   ;;  %v3952_v23 = vmul.f32 %v13195_v15, %v11240_v55 }
 0x615   : > { %v5871_v27 = vpop.permute.xlu0 %5870  ;;  %v5866_v10 = vpop.permute.xlu1 %5865 }
 0x616   : > { %v6022_v51 = vrot.slane %v6021_v37, 4  ;;  %v5952_v18 = vmul.f32 %v5871_v27, %v13184_v4  ;;  %v5951_v57 = vmul.f32 %v5866_v10, %v13185_v19  ;;  %v13196_v10 = vld [vmem:[#allocation86_spill] sm:$0xff]  ;;  %v13198_v4 = vld [vmem:[#allocation85_spill] sm:$0xff] }
 0x618   : > { %v6023_v2 = vadd.f32 %v6022_v51, %v6021_v37  ;;  %v6028_v17 = vadd.f32 %v5952_v18, %v5951_v57  ;;  %4247 = vperm.xlu1 %7834, %v3957_v61   ;;  %4232 = vperm.xlu0 %7835, %v3954_v62   ;;  %v13197_v61 = vld [vmem:[#allocation169_spill] sm:$0xff] }
 0x619   : > { %v5881_v58 = vpop.permute.xlu0 %5880  ;;  %v5876_v13 = vpop.permute.xlu1 %5875  ;;  %v3955_v51 = vmul.f32 %v13197_v61, %v11250_v44 }
 0x61a   : > { %v6024_v60 = vrot.slane %v6023_v2, 2  ;;  %v6029_v20 = vrot.slane %v6028_v17, 4  ;;  %v5954_v54 = vmul.f32 %v5881_v58, %v13189_v48  ;;  %v5953_v63 = vmul.f32 %v5876_v13, %v13190_v35  ;;  %v13199_v58 = vld [vmem:[#allocation213_spill] sm:$0xff] }
 0x61b   : > { %v3956_v55 = vmul.f32 %v13199_v58, %v11250_v44  ;;  %v13200_v13 = vld [vmem:[#allocation177_spill] sm:$0xff]  ;;  %v13214_v58 = vld [vmem:[#allocation210_spill] sm:$0xff] }
 0x61c   : > { %v6025_v12 = vadd.f32 %v6024_v60, %v6023_v2  ;;  %v6030_v45 = vadd.f32 %v6029_v20, %v6028_v17  ;;  %v6035_v28 = vadd.f32 %v5954_v54, %v5953_v63  ;;  %4202 = vperm.xlu1 %7834, %v3948_v42   ;;  %4217 = vperm.xlu0 %7835, %v3951_v32   ;;  %v13201_v60 = vld [vmem:[#allocation94_spill] sm:$0xff]  ;;  %v13202_v48 = vld [vmem:[#allocation93_spill] sm:$0xff] }
 0x61d   : > { %v3968_v14 = vpop.permute.xlu0 %3967  ;;  %v3973_v21 = vpop.permute.xlu1 %3972  ;;  %v3962_v43 = vmul.f32 %v13200_v13, %v11274_v6  ;;  %v5708_v42 = vrot.slane %v11137_v38, %v10090_v16  ;;  %v11303_v16 = vrot.slane %v11050_v11, %v13137_v34  ;;  %v7933_v13 = vld [vmem:[#allocation10 + $0x8] sm:$0xff]  }
 0x61e   : > { %v6026_v33 = vrot.slane %v6025_v12, 1  ;;  %v6031_v7 = vrot.slane %v6030_v45, 2  ;;  %v6036_v59 = vrot.slane %v6035_v28, 4  ;;  %v4285_v24 = vmul.f32 %v3968_v14, %v13193_v52  ;;  %v13203_v14 = vld [vmem:[#allocation149_spill] sm:$0xff] }
 0x61f   : > { %v4286_v5 = vmul.f32 %v3973_v21, %v13194_v36  ;;  %v5763_v21 = vmul.f32 %v13203_v14, %v5708_v42 }
 0x620   : > { %v6027_v0 = vadd.f32 %v6026_v33, %v6025_v12  ;;  %v6032_v30 = vadd.f32 %v6031_v7, %v6030_v45  ;;  %v6037_v50 = vadd.f32 %v6036_v59, %v6035_v28  ;;  %4267 = vperm.xlu1 %7834, %v3961_v53   ;;  %4252 = vperm.xlu0 %7835, %v3958_v39   ;;  %v13205_v33 = vld [vmem:[#allocation89_spill] sm:$0xff]  ;;  %v13206_v59 = vld [vmem:[#allocation80_spill] sm:$0xff] }
 0x621   : > { %v4349_v41 = vadd.f32 %v4286_v5, %v4285_v24  ;;  %v3993_v49 = vpop.permute.xlu0 %3992  ;;  %v3988_v40 = vpop.permute.xlu1 %3987  ;;  %v3959_v53 = vmul.f32 %v13204_v1, %v11257_v26  ;;  %v13220_v1 = vld [vmem:[#allocation125_spill] sm:$0xff] }
 0x622   : > { %v6033_v37 = vrot.slane %v6032_v30, 1  ;;  %v6038_v27 = vrot.slane %v6037_v50, 2  ;;  %v4290_v22 = vmul.f32 %v3993_v49, %v13196_v10  ;;  %v4289_v18 = vmul.f32 %v3988_v40, %v13198_v4 }
 0x623   : > { %v6085_v19 = vpack.c.bf16 %v6027_v0, %v6027_v0  ;;  %v11312_v40 = vrot.slane %v11137_v38, %v13137_v34  ;;  %v7932_v34 = vld [vmem:[#allocation10] sm:$0xff]  }
 0x624   : > { %v6034_v57 = vadd.f32 %v6033_v37, %v6032_v30  ;;  %v6039_v29 = vadd.f32 %v6038_v27, %v6037_v50  ;;  %4222 = vperm.xlu1 %7834, %v3952_v23   ;;  %4237 = vperm.xlu0 %7835, %v3955_v51   ;;  %v4358_v62 = vadd.f32 %v4290_v22, %v4289_v18  ;;  %v13207_v50 = vld [vmem:[#allocation195_spill] sm:$0xff]  ;;  %v13208_v23 = vld [vmem:[#allocation102_spill] sm:$0xff]  ;;  %v13209_v27 = vld [vmem:[#allocation101_spill] sm:$0xff] }
 0x625   : > { %v4013_v2 = vpop.permute.xlu0 %4012  ;;  %v4008_v17 = vpop.permute.xlu1 %4007  ;;  %v6133_v35 = vunpack.c.l.b16 %v6085_v19  ;;  %v5749_v49 = vmul.f32 %v13207_v50, %v11303_v16  ;;  %v13210_v22 = vld [vmem:[#allocation133_spill] sm:$0xff]  ;;  %v11322_v18 = vrot.slane %v11050_v11, %v13142_v46  ;;  %7668 = vmatpush3.bf16.msra.mxu0 %v7932_v34 }
 0x626   : > { %v6086_v31 = vpack.c.bf16 %v6034_v57, %v6034_v57  ;;  %v6040_v32 = vrot.slane %v6039_v29, 1  ;;  %v4294_v20 = vmul.f32 %v4013_v2, %v13201_v60  ;;  %v4293_v54 = vmul.f32 %v4008_v17, %v13202_v48  ;;  %v13211_v19 = vld [vmem:[#allocation33_spill] sm:$0xff] }
 0x627   : > { %v13213_v2 = vld [vmem:[#allocation121_spill] sm:$0xff]  ;;  %v13215_v60 = vmov 0.0  }
 0x628   : > { %v6134_v63 = vunpack.c.l.b16 %v6086_v31  ;;  %v6041_v12 = vadd.f32 %v6040_v32, %v6039_v29  ;;  %v4367_v45 = vadd.f32 %v4294_v20, %v4293_v54  ;;  %4242 = vperm.xlu1 %7834, %v3956_v55   ;;  %4272 = vperm.xlu0 %7835, %v3962_v43   ;;  %v13212_v29 = vld [vmem:[#allocation97_spill] sm:$0xff]  ;;  %v5765_v17 = vmul.f32 %v13213_v2, %v11312_v40  ;;  %v13216_v20 = vld [vmem:[#allocation90_spill] sm:$0xff] }
 0x629   : > { %v3998_v28 = vpop.permute.xlu0 %3997  ;;  %v3978_v44 = vpop.permute.xlu1 %3977  ;;  %v3963_v55 = vmul.f32 %v13214_v58, %v11274_v6  ;;  %v11334_v32 = vrot.slane %v11137_v38, %v13142_v46  ;;  %7669 = vmatprep.subr.bf16.mxu0 %v13215_v60  ;;  %v13217_v54 = vld [vmem:[#allocation41_spill] sm:$0xff] }
 0x62a   : > { %v6148_v8 = vsel %vm938_vm1, %v6134_v63, %v6133_v35  ;;  %v6087_v39 = vpack.c.bf16 %v6041_v12, %v6041_v12  ;;  %v4291_v7 = vmul.f32 %v3998_v28, %v13205_v33  ;;  %v4287_v52 = vmul.f32 %v3978_v44, %v13206_v59  ;;  %v13218_v63 = vld [vmem:[#allocation197_spill] sm:$0xff]  ;;  %7670 = vmatpush3.bf16.msra.mxu0 %v7933_v13  ;;  %v13221_v33 = vld [vmem:[#allocation47_spill] sm:$0xff] }
 0x62b   : > { %v5751_v12 = vmul.f32 %v13218_v63, %v11322_v18  ;;  %7671 = vmatprep.subr.bf16.mxu0 %v13215_v60 }
 0x62c   : > { %v6135_v24 = vunpack.c.l.b16 %v6087_v39  ;;  %v4359_v36 = vadd.f32 %v4358_v62, %v4291_v7  ;;  %v4350_v5 = vadd.f32 %v4349_v41, %v4287_v52  ;;  %5885 = vperm.xlu1 %7834, %v5763_v21   ;;  %4257 = vperm.xlu0 %7835, %v3959_v53   ;;  %v5764_v41 = vmul.f32 %v13210_v22, %v5708_v42  ;;  %v13223_v52 = vld [vmem:[#allocation212_spill] sm:$0xff] }
 0x62d   : > { %v4033_v0 = vpop.permute.xlu0 %4032  ;;  %v4028_v30 = vpop.permute.xlu1 %4027  ;;  %v5767_v53 = vmul.f32 %v13220_v1, %v11334_v32  ;;  %v13233_v1 = vld [vmem:[#allocation98_spill] sm:$0xff] }
 0x62e   : > { %v11315_v15 = vsel %vm941_vm2, %v6135_v24, %v6148_v8  ;;  %v4298_v37 = vmul.f32 %v4033_v0, %v13208_v23  ;;  %v4297_v10 = vmul.f32 %v4028_v30, %v13209_v27  ;;  %v11347_v8 = vrot.slane %v11050_v11, %v13147_v3  ;;  %v7934_v30 = vld [vmem:[#allocation10 + $0x10] sm:$0xff]   ;;  %v13224_v23 = vld [vmem:[#allocation199_spill] sm:$0xff] }
 0x62f   : > { %v3964_v24 = vmul.f32 %v13223_v52, %v11274_v6  ;;  %v11358_v27 = vrot.slane %v11137_v38, %v13147_v3  ;;  %7672 = vmatpush3.bf16.msra.mxu0 %v7934_v30 }
 0x630   : > { %v4376_v61 = vadd.f32 %v4298_v37, %v4297_v10  ;;  %5815 = vperm.xlu1 %7834, %v5749_v49   ;;  %5890 = vperm.xlu0 %7835, %v5764_v41   ;;  %v5753_v37 = vmul.f32 %v13224_v23, %v11347_v8  ;;  %v13225_v41 = vld [vmem:[#allocation43_spill] sm:$0xff] }
 0x631   : > { %v4048_v51 = vpop.permute.xlu0 %4047  ;;  %v4018_v4 = vpop.permute.xlu1 %4017  ;;  %7673 = vmatprep.subr.bf16.mxu0 %v13215_v60 }
 0x632   : > { %v4301_v57 = vmul.f32 %v4048_v51, %v13211_v19  ;;  %v4295_v62 = vmul.f32 %v4018_v4, %v13212_v29  ;;  %v13226_v4 = vld [vmem:[#allocation31_spill] sm:$0xff] }
 0x634   : > { %v11330_v43 = vadd.f32 %v4367_v45, %v4295_v62  ;;  %5895 = vperm.xlu1 %7834, %v5765_v17   ;;  %4277 = vperm.xlu0 %7835, %v3963_v55   ;;  %v13219_v45 = vld [vmem:[#allocation215_spill] sm:$0xff]  ;;  %v13228_v17 = vld [vmem:[#allocation129_spill] sm:$0xff]  ;;  %v11371_v55 = vrot.slane %v11050_v11, %v13152_v25  ;;  %v11379_v11 = vrot.slane %v11137_v38, %v13152_v25 }
 0x635   : > { %v4003_v42 = vpop.permute.xlu0 %4002  ;;  %v4053_v31 = vpop.permute.xlu1 %4052  ;;  %v3960_v28 = vmul.f32 %v13219_v45, %v11257_v26  ;;  %v13222_v26 = vld [vmem:[#allocation82_spill] sm:$0xff]  ;;  %v5769_v58 = vmul.f32 %v13228_v17, %v11358_v27  ;;  %v7935_v45 = vld [vmem:[#allocation10 + $0x18] sm:$0xff]   ;;  %v13241_v17 = vld [vmem:[#allocation32_spill] sm:$0xff] }
 0x636   : > { %v4292_v48 = vmul.f32 %v4003_v42, %v13216_v20  ;;  %v4302_v35 = vmul.f32 %v4053_v31, %v13217_v54  ;;  %v13229_v42 = vld [vmem:[#allocation57_spill] sm:$0xff]  ;;  %7674 = vmatpush3.bf16.msra.mxu0 %v7935_v45  ;;  %v13244_v45 = vld [vmem:[#allocation63_spill] sm:$0xff] }
 0x637   : > { %v13230_v20 = vld [vmem:[#allocation49_spill] sm:$0xff]  ;;  %7675 = vmatprep.subr.bf16.mxu0 %v13215_v60 }
 0x638   : > { %v4360_v44 = vadd.f32 %v4359_v36, %v4292_v48  ;;  %v4385_v14 = vadd.f32 %v4302_v35, %v4301_v57  ;;  %5825 = vperm.xlu1 %7834, %v5751_v12   ;;  %4262 = vperm.xlu0 %7835, %v3960_v28   ;;  %v13231_v54 = vld [vmem:[#allocation161_spill] sm:$0xff] }
 0x639   : > { %v4068_v21 = vpop.permute.xlu0 %4067  ;;  %v3983_v46 = vpop.permute.xlu1 %3982 }
 0x63a   : > { %v4361_v39 = vrot.slane %v4360_v44, 4  ;;  %v4305_v7 = vmul.f32 %v4068_v21, %v13221_v33  ;;  %v4288_v59 = vmul.f32 %v3983_v46, %v13222_v26  ;;  %v13232_v21 = vld [vmem:[#allocation51_spill] sm:$0xff]  ;;  %v13235_v33 = vld [vmem:[#allocation190_spill] sm:$0xff] }
 0x63c   : > { %v4362_v36 = vadd.f32 %v4361_v39, %v4360_v44  ;;  %v4351_v0 = vadd.f32 %v4350_v5, %v4288_v59  ;;  %5905 = vperm.xlu1 %7834, %v5767_v53   ;;  %4282 = vperm.xlu0 %7835, %v3964_v24   ;;  %v13227_v5 = vld [vmem:[#allocation188_spill] sm:$0xff]  ;;  %v13234_v39 = vld [vmem:[#allocation201_spill] sm:$0xff] }
 0x63d   : > { %v4058_v50 = vpop.permute.xlu0 %4057  ;;  %v4038_v49 = vpop.permute.xlu1 %4037  ;;  %v5750_v34 = vmul.f32 %v13227_v5, %v11303_v16 }
 0x63e   : > { %v4363_v10 = vrot.slane %v4362_v36, 2  ;;  %v4352_v22 = vrot.slane %v4351_v0, 4  ;;  %v4303_v51 = vmul.f32 %v4058_v50, %v13225_v41  ;;  %v4299_v6 = vmul.f32 %v4038_v49, %v13226_v4  ;;  %v13237_v49 = vld [vmem:[#allocation65_spill] sm:$0xff] }
 0x640   : > { %v4364_v19 = vadd.f32 %v4363_v10, %v4362_v36  ;;  %v4353_v57 = vadd.f32 %v4352_v22, %v4351_v0  ;;  %v11365_v29 = vadd.f32 %v4385_v14, %v4303_v51  ;;  %v4377_v62 = vadd.f32 %v4376_v61, %v4299_v6  ;;  %5835 = vperm.xlu1 %7834, %v5753_v37   ;;  %v13236_v36 = vld [vmem:[#allocation134_spill] sm:$0xff]  ;;  %v13239_v10 = vld [vmem:[#allocation135_spill] sm:$0xff] }
 0x641   : > { %5820 = vperm.xlu0 %7835, %v5750_v34   ;;  %v4093_v3 = vpop.permute.xlu0 %4092  ;;  %v4073_v2 = vpop.permute.xlu1 %4072  ;;  %v5766_v61 = vmul.f32 %v13231_v54, %v11312_v40  ;;  %v5755_v40 = vmul.f32 %v13234_v39, %v11371_v55  ;;  %v5771_v0 = vmul.f32 %v13236_v36, %v11379_v11  ;;  %v5768_v22 = vmul.f32 %v13239_v10, %v11334_v32  ;;  %v7936_v6 = vld [vmem:[#allocation10 + $0x20] sm:$0xff]   ;;  %v13242_v32 = vld [vmem:[#allocation192_spill] sm:$0xff]  ;;  %v13246_v39 = vld [vmem:[#allocation45_spill] sm:$0xff] }
 0x642   : > { %v4365_v13 = vrot.slane %v4364_v19, 1  ;;  %v4354_v16 = vrot.slane %v4353_v57, 2  ;;  %v4310_v31 = vmul.f32 %v4093_v3, %v13229_v42  ;;  %v4306_v48 = vmul.f32 %v4073_v2, %v13230_v20  ;;  %v13240_v3 = vld [vmem:[#allocation59_spill] sm:$0xff]  ;;  %7676 = vmatpush3.bf16.msra.mxu0 %v7936_v6  ;;  %v7939_v6 = vld [vmem:[#allocation10 + $0x38] sm:$0xff]  }
 0x643   : > { %7677 = vmatprep.subr.bf16.mxu0 %v13215_v60 }
 0x644   : > { %v4366_v35 = vadd.f32 %v4365_v13, %v4364_v19  ;;  %v4355_v63 = vadd.f32 %v4354_v16, %v4353_v57  ;;  %v4394_v12 = vadd.f32 %v4306_v48, %v4305_v7  ;;  %5915 = vperm.xlu1 %7834, %v5769_v58   ;;  %v5752_v7 = vmul.f32 %v13235_v33, %v11322_v18  ;;  %v13238_v18 = vld [vmem:[#allocation55_spill] sm:$0xff] }
 0x645   : > { %5900 = vperm.xlu0 %7835, %v5766_v61   ;;  %v4078_v28 = vpop.permute.xlu0 %4077  ;;  %v4023_v44 = vpop.permute.xlu1 %4022  ;;  %v7937_v13 = vld [vmem:[#allocation10 + $0x28] sm:$0xff]   ;;  %v5754_v16 = vmul.f32 %v13242_v32, %v11347_v8 }
 0x646   : > { %v4356_v14 = vrot.slane %v4355_v63, 1  ;;  %v4307_v46 = vmul.f32 %v4078_v28, %v13232_v21  ;;  %v4296_v53 = vmul.f32 %v4023_v44, %v13233_v1  ;;  %v4494_v26 = vpack.c.bf16 %v4366_v35, %v4366_v35  ;;  %7678 = vmatpush3.bf16.msra.mxu0 %v7937_v13  ;;  %v13245_v44 = vld [vmem:[#allocation138_spill] sm:$0xff] }
 0x647   : > { %7679 = vmatprep.subr.bf16.mxu0 %v13215_v60 }
 0x648   : > { %v4357_v59 = vadd.f32 %v4356_v14, %v4355_v63  ;;  %v11388_v52 = vadd.f32 %v4394_v12, %v4307_v46  ;;  %v4369_v38 = vadd.f32 %v11330_v43, %v4296_v53  ;;  %5845 = vperm.xlu1 %7834, %v5755_v40   ;;  %v4542_v41 = vunpack.c.l.b16 %v4494_v26  ;;  %v13243_v63 = vld [vmem:[#allocation67_spill] sm:$0xff] }
 0x649   : > { %5830 = vperm.xlu0 %7835, %v5752_v7   ;;  %v4113_v25 = vpop.permute.xlu0 %4112  ;;  %v4088_v24 = vpop.permute.xlu1 %4087  ;;  %v5770_v14 = vmul.f32 %v13245_v44, %v11358_v27  ;;  %v13247_v7 = vld [vmem:[#allocation194_spill] sm:$0xff] }
 0x64a   : > { %v4493_v30 = vpack.c.bf16 %v4357_v59, %v4357_v59  ;;  %v4370_v50 = vrot.slane %v4369_v38, 4  ;;  %v4314_v23 = vmul.f32 %v4113_v25, %v13237_v49  ;;  %v4309_v37 = vmul.f32 %v4088_v24, %v13238_v18  ;;  %v7938_v24 = vld [vmem:[#allocation10 + $0x30] sm:$0xff]  }
 0x64b   : > { %v5756_v26 = vmul.f32 %v13247_v7, %v11371_v55  ;;  %7680 = vmatpush3.bf16.msra.mxu0 %v7938_v24  ;;  %v13253_v24 = vld [vmem:[#allocation71_spill] sm:$0xff] }
 0x64c   : > { %v4541_v51 = vunpack.c.l.b16 %v4493_v30  ;;  %v4371_v4 = vadd.f32 %v4370_v50, %v4369_v38  ;;  %v4403_v43 = vadd.f32 %v4310_v31, %v4309_v37  ;;  %5925 = vperm.xlu1 %7834, %v5771_v0   ;;  %v13248_v50 = vld [vmem:[#allocation53_spill] sm:$0xff]  ;;  %7681 = vmatprep.subr.bf16.mxu0 %v13215_v60 }
 0x64d   : > { %5910 = vperm.xlu0 %7835, %v5768_v22   ;;  %v4098_v5 = vpop.permute.xlu0 %4097  ;;  %v4043_v34 = vpop.permute.xlu1 %4042  ;;  %v13251_v60 = vld [vmem:[#allocation69_spill] sm:$0xff] }
 0x64e   : > { %v4557_v19 = vsel %vm938_vm1, %v4542_v41, %v4541_v51  ;;  %v4372_v57 = vrot.slane %v4371_v4, 2  ;;  %v4311_v2 = vmul.f32 %v4098_v5, %v13240_v3  ;;  %v4300_v58 = vmul.f32 %v4043_v34, %v13241_v17 }
 0x64f   : > { %7682 = vmatpush3.bf16.msra.mxu0 %v7939_v6 }
 0x650   : > { %v4373_v42 = vadd.f32 %v4372_v57, %v4371_v4  ;;  %v4404_v31 = vadd.f32 %v4403_v43, %v4311_v2  ;;  %v4378_v20 = vadd.f32 %v4377_v62, %v4300_v58  ;;  %v13250_v4 = vld [vmem:[#allocation61_spill] sm:$0xff] }
 0x651   : > { %5840 = vperm.xlu0 %7835, %v5754_v16   ;;  %v4118_v48 = vpop.permute.xlu0 %4117  ;;  %v4108_v54 = vpop.permute.xlu1 %4107 }
 0x652   : > { %v4374_v61 = vrot.slane %v4373_v42, 1  ;;  %v4379_v35 = vrot.slane %v4378_v20, 4  ;;  %v4315_v12 = vmul.f32 %v4118_v48, %v13243_v63  ;;  %v4313_v28 = vmul.f32 %v4108_v54, %v13244_v45 }
 0x654   : > { %v4375_v8 = vadd.f32 %v4374_v61, %v4373_v42  ;;  %v4380_v21 = vadd.f32 %v4379_v35, %v4378_v20  ;;  %v4412_v46 = vadd.f32 %v4314_v23, %v4313_v28  ;;  %v13249_v23 = vld [vmem:[#allocation142_spill] sm:$0xff] }
 0x655   : > { %5920 = vperm.xlu0 %7835, %v5770_v14   ;;  %v4063_v62 = vpop.permute.xlu1 %4062  ;;  %v5772_v18 = vmul.f32 %v13249_v23, %v11379_v11  ;;  %v7942_v42 = vld [vmem:[#allocation14 + $0x4] ss:$8 sps:$4 sm:$0xff]  }
 0x656   : > { %v4495_v1 = vpack.c.bf16 %v4375_v8, %v4375_v8  ;;  %v4381_v53 = vrot.slane %v4380_v21, 2  ;;  %v4304_v40 = vmul.f32 %v4063_v62, %v13246_v39  ;;  %v4413_v33 = vadd.f32 %v4412_v46, %v4315_v12  ;;  %6237 = vmatprep.subr.bf16.mxu0 %v7942_v42 }
 0x658   : > { %v4543_v59 = vunpack.c.l.b16 %v4495_v1  ;;  %v4382_v38 = vadd.f32 %v4381_v53, %v4380_v21  ;;  %v4387_v25 = vadd.f32 %v11365_v29, %v4304_v40 }
 0x659   : > { %5850 = vperm.xlu0 %7835, %v5756_v26   ;;  %v4083_v27 = vpop.permute.xlu1 %4082 }
 0x65a   : > { %v4558_v36 = vsel %vm941_vm2, %v4543_v59, %v4557_v19  ;;  %v4383_v0 = vrot.slane %v4382_v38, 1  ;;  %v4388_v30 = vrot.slane %v4387_v25, 4  ;;  %v4308_v49 = vmul.f32 %v4083_v27, %v13248_v50 }
 0x65c   : > { %v4384_v37 = vadd.f32 %v4383_v0, %v4382_v38  ;;  %v4389_v10 = vadd.f32 %v4388_v30, %v4387_v25  ;;  %v4396_v55 = vadd.f32 %v11388_v52, %v4308_v49  ;;  %v13252_v25 = vld [vmem:[#allocation73_spill] sm:$0xff] }
 0x65d   : > { %5930 = vperm.xlu0 %7835, %v5772_v18   ;;  %v4103_v29 = vpop.permute.xlu1 %4102  ;;  %v13254_v18 = vld [vmem:[#allocation81_spill] sm:$0xff] }
 0x65e   : > { %v4496_v22 = vpack.c.bf16 %v4384_v37, %v4384_v37  ;;  %v4390_v41 = vrot.slane %v4389_v10, 2  ;;  %v4397_v51 = vrot.slane %v4396_v55, 4  ;;  %v4312_v43 = vmul.f32 %v4103_v29, %v13250_v4 }
 0x660   : > { %v4544_v5 = vunpack.c.l.b16 %v4496_v22  ;;  %v4391_v34 = vadd.f32 %v4390_v41, %v4389_v10  ;;  %v4398_v19 = vadd.f32 %v4397_v51, %v4396_v55  ;;  %v4405_v57 = vadd.f32 %v4404_v31, %v4312_v43  ;;  %v13255_v10 = vld [vmem:[#allocation79_spill] sm:$0xff]  ;;  %v13256_v51 = vld [vmem:[#allocation88_spill] sm:$0xff] }
 0x661   : > { %v4123_v11 = vpop.permute.xlu1 %4122  ;;  %v13257_v43 = vld [vmem:[#allocation87_spill] sm:$0xff] }
 0x662   : > { %v4559_v3 = vsel %vm944_vm3, %v4544_v5, %v4558_v36  ;;  %v4392_v2 = vrot.slane %v4391_v34, 1  ;;  %v4399_v52 = vrot.slane %v4398_v19, 2  ;;  %v4406_v17 = vrot.slane %v4405_v57, 4 }
 0x663   : > { %v4316_v58 = vmul.f32 %v4123_v11, %v13251_v60 }
 0x664   : > { %v4393_v13 = vadd.f32 %v4392_v2, %v4391_v34  ;;  %v4400_v32 = vadd.f32 %v4399_v52, %v4398_v19  ;;  %v4407_v16 = vadd.f32 %v4406_v17, %v4405_v57  ;;  %v13258_v57 = vld [vmem:[#allocation83_spill] sm:$0xff] }
 0x665   : > { %v4414_v20 = vadd.f32 %v4413_v33, %v4316_v58 }
 0x666   : > { %v4497_v48 = vpack.c.bf16 %v4393_v13, %v4393_v13  ;;  %v4401_v54 = vrot.slane %v4400_v32, 1  ;;  %v4408_v61 = vrot.slane %v4407_v16, 2  ;;  %v13260_v13 = vld [vmem:[#allocation96_spill] sm:$0xff] }
 0x667   : > { %v4415_v35 = vrot.slane %v4414_v20, 4 }
 0x668   : > { %v4545_v31 = vunpack.c.l.b16 %v4497_v48  ;;  %v4402_v63 = vadd.f32 %v4401_v54, %v4400_v32  ;;  %v4409_v12 = vadd.f32 %v4408_v61, %v4407_v16  ;;  %v13261_v16 = vld [vmem:[#allocation95_spill] sm:$0xff] }
 0x669   : > { %v4416_v45 = vadd.f32 %v4415_v35, %v4414_v20  ;;  %v13262_v61 = vld [vmem:[#allocation91_spill] sm:$0xff] }
 0x66a   : > { %v4560_v28 = vsel %vm947_vm4, %v4545_v31, %v4559_v3  ;;  %v4498_v44 = vpack.c.bf16 %v4402_v63, %v4402_v63  ;;  %v4410_v14 = vrot.slane %v4409_v12, 1  ;;  %v13259_v3 = vld [vmem:[#allocation75_spill] sm:$0xff] }
 0x66b   : > { %v4417_v8 = vrot.slane %v4416_v45, 2 }
 0x66c   : > { %v4546_v21 = vunpack.c.l.b16 %v4498_v44  ;;  %v4411_v46 = vadd.f32 %v4410_v14, %v4409_v12  ;;  %v13264_v44 = vld [vmem:[#allocation104_spill] sm:$0xff] }
 0x66d   : > { %v4418_v62 = vadd.f32 %v4417_v8, %v4416_v45  ;;  %v13263_v45 = vld [vmem:[#allocation103_spill] sm:$0xff]  ;;  %v13265_v8 = vld [vmem:[#allocation84_spill] sm:$0xff] }
 0x66e   : > { %v4561_v1 = vsel %vm950_vm5, %v4546_v21, %v4560_v28  ;;  %v4499_v53 = vpack.c.bf16 %v4411_v46, %v4411_v46 }
 0x66f   : > { %v4419_v39 = vrot.slane %v4418_v62, 1 }
 0x670   : > { %v4547_v40 = vunpack.c.l.b16 %v4499_v53 }
 0x671   : > { %v4420_v33 = vadd.f32 %v4419_v39, %v4418_v62 }
 0x672   : > { %v4562_v7 = vsel %vm953_vm6, %v4547_v40, %v4561_v1  ;;  %v13266_v40 = vld [vmem:[#allocation77_spill] sm:$0xff] }
 0x673   : > { %v4500_v26 = vpack.c.bf16 %v4420_v33, %v4420_v33  ;;  %v4133_v59 = vpop.permute.xlu0 %4132  ;;  %v4128_v38 = vpop.permute.xlu1 %4127 }
 0x674   : > { %v4318_v27 = vmul.f32 %v4133_v59, %v13252_v25  ;;  %v4317_v36 = vmul.f32 %v4128_v38, %v13253_v24  ;;  %v13267_v24 = vld [vmem:[#allocation99_spill] sm:$0xff] }
 0x675   : > { %v4548_v0 = vunpack.c.l.b16 %v4500_v26 }
 0x676   : > { %v4421_v30 = vadd.f32 %v4318_v27, %v4317_v36 }
 0x677   : > { %v4153_v50 = vpop.permute.xlu0 %4152  ;;  %v4148_v49 = vpop.permute.xlu1 %4147  ;;  %v11427_v23 = vsel %vm956_vm7, %v4548_v0, %v4562_v7  ;;  %v13268_v0 = vld [vmem:[#allocation92_spill] sm:$0xff] }
 0x678   : > { %v4322_v37 = vmul.f32 %v4153_v50, %v13254_v18  ;;  %v4321_v55 = vmul.f32 %v4148_v49, %v13255_v10  ;;  %v13269_v10 = vld [vmem:[#allocation110_spill] sm:$0xff] }
 0x67a   : > { %v4430_v29 = vadd.f32 %v4322_v37, %v4321_v55 }
 0x67b   : > { %v4173_v22 = vpop.permute.xlu0 %4172  ;;  %v4168_v41 = vpop.permute.xlu1 %4167 }
 0x67c   : > { %v4326_v4 = vmul.f32 %v4173_v22, %v13256_v51  ;;  %v4325_v6 = vmul.f32 %v4168_v41, %v13257_v43  ;;  %v13270_v43 = vld [vmem:[#allocation112_spill] sm:$0xff] }
 0x67e   : > { %v4439_v5 = vadd.f32 %v4326_v4, %v4325_v6 }
 0x67f   : > { %v4158_v34 = vpop.permute.xlu0 %4157  ;;  %v4138_v19 = vpop.permute.xlu1 %4137 }
 0x680   : > { %v4323_v11 = vmul.f32 %v4158_v34, %v13258_v57  ;;  %v4319_v2 = vmul.f32 %v4138_v19, %v13259_v3 }
 0x682   : > { %v4431_v52 = vadd.f32 %v4430_v29, %v4323_v11  ;;  %v4422_v17 = vadd.f32 %v4421_v30, %v4319_v2 }
 0x683   : > { %v4193_v60 = vpop.permute.xlu0 %4192  ;;  %v4188_v58 = vpop.permute.xlu1 %4187 }
 0x684   : > { %v4330_v32 = vmul.f32 %v4193_v60, %v13260_v13  ;;  %v4329_v42 = vmul.f32 %v4188_v58, %v13261_v16  ;;  %v13272_v58 = vld [vmem:[#allocation100_spill] sm:$0xff] }
 0x686   : > { %v4448_v20 = vadd.f32 %v4330_v32, %v4329_v42 }
 0x687   : > { %v4178_v48 = vpop.permute.xlu0 %4177  ;;  %v4208_v54 = vpop.permute.xlu1 %4207 }
 0x688   : > { %v4327_v35 = vmul.f32 %v4178_v48, %v13262_v61  ;;  %v4333_v28 = vmul.f32 %v4208_v54, %v13263_v45  ;;  %v13274_v45 = vld [vmem:[#allocation120_spill] sm:$0xff] }
 0x68a   : > { %v4440_v31 = vadd.f32 %v4439_v5, %v4327_v35 }
 0x68b   : > { %v4213_v63 = vpop.permute.xlu0 %4212  ;;  %v4163_v12 = vpop.permute.xlu1 %4162 }
 0x68c   : > { %v4334_v14 = vmul.f32 %v4213_v63, %v13264_v44  ;;  %v4324_v21 = vmul.f32 %v4163_v12, %v13265_v8  ;;  %v13273_v63 = vld [vmem:[#allocation118_spill] sm:$0xff] }
 0x68e   : > { %v4457_v46 = vadd.f32 %v4334_v14, %v4333_v28  ;;  %v4432_v62 = vadd.f32 %v4431_v52, %v4324_v21 }
 0x68f   : > { %v4143_v1 = vpop.permute.xlu0 %4142  ;;  %v4228_v53 = vpop.permute.xlu1 %4227 }
 0x690   : > { %v4433_v39 = vrot.slane %v4432_v62, 4  ;;  %v4320_v33 = vmul.f32 %v4143_v1, %v13266_v40  ;;  %v4337_v55 = vmul.f32 %v4228_v53, %v13269_v10  ;;  %v13278_v10 = vld [vmem:[#allocation127_spill] sm:$0xff] }
 0x692   : > { %v4434_v7 = vadd.f32 %v4433_v39, %v4432_v62  ;;  %v4423_v26 = vadd.f32 %v4422_v17, %v4320_v33  ;;  %v13271_v17 = vld [vmem:[#allocation106_spill] sm:$0xff] }
 0x693   : > { %v4198_v59 = vpop.permute.xlu0 %4197  ;;  %v4183_v38 = vpop.permute.xlu1 %4182  ;;  %v13275_v33 = vld [vmem:[#allocation114_spill] sm:$0xff] }
 0x694   : > { %v4435_v25 = vrot.slane %v4434_v7, 2  ;;  %v4424_v27 = vrot.slane %v4423_v26, 4  ;;  %v4331_v36 = vmul.f32 %v4198_v59, %v13267_v24  ;;  %v4328_v30 = vmul.f32 %v4183_v38, %v13268_v0  ;;  %v13277_v0 = vld [vmem:[#allocation126_spill] sm:$0xff] }
 0x696   : > { %v4436_v50 = vadd.f32 %v4435_v25, %v4434_v7  ;;  %v4425_v49 = vadd.f32 %v4424_v27, %v4423_v26  ;;  %v4449_v18 = vadd.f32 %v4448_v20, %v4331_v36  ;;  %v4441_v37 = vadd.f32 %v4440_v31, %v4328_v30  ;;  %v13276_v26 = vld [vmem:[#allocation108_spill] sm:$0xff] }
 0x697   : > { %v4233_v29 = vpop.permute.xlu0 %4232  ;;  %v4248_v22 = vpop.permute.xlu1 %4247 }
 0x698   : > { %v4437_v41 = vrot.slane %v4436_v50, 1  ;;  %v4426_v51 = vrot.slane %v4425_v49, 2  ;;  %v4442_v4 = vrot.slane %v4441_v37, 4  ;;  %v4338_v6 = vmul.f32 %v4233_v29, %v13270_v43  ;;  %v13279_v29 = vld [vmem:[#allocation116_spill] sm:$0xff] }
 0x699   : > { %v4341_v12 = vmul.f32 %v4248_v22, %v13273_v63 }
 0x69a   : > { %v4438_v5 = vadd.f32 %v4437_v41, %v4436_v50  ;;  %v4427_v34 = vadd.f32 %v4426_v51, %v4425_v49  ;;  %v4443_v19 = vadd.f32 %v4442_v4, %v4441_v37  ;;  %v4466_v57 = vadd.f32 %v4338_v6, %v4337_v55 }
 0x69b   : > { %v4218_v11 = vpop.permute.xlu0 %4217  ;;  %v4203_v3 = vpop.permute.xlu1 %4202 }
 0x69c   : > { %v4428_v2 = vrot.slane %v4427_v34, 1  ;;  %v4444_v52 = vrot.slane %v4443_v19, 2  ;;  %v4335_v60 = vmul.f32 %v4218_v11, %v13271_v17  ;;  %v4332_v13 = vmul.f32 %v4203_v3, %v13272_v58  ;;  %v13280_v11 = vld [vmem:[#allocation122_spill] sm:$0xff] }
 0x69d   : > { %v4502_v32 = vpack.c.bf16 %v4438_v5, %v4438_v5 }
 0x69e   : > { %v4429_v16 = vadd.f32 %v4428_v2, %v4427_v34  ;;  %v4445_v42 = vadd.f32 %v4444_v52, %v4443_v19  ;;  %v4458_v20 = vadd.f32 %v4457_v46, %v4335_v60  ;;  %v4450_v48 = vadd.f32 %v4449_v18, %v4332_v13 }
 0x69f   : > { %v4253_v54 = vpop.permute.xlu0 %4252  ;;  %v4268_v61 = vpop.permute.xlu1 %4267  ;;  %v4550_v14 = vunpack.c.l.b16 %v4502_v32 }
 0x6a0   : > { %v4501_v35 = vpack.c.bf16 %v4429_v16, %v4429_v16  ;;  %v4446_v31 = vrot.slane %v4445_v42, 1  ;;  %v4342_v28 = vmul.f32 %v4253_v54, %v13274_v45  ;;  %v4451_v44 = vrot.slane %v4450_v48, 4  ;;  %v13282_v54 = vld [vmem:[#allocation58_spill] sm:$0xff] }
 0x6a1   : > { %v4345_v30 = vmul.f32 %v4268_v61, %v13277_v0 }
 0x6a2   : > { %v4549_v8 = vunpack.c.l.b16 %v4501_v35  ;;  %v4447_v21 = vadd.f32 %v4446_v31, %v4445_v42  ;;  %v4475_v62 = vadd.f32 %v4342_v28, %v4341_v12  ;;  %v4452_v1 = vadd.f32 %v4451_v44, %v4450_v48 }
 0x6a3   : > { %v4238_v53 = vpop.permute.xlu0 %4237  ;;  %v4223_v39 = vpop.permute.xlu1 %4222 }
 0x6a4   : > { %v4564_v40 = vsel %vm938_vm1, %v4550_v14, %v4549_v8  ;;  %v4503_v46 = vpack.c.bf16 %v4447_v21, %v4447_v21  ;;  %v4339_v7 = vmul.f32 %v4238_v53, %v13275_v33  ;;  %v4336_v59 = vmul.f32 %v4223_v39, %v13276_v26  ;;  %v13283_v8 = vld [vmem:[#allocation130_spill] sm:$0xff] }
 0x6a5   : > { %v4453_v38 = vrot.slane %v4452_v1, 2 }
 0x6a6   : > { %v4551_v25 = vunpack.c.l.b16 %v4503_v46  ;;  %v4467_v27 = vadd.f32 %v4466_v57, %v4339_v7  ;;  %v4459_v24 = vadd.f32 %v4458_v20, %v4336_v59  ;;  %v13281_v20 = vld [vmem:[#allocation56_spill] sm:$0xff] }
 0x6a7   : > { %v4454_v36 = vadd.f32 %v4453_v38, %v4452_v1  ;;  %v4273_v50 = vpop.permute.xlu0 %4272  ;;  %v4243_v49 = vpop.permute.xlu1 %4242  ;;  %v13284_v59 = vld [vmem:[#allocation124_spill] sm:$0xff] }
 0x6a8   : > { %v4565_v18 = vsel %vm941_vm2, %v4551_v25, %v4564_v40  ;;  %v4460_v37 = vrot.slane %v4459_v24, 4  ;;  %v4346_v55 = vmul.f32 %v4273_v50, %v13278_v10  ;;  %v4340_v22 = vmul.f32 %v4243_v49, %v13279_v29 }
 0x6a9   : > { %v4455_v41 = vrot.slane %v4454_v36, 1 }
 0x6aa   : > { %v4461_v51 = vadd.f32 %v4460_v37, %v4459_v24  ;;  %v4484_v4 = vadd.f32 %v4346_v55, %v4345_v30  ;;  %v4468_v43 = vadd.f32 %v4467_v27, %v4340_v22 }
 0x6ab   : > { %v4456_v6 = vadd.f32 %v4455_v41, %v4454_v36  ;;  %v4258_v5 = vpop.permute.xlu0 %4257  ;;  %v5886_v34 = vpop.permute.xlu1 %5885 }
 0x6ac   : > { %v4462_v19 = vrot.slane %v4461_v51, 2  ;;  %v4469_v57 = vrot.slane %v4468_v43, 4  ;;  %v4343_v3 = vmul.f32 %v4258_v5, %v13280_v11  ;;  %v5955_v48 = vmul.f32 %v5886_v34, %v13281_v20  ;;  %v13287_v34 = vld [vmem:[#allocation29_spill] sm:$0xff]  ;;  %v13289_v20 = vld [vmem:[#allocation62_spill] sm:$0xff] }
 0x6ad   : > { %v4504_v2 = vpack.c.bf16 %v4456_v6, %v4456_v6 }
 0x6ae   : > { %v4463_v52 = vadd.f32 %v4462_v19, %v4461_v51  ;;  %v4470_v17 = vadd.f32 %v4469_v57, %v4468_v43  ;;  %v4476_v60 = vadd.f32 %v4475_v62, %v4343_v3  ;;  %v13286_v43 = vld [vmem:[#allocation24_spill] sm:$0xff] }
 0x6af   : > { %v4552_v58 = vunpack.c.l.b16 %v4504_v2  ;;  %v5891_v13 = vpop.permute.xlu0 %5890  ;;  %v5816_v32 = vpop.permute.xlu1 %5815 }
 0x6b0   : > { %v4464_v16 = vrot.slane %v4463_v52, 1  ;;  %v4471_v42 = vrot.slane %v4470_v17, 2  ;;  %v5956_v61 = vmul.f32 %v5891_v13, %v13282_v54  ;;  %v5941_v6 = vmul.f32 %v5816_v32, %v13286_v43  ;;  %v13288_v13 = vld [vmem:[#allocation60_spill] sm:$0xff]  ;;  %v13294_v43 = vld [vmem:[#allocation38_spill] sm:$0xff] }
 0x6b1   : > { %v4566_v35 = vsel %vm944_vm3, %v4552_v58, %v4565_v18  ;;  %v13285_v18 = vld [vmem:[#allocation132_spill] sm:$0xff] }
 0x6b2   : > { %v4465_v31 = vadd.f32 %v4464_v16, %v4463_v52  ;;  %v4472_v63 = vadd.f32 %v4471_v42, %v4470_v17  ;;  %v6042_v12 = vadd.f32 %v5956_v61, %v5955_v48 }
 0x6b3   : > { %v4278_v45 = vpop.permute.xlu0 %4277  ;;  %v5896_v62 = vpop.permute.xlu1 %5895 }
 0x6b4   : > { %v4505_v28 = vpack.c.bf16 %v4465_v31, %v4465_v31  ;;  %v4473_v44 = vrot.slane %v4472_v63, 1  ;;  %v6043_v14 = vrot.slane %v6042_v12, 4  ;;  %v4347_v21 = vmul.f32 %v4278_v45, %v13283_v8  ;;  %v13291_v8 = vld [vmem:[#allocation30_spill] sm:$0xff] }
 0x6b5   : > { %v5957_v16 = vmul.f32 %v5896_v62, %v13288_v13 }
 0x6b6   : > { %v4553_v1 = vunpack.c.l.b16 %v4505_v28  ;;  %v4474_v53 = vadd.f32 %v4473_v44, %v4472_v63  ;;  %v6044_v39 = vadd.f32 %v6043_v14, %v6042_v12  ;;  %v4485_v40 = vadd.f32 %v4484_v4, %v4347_v21  ;;  %v13290_v28 = vld [vmem:[#allocation25_spill] sm:$0xff] }
 0x6b7   : > { %v4263_v46 = vpop.permute.xlu0 %4262  ;;  %v5826_v36 = vpop.permute.xlu1 %5825 }
 0x6b8   : > { %v4567_v33 = vsel %vm947_vm4, %v4553_v1, %v4566_v35  ;;  %v4506_v7 = vpack.c.bf16 %v4474_v53, %v4474_v53  ;;  %v6045_v26 = vrot.slane %v6044_v39, 2  ;;  %v4344_v38 = vmul.f32 %v4263_v46, %v13284_v59 }
 0x6b9   : > { %v5943_v44 = vmul.f32 %v5826_v36, %v13290_v28  ;;  %v13293_v36 = vld [vmem:[#allocation66_spill] sm:$0xff] }
 0x6ba   : > { %v4554_v25 = vunpack.c.l.b16 %v4506_v7  ;;  %v6046_v27 = vadd.f32 %v6045_v26, %v6044_v39  ;;  %v4477_v24 = vadd.f32 %v4476_v60, %v4344_v38  ;;  %v13292_v7 = vld [vmem:[#allocation64_spill] sm:$0xff] }
 0x6bb   : > { %v4283_v0 = vpop.permute.xlu0 %4282  ;;  %v5906_v5 = vpop.permute.xlu1 %5905 }
 0x6bc   : > { %v4568_v30 = vsel %vm950_vm5, %v4554_v25, %v4567_v33  ;;  %v6047_v50 = vrot.slane %v6046_v27, 1  ;;  %v4478_v49 = vrot.slane %v4477_v24, 4  ;;  %v4348_v37 = vmul.f32 %v4283_v0, %v13285_v18 }
 0x6bd   : > { %v5959_v26 = vmul.f32 %v5906_v5, %v13292_v7  ;;  %v13295_v5 = vld [vmem:[#allocation39_spill] sm:$0xff] }
 0x6be   : > { %v6048_v10 = vadd.f32 %v6047_v50, %v6046_v27  ;;  %v4479_v55 = vadd.f32 %v4478_v49, %v4477_v24  ;;  %v4486_v29 = vadd.f32 %v4485_v40, %v4348_v37 }
 0x6bf   : > { %v5836_v35 = vpop.permute.xlu1 %5835 }
 0x6c0   : > { %v6088_v22 = vpack.c.bf16 %v6048_v10, %v6048_v10  ;;  %v4480_v41 = vrot.slane %v4479_v55, 2  ;;  %v4487_v51 = vrot.slane %v4486_v29, 4  ;;  %v5821_v4 = vpop.permute.xlu0 %5820 }
 0x6c1   : > { %v5942_v19 = vmul.f32 %v5821_v4, %v13287_v34  ;;  %v7940_v4 = vld [vmem:[#allocation14] ss:$8 sps:$4 sm:$0xff]  }
 0x6c2   : > { %v6136_v57 = vunpack.c.l.b16 %v6088_v22  ;;  %v4481_v11 = vadd.f32 %v4480_v41, %v4479_v55  ;;  %v4488_v3 = vadd.f32 %v4487_v51, %v4486_v29 }
 0x6c3   : > { %v5993_v2 = vadd.f32 %v5942_v19, %v5941_v6  ;;  %v5916_v27 = vpop.permute.xlu1 %5915  ;;  %v5945_v6 = vmul.f32 %v5836_v35, %v13294_v43 }
 0x6c4   : > { %v11470_v52 = vsel %vm944_vm3, %v6136_v57, %v11315_v15  ;;  %v4482_v17 = vrot.slane %v4481_v11, 1  ;;  %v4489_v60 = vrot.slane %v4488_v3, 2  ;;  %v5901_v58 = vpop.permute.xlu0 %5900  ;;  %v7945_v57 = vld [vmem:[#allocation14 + $0x14] ss:$8 sps:$4 sm:$0xff]  }
 0x6c5   : > { %v5994_v42 = vrot.slane %v5993_v2, 4  ;;  %v5958_v48 = vmul.f32 %v5901_v58, %v13289_v20 }
 0x6c6   : > { %v4483_v32 = vadd.f32 %v4482_v17, %v4481_v11  ;;  %v4490_v54 = vadd.f32 %v4489_v60, %v4488_v3 }
 0x6c7   : > { %v5995_v61 = vadd.f32 %v5994_v42, %v5993_v2  ;;  %v6049_v31 = vadd.f32 %v5958_v48, %v5957_v16  ;;  %v5846_v17 = vpop.permute.xlu1 %5845 }
 0x6c8   : > { %v4507_v63 = vpack.c.bf16 %v4483_v32, %v4483_v32  ;;  %v4491_v12 = vrot.slane %v4490_v54, 1  ;;  %v5831_v45 = vpop.permute.xlu0 %5830  ;;  %v7943_v32 = vld [vmem:[#allocation14 + $0x10] ss:$8 sps:$4 sm:$0xff]  }
 0x6c9   : > { %v5996_v15 = vrot.slane %v5995_v61, 2  ;;  %v6050_v14 = vrot.slane %v6049_v31, 4  ;;  %v5944_v21 = vmul.f32 %v5831_v45, %v13291_v8 }
 0x6ca   : > { %v4555_v1 = vunpack.c.l.b16 %v4507_v63  ;;  %v4492_v53 = vadd.f32 %v4491_v12, %v4490_v54  ;;  %v13296_v54 = vmov 0   ;;  %v7948_v12 = vld [vmem:[#allocation14 + $0x24] ss:$8 sps:$4 sm:$0xff]  }
 0x6cb   : > { %v5997_v62 = vadd.f32 %v5996_v15, %v5995_v61  ;;  %v6051_v39 = vadd.f32 %v6050_v14, %v6049_v31  ;;  %v6000_v40 = vadd.f32 %v5944_v21, %v5943_v44  ;;  %v13298_v31 = vld [vmem:[#allocation70_spill] sm:$0xff]  ;;  %v13299_v15 = vld [vmem:[#allocation40_spill] sm:$0xff] }
 0x6cc   : > { %v4569_v46 = vsel %vm953_vm6, %v4555_v1, %v4568_v30  ;;  %v4508_v33 = vpack.c.bf16 %v4492_v53, %v4492_v53  ;;  %v5911_v59 = vpop.permute.xlu0 %5910  ;;  %v5947_v14 = vmul.f32 %v5846_v17, %v13299_v15  ;;  %v7957_v17 = vld [vmem:[#allocation14 + $0x54] ss:$8 sps:$4 sm:$0xff]  }
 0x6cd   : > { %v5998_v38 = vrot.slane %v5997_v62, 1  ;;  %v6052_v25 = vrot.slane %v6051_v39, 2  ;;  %v6001_v24 = vrot.slane %v6000_v40, 4  ;;  %v5960_v0 = vmul.f32 %v5911_v59, %v13293_v36  ;;  %v7951_v59 = vld [vmem:[#allocation14 + $0x34] ss:$8 sps:$4 sm:$0xff]  }
 0x6ce   : > { %v4556_v50 = vunpack.c.l.b16 %v4508_v33  ;;  %v7946_v33 = vld [vmem:[#allocation14 + $0x20] ss:$8 sps:$4 sm:$0xff]  }
 0x6cf   : > { %v5999_v49 = vadd.f32 %v5998_v38, %v5997_v62  ;;  %v6053_v18 = vadd.f32 %v6052_v25, %v6051_v39  ;;  %v6002_v37 = vadd.f32 %v6001_v24, %v6000_v40  ;;  %v6056_v10 = vadd.f32 %v5960_v0, %v5959_v26  ;;  %v5926_v39 = vpop.permute.xlu1 %5925  ;;  %v13300_v40 = vld [vmem:[#allocation42_spill] sm:$0xff]  ;;  %v13301_v24 = vld [vmem:[#allocation72_spill] sm:$0xff] }
 0x6d0   : > { %v5841_v55 = vpop.permute.xlu0 %5840  ;;  %v4570_v29 = vsel %vm956_vm7, %v4556_v50, %v4569_v46  ;;  %v5963_v36 = vmul.f32 %v5926_v39, %v13301_v24 }
 0x6d1   : > { %v6081_v22 = vpack.c.bf16 %v5999_v49, %v5999_v49  ;;  %v6054_v30 = vrot.slane %v6053_v18, 1  ;;  %v6003_v41 = vrot.slane %v6002_v37, 2  ;;  %v6057_v51 = vrot.slane %v6056_v10, 4 }
 0x6d2   : > { %v5946_v34 = vmul.f32 %v5841_v55, %v13295_v5  ;;  %v4571_v19 = vpack.c.b16 %v4570_v29, %v11427_v23  ;;  %v13297_v23 = vld [vmem:[#allocation68_spill] sm:$0xff] }
 0x6d3   : > { %v6129_v11 = vunpack.c.l.b16 %v6081_v22  ;;  %v6055_v3 = vadd.f32 %v6054_v30, %v6053_v18  ;;  %v6004_v2 = vadd.f32 %v6003_v41, %v6002_v37  ;;  %v6058_v60 = vadd.f32 %v6057_v51, %v6056_v10  ;;  %v13302_v37 = vld [vmem:[#allocation74_spill] sm:$0xff]  ;;  %v7949_v55 = vld [vmem:[#allocation14 + $0x30] ss:$8 sps:$4 sm:$0xff]  }
 0x6d4   : > { %v6007_v58 = vadd.f32 %v5946_v34, %v5945_v6  ;;  %v5921_v13 = vpop.permute.xlu0 %5920  ;;  %7684 = vmatmul.mubr.bf16.vlgmr.msra.gmra.mrb[96].mxu0 %v4571_v19  ;;  %v5961_v61 = vmul.f32 %v5916_v27, %v13297_v23  ;;  %v7954_v41 = vld [vmem:[#allocation14 + $0x44] ss:$8 sps:$4 sm:$0xff]  }
 0x6d5   : > { %v6144_v16 = vsel %vm947_vm4, %v6129_v11, %v11183_v56  ;;  %v6089_v42 = vpack.c.bf16 %v6055_v3, %v6055_v3  ;;  %v6005_v20 = vrot.slane %v6004_v2, 1  ;;  %v6059_v48 = vrot.slane %v6058_v60, 2  ;;  %6238 = vmatpush1.bf16.msra.mxu0 %v7940_v4  ;;  %6269 = vmatprep.mubr.bf16.mxu0 %v13296_v54  ;;  %v7960_v54 = vld [vmem:[#allocation14 + $0x64] ss:$8 sps:$4 sm:$0xff]  }
 0x6d6   : > { %v6008_v35 = vrot.slane %v6007_v58, 4  ;;  %v5962_v63 = vmul.f32 %v5921_v13, %v13298_v31  ;;  %6239 = vmatprep.subr.bf16.mxu0 %v7945_v57  ;;  %v7952_v57 = vld [vmem:[#allocation14 + $0x40] ss:$8 sps:$4 sm:$0xff]  }
 0x6d7   : > { %v6137_v45 = vunpack.c.l.b16 %v6089_v42  ;;  %v6006_v28 = vadd.f32 %v6005_v20, %v6004_v2  ;;  %v6060_v44 = vadd.f32 %v6059_v48, %v6058_v60  ;;  %v7955_v48 = vld [vmem:[#allocation14 + $0x50] ss:$8 sps:$4 sm:$0xff]  }
 0x6d8   : > { %v6009_v56 = vadd.f32 %v6008_v35, %v6007_v58  ;;  %v6063_v8 = vadd.f32 %v5962_v63, %v5961_v61  ;;  %v5851_v21 = vpop.permute.xlu0 %5850 }
 0x6d9   : > { %v6151_v1 = vsel %vm947_vm4, %v6137_v45, %v11470_v52  ;;  %v6082_v53 = vpack.c.bf16 %v6006_v28, %v6006_v28  ;;  %v6061_v62 = vrot.slane %v6060_v44, 1  ;;  %v5948_v46 = vmul.f32 %v5851_v21, %v13300_v40  ;;  %6240 = vmatpush1.bf16.msra.mxu0 %v7943_v32  ;;  %v7958_v45 = vld [vmem:[#allocation14 + $0x60] ss:$8 sps:$4 sm:$0xff]   ;;  %v7963_v28 = vld [vmem:[#allocation14 + $0x74] ss:$8 sps:$4 sm:$0xff]  }
 0x6da   : > { %v6010_v7 = vrot.slane %v6009_v56, 2  ;;  %v6064_v26 = vrot.slane %v6063_v8, 4  ;;  %6241 = vmatprep.subr.bf16.mxu0 %v7948_v12 }
 0x6db   : > { %v6130_v38 = vunpack.c.l.b16 %v6082_v53  ;;  %v6062_v25 = vadd.f32 %v6061_v62, %v6060_v44  ;;  %v6014_v27 = vadd.f32 %v5948_v46, %v5947_v14 }
 0x6dc   : > { %v6011_v0 = vadd.f32 %v6010_v7, %v6009_v56  ;;  %v6065_v50 = vadd.f32 %v6064_v26, %v6063_v8  ;;  %v5931_v49 = vpop.permute.xlu0 %5930  ;;  %v7961_v8 = vld [vmem:[#allocation14 + $0x70] ss:$8 sps:$4 sm:$0xff]  }
 0x6dd   : > { %v6090_v52 = vpack.c.bf16 %v6062_v25, %v6062_v25  ;;  %v6015_v18 = vrot.slane %v6014_v27, 4  ;;  %v5964_v10 = vmul.f32 %v5931_v49, %v13302_v37  ;;  %6242 = vmatpush1.bf16.msra.mxu0 %v7946_v33  ;;  %v6145_v29 = vsel %vm950_vm5, %v6130_v38, %v6144_v16  ;;  %v8173_v25 = vld [vmem:[%s8901_s12 + $0xa0] sm:$0xff]  ;;  %v8175_v37 = vld [vmem:[%s8901_s12 + $0xb0] sm:$0xff] }
 0x6de   : > { %v6012_v22 = vrot.slane %v6011_v0, 1  ;;  %v6066_v30 = vrot.slane %v6065_v50, 2  ;;  %6243 = vmatprep.subr.bf16.mxu0 %v7951_v59  ;;  %v8172_v59 = vld [vmem:[%s8901_s12 + $0x90] sm:$0xff] }
 0x6df   : > { %v6138_v51 = vunpack.c.l.b16 %v6090_v52  ;;  %v6016_v4 = vadd.f32 %v6015_v18, %v6014_v27  ;;  %v6070_v43 = vadd.f32 %v5964_v10, %v5963_v36 }
 0x6e0   : > { %v6013_v6 = vadd.f32 %v6012_v22, %v6011_v0  ;;  %v6067_v5 = vadd.f32 %v6066_v30, %v6065_v50  ;;  %v8174_v0 = vld [vmem:[%s8901_s12 + $0x80] sm:$0xff] }
 0x6e1   : > { %v6017_v34 = vrot.slane %v6016_v4, 2  ;;  %v6071_v19 = vrot.slane %v6070_v43, 4  ;;  %6244 = vmatpush1.bf16.msra.mxu0 %v7949_v55  ;;  %v6152_v11 = vsel %vm950_vm5, %v6138_v51, %v6151_v1  ;;  %v8176_v30 = vld [vmem:[%s8901_s12 + $0xc0] sm:$0xff] }
 0x6e2   : > { %v6083_v3 = vpack.c.bf16 %v6013_v6, %v6013_v6  ;;  %v6068_v2 = vrot.slane %v6067_v5, 1  ;;  %6245 = vmatprep.subr.bf16.mxu0 %v7954_v41 }
 0x6e3   : > { %v6018_v60 = vadd.f32 %v6017_v34, %v6016_v4  ;;  %v6072_v58 = vadd.f32 %v6071_v19, %v6070_v43  ;;  %v8177_v43 = vld [vmem:[%s8901_s12 + $0x10] sm:$0xff] }
 0x6e4   : > { %v6131_v13 = vunpack.c.l.b16 %v6083_v3  ;;  %v6069_v16 = vadd.f32 %v6068_v2, %v6067_v5  ;;  %v8178_v34 = vld [vmem:[%s8901_s12 + $0xd0] sm:$0xff]  ;;  %v8179_v3 = vld [vmem:[%s8901_s12 + $0x20] sm:$0xff] }
 0x6e5   : > { %v6019_v42 = vrot.slane %v6018_v60, 1  ;;  %v6073_v20 = vrot.slane %v6072_v58, 2  ;;  %6246 = vmatpush1.bf16.msra.mxu0 %v7952_v57 }
 0x6e6   : > { %v6091_v32 = vpack.c.bf16 %v6069_v16, %v6069_v16  ;;  %6247 = vmatprep.subr.bf16.mxu0 %v7957_v17  ;;  %v6146_v23 = vsel %vm953_vm6, %v6131_v13, %v6145_v29  ;;  %v8180_v13 = vld [vmem:[%s8901_s12 + $0xe0] sm:$0xff] }
 0x6e7   : > { %v6020_v61 = vadd.f32 %v6019_v42, %v6018_v60  ;;  %v6074_v35 = vadd.f32 %v6073_v20, %v6072_v58 }
 0x6e8   : > { %v6139_v31 = vunpack.c.l.b16 %v6091_v32  ;;  %v8181_v32 = vld [vmem:[%s8901_s12] sm:$0xff] }
 0x6e9   : > { %v6084_v63 = vpack.c.bf16 %v6020_v61, %v6020_v61  ;;  %v6075_v12 = vrot.slane %v6074_v35, 1  ;;  %6248 = vmatpush1.bf16.msra.mxu0 %v7955_v48 }
 0x6ea   : > { %6249 = vmatprep.subr.bf16.mxu0 %v7960_v54  ;;  %v6153_v44 = vsel %vm953_vm6, %v6139_v31, %v6152_v11 }
 0x6eb   : > { %v6132_v15 = vunpack.c.l.b16 %v6084_v63  ;;  %v6076_v14 = vadd.f32 %v6075_v12, %v6074_v35  ;;  %v8182_v35 = vld [vmem:[%s8901_s12 + $0xf0] sm:$0xff] }
 0x6ec   : > { %v8183_v12 = vld [vmem:[%s8901_s12 + $0x30] sm:$0xff] }
 0x6ed   : > { %v6092_v56 = vpack.c.bf16 %v6076_v14, %v6076_v14  ;;  %6250 = vmatpush1.bf16.msra.mxu0 %v7958_v45  ;;  %v6147_v21 = vsel %vm956_vm7, %v6132_v15, %v6146_v23  ;;  %v8184_v14 = vld [vmem:[%s8901_s12 + $0x40] sm:$0xff] }
 0x6ee   : > { %6251 = vmatprep.subr.bf16.mxu0 %v7963_v28 }
 0x6ef   : > { %v6140_v1 = vunpack.c.l.b16 %v6092_v56 }
 0x6f1   : > { %6252 = vmatpush1.bf16.msra.mxu0 %v7961_v8  ;;  %v6154_v53 = vsel %vm956_vm7, %v6140_v1, %v6153_v44 }
 0x6f2   : > { %v6155_v62 = vpack.c.b16 %v6154_v53, %v6147_v21 }
 0x6f4   : > { %6270 = vmatmul.mubr.bf16.vlgmr.msra.gmra.mrb[100].mxu0 %v6155_v62 }
 0x7a7   : > { %v11500_v39 = vpop.f32.mrb[96].mxu0 }
 0x7a8   : > { %v7685_v40 = vpop.f32.mrb[97].mxu0  ;;  %v4664_v18 = vrot.slane %v11500_v39, 1  ;;  %v4665_v22 = vrot.slane %v11500_v39, 2  ;;  %v4666_v60 = vrot.slane %v11500_v39, 3  ;;  %v4667_v20 = vrot.slane %v11500_v39, 4 }
 0x7a9   : > { %v4658_v46 = vpop.f32.mrb[98].mxu0  ;;  %v11546_v54 = vadd.f32 %v8181_v32, %v11500_v39  ;;  %v4668_v23 = vrot.slane %v11500_v39, 5  ;;  %v4669_v15 = vrot.slane %v11500_v39, 6  ;;  %v8185_v40 = vld [vmem:[%s8901_s12 + $0x50] sm:$0xff] }
 0x7aa   : > { %v7686_v33 = vpop.f32.mrb[99].mxu0  ;;  %v4671_v7 = vrot.slane %v4658_v46, 1  ;;  %v4672_v26 = vrot.slane %v4658_v46, 2  ;;  %v4673_v24 = vrot.slane %v4658_v46, 3  ;;  %v11510_v50 = vadd.f32 %v8174_v0, %v4658_v46 }
 0x7ab   : > { %v4674_v49 = vrot.slane %v4658_v46, 4  ;;  %v4675_v29 = vrot.slane %v4658_v46, 5  ;;  %v11526_v6 = vadd.f32 %v8177_v43, %v4664_v18  ;;  %v4676_v5 = vrot.slane %v4658_v46, 6  ;;  %v8188_v43 = vld [vmem:[%s8908_s16 + $0x40] sm:$0xff] }
 0x7ac   : > { %v11503_v38 = vadd.f32 %v8172_v59, %v4671_v7  ;;  %v11506_v27 = vadd.f32 %v8173_v25, %v4672_v26  ;;  %v11515_v10 = vadd.f32 %v8175_v37, %v4673_v24  ;;  %v11534_v2 = vadd.f32 %v8179_v3, %v4665_v22  ;;  %v8186_v25 = vld [vmem:[%s8901_s12 + $0x60] sm:$0xff] }
 0x7ad   : > { %v11521_v41 = vadd.f32 %v8176_v30, %v4674_v49  ;;  %v11529_v19 = vadd.f32 %v8178_v34, %v4675_v29  ;;  %v4677_v17 = vrot.slane %v4658_v46, 7  ;;  %v6394_v58 = vrot.slane %v11526_v6, 7  ;;  %v8187_v22 = vld [vmem:[%s8908_s16] sm:$0xff] }
 0x7ae   : > { %v6408_v36 = vrot.slane %v11503_v38, 7  ;;  %v6410_v52 = vrot.slane %v11506_v27, 6  ;;  %v6412_v4 = vrot.slane %v11515_v10, 5  ;;  %v11539_v16 = vadd.f32 %v8180_v13, %v4676_v5  ;;  %v8189_v34 = vld [vmem:[%s8908_s16 + $0x80] sm:$0xff]  ;;  %v8191_v13 = vld [vmem:[%s8908_s16 + $0x48] sm:$0xff] }
 0x7af   : > { %13303 = vst [vmem:[#allocation170_spill] sm:$0xff] %v11529_v19  ;;  %v6414_v11 = vrot.slane %v11521_v41, 4  ;;  %v6416_v48 = vrot.slane %v11529_v19, 3  ;;  %v6396_v61 = vrot.slane %v11534_v2, 6  ;;  %v11551_v31 = vadd.f32 %v8182_v35, %v4677_v17 }
 0x7b0   : > { %v6409_v55 = vsel %vm938_vm1, %v6408_v36, %v11510_v50  ;;  %13304 = vst [vmem:[#allocation182_spill] sm:$0xff] %v11539_v16  ;;  %v11555_v45 = vadd.f32 %v8183_v12, %v4666_v60  ;;  %v6395_v28 = vsel %vm938_vm1, %v6394_v58, %v11546_v54  ;;  %v6418_v44 = vrot.slane %v11539_v16, 2  ;;  %v8190_v60 = vld [vmem:[%s8908_s16 + $0x8] sm:$0xff]  ;;  %v8215_v16 = vld [vmem:[%s8908_s16 + $0x380] sm:$0xff] }
 0x7b1   : > { %v6411_v51 = vsel %vm941_vm2, %v6410_v52, %v6409_v55  ;;  %13305 = vst [vmem:[#allocation187_spill] sm:$0xff] %v11551_v31  ;;  %v11562_v56 = vadd.f32 %v8184_v14, %v4667_v20  ;;  %v6397_v21 = vsel %vm941_vm2, %v6396_v61, %v6395_v28  ;;  %v6420_v53 = vrot.slane %v11551_v31, 1  ;;  %v8194_v28 = vld [vmem:[%s8908_s16 + $0x240] sm:$0xff]  ;;  %v8208_v36 = vld [vmem:[%s8908_s16 + $0x148] sm:$0xff] }
 0x7b2   : > { %v6413_v57 = vsel %vm944_vm3, %v6412_v4, %v6411_v51  ;;  %v11571_v46 = vadd.f32 %v8185_v40, %v4668_v23  ;;  %v6398_v33 = vrot.slane %v11555_v45, 5  ;;  %v11579_v24 = vadd.f32 %v8186_v25, %v4669_v15  ;;  %v8196_v40 = vld [vmem:[%s8908_s16 + $0x248] sm:$0xff] }
 0x7b3   : > { %v6415_v42 = vsel %vm947_vm4, %v6414_v11, %v6413_v57  ;;  %v8197_v25 = vld [vmem:[%s8908_s16 + $0x208] sm:$0xff] }
 0x7b4   : > { %v6417_v63 = vsel %vm950_vm5, %v6416_v48, %v6415_v42  ;;  %v11590_v37 = vsel %vm944_vm3, %v6398_v33, %v6397_v21  ;;  %v8192_v48 = vld [vmem:[%s8908_s16 + $0x88] sm:$0xff] }
 0x7b5   : > { %v6419_v8 = vsel %vm953_vm6, %v6418_v44, %v6417_v63  ;;  %v8193_v63 = vld [vmem:[%s8908_s16 + $0x200] sm:$0xff] }
 0x7b6   : > { %v11587_v18 = vsel %vm956_vm7, %v6420_v53, %v6419_v8  ;;  %v8195_v8 = vld [vmem:[%s8908_s16 + $0x280] sm:$0xff] }
 0x7c7   : > { %v11566_v1 = vpop.f32.mrb[100].mxu0 }
 0x7c8   : > { %v6284_v7 = vrot.slane %v11566_v1, 1  ;;  %v6286_v26 = vrot.slane %v11566_v1, 2  ;;  %v11576_v59 = vpop.f32.mrb[101].mxu0  ;;  %v6288_v55 = vrot.slane %v11566_v1, 3  ;;  %v6290_v29 = vrot.slane %v11566_v1, 4 }
 0x7c9   : > { %v6285_v0 = vrot.slane %v11576_v59, 1  ;;  %v6287_v49 = vrot.slane %v11576_v59, 2  ;;  %v11584_v52 = vpop.f32.mrb[102].mxu0  ;;  %v11596_v30 = vadd.f32 %v8187_v22, %v11566_v1  ;;  %v6289_v51 = vrot.slane %v11576_v59, 3 }
 0x7ca   : > { %v11599_v4 = vpop.f32.mrb[103].mxu0  ;;  %v11602_v5 = vadd.f32 %v8188_v43, %v6284_v7  ;;  %v11605_v57 = vadd.f32 %v8189_v34, %v6286_v26  ;;  %v6298_v11 = vrot.slane %v11584_v52, 1  ;;  %v6300_v3 = vrot.slane %v11584_v52, 2 }
 0x7cb   : > { %v6291_v17 = vrot.slane %v11576_v59, 4  ;;  %v11612_v58 = vadd.f32 %v8190_v60, %v11576_v59  ;;  %v11615_v42 = vadd.f32 %v8191_v13, %v6285_v0  ;;  %v6299_v20 = vrot.slane %v11599_v4, 1  ;;  %v8199_v13 = vld [vmem:[%s8908_s16 + $0x2c8] sm:$0xff] }
 0x7cc   : > { %v11619_v32 = vadd.f32 %v8192_v48, %v6287_v49  ;;  %v6301_v35 = vrot.slane %v11599_v4, 2  ;;  %v11626_v12 = vadd.f32 %v8193_v63, %v11584_v52  ;;  %v11629_v44 = vadd.f32 %v8194_v28, %v6298_v11  ;;  %v8198_v49 = vld [vmem:[%s8908_s16 + $0x288] sm:$0xff]  ;;  %v8201_v63 = vld [vmem:[%s8908_s16 + $0xc0] sm:$0xff] }
 0x7cd   : > { %v6303_v15 = vrot.slane %v11599_v4, 3  ;;  %v6305_v14 = vrot.slane %v11599_v4, 4  ;;  %v11634_v21 = vadd.f32 %v8195_v8, %v6300_v3  ;;  %v11638_v33 = vadd.f32 %v8196_v40, %v6299_v20  ;;  %v8200_v48 = vld [vmem:[%s8908_s16 + $0x308] sm:$0xff]  ;;  %v8202_v8 = vld [vmem:[%s8908_s16 + $0x100] sm:$0xff] }
 0x7ce   : > { %v6292_v7 = vrot.slane %v11566_v1, 5  ;;  %v11644_v0 = vadd.f32 %v8197_v25, %v11599_v4  ;;  %v11647_v22 = vadd.f32 %v8198_v49, %v6301_v35  ;;  %v6294_v43 = vrot.slane %v11566_v1, 6  ;;  %v8203_v25 = vld [vmem:[%s8908_s16 + $0xc8] sm:$0xff] }
 0x7cf   : > { %v6293_v34 = vrot.slane %v11576_v59, 5  ;;  %v6295_v11 = vrot.slane %v11576_v59, 6  ;;  %v6296_v3 = vrot.slane %v11566_v1, 7  ;;  %v6297_v60 = vrot.slane %v11576_v59, 7 }
 0x7d0   : > { %v11655_v20 = vadd.f32 %v8199_v13, %v6303_v15  ;;  %v11658_v35 = vadd.f32 %v8200_v48, %v6305_v14  ;;  %v11661_v28 = vadd.f32 %v8201_v63, %v6288_v55  ;;  %v11664_v40 = vadd.f32 %v8202_v8, %v6290_v29  ;;  %v8204_v15 = vld [vmem:[%s8908_s16 + $0x140] sm:$0xff]  ;;  %v8206_v48 = vld [vmem:[%s8908_s16 + $0x108] sm:$0xff] }
 0x7d1   : > { %v11668_v59 = vadd.f32 %v8203_v25, %v6289_v51  ;;  %v11671_v49 = vadd.f32 %v8204_v15, %v6292_v7  ;;  %v8205_v13 = vld [vmem:[%s8908_s16 + $0x180] sm:$0xff]  ;;  %v11677_v55 = vadd.f32 %v8206_v48, %v6291_v17  ;;  %v6677_v29 = vrot.slane %v11602_v5, 7  ;;  %v8209_v51 = vld [vmem:[%s8908_s16 + $0x188] sm:$0xff] }
 0x7d2   : > { %v11674_v14 = vadd.f32 %v8205_v13, %v6294_v43  ;;  %v8207_v63 = vld [vmem:[%s8908_s16 + $0x1c0] sm:$0xff]  ;;  %v6679_v8 = vrot.slane %v11605_v57, 6  ;;  %v11685_v1 = vadd.f32 %v8208_v36, %v6293_v34  ;;  %v11688_v25 = vadd.f32 %v8209_v51, %v6295_v11  ;;  %v8210_v7 = vld [vmem:[%s8908_s16 + $0x1c8] sm:$0xff] }
 0x7d3   : > { %v11680_v62 = vadd.f32 %v8207_v63, %v6296_v3  ;;  %v11691_v15 = vadd.f32 %v8210_v7, %v6297_v60  ;;  %v6681_v43 = vrot.slane %v11661_v28, 5  ;;  %v6678_v17 = vsel %vm938_vm1, %v6677_v29, %v11596_v30 }
 0x7d4   : > { %v6683_v3 = vrot.slane %v11664_v40, 4  ;;  %v6691_v13 = vrot.slane %v11615_v42, 7  ;;  %v6693_v48 = vrot.slane %v11619_v32, 6  ;;  %v6680_v36 = vsel %vm941_vm2, %v6679_v8, %v6678_v17 }
 0x7d5   : > { %v6685_v34 = vrot.slane %v11671_v49, 3  ;;  %v6687_v11 = vrot.slane %v11674_v14, 2  ;;  %v6689_v60 = vrot.slane %v11680_v62, 1  ;;  %v6682_v63 = vsel %vm944_vm3, %v6681_v43, %v6680_v36 }
 0x7d6   : > { %v6692_v51 = vsel %vm938_vm1, %v6691_v13, %v11612_v58  ;;  %v6695_v29 = vrot.slane %v11668_v59, 5  ;;  %v6697_v7 = vrot.slane %v11677_v55, 4  ;;  %v6684_v26 = vsel %vm947_vm4, %v6683_v3, %v6682_v63 }
 0x7d7   : > { %v6694_v8 = vsel %vm941_vm2, %v6693_v48, %v6692_v51  ;;  %v6699_v17 = vrot.slane %v11685_v1, 3  ;;  %v6306_v53 = vrot.slane %v11584_v52, 5  ;;  %v6686_v61 = vsel %vm950_vm5, %v6685_v34, %v6684_v26 }
 0x7d8   : > { %v6696_v43 = vsel %vm944_vm3, %v6695_v29, %v6694_v8  ;;  %v6701_v13 = vrot.slane %v11688_v25, 2  ;;  %v6703_v36 = vrot.slane %v11691_v15, 1  ;;  %v6688_v23 = vsel %vm953_vm6, %v6687_v11, %v6686_v61  ;;  %v8211_v29 = vld [vmem:[%s8908_s16 + $0x2c0] sm:$0xff] }
 0x7d9   : > { %v6698_v3 = vsel %vm947_vm4, %v6697_v7, %v6696_v43  ;;  %v6308_v48 = vrot.slane %v11584_v52, 6  ;;  %v6310_v63 = vrot.slane %v11584_v52, 7  ;;  %v6690_v51 = vsel %vm956_vm7, %v6689_v60, %v6688_v23  ;;  %v8212_v7 = vld [vmem:[%s8908_s16 + $0x300] sm:$0xff] }
 0x7da   : > { %v6700_v26 = vsel %vm950_vm5, %v6699_v17, %v6698_v3  ;;  %v6311_v34 = vrot.slane %v11599_v4, 7  ;;  %v13306_v8 = vrot.slane %v11584_v52, 3  ;;  %v6721_v61 = vrot.slane %v11647_v22, 6  ;;  %v8213_v60 = vld [vmem:[%s8908_s16 + $0x340] sm:$0xff] }
 0x7db   : > { %v6702_v11 = vsel %vm953_vm6, %v6701_v13, %v6700_v26  ;;  %v13307_v43 = vrot.slane %v11584_v52, 4  ;;  %v11736_v17 = vadd.f32 %v8213_v60, %v6306_v53  ;;  %v6705_v31 = vrot.slane %v11629_v44, 7  ;;  %v8217_v60 = vld [vmem:[%s8908_s16 + $0x3c0] sm:$0xff] }
 0x7dc   : > { %v11726_v9 = vadd.f32 %v8211_v29, %v13306_v8  ;;  %v6704_v3 = vsel %vm956_vm7, %v6703_v36, %v6702_v11  ;;  %v13308_v29 = vrot.slane %v11599_v4, 5  ;;  %v6707_v13 = vrot.slane %v11634_v21, 6  ;;  %v8218_v11 = vld [vmem:[%s8908_s16 + $0x3c8] sm:$0xff] }
 0x7dd   : > { %v11733_v23 = vadd.f32 %v8212_v7, %v13307_v43  ;;  %v6737_v26 = vadd.f32 %v6704_v3, %v6690_v51  ;;  %v11747_v52 = vadd.f32 %v8215_v16, %v6308_v48  ;;  %v8216_v7 = vld [vmem:[%s8908_s16 + $0x388] sm:$0xff]  ;;  %v13309_v43 = vrot.slane %v11599_v4, 6 }
 0x7de   : > { %v11742_v8 = vadd.f32 %v8214_v47, %v13308_v29  ;;  %v11755_v36 = vadd.f32 %v8217_v60, %v6310_v63  ;;  %v11758_v19 = vadd.f32 %v8218_v11, %v6311_v34  ;;  %v6706_v47 = vsel %vm938_vm1, %v6705_v31, %v11626_v12 }
 0x7df   : > { %v11752_v53 = vadd.f32 %v8216_v7, %v13309_v43  ;;  %v6709_v29 = vrot.slane %v11726_v9, 5  ;;  %v13310_v16 = vrot.slane %v11638_v33, 7  ;;  %6738 = vadd.xlane.f32.xlu1 %v6737_v26  ;;  %v6708_v4 = vsel %vm941_vm2, %v6707_v13, %v6706_v47 }
 0x7e0   : > { %v6711_v51 = vrot.slane %v11733_v23, 4  ;;  %v6723_v34 = vrot.slane %v11655_v20, 5  ;;  %v6713_v31 = vrot.slane %v11736_v17, 3  ;;  %v6725_v7 = vrot.slane %v11658_v35, 4 }
 0x7e1   : > { %v6720_v48 = vsel %vm938_vm1, %v13310_v16, %v11644_v0  ;;  %v6710_v3 = vsel %vm944_vm3, %v6709_v29, %v6708_v4  ;;  %v13311_v43 = vrot.slane %v11562_v56, 4  ;;  %v6715_v13 = vrot.slane %v11747_v52, 2 }
 0x7e2   : > { %v6722_v63 = vsel %vm941_vm2, %v6721_v61, %v6720_v48  ;;  %v6712_v26 = vsel %vm947_vm4, %v6711_v51, %v6710_v3  ;;  %v6727_v11 = vrot.slane %v11742_v8, 3  ;;  %v6717_v29 = vrot.slane %v11755_v36, 1 }
 0x7e3   : > { %v6401_v60 = vsel %vm947_vm4, %v13311_v43, %v11590_v37  ;;  %v6724_v61 = vsel %vm944_vm3, %v6723_v34, %v6722_v63  ;;  %v6714_v47 = vsel %vm950_vm5, %v6713_v31, %v6712_v26  ;;  %v6729_v48 = vrot.slane %v11752_v53, 2  ;;  %6426 = vadd.xlane.f32.xlu1 %v11587_v18  ;;  %v8219_v43 = vld [vmem:[%s8901_s12 + $0x70] sm:$0xff] }
 0x7e4   : > { %v6726_v16 = vsel %vm947_vm4, %v6725_v7, %v6724_v61  ;;  %v6716_v4 = vsel %vm953_vm6, %v6715_v13, %v6714_v47  ;;  %v6731_v51 = vrot.slane %v11758_v19, 1  ;;  %v6402_v63 = vrot.slane %v11571_v46, 3 }
 0x7e5   : > { %v6728_v37 = vsel %vm950_vm5, %v6727_v11, %v6726_v16  ;;  %v6718_v34 = vsel %vm956_vm7, %v6717_v29, %v6716_v4  ;;  %v13312_v7 = vrot.slane %v11500_v39, 7  ;;  %v6404_v11 = vrot.slane %v11579_v24, 2 }
 0x7e6   : > { %v6730_v3 = vsel %vm953_vm6, %v6729_v48, %v6728_v37  ;;  %v6403_v13 = vsel %vm950_vm5, %v6402_v63, %v6401_v60 }
 0x7e7   : > { %v6732_v31 = vsel %vm956_vm7, %v6731_v51, %v6730_v3  ;;  %v11797_v26 = vadd.f32 %v8219_v43, %v13312_v7  ;;  %v6405_v18 = vsel %vm953_vm6, %v6404_v11, %v6403_v13 }
 0x7e8   : > { %v6740_v61 = vadd.f32 %v6732_v31, %v6718_v34 }
 0x7e9   : > { %v6406_v47 = vrot.slane %v11797_v26, 1 }
 0x7ea   : > { %6741 = vadd.xlane.f32.xlu0 %v6740_v61 }
 0x7eb   : > { %v6407_v29 = vsel %vm956_vm7, %v6406_v47, %v6405_v18 }
 0x7ee   : > { %6424 = vadd.xlane.f32.xlu0 %v6407_v29 }
 0x86c   : > { %v6739_v16 = vpop.xlane.xlu1 %6738 }
 0x86d   : > { %v6744_v48 = vmul.f32 0.00390625, %v6739_v16 }
 0x86f   : > { %v6748_v4 = vrot.slane %v6744_v48, 1  ;;  %v6749_v37 = vrot.slane %v6744_v48, 2  ;;  %v6750_v39 = vrot.slane %v6744_v48, 3  ;;  %v6751_v51 = vrot.slane %v6744_v48, 4 }
 0x870   : > { %v6427_v3 = vpop.xlane.xlu1 %6426  ;;  %v6752_v43 = vrot.slane %v6744_v48, 5  ;;  %v6753_v60 = vrot.slane %v6744_v48, 6  ;;  %v6754_v63 = vrot.slane %v6744_v48, 7  ;;  %v11805_v34 = vsub.f32 %v11596_v30, %v6744_v48 }
 0x871   : > { %v11807_v31 = vmul.f32 0.0078125, %v6427_v3  ;;  %v11810_v7 = vsub.f32 %v11612_v58, %v6744_v48  ;;  %v11813_v13 = vsub.f32 %v11602_v5, %v6748_v4  ;;  %v11816_v61 = vsub.f32 %v11615_v42, %v6748_v4 }
 0x872   : > { %13313 = vst [vmem:[#allocation184_spill] sm:$0xff] %v11805_v34  ;;  %v11819_v11 = vsub.f32 %v11605_v57, %v6749_v37  ;;  %v11822_v18 = vsub.f32 %v11619_v32, %v6749_v37  ;;  %v11825_v30 = vsub.f32 %v11661_v28, %v6750_v39  ;;  %v11828_v47 = vsub.f32 %v11668_v59, %v6750_v39 }
 0x873   : > { %13314 = vst [vmem:[#allocation189_spill] sm:$0xff] %v11810_v7  ;;  %13315 = vst [vmem:[#allocation185_spill] sm:$0xff] %v11813_v13  ;;  %v11831_v58 = vsub.f32 %v11664_v40, %v6751_v51  ;;  %v11834_v5 = vsub.f32 %v11677_v55, %v6751_v51  ;;  %v11837_v42 = vsub.f32 %v11671_v49, %v6752_v43 }
 0x874   : > { %13316 = vst [vmem:[#allocation191_spill] sm:$0xff] %v11816_v61  ;;  %13317 = vst [vmem:[#allocation186_spill] sm:$0xff] %v11819_v11  ;;  %v11840_v57 = vsub.f32 %v11685_v1, %v6752_v43  ;;  %v11843_v32 = vsub.f32 %v11674_v14, %v6753_v60  ;;  %v11846_v28 = vsub.f32 %v11688_v25, %v6753_v60 }
 0x875   : > { %13318 = vst [vmem:[#allocation193_spill] sm:$0xff] %v11822_v18  ;;  %13319 = vst [vmem:[#allocation26_spill] sm:$0xff] %v11825_v30  ;;  %v11849_v59 = vsub.f32 %v11680_v62, %v6754_v63  ;;  %v11852_v40 = vsub.f32 %v11691_v15, %v6754_v63  ;;  %v6810_v49 = vmul.f32 %v11805_v34, %v11805_v34 }
 0x876   : > { %13320 = vst [vmem:[#allocation35_spill] sm:$0xff] %v11828_v47  ;;  %13321 = vst [vmem:[#allocation37_spill] sm:$0xff] %v11831_v58  ;;  %v6811_v1 = vmul.f32 %v11810_v7, %v11810_v7  ;;  %v6812_v14 = vmul.f32 %v11813_v13, %v11813_v13  ;;  %v6813_v25 = vmul.f32 %v11816_v61, %v11816_v61 }
 0x877   : > { %13322 = vst [vmem:[#allocation36_spill] sm:$0xff] %v11834_v5  ;;  %13323 = vst [vmem:[#allocation27_spill] sm:$0xff] %v11837_v42  ;;  %v6742_v55 = vpop.xlane.xlu0 %6741  ;;  %v6814_v62 = vmul.f32 %v11819_v11, %v11819_v11  ;;  %v6815_v15 = vmul.f32 %v11822_v18, %v11822_v18  ;;  %v6816_v16 = vmul.f32 %v11825_v30, %v11825_v30 }
 0x878   : > { %13324 = vst [vmem:[#allocation22_spill] sm:$0xff] %v11840_v57  ;;  %13325 = vst [vmem:[#allocation146_spill] sm:$0xff] %v11843_v32  ;;  %v11862_v29 = vmul.f32 0.00390625, %v6742_v55  ;;  %v6817_v48 = vmul.f32 %v11828_v47, %v11828_v47  ;;  %v6818_v4 = vmul.f32 %v11831_v58, %v11831_v58  ;;  %v6819_v37 = vmul.f32 %v11834_v5, %v11834_v5 }
 0x879   : > { %13326 = vst [vmem:[#allocation28_spill] sm:$0xff] %v11846_v28  ;;  %13327 = vst [vmem:[#allocation23_spill] sm:$0xff] %v11849_v59  ;;  %v6820_v39 = vmul.f32 %v11837_v42, %v11837_v42  ;;  %v6821_v51 = vmul.f32 %v11840_v57, %v11840_v57  ;;  %v6822_v3 = vmul.f32 %v11843_v32, %v11843_v32  ;;  %v6874_v5 = vrot.slane %v6812_v14, 7 }
 0x87a   : > { %13328 = vst [vmem:[#allocation139_spill] sm:$0xff] %v11852_v40  ;;  %v6823_v43 = vmul.f32 %v11846_v28, %v11846_v28  ;;  %v6824_v60 = vmul.f32 %v11849_v59, %v11849_v59  ;;  %v6825_v55 = vmul.f32 %v11852_v40, %v11852_v40  ;;  %v6876_v58 = vrot.slane %v6814_v62, 6 }
 0x87b   : > { %v6425_v63 = vpop.xlane.xlu0 %6424  ;;  %v6878_v47 = vrot.slane %v6816_v16, 5  ;;  %v6880_v30 = vrot.slane %v6818_v4, 4  ;;  %v6882_v57 = vrot.slane %v6820_v39, 3  ;;  %v6884_v18 = vrot.slane %v6822_v3, 2 }
 0x87c   : > { %v11888_v42 = vmul.f32 0.0078125, %v6425_v63  ;;  %v6875_v32 = vsel %vm938_vm1, %v6874_v5, %v6810_v49  ;;  %v6886_v11 = vrot.slane %v6824_v60, 1  ;;  %v6888_v61 = vrot.slane %v6813_v25, 7 }
 0x87d   : > { %v6890_v28 = vrot.slane %v6815_v15, 6  ;;  %v6877_v13 = vsel %vm941_vm2, %v6876_v58, %v6875_v32  ;;  %v6892_v59 = vrot.slane %v6817_v48, 5  ;;  %v6894_v7 = vrot.slane %v6819_v37, 4 }
 0x87e   : > { %v6896_v34 = vrot.slane %v6821_v51, 3  ;;  %v6879_v40 = vsel %vm944_vm3, %v6878_v47, %v6877_v13  ;;  %v6889_v14 = vsel %vm938_vm1, %v6888_v61, %v6811_v1  ;;  %v6898_v62 = vrot.slane %v6823_v43, 2 }
 0x87f   : > { %v6900_v16 = vrot.slane %v6825_v55, 1  ;;  %v6881_v4 = vsel %vm947_vm4, %v6880_v30, %v6879_v40  ;;  %v6891_v39 = vsel %vm941_vm2, %v6890_v28, %v6889_v14  ;;  %v6755_v5 = vrot.slane %v11862_v29, 1 }
 0x880   : > { %v6756_v49 = vrot.slane %v11862_v29, 2  ;;  %v6883_v25 = vsel %vm950_vm5, %v6882_v57, %v6881_v4  ;;  %v6893_v58 = vsel %vm944_vm3, %v6892_v59, %v6891_v39  ;;  %v6757_v32 = vrot.slane %v11862_v29, 3 }
 0x881   : > { %v6758_v13 = vrot.slane %v11862_v29, 4  ;;  %v6885_v61 = vsel %vm953_vm6, %v6884_v18, %v6883_v25  ;;  %v6895_v47 = vsel %vm947_vm4, %v6894_v7, %v6893_v58  ;;  %v6759_v30 = vrot.slane %v11862_v29, 5 }
 0x882   : > { %v6760_v28 = vrot.slane %v11862_v29, 6  ;;  %v6887_v40 = vsel %vm956_vm7, %v6886_v11, %v6885_v61  ;;  %v6897_v1 = vsel %vm950_vm5, %v6896_v34, %v6895_v47  ;;  %v6761_v57 = vrot.slane %v11862_v29, 7 }
 0x883   : > { %v11911_v59 = vsub.f32 %v11626_v12, %v11862_v29  ;;  %v6899_v15 = vsel %vm953_vm6, %v6898_v62, %v6897_v1  ;;  %v11916_v18 = vsub.f32 %v11644_v0, %v11862_v29  ;;  %v11919_v7 = vsub.f32 %v11629_v44, %v6755_v5 }
 0x884   : > { %v11922_v48 = vsub.f32 %v11638_v33, %v6755_v5  ;;  %v6901_v34 = vsel %vm956_vm7, %v6900_v16, %v6899_v15  ;;  %v11926_v11 = vsub.f32 %v11634_v21, %v6756_v49  ;;  %v11929_v12 = vsub.f32 %v11647_v22, %v6756_v49 }
 0x885   : > { %v11932_v37 = vsub.f32 %v11726_v9, %v6757_v32  ;;  %v6934_v51 = vadd.f32 %v6901_v34, %v6887_v40  ;;  %v11935_v0 = vsub.f32 %v11655_v20, %v6757_v32  ;;  %v11938_v44 = vsub.f32 %v11733_v23, %v6758_v13 }
 0x886   : > { %v11941_v33 = vsub.f32 %v11658_v35, %v6758_v13  ;;  %v11944_v29 = vsub.f32 %v11736_v17, %v6759_v30  ;;  %v11947_v21 = vsub.f32 %v11742_v8, %v6759_v30  ;;  %v11950_v22 = vsub.f32 %v11747_v52, %v6760_v28 }
 0x887   : > { %v11953_v9 = vsub.f32 %v11752_v53, %v6760_v28  ;;  %6935 = vadd.xlane.f32.xlu0 %v6934_v51  ;;  %v11956_v20 = vsub.f32 %v11755_v36, %v6761_v57  ;;  %v11959_v23 = vsub.f32 %v11758_v19, %v6761_v57  ;;  %v6826_v35 = vmul.f32 %v11911_v59, %v11911_v59 }
 0x888   : > { %13329 = vst [vmem:[#allocation136_spill] sm:$0xff] %v11944_v29  ;;  %13330 = vst [vmem:[#allocation155_spill] sm:$0xff] %v11947_v21  ;;  %v6827_v17 = vmul.f32 %v11916_v18, %v11916_v18  ;;  %v6828_v8 = vmul.f32 %v11919_v7, %v11919_v7  ;;  %v6829_v52 = vmul.f32 %v11922_v48, %v11922_v48 }
 0x889   : > { %13331 = vst [vmem:[#allocation167_spill] sm:$0xff] %v11950_v22  ;;  %13332 = vst [vmem:[#allocation111_spill] sm:$0xff] %v11953_v9  ;;  %v6830_v53 = vmul.f32 %v11926_v11, %v11926_v11  ;;  %v6831_v36 = vmul.f32 %v11929_v12, %v11929_v12  ;;  %v6832_v19 = vmul.f32 %v11932_v37, %v11932_v37 }
 0x88a   : > { %13333 = vst [vmem:[#allocation151_spill] sm:$0xff] %v11956_v20  ;;  %13334 = vst [vmem:[#allocation143_spill] sm:$0xff] %v11959_v23  ;;  %v6833_v3 = vmul.f32 %v11935_v0, %v11935_v0  ;;  %v6834_v43 = vmul.f32 %v11938_v44, %v11938_v44  ;;  %v6835_v60 = vmul.f32 %v11941_v33, %v11941_v33  ;;  %v6902_v39 = vrot.slane %v6828_v8, 7 }
 0x88b   : > { %v6836_v63 = vmul.f32 %v11944_v29, %v11944_v29  ;;  %v6837_v55 = vmul.f32 %v11947_v21, %v11947_v21  ;;  %v6838_v14 = vmul.f32 %v11950_v22, %v11950_v22  ;;  %v6839_v62 = vmul.f32 %v11953_v9, %v11953_v9  ;;  %v13355_v29 = vld [vmem:[#allocation28_spill] sm:$0xff] }
 0x88c   : > { %v6840_v16 = vmul.f32 %v11956_v20, %v11956_v20  ;;  %v6841_v4 = vmul.f32 %v11959_v23, %v11959_v23  ;;  %v6904_v5 = vrot.slane %v6830_v53, 6  ;;  %v6906_v49 = vrot.slane %v6832_v19, 5  ;;  %v13349_v23 = vld [vmem:[#allocation35_spill] sm:$0xff]  ;;  %v13351_v20 = vld [vmem:[#allocation36_spill] sm:$0xff] }
 0x88d   : > { %v6908_v25 = vrot.slane %v6834_v43, 4  ;;  %v6910_v58 = vrot.slane %v6836_v63, 3  ;;  %v6912_v32 = vrot.slane %v6838_v14, 2  ;;  %v6903_v13 = vsel %vm938_vm1, %v6902_v39, %v6826_v35 }
 0x88e   : > { %v6914_v61 = vrot.slane %v6840_v16, 1  ;;  %v6916_v47 = vrot.slane %v6829_v52, 7  ;;  %v6918_v30 = vrot.slane %v6831_v36, 6  ;;  %v6905_v28 = vsel %vm941_vm2, %v6904_v5, %v6903_v13 }
 0x88f   : > { %v6920_v40 = vrot.slane %v6833_v3, 5  ;;  %v6922_v1 = vrot.slane %v6835_v60, 4  ;;  %v6924_v57 = vrot.slane %v6837_v55, 3  ;;  %v6907_v15 = vsel %vm944_vm3, %v6906_v49, %v6905_v28 }
 0x890   : > { %v6917_v34 = vsel %vm938_vm1, %v6916_v47, %v6827_v17  ;;  %v6926_v51 = vrot.slane %v6839_v62, 2  ;;  %v6928_v8 = vrot.slane %v6841_v4, 1  ;;  %v6909_v53 = vsel %vm947_vm4, %v6908_v25, %v6907_v15 }
 0x891   : > { %v6919_v19 = vsel %vm941_vm2, %v6918_v30, %v6917_v34  ;;  %v6433_v35 = vrot.slane %v11888_v42, 1  ;;  %v6434_v52 = vrot.slane %v11888_v42, 2  ;;  %v6911_v36 = vsel %vm950_vm5, %v6910_v58, %v6909_v53 }
 0x892   : > { %v6921_v3 = vsel %vm944_vm3, %v6920_v40, %v6919_v19  ;;  %v6435_v43 = vrot.slane %v11888_v42, 3  ;;  %v6436_v60 = vrot.slane %v11888_v42, 4  ;;  %v6913_v17 = vsel %vm953_vm6, %v6912_v32, %v6911_v36 }
 0x893   : > { %v6923_v63 = vsel %vm947_vm4, %v6922_v1, %v6921_v3  ;;  %v6437_v55 = vrot.slane %v11888_v42, 5  ;;  %v6438_v14 = vrot.slane %v11888_v42, 6  ;;  %v6915_v62 = vsel %vm956_vm7, %v6914_v61, %v6913_v17 }
 0x894   : > { %v6925_v16 = vsel %vm950_vm5, %v6924_v57, %v6923_v63  ;;  %v6439_v4 = vrot.slane %v11888_v42, 7  ;;  %v12014_v39 = vsub.f32 %v11546_v54, %v11888_v42  ;;  %v12018_v49 = vsub.f32 %v11526_v6, %v6433_v35 }
 0x895   : > { %v6927_v5 = vsel %vm953_vm6, %v6926_v51, %v6925_v16  ;;  %v12021_v25 = vsub.f32 %v11534_v2, %v6434_v52  ;;  %v12024_v58 = vsub.f32 %v11555_v45, %v6435_v43  ;;  %v12028_v13 = vsub.f32 %v11562_v56, %v6436_v60 }
 0x896   : > { %v6929_v32 = vsel %vm956_vm7, %v6928_v8, %v6927_v5  ;;  %v12031_v61 = vsub.f32 %v11571_v46, %v6437_v55  ;;  %v12034_v54 = vsub.f32 %v11579_v24, %v6438_v14  ;;  %v12037_v6 = vsub.f32 %v11797_v26, %v6439_v4 }
 0x897   : > { %v6937_v42 = vadd.f32 %v6929_v32, %v6915_v62  ;;  %v6479_v2 = vmul.f32 %v12014_v39, %v12014_v39  ;;  %v6480_v45 = vmul.f32 %v12018_v49, %v12018_v49  ;;  %v6481_v56 = vmul.f32 %v12021_v25, %v12021_v25  ;;  %v13335_v32 = vld [vmem:[#allocation170_spill] sm:$0xff] }
 0x898   : > { %v6482_v46 = vmul.f32 %v12024_v58, %v12024_v58  ;;  %v6483_v24 = vmul.f32 %v12028_v13, %v12028_v13  ;;  %v6484_v47 = vmul.f32 %v12031_v61, %v12031_v61  ;;  %v6485_v26 = vmul.f32 %v12034_v54, %v12034_v54 }
 0x899   : > { %6938 = vadd.xlane.f32.xlu1 %v6937_v42  ;;  %v6486_v30 = vmul.f32 %v12037_v6, %v12037_v6  ;;  %v6511_v28 = vrot.slane %v6480_v45, 7  ;;  %v6440_v40 = vrot.slane %v11807_v31, 1  ;;  %v6513_v1 = vrot.slane %v6481_v56, 6 }
 0x89a   : > { %v6515_v57 = vrot.slane %v6482_v46, 5  ;;  %v6517_v15 = vrot.slane %v6483_v24, 4  ;;  %v6519_v34 = vrot.slane %v6484_v47, 3  ;;  %v6521_v8 = vrot.slane %v6485_v26, 2 }
 0x89b   : > { %v6512_v51 = vsel %vm938_vm1, %v6511_v28, %v6479_v2  ;;  %v6523_v53 = vrot.slane %v6486_v30, 1  ;;  %v6441_v19 = vrot.slane %v11807_v31, 2  ;;  %v6442_v52 = vrot.slane %v11807_v31, 3  ;;  %v13337_v2 = vld [vmem:[#allocation187_spill] sm:$0xff] }
 0x89c   : > { %v6514_v35 = vsel %vm941_vm2, %v6513_v1, %v6512_v51  ;;  %v6443_v36 = vrot.slane %v11807_v31, 4  ;;  %v6444_v3 = vrot.slane %v11807_v31, 5  ;;  %v6445_v60 = vrot.slane %v11807_v31, 6 }
 0x89d   : > { %v6516_v43 = vsel %vm944_vm3, %v6515_v57, %v6514_v35  ;;  %v6446_v17 = vrot.slane %v11807_v31, 7  ;;  %v12067_v63 = vsub.f32 %v11510_v50, %v11807_v31  ;;  %v12071_v14 = vsub.f32 %v11503_v38, %v6440_v40  ;;  %v13336_v50 = vld [vmem:[#allocation182_spill] sm:$0xff] }
 0x89e   : > { %v6518_v55 = vsel %vm947_vm4, %v6517_v15, %v6516_v43  ;;  %v12074_v62 = vsub.f32 %v11506_v27, %v6441_v19  ;;  %v12077_v16 = vsub.f32 %v11515_v10, %v6442_v52  ;;  %v12081_v5 = vsub.f32 %v11521_v41, %v6443_v36 }
 0x89f   : > { %v6520_v4 = vsel %vm950_vm5, %v6519_v34, %v6518_v55  ;;  %v12084_v42 = vsub.f32 %v13335_v32, %v6444_v3  ;;  %v12087_v31 = vsub.f32 %v13336_v50, %v6445_v60  ;;  %v12091_v45 = vsub.f32 %v13337_v2, %v6446_v17  ;;  %v6643_v55 = vld [vmem:[%s12469_s10] sm:$0x3] }
 0x8a0   : > { %v6522_v38 = vsel %vm953_vm6, %v6521_v8, %v6520_v4  ;;  %v6488_v27 = vmul.f32 %v12071_v14, %v12071_v14  ;;  %v6489_v41 = vmul.f32 %v12074_v62, %v12074_v62  ;;  %v6490_v56 = vmul.f32 %v12077_v16, %v12077_v16  ;;  %v6644_v4 = vld [vmem:[%s13338_s24] sm:$0x3] }
 0x8a1   : > { %v6524_v10 = vsel %vm956_vm7, %v6523_v53, %v6522_v38  ;;  %v6491_v46 = vmul.f32 %v12081_v5, %v12081_v5  ;;  %v6487_v24 = vmul.f32 %v12067_v63, %v12067_v63  ;;  %v6492_v47 = vmul.f32 %v12084_v42, %v12084_v42  ;;  %v7169_v32 = vld [vmem:[%s13339_s17] sm:$0x3] }
 0x8a2   : > { %6541 = vadd.xlane.f32.xlu0 %v6524_v10  ;;  %v6525_v26 = vrot.slane %v6488_v27, 7  ;;  %v6493_v30 = vmul.f32 %v12087_v31, %v12087_v31  ;;  %v6527_v28 = vrot.slane %v6489_v41, 6  ;;  %v6494_v40 = vmul.f32 %v12091_v45, %v12091_v45  ;;  %v13340_v38 = vld [vmem:[#allocation34_spill] sm:$0xff] }
 0x8a3   : > { %v6529_v57 = vrot.slane %v6490_v56, 5  ;;  %v6531_v34 = vrot.slane %v6491_v46, 4  ;;  %v6533_v8 = vrot.slane %v6492_v47, 3  ;;  %v12127_v2 = vrot.slane %v6643_v55, %v13340_v38  ;;  %v13341_v41 = vld [vmem:[#allocation178_spill] sm:$0xff] }
 0x8a4   : > { %v6526_v1 = vsel %vm938_vm1, %v6525_v26, %v6487_v24  ;;  %v6535_v19 = vrot.slane %v6493_v30, 2  ;;  %v6537_v52 = vrot.slane %v6494_v40, 1  ;;  %v12130_v56 = vrot.slane %v6643_v55, %v13341_v41  ;;  %v13347_v55 = vld [vmem:[#allocation193_spill] sm:$0xff] }
 0x8a5   : > { %v6528_v15 = vsel %vm941_vm2, %v6527_v28, %v6526_v1  ;;  %v12133_v46 = vrot.slane %v6644_v4, %v13340_v38  ;;  %v12136_v30 = vrot.slane %v6644_v4, %v13341_v41  ;;  %v12139_v28 = vrot.slane %v7169_v32, %v13340_v38  ;;  %v13348_v38 = vld [vmem:[#allocation26_spill] sm:$0xff] }
 0x8a6   : > { %v6530_v51 = vsel %vm944_vm3, %v6529_v57, %v6528_v15  ;;  %v12142_v15 = vrot.slane %v7169_v32, %v13341_v41  ;;  %v13350_v32 = vld [vmem:[#allocation37_spill] sm:$0xff] }
 0x8a7   : > { %v6532_v53 = vsel %vm947_vm4, %v6531_v34, %v6530_v51  ;;  %v13342_v51 = vld [vmem:[#allocation184_spill] sm:$0xff] }
 0x8a8   : > { %v6534_v35 = vsel %vm950_vm5, %v6533_v8, %v6532_v53  ;;  %v13343_v53 = vld [vmem:[#allocation189_spill] sm:$0xff] }
 0x8a9   : > { %v6536_v36 = vsel %vm953_vm6, %v6535_v19, %v6534_v35  ;;  %v13344_v35 = vld [vmem:[#allocation185_spill] sm:$0xff] }
 0x8aa   : > { %v6538_v3 = vsel %vm956_vm7, %v6537_v52, %v6536_v36 }
 0x8ab   : > { %6543 = vadd.xlane.f32.xlu1 %v6538_v3  ;;  %v13345_v3 = vld [vmem:[#allocation191_spill] sm:$0xff] }
 0x914   : > { %v6936_v43 = vpop.xlane.xlu0 %6935 }
 0x915   : > { %v6940_v60 = vmul.f32 0.00390625, %v6936_v43 }
 0x917   : > { %v6942_v17 = vadd.f32 1e-05, %v6940_v60  ;;  %v13346_v60 = vld [vmem:[#allocation186_spill] sm:$0xff] }
 0x919   : > { %8164 = vrsqrt.f32 %v6942_v17 }
 0x923   : > { %v8165_v50 = vpop.eup %8164 }
 0x924   : > { %v6948_v27 = vrot.slane %v8165_v50, 1  ;;  %v6949_v10 = vrot.slane %v8165_v50, 2  ;;  %v6950_v47 = vrot.slane %v8165_v50, 3  ;;  %v6951_v26 = vrot.slane %v8165_v50, 4 }
 0x925   : > { %v6952_v1 = vrot.slane %v8165_v50, 5  ;;  %v6953_v57 = vrot.slane %v8165_v50, 6  ;;  %v6954_v34 = vrot.slane %v8165_v50, 7  ;;  %v6978_v8 = vmul.f32 %v8165_v50, %v13342_v51  ;;  %v13352_v51 = vld [vmem:[#allocation27_spill] sm:$0xff] }
 0x926   : > { %v6939_v24 = vpop.xlane.xlu1 %6938  ;;  %v6979_v19 = vmul.f32 %v8165_v50, %v13343_v53  ;;  %v6980_v52 = vmul.f32 %v6948_v27, %v13344_v35  ;;  %v6981_v43 = vmul.f32 %v6948_v27, %v13345_v3  ;;  %v6982_v17 = vmul.f32 %v6949_v10, %v13346_v60  ;;  %v13353_v50 = vld [vmem:[#allocation22_spill] sm:$0xff]  ;;  %v13356_v3 = vld [vmem:[#allocation23_spill] sm:$0xff] }
 0x927   : > { %v6941_v40 = vmul.f32 0.00390625, %v6939_v24  ;;  %v6983_v4 = vmul.f32 %v6949_v10, %v13347_v55  ;;  %v6984_v24 = vmul.f32 %v6950_v47, %v13348_v38  ;;  %v6985_v9 = vmul.f32 %v6950_v47, %v13349_v23  ;;  %v13354_v35 = vld [vmem:[#allocation146_spill] sm:$0xff]  ;;  %v13357_v10 = vld [vmem:[#allocation139_spill] sm:$0xff] }
 0x928   : > { %v6986_v41 = vmul.f32 %v6951_v26, %v13350_v32  ;;  %v6987_v22 = vmul.f32 %v6951_v26, %v13351_v20  ;;  %v6988_v21 = vmul.f32 %v6952_v1, %v13352_v51  ;;  %v6989_v53 = vmul.f32 %v6952_v1, %v13353_v50 }
 0x929   : > { %v6943_v36 = vadd.f32 1e-05, %v6941_v40  ;;  %v6990_v40 = vmul.f32 %v6953_v57, %v13354_v35  ;;  %v6991_v27 = vmul.f32 %v6953_v57, %v13355_v29  ;;  %v6992_v60 = vmul.f32 %v6954_v34, %v13356_v3 }
 0x92a   : > { %v6993_v55 = vmul.f32 %v6954_v34, %v13357_v10  ;;  %v7023_v38 = vmul.f32 %v12127_v2, %v6980_v52  ;;  %v7021_v23 = vmul.f32 %v12127_v2, %v6978_v8  ;;  %v7022_v47 = vmul.f32 %v12130_v56, %v6979_v19 }
 0x92b   : > { %8166 = vrsqrt.f32 %v6943_v36  ;;  %v7024_v20 = vmul.f32 %v12130_v56, %v6981_v43  ;;  %v7025_v26 = vmul.f32 %v12127_v2, %v6982_v17  ;;  %v7026_v1 = vmul.f32 %v12130_v56, %v6983_v4 }
 0x92c   : > { %v7027_v32 = vmul.f32 %v12127_v2, %v6984_v24  ;;  %v7028_v29 = vmul.f32 %v12130_v56, %v6985_v9  ;;  %v7029_v57 = vmul.f32 %v12127_v2, %v6986_v41  ;;  %v7030_v34 = vmul.f32 %v12130_v56, %v6987_v22 }
 0x92d   : > { %v7031_v52 = vmul.f32 %v12127_v2, %v6988_v21  ;;  %v7032_v8 = vmul.f32 %v12130_v56, %v6989_v53  ;;  %v7033_v19 = vmul.f32 %v12127_v2, %v6990_v40  ;;  %v7034_v17 = vmul.f32 %v12130_v56, %v6991_v27 }
 0x92e   : > { %v7035_v4 = vmul.f32 %v12127_v2, %v6992_v60  ;;  %v7066_v24 = vadd.f32 %v12133_v46, %v7023_v38  ;;  %v7036_v9 = vmul.f32 %v12130_v56, %v6993_v55  ;;  %v7064_v41 = vadd.f32 %v12133_v46, %v7021_v23 }
 0x92f   : > { %v6542_v36 = vpop.xlane.xlu0 %6541  ;;  %v7065_v51 = vadd.f32 %v12136_v30, %v7022_v47  ;;  %v7068_v22 = vadd.f32 %v12133_v46, %v7025_v26  ;;  %v7067_v50 = vadd.f32 %v12136_v30, %v7024_v20  ;;  %v7069_v53 = vadd.f32 %v12136_v30, %v7026_v1 }
 0x930   : > { %v6545_v43 = vmul.f32 0.0078125, %v6542_v36  ;;  %v7070_v35 = vadd.f32 %v12133_v46, %v7027_v32  ;;  %v7071_v40 = vadd.f32 %v12136_v30, %v7028_v29  ;;  %v7072_v27 = vadd.f32 %v12133_v46, %v7029_v57 }
 0x931   : > { %v7073_v3 = vadd.f32 %v12136_v30, %v7030_v34  ;;  %v7074_v60 = vadd.f32 %v12133_v46, %v7031_v52  ;;  %v7075_v10 = vadd.f32 %v12136_v30, %v7032_v8  ;;  %v7076_v55 = vadd.f32 %v12133_v46, %v7033_v19 }
 0x932   : > { %v6547_v21 = vadd.f32 1e-05, %v6545_v43  ;;  %v7183_v38 = vmul.f32 %v12139_v28, %v7066_v24  ;;  %v7077_v23 = vadd.f32 %v12136_v30, %v7034_v17  ;;  %v7078_v47 = vadd.f32 %v12133_v46, %v7035_v4 }
 0x933   : > { %v7079_v20 = vadd.f32 %v12136_v30, %v7036_v9  ;;  %v7185_v26 = vmul.f32 %v12139_v28, %v7068_v22  ;;  %v7181_v32 = vmul.f32 %v12139_v28, %v7064_v41  ;;  %v7184_v29 = vmul.f32 %v12142_v15, %v7067_v50 }
 0x934   : > { %8168 = vrsqrt.f32 %v6547_v21  ;;  %v7186_v57 = vmul.f32 %v12142_v15, %v7069_v53  ;;  %v7187_v36 = vmul.f32 %v12139_v28, %v7070_v35  ;;  %v7182_v34 = vmul.f32 %v12142_v15, %v7065_v51 }
 0x935   : > { %v12194_v1 = vpop.eup %8166  ;;  %v12202_v52 = vmul.f32 %v12142_v15, %v7071_v40  ;;  %v7189_v8 = vmul.f32 %v12139_v28, %v7072_v27  ;;  %v12206_v19 = vmul.f32 %v12142_v15, %v7073_v3  ;;  %v7191_v17 = vmul.f32 %v12139_v28, %v7074_v60 }
 0x936   : > { %v12210_v4 = vmul.f32 %v12139_v28, %v7076_v55  ;;  %v7245_v24 = vrot.slane %v7183_v38, 7  ;;  %v7247_v9 = vrot.slane %v7185_v26, 6  ;;  %v12213_v22 = vmul.f32 %v12142_v15, %v7075_v10 }
 0x937   : > { %v12216_v51 = vmul.f32 %v12142_v15, %v7077_v23  ;;  %v12219_v21 = vmul.f32 %v12139_v28, %v7078_v47  ;;  %v7249_v53 = vrot.slane %v7187_v36, 5  ;;  %v7259_v35 = vrot.slane %v7184_v29, 7 }
 0x938   : > { %v6544_v43 = vpop.xlane.xlu1 %6543  ;;  %v7246_v50 = vsel %vm938_vm1, %v7245_v24, %v7181_v32  ;;  %v7261_v40 = vrot.slane %v7186_v57, 6  ;;  %v12223_v3 = vmul.f32 %v12142_v15, %v7079_v20  ;;  %v7251_v55 = vrot.slane %v7189_v8, 4 }
 0x939   : > { %v6546_v41 = vmul.f32 0.0078125, %v6544_v43  ;;  %v7248_v60 = vsel %vm941_vm2, %v7247_v9, %v7246_v50  ;;  %v7253_v38 = vrot.slane %v7191_v17, 3  ;;  %v7260_v47 = vsel %vm938_vm1, %v7259_v35, %v7182_v34  ;;  %v12243_v34 = vld [vmem:[%s13358_s3] ss:$0 sm:$0xff] }
 0x93a   : > { %v7250_v10 = vsel %vm944_vm3, %v7249_v53, %v7248_v60  ;;  %v7263_v29 = vrot.slane %v12202_v52, 5  ;;  %v12236_v36 = vsel %vm941_vm2, %v7261_v40, %v7260_v47  ;;  %v12249_v40 = vld [vmem:[%s13359_s20] ss:$0 sm:$0xff] }
 0x93b   : > { %v6548_v27 = vadd.f32 1e-05, %v6546_v41  ;;  %v7252_v26 = vsel %vm947_vm4, %v7251_v55, %v7250_v10 }
 0x93c   : > { %v12233_v20 = vsel %vm950_vm5, %v7253_v38, %v7252_v26 }
 0x93d   : > { %8170 = vrsqrt.f32 %v6548_v27 }
 0x93e   : > { %v8169_v57 = vpop.eup %8168 }
 0x93f   : > { %v6553_v17 = vrot.slane %v8169_v57, 1  ;;  %v6554_v24 = vrot.slane %v8169_v57, 2  ;;  %v6555_v9 = vrot.slane %v8169_v57, 3  ;;  %v6556_v41 = vrot.slane %v8169_v57, 4 }
 0x940   : > { %v6557_v50 = vrot.slane %v8169_v57, 5  ;;  %v6558_v53 = vrot.slane %v8169_v57, 6  ;;  %v6559_v35 = vrot.slane %v8169_v57, 7  ;;  %v6583_v27 = vmul.f32 %v8169_v57, %v12014_v39 }
 0x941   : > { %v6584_v60 = vmul.f32 %v6553_v17, %v12018_v49  ;;  %v6585_v55 = vmul.f32 %v6554_v24, %v12021_v25  ;;  %v6586_v10 = vmul.f32 %v6555_v9, %v12024_v58  ;;  %v6587_v38 = vmul.f32 %v6556_v41, %v12028_v13  ;;  %v12266_v58 = vld [vmem:[%s13360_s28] ss:$0 sm:$0xff] }
 0x942   : > { %v6588_v47 = vmul.f32 %v6557_v50, %v12031_v61  ;;  %v6589_v26 = vmul.f32 %v6558_v53, %v12034_v54  ;;  %v6590_v43 = vmul.f32 %v6559_v35, %v12037_v6  ;;  %v6605_v39 = vmul.f32 %v12243_v34, %v6583_v27 }
 0x943   : > { %v6606_v57 = vmul.f32 %v12243_v34, %v6584_v60  ;;  %v6607_v32 = vmul.f32 %v12243_v34, %v6585_v55  ;;  %v6608_v49 = vmul.f32 %v12243_v34, %v6586_v10  ;;  %v6609_v25 = vmul.f32 %v12243_v34, %v6587_v38 }
 0x944   : > { %v6610_v13 = vmul.f32 %v12243_v34, %v6588_v47  ;;  %v6611_v61 = vmul.f32 %v12243_v34, %v6589_v26  ;;  %v6612_v54 = vmul.f32 %v12243_v34, %v6590_v43  ;;  %v6627_v6 = vadd.f32 %v12249_v40, %v6605_v39 }
 0x945   : > { %v6628_v17 = vadd.f32 %v12249_v40, %v6606_v57  ;;  %v6629_v24 = vadd.f32 %v12249_v40, %v6607_v32  ;;  %v6630_v9 = vadd.f32 %v12249_v40, %v6608_v49  ;;  %v6631_v41 = vadd.f32 %v12249_v40, %v6609_v25 }
 0x946   : > { %v6632_v50 = vadd.f32 %v12249_v40, %v6610_v13  ;;  %v6633_v53 = vadd.f32 %v12249_v40, %v6611_v61  ;;  %v6634_v35 = vadd.f32 %v12249_v40, %v6612_v54  ;;  %v7103_v27 = vmul.f32 %v12266_v58, %v6627_v6 }
 0x947   : > { %v8171_v60 = vpop.eup %8170  ;;  %v7104_v43 = vmul.f32 %v12266_v58, %v6628_v17  ;;  %v7105_v55 = vmul.f32 %v12266_v58, %v6629_v24  ;;  %v7106_v10 = vmul.f32 %v12266_v58, %v6630_v9  ;;  %v7107_v32 = vmul.f32 %v12266_v58, %v6631_v41 }
 0x948   : > { %v7108_v38 = vmul.f32 %v12266_v58, %v6632_v50  ;;  %v7109_v47 = vmul.f32 %v12266_v58, %v6633_v53  ;;  %v7110_v26 = vmul.f32 %v12266_v58, %v6634_v35  ;;  %v6560_v39 = vrot.slane %v8171_v60, 1 }
 0x949   : > { %v7135_v57 = vrot.slane %v7104_v43, 7  ;;  %v7137_v49 = vrot.slane %v7105_v55, 6  ;;  %v7139_v25 = vrot.slane %v7106_v10, 5  ;;  %v7141_v13 = vrot.slane %v7107_v32, 4 }
 0x94a   : > { %v7143_v61 = vrot.slane %v7108_v38, 3  ;;  %v7145_v54 = vrot.slane %v7109_v47, 2  ;;  %v7147_v6 = vrot.slane %v7110_v26, 1  ;;  %v6561_v17 = vrot.slane %v8171_v60, 2 }
 0x94b   : > { %v7136_v24 = vsel %vm938_vm1, %v7135_v57, %v7103_v27  ;;  %v6562_v9 = vrot.slane %v8171_v60, 3  ;;  %v6563_v8 = vrot.slane %v8171_v60, 4  ;;  %v6564_v41 = vrot.slane %v8171_v60, 5 }
 0x94c   : > { %v7138_v50 = vsel %vm941_vm2, %v7137_v49, %v7136_v24  ;;  %v6565_v23 = vrot.slane %v8171_v60, 6  ;;  %v6566_v53 = vrot.slane %v8171_v60, 7  ;;  %v6591_v35 = vmul.f32 %v8171_v60, %v12067_v63 }
 0x94d   : > { %v7140_v43 = vsel %vm944_vm3, %v7139_v25, %v7138_v50  ;;  %v6592_v55 = vmul.f32 %v6560_v39, %v12071_v14  ;;  %v6593_v10 = vmul.f32 %v6561_v17, %v12074_v62  ;;  %v6594_v32 = vmul.f32 %v6562_v9, %v12077_v16 }
 0x94e   : > { %v7142_v38 = vsel %vm947_vm4, %v7141_v13, %v7140_v43  ;;  %v6595_v27 = vmul.f32 %v6563_v8, %v12081_v5  ;;  %v6596_v47 = vmul.f32 %v6564_v41, %v12084_v42  ;;  %v6597_v26 = vmul.f32 %v6565_v23, %v12087_v31 }
 0x94f   : > { %v7144_v57 = vsel %vm950_vm5, %v7143_v61, %v7142_v38  ;;  %v6598_v63 = vmul.f32 %v6566_v53, %v12091_v45  ;;  %v6613_v60 = vmul.f32 %v12243_v34, %v6591_v35  ;;  %v6614_v14 = vmul.f32 %v12243_v34, %v6592_v55 }
 0x950   : > { %v7146_v62 = vsel %vm953_vm6, %v7145_v54, %v7144_v57  ;;  %v6615_v16 = vmul.f32 %v12243_v34, %v6593_v10  ;;  %v6616_v39 = vmul.f32 %v12243_v34, %v6594_v32  ;;  %v6617_v5 = vmul.f32 %v12243_v34, %v6595_v27 }
 0x951   : > { %v7148_v42 = vsel %vm956_vm7, %v7147_v6, %v7146_v62  ;;  %v6618_v31 = vmul.f32 %v12243_v34, %v6596_v47  ;;  %v6619_v23 = vmul.f32 %v12243_v34, %v6597_v26  ;;  %v6620_v45 = vmul.f32 %v12243_v34, %v6598_v63 }
 0x952   : > { %7165 = vadd.xlane.f32.xlu0 %v7148_v42  ;;  %v6635_v8 = vadd.f32 %v12249_v40, %v6613_v60  ;;  %v6636_v49 = vadd.f32 %v12249_v40, %v6614_v14  ;;  %v6637_v25 = vadd.f32 %v12249_v40, %v6615_v16  ;;  %v6638_v13 = vadd.f32 %v12249_v40, %v6616_v39 }
 0x953   : > { %v6639_v61 = vadd.f32 %v12249_v40, %v6617_v5  ;;  %v6640_v54 = vadd.f32 %v12249_v40, %v6618_v31  ;;  %v6641_v6 = vadd.f32 %v12249_v40, %v6619_v23  ;;  %v6642_v17 = vadd.f32 %v12249_v40, %v6620_v45 }
 0x954   : > { %v7112_v24 = vmul.f32 %v12266_v58, %v6636_v49  ;;  %v7113_v34 = vmul.f32 %v12266_v58, %v6637_v25  ;;  %v7114_v9 = vmul.f32 %v12266_v58, %v6638_v13  ;;  %v7269_v41 = vrot.slane %v12216_v51, 2 }
 0x955   : > { %v7111_v50 = vmul.f32 %v12266_v58, %v6635_v8  ;;  %v7115_v53 = vmul.f32 %v12266_v58, %v6639_v61  ;;  %v7116_v35 = vmul.f32 %v12266_v58, %v6640_v54  ;;  %v7264_v43 = vsel %vm944_vm3, %v7263_v29, %v12236_v36 }
 0x956   : > { %v7117_v40 = vmul.f32 %v12266_v58, %v6641_v6  ;;  %v7149_v55 = vrot.slane %v7112_v24, 7  ;;  %v7151_v10 = vrot.slane %v7113_v34, 6  ;;  %v13361_v32 = vrot.slane %v12210_v4, 2 }
 0x957   : > { %v7118_v38 = vmul.f32 %v12266_v58, %v6642_v17  ;;  %v7271_v27 = vrot.slane %v12223_v3, 1  ;;  %v6955_v47 = vrot.slane %v12194_v1, 1  ;;  %v6956_v26 = vrot.slane %v12194_v1, 2 }
 0x958   : > { %v7256_v51 = vsel %vm953_vm6, %v13361_v32, %v12233_v20  ;;  %v7150_v52 = vsel %vm938_vm1, %v7149_v55, %v7111_v50  ;;  %v7153_v29 = vrot.slane %v7114_v9, 5  ;;  %v7155_v36 = vrot.slane %v7115_v53, 4  ;;  %v13365_v50 = vld [vmem:[#allocation136_spill] sm:$0xff] }
 0x959   : > { %v13362_v57 = vrot.slane %v12206_v19, 4  ;;  %v7152_v4 = vsel %vm941_vm2, %v7151_v10, %v7150_v52  ;;  %v7157_v60 = vrot.slane %v7116_v35, 3  ;;  %v13363_v20 = vrot.slane %v12219_v21, 1  ;;  %v13369_v10 = vld [vmem:[#allocation111_spill] sm:$0xff] }
 0x95a   : > { %v13364_v3 = vrot.slane %v12213_v22, 3  ;;  %v7154_v62 = vsel %vm944_vm3, %v7153_v29, %v7152_v4  ;;  %v7159_v16 = vrot.slane %v7117_v40, 2  ;;  %v6957_v19 = vrot.slane %v12194_v1, 3 }
 0x95b   : > { %v7266_v63 = vsel %vm947_vm4, %v13362_v57, %v7264_v43  ;;  %v7258_v58 = vsel %vm956_vm7, %v13363_v20, %v7256_v51  ;;  %v7156_v5 = vsel %vm947_vm4, %v7155_v36, %v7154_v62  ;;  %v7161_v42 = vrot.slane %v7118_v38, 1 }
 0x95c   : > { %v7268_v14 = vsel %vm950_vm5, %v13364_v3, %v7266_v63  ;;  %v6958_v21 = vrot.slane %v12194_v1, 4  ;;  %v7158_v23 = vsel %vm950_vm5, %v7157_v60, %v7156_v5  ;;  %v6959_v22 = vrot.slane %v12194_v1, 5 }
 0x95d   : > { %v7270_v39 = vsel %vm953_vm6, %v7269_v41, %v7268_v14  ;;  %v6960_v8 = vrot.slane %v12194_v1, 6  ;;  %v7160_v49 = vsel %vm953_vm6, %v7159_v16, %v7158_v23  ;;  %v6961_v25 = vrot.slane %v12194_v1, 7 }
 0x95e   : > { %v7272_v31 = vsel %vm956_vm7, %v7271_v27, %v7270_v39  ;;  %v6996_v13 = vmul.f32 %v6955_v47, %v11919_v7  ;;  %v6998_v61 = vmul.f32 %v6956_v26, %v11926_v11  ;;  %v7162_v54 = vsel %vm956_vm7, %v7161_v42, %v7160_v49 }
 0x95f   : > { %v7305_v45 = vadd.f32 %v7272_v31, %v7258_v58  ;;  %v6997_v6 = vmul.f32 %v6955_v47, %v11922_v48  ;;  %v6999_v17 = vmul.f32 %v6956_v26, %v11929_v12  ;;  %v7000_v24 = vmul.f32 %v6957_v19, %v11932_v37  ;;  %7167 = vadd.xlane.f32.xlu1 %v7162_v54  ;;  %v13366_v48 = vld [vmem:[#allocation155_spill] sm:$0xff] }
 0x960   : > { %v6994_v34 = vmul.f32 %v12194_v1, %v11911_v59  ;;  %v6995_v9 = vmul.f32 %v12194_v1, %v11916_v18  ;;  %v7002_v7 = vmul.f32 %v6958_v21, %v11938_v44  ;;  %v7001_v11 = vmul.f32 %v6957_v19, %v11935_v0  ;;  %v13367_v12 = vld [vmem:[#allocation167_spill] sm:$0xff] }
 0x961   : > { %7306 = vadd.xlane.f32.xlu0 %v7305_v45  ;;  %v7003_v41 = vmul.f32 %v6958_v21, %v11941_v33  ;;  %v7004_v53 = vmul.f32 %v6959_v22, %v13365_v50  ;;  %v7005_v35 = vmul.f32 %v6959_v22, %v13366_v48  ;;  %v7006_v43 = vmul.f32 %v6960_v8, %v13367_v12  ;;  %v13368_v37 = vld [vmem:[#allocation151_spill] sm:$0xff] }
 0x962   : > { %v7008_v40 = vmul.f32 %v6961_v25, %v13368_v37  ;;  %v7039_v55 = vmul.f32 %v12127_v2, %v6996_v13  ;;  %v7041_v59 = vmul.f32 %v12127_v2, %v6998_v61  ;;  %v7007_v18 = vmul.f32 %v6960_v8, %v13369_v10  ;;  %v13370_v1 = vld [vmem:[#allocation143_spill] sm:$0xff] }
 0x963   : > { %v7040_v44 = vmul.f32 %v12130_v56, %v6997_v6  ;;  %v7042_v0 = vmul.f32 %v12130_v56, %v6999_v17  ;;  %v7043_v33 = vmul.f32 %v12127_v2, %v7000_v24  ;;  %v7009_v32 = vmul.f32 %v6961_v25, %v13370_v1 }
 0x964   : > { %v7037_v51 = vmul.f32 %v12127_v2, %v6994_v34  ;;  %v7038_v38 = vmul.f32 %v12130_v56, %v6995_v9  ;;  %v7045_v27 = vmul.f32 %v12127_v2, %v7002_v7  ;;  %v7044_v47 = vmul.f32 %v12130_v56, %v7001_v11 }
 0x965   : > { %v7046_v26 = vmul.f32 %v12130_v56, %v7003_v41  ;;  %v7047_v52 = vmul.f32 %v12127_v2, %v7004_v53  ;;  %v7048_v29 = vmul.f32 %v12130_v56, %v7005_v35  ;;  %v7049_v36 = vmul.f32 %v12127_v2, %v7006_v43 }
 0x966   : > { %v7051_v57 = vmul.f32 %v12127_v2, %v7008_v40  ;;  %v7082_v63 = vadd.f32 %v12133_v46, %v7039_v55  ;;  %v7084_v4 = vadd.f32 %v12133_v46, %v7041_v59  ;;  %v7050_v60 = vmul.f32 %v12130_v56, %v7007_v18 }
 0x967   : > { %v7083_v20 = vadd.f32 %v12136_v30, %v7040_v44  ;;  %v7085_v58 = vadd.f32 %v12136_v30, %v7042_v0  ;;  %v7086_v3 = vadd.f32 %v12133_v46, %v7043_v33  ;;  %v7052_v14 = vmul.f32 %v12130_v56, %v7009_v32 }
 0x968   : > { %v7080_v62 = vadd.f32 %v12133_v46, %v7037_v51  ;;  %v7081_v16 = vadd.f32 %v12136_v30, %v7038_v38  ;;  %v7088_v2 = vadd.f32 %v12133_v46, %v7045_v27  ;;  %v7087_v39 = vadd.f32 %v12136_v30, %v7044_v47 }
 0x969   : > { %v7089_v19 = vadd.f32 %v12136_v30, %v7046_v26  ;;  %v7090_v5 = vadd.f32 %v12133_v46, %v7047_v52  ;;  %v7091_v42 = vadd.f32 %v12136_v30, %v7048_v29  ;;  %v7092_v31 = vadd.f32 %v12133_v46, %v7049_v36 }
 0x96a   : > { %v7094_v21 = vadd.f32 %v12133_v46, %v7051_v57  ;;  %v7199_v56 = vmul.f32 %v12139_v28, %v7082_v63  ;;  %v7201_v23 = vmul.f32 %v12139_v28, %v7084_v4  ;;  %v7093_v45 = vadd.f32 %v12136_v30, %v7050_v60  ;;  %v7599_v63 = vld [vmem:[#allocation2] ss:$0 sm:$0xff] }
 0x96b   : > { %v7200_v22 = vmul.f32 %v12142_v15, %v7083_v20  ;;  %v7202_v8 = vmul.f32 %v12142_v15, %v7085_v58  ;;  %v7203_v49 = vmul.f32 %v12139_v28, %v7086_v3  ;;  %v7095_v25 = vadd.f32 %v12136_v30, %v7052_v14 }
 0x96c   : > { %v7197_v13 = vmul.f32 %v12139_v28, %v7080_v62  ;;  %v7198_v61 = vmul.f32 %v12142_v15, %v7081_v16  ;;  %v7205_v46 = vmul.f32 %v12139_v28, %v7088_v2  ;;  %v7204_v54 = vmul.f32 %v12142_v15, %v7087_v39 }
 0x96d   : > { %v7207_v6 = vmul.f32 %v12139_v28, %v7090_v5  ;;  %v7273_v17 = vrot.slane %v7199_v56, 7  ;;  %v7275_v24 = vrot.slane %v7201_v23, 6  ;;  %v7206_v34 = vmul.f32 %v12142_v15, %v7089_v19 }
 0x96e   : > { %v7208_v9 = vmul.f32 %v12142_v15, %v7091_v42  ;;  %v7209_v7 = vmul.f32 %v12139_v28, %v7092_v31  ;;  %v7211_v30 = vmul.f32 %v12139_v28, %v7094_v21  ;;  %v7277_v41 = vrot.slane %v7203_v49, 5 }
 0x96f   : > { %v7274_v11 = vsel %vm938_vm1, %v7273_v17, %v7197_v13  ;;  %v7287_v50 = vrot.slane %v7200_v22, 7  ;;  %v7289_v53 = vrot.slane %v7202_v8, 6  ;;  %v7210_v48 = vmul.f32 %v12142_v15, %v7093_v45 }
 0x970   : > { %v7212_v35 = vmul.f32 %v12142_v15, %v7095_v25  ;;  %v7276_v12 = vsel %vm941_vm2, %v7275_v24, %v7274_v11  ;;  %v7279_v43 = vrot.slane %v7205_v46, 4  ;;  %v7281_v40 = vrot.slane %v7207_v6, 3 }
 0x971   : > { %v7278_v37 = vsel %vm944_vm3, %v7277_v41, %v7276_v12  ;;  %v7288_v55 = vsel %vm938_vm1, %v7287_v50, %v7198_v61  ;;  %v7291_v59 = vrot.slane %v7204_v54, 5  ;;  %v7283_v10 = vrot.slane %v7209_v7, 2 }
 0x972   : > { %v7280_v28 = vsel %vm947_vm4, %v7279_v43, %v7278_v37  ;;  %v7290_v18 = vsel %vm941_vm2, %v7289_v53, %v7288_v55  ;;  %v7293_v44 = vrot.slane %v7206_v34, 4  ;;  %v7285_v15 = vrot.slane %v7211_v30, 1 }
 0x973   : > { %v7282_v0 = vsel %vm950_vm5, %v7281_v40, %v7280_v28  ;;  %v7292_v33 = vsel %vm944_vm3, %v7291_v59, %v7290_v18  ;;  %v7295_v1 = vrot.slane %v7208_v9, 3  ;;  %v7297_v38 = vrot.slane %v7210_v48, 2 }
 0x974   : > { %v7284_v32 = vsel %vm953_vm6, %v7283_v10, %v7282_v0  ;;  %v7294_v51 = vsel %vm947_vm4, %v7293_v44, %v7292_v33  ;;  %v7299_v26 = vrot.slane %v7212_v35, 1 }
 0x975   : > { %v7286_v27 = vsel %vm956_vm7, %v7285_v15, %v7284_v32  ;;  %v7296_v47 = vsel %vm950_vm5, %v7295_v1, %v7294_v51 }
 0x976   : > { %v7298_v52 = vsel %vm953_vm6, %v7297_v38, %v7296_v47 }
 0x977   : > { %v7300_v29 = vsel %vm956_vm7, %v7299_v26, %v7298_v52 }
 0x978   : > { %v7308_v36 = vadd.f32 %v7300_v29, %v7286_v27 }
 0x97a   : > { %7309 = vadd.xlane.f32.xlu1 %v7308_v36 }
 0x9df   : > { %v7166_v57 = vpop.xlane.xlu0 %7165 }
 0x9ec   : > { %v7168_v58 = vpop.xlane.xlu1 %7167 }
 0x9ee   : > { %v7307_v4 = vpop.xlane.xlu0 %7306 }
 0x9ef   : > { %v7311_v60 = vadd.f32 %v7307_v4, %v7166_v57 }
 0x9f1   : > { %v7320_v20 = vadd.f32 %v7599_v63, %v7311_v60 }
 0x9f3   : > { %7323 = vst.msk [vmem:[%s647_s9] sm:$0xff] %vm7322_vm13, %v7320_v20 }
 0xa07   : > { %v7310_v3 = vpop.xlane.xlu1 %7309 }
 0xa08   : > { %v7312_v14 = vadd.f32 %v7310_v3, %v7168_v58 }
 0xa0a   : > { %v7321_v62 = vadd.f32 %v7599_v63, %v7312_v14 }
 0xa0c   : > { %7324 = vst.msk [vmem:[%s647_s9 + $0x8] sm:$0xff] %vm7322_vm13, %v7321_v62 }
 0xa0d PF: > { %p33_p3 = scmp.ge.s32.totalorder %s8793_s29, 4   ;;  %s13372_s20 = smov %s8494_s21 }
 0xa0e   : > { %s13373_s21 = smov %s8498_s22  ;;  %s13374_s22 = smov %s8805_s2 }
 0xa0f   : > { %s13375_s23 = smov %s8793_s29  ;;  %35 = sbr.rel (!%p33_p3) target bundleno = 18 (0x12), region = 157 }
 0xa16   :  { %7346 = vsyncpa [#allocation4], 1 }
 0xa17   :  { %7348 = vsyncpa [#allocation4 + $0x1], 1 }
 0xa18   :  { %7349 = vsyncpa [#allocation6], 1 }
 0xa19   :  { %7351 = vsyncpa [#allocation6 + $0x1], 1 }
 0xa1a   :  { %7352 = vsyncpa [#allocation9], 1 }
 0xa1b   :  { %7353 = vsyncpa [#allocation12], 1 }
 0xa1c   :  { %7354 = vsyncpa [#allocation15], 1 }

</bundles_post_ra>
